<compile_context>
chip_gen: v7x
topology: tpu7x:2x2x1
jax: 0.10.0
libtpu: 0.0.40
codegen_flags: <defaults>
</compile_context>

<pallas_src>
import functools

import numpy as np
import jax
import jax.numpy as jnp
from jax import lax
from jax.experimental import pallas as pl
from jax.experimental.pallas import tpu as pltpu

BN_EPS = 1e-5
HEAD_PAD = 128   # lane-dense padded head width; real logits are columns 0 (video) and 1 (audio)


def unified_head_kernel(
    # ---- inputs ----
    aseq_ref,      # (B, tT, 1024) native dtype, pipelined time tile of SSL features
    vfeat_ref,     # (B, 512)      f32, resident freqnet features
    w_afc_hbm, b_afc_hbm,           # audio_fc Linear (1024,1024) bf16 / bias (1,1024) f32
    wf1_a_hbm, wf1_v_hbm, bf1_hbm,  # fusion Linear1 split rows (1024,1024)/(512,1024) bf16, bias f32
    wf2_hbm, bf2_hbm,               # fusion Linear2 (1024,512) bf16 / bias (1,512) f32
    wh_hbm, bh_hbm,                 # padded heads (512,128) bf16 / bias (1,128) f32
    # ---- outputs ----
    out_ref,       # (B, 128) f32 lane-dense padded logits
    # ---- scratch ----
    asum_ref,      # (B, 1024) f32 running time sum
    w_afc, b_afc, wf1_a, wf1_v, bf1, wf2, bf2, wh, bh,   # single-buffered VMEM weight copies
    wsem,          # DMA semaphores, one per weight tensor
    *, T, tT, sub, inv_T,
):
    t = pl.program_id(0)
    hbm_refs = (w_afc_hbm, b_afc_hbm, wf1_a_hbm, wf1_v_hbm, bf1_hbm,
                wf2_hbm, bf2_hbm, wh_hbm, bh_hbm)
    vmem_refs = (w_afc, b_afc, wf1_a, wf1_v, bf1, wf2, bf2, wh, bh)

    @pl.when(t == 0)
    def _():
        asum_ref[...] = jnp.zeros_like(asum_ref)
        # Kick off the weight loads; they complete under the streaming time reduce.
        for i, (src, dst) in enumerate(zip(hbm_refs, vmem_refs)):
            pltpu.make_async_copy(src, dst, wsem.at[i]).start()

    # ---- streaming f32 time sum, slab-wise (no full-tile f32 temporary) ----
    B_, D_ = aseq_ref.shape[0], aseq_ref.shape[2]

    def add_slab(start, size):
        # valid rows remaining in this slab (can be <= 0 on a fully out-of-bounds slab)
        limit = T - t * tT - start
        rows = lax.broadcasted_iota(jnp.int32, (B_, size, D_), 1)
        slab = aseq_ref[:, pl.ds(start, size), :].astype(jnp.float32)
        slab = jnp.where(rows < limit, slab, 0.0)          # mask ragged last tile in-kernel
        asum_ref[...] += jnp.sum(slab, axis=1)

    n_full, rem = tT // sub, tT % sub
    if n_full > 0:
        def body(s, carry):
            add_slab(pl.multiple_of(s * sub, sub), sub)
            return carry
        lax.fori_loop(0, n_full, body, 0, unroll=True)
    if rem > 0:
        add_slab(n_full * sub, rem)

    # ---- last step: finish the weight DMAs and run the fused MLP head ----
    @pl.when(t == pl.num_programs(0) - 1)
    def _():
        for i, (src, dst) in enumerate(zip(hbm_refs, vmem_refs)):
            pltpu.make_async_copy(src, dst, wsem.at[i]).wait()

        a = (asum_ref[...] * inv_T).astype(jnp.bfloat16)                   # time mean (B, 1024)

        # audio_fc: Linear -> BN(eval, folded) -> ReLU -> Dropout(identity)
        h = jnp.dot(a, w_afc[...], preferred_element_type=jnp.float32)
        h = jnp.maximum(h + b_afc[...], 0.0)                               # (B, 1024)

        # fusion Linear(1536,1024) on concat([audio, video]) == split-weight sum of two matmuls
        f1 = jnp.dot(h.astype(jnp.bfloat16), wf1_a[...], preferred_element_type=jnp.float32)
        f1 += jnp.dot(vfeat_ref[...].astype(jnp.bfloat16), wf1_v[...],
                      preferred_element_type=jnp.float32)
        f1 = jnp.maximum(f1 + bf1[...], 0.0)                               # (B, 1024)

        # fusion Linear(1024,512) -> BN(folded) -> ReLU -> Dropout(identity)
        f2 = jnp.dot(f1.astype(jnp.bfloat16), wf2[...], preferred_element_type=jnp.float32)
        f2 = jnp.maximum(f2 + bf2[...], 0.0)                               # (B, 512)

        # heads: lane-dense padded (512,128) matmul; unmasked vst on a 128-wide output block
        out = jnp.dot(f2.astype(jnp.bfloat16), wh[...], preferred_element_type=jnp.float32)
        out_ref[...] = out + bh[...]                                       # (B, 128)


def _round_down(x, m):
    return (x // m) * m


def unified_model_forward(audio_feat_seq, video_feat, params, *, time_tile=None, sub_rows=128):
    B, T, D = audio_feat_seq.shape
    assert D == 1024 and video_feat.shape == (B, 512)

    weight_names = ("w_afc", "b_afc", "wf1_a", "wf1_v", "bf1",
                    "wf2", "bf2", "w_heads", "b_heads")
    weights = tuple(params[n] for n in weight_names)
    weight_bytes = sum(int(np.prod(w.shape)) * jnp.dtype(w.dtype).itemsize for w in weights)
    a_itemsize = jnp.dtype(audio_feat_seq.dtype).itemsize

    # --- per-generation VMEM ceiling: ~56 MiB on v7x (64 MiB phys), 112 MiB on v5e/v6e (128 MiB) ---
    try:
        info = pltpu.get_tpu_info()
        vmem_cap = int(getattr(info, "vmem_capacity_bytes", 64 << 20))
    except Exception:
        vmem_cap = 64 << 20                                  # conservative fallback
    vmem_ceiling = int(max(48 << 20, min((vmem_cap * 7) // 8, 112 << 20)))

    # fixed VMEM residents (weights single-buffered via manual DMA)
    fixed_bytes = (weight_bytes
                   + B * 1024 * 4                            # f32 time-sum scratch
                   + 2 * B * 512 * 4                         # vfeat block (default 2 buffers, tiny)
                   + 2 * B * HEAD_PAD * 4                    # output block
                   + (6 << 20))                              # headroom: mask/select temps, compiler scratch

    # --- time tile: as large as the budget allows for the double-buffered audio stream (<= 2048) ---
    if time_tile is None:
        avail = max(vmem_ceiling - fixed_bytes, 1 << 20)
        tT_cap = int(max(8, min(avail // (2 * B * D * a_itemsize), 2048)))
    else:
        tT_cap = int(time_tile)
    if tT_cap >= T:
        tT = T                                               # single step: full time dim, no 8-row rule
    else:
        tT = min(max(8, _round_down(tT_cap, 8)), T)          # multiple of 8 (BlockSpec sublane rule)
    sub = max(1, min(sub_rows, tT))                          # in-kernel reduce slab size
    n_t = int(pl.cdiv(T, tT))

    vmem_limit = int(min(max(fixed_bytes + 2 * B * tT * D * a_itemsize, 32 << 20), vmem_ceiling))

    # --- specs ---
    audio_spec = pl.BlockSpec((B, tT, D), lambda t: (0, t, 0))     # pipelined HBM stream
    vfeat_spec = pl.BlockSpec((B, 512), lambda t: (0, 0))          # resident
    hbm_spec = pl.BlockSpec(memory_space=pl.ANY)                   # weights: manual single-buffer DMA
    in_specs = [audio_spec, vfeat_spec] + [hbm_spec] * len(weights)
    out_spec = pl.BlockSpec((B, HEAD_PAD), lambda t: (0, 0))

    scratch_shapes = (
        [pltpu.VMEM((B, 1024), jnp.float32)]
        + [pltpu.VMEM(tuple(w.shape), w.dtype) for w in weights]
        + [pltpu.SemaphoreType.DMA((len(weights),))]
    )

    # advisory cost estimate so XLA can schedule/overlap around the custom call
    mm_flops = 2 * B * (1024 * 1024 + 1024 * 1024 + 512 * 1024 + 1024 * 512 + 512 * HEAD_PAD)
    flops = mm_flops + B * T * D
    bytes_accessed = B * T * D * a_itemsize + B * 512 * 4 + weight_bytes + B * HEAD_PAD * 4

    out_padded = pl.pallas_call(
        functools.partial(unified_head_kernel, T=T, tT=tT, sub=sub, inv_T=1.0 / T),
        out_shape=jax.ShapeDtypeStruct((B, HEAD_PAD), jnp.float32),
        grid_spec=pltpu.PrefetchScalarGridSpec(
            num_scalar_prefetch=0,
            grid=(n_t,),
            in_specs=in_specs,
            out_specs=out_spec,
            scratch_shapes=scratch_shapes,
        ),
        compiler_params=pltpu.CompilerParams(
            dimension_semantics=("arbitrary",),              # time axis is a reduction
            vmem_limit_bytes=vmem_limit,
        ),
        cost_estimate=pl.CostEstimate(flops=int(flops), transcendentals=0,
                                      bytes_accessed=int(bytes_accessed)),
    )(audio_feat_seq, video_feat, *weights)

    return out_padded[:, :2]


def xavier_uniform(key, fan_in, fan_out):
    bound = float(np.sqrt(6.0 / (fan_in + fan_out)))
    # stored as (in, out), i.e. transpose of the PyTorch (out, in) weight
    return jax.random.uniform(key, (fan_in, fan_out), jnp.float32, -bound, bound)


def init_params(key):
    k = jax.random.split(key, 5)
    # eval-mode BatchNorm1d with default running stats == constant scale, folded into W
    bn_scale = float(1.0 / np.sqrt(1.0 + BN_EPS))

    # audio_fc: Linear(1024, 1024)
    w_afc = xavier_uniform(k[0], 1024, 1024) * bn_scale
    b_afc = jnp.zeros((1, 1024), jnp.float32)                 # 0 bias -> 0 after BN scale

    # fusion Linear(1536, 1024): split into audio (first 1024 inputs) / video (last 512)
    wf1 = xavier_uniform(k[1], 1536, 1024) * bn_scale
    wf1_a, wf1_v = wf1[:1024], wf1[1024:]
    bf1 = jnp.zeros((1, 1024), jnp.float32)

    # fusion Linear(1024, 512)
    wf2 = xavier_uniform(k[2], 1024, 512) * bn_scale
    bf2 = jnp.zeros((1, 512), jnp.float32)

    # heads fc_video / fc_audio: Linear(512, 1) each, stacked and zero-padded to 128 lanes
    wv = xavier_uniform(k[3], 512, 1)
    wa = xavier_uniform(k[4], 512, 1)
    w_heads = jnp.zeros((512, HEAD_PAD), jnp.float32)
    w_heads = w_heads.at[:, 0:1].set(wv).at[:, 1:2].set(wa)

    # hasattr(self, 'dataset_stats') is always True in __init__ -> dataset-stats log-prior biases
    video_bias = float(-np.log((9253 + 7899) / (165 + 164)))
    audio_bias = float(-np.log((9253 + 164) / (7899 + 165)))
    b_heads = jnp.zeros((1, HEAD_PAD), jnp.float32)
    b_heads = b_heads.at[0, 0].set(video_bias).at[0, 1].set(audio_bias)

    bf16 = lambda x: x.astype(jnp.bfloat16)
    return dict(
        w_afc=bf16(w_afc), b_afc=b_afc,
        wf1_a=bf16(wf1_a), wf1_v=bf16(wf1_v), bf1=bf1,
        wf2=bf16(wf2), bf2=bf2,
        w_heads=bf16(w_heads), b_heads=b_heads,
    )


def reference_forward(audio_feat_seq, video_feat, p):
    # Plain-JAX mirror of the module forward with the same bf16-weight / f32-accumulate policy.
    a = jnp.mean(audio_feat_seq.astype(jnp.float32), axis=1).astype(jnp.bfloat16)
    v = video_feat.astype(jnp.bfloat16)
    h = jnp.maximum(jnp.dot(a, p["w_afc"], preferred_element_type=jnp.float32) + p["b_afc"], 0.0)
    f1 = (jnp.dot(h.astype(jnp.bfloat16), p["wf1_a"], preferred_element_type=jnp.float32)
          + jnp.dot(v, p["wf1_v"], preferred_element_type=jnp.float32))
    f1 = jnp.maximum(f1 + p["bf1"], 0.0)
    f2 = jnp.maximum(jnp.dot(f1.astype(jnp.bfloat16), p["wf2"],
                             preferred_element_type=jnp.float32) + p["bf2"], 0.0)
    out = jnp.dot(f2.astype(jnp.bfloat16), p["w_heads"],
                  preferred_element_type=jnp.float32) + p["b_heads"]
    return out[:, :2]


if __name__ == "__main__":
    key = jax.random.PRNGKey(0)
    kp, ka, kv, ka2 = jax.random.split(key, 4)

    B = 2
    params = init_params(kp)
    video_feat = jax.random.normal(kv, (B, 512), jnp.float32)          # freqnet features

    # primary small-shape run (single time tile)
    T = 8
    audio_feat_seq = jax.random.normal(ka, (B, T, 1024), jnp.float32)  # SSL features
    out = jax.block_until_ready(unified_model_forward(audio_feat_seq, video_feat, params))
    ref = reference_forward(audio_feat_seq, video_feat, params)
    assert out.shape == (B, 2), out.shape
    assert jnp.allclose(out, ref, rtol=2e-2, atol=2e-2), (out, ref)

    # multi-step path with a ragged last time tile: exercises the in-kernel row mask and the
    # cross-step weight-DMA overlap (deliberately tiny tile to force 3 grid steps).
    T2 = 20
    audio2 = jax.random.normal(ka2, (B, T2, 1024), jnp.float32)
    out2 = jax.block_until_ready(unified_model_forward(audio2, video_feat, params, time_tile=8))
    ref2 = reference_forward(audio2, video_feat, params)
    assert out2.shape == (B, 2), out2.shape
    assert jnp.allclose(out2, ref2, rtol=2e-2, atol=2e-2), (out2, ref2)

    print("KERNEL_OK")
</pallas_src>

<mosaic_0001>
module attributes {stable_mosaic.version = 11 : i64} {
  func.func @unified_head_kernel(%arg0: i32, %arg1: memref<2x8x1024xf32, #tpu.memory_space<vmem>>, %arg2: memref<2x512xf32, #tpu.memory_space<vmem>>, %arg3: memref<1024x1024xbf16, #tpu.memory_space<any>>, %arg4: memref<1x1024xf32, #tpu.memory_space<any>>, %arg5: memref<1024x1024xbf16, #tpu.memory_space<any>>, %arg6: memref<512x1024xbf16, #tpu.memory_space<any>>, %arg7: memref<1x1024xf32, #tpu.memory_space<any>>, %arg8: memref<1024x512xbf16, #tpu.memory_space<any>>, %arg9: memref<1x512xf32, #tpu.memory_space<any>>, %arg10: memref<512x128xbf16, #tpu.memory_space<any>>, %arg11: memref<1x128xf32, #tpu.memory_space<any>>, %arg12: memref<2x128xf32, #tpu.memory_space<vmem>>, %arg13: memref<2x1024xf32, #tpu.memory_space<vmem>>, %arg14: memref<1024x1024xbf16, #tpu.memory_space<vmem>>, %arg15: memref<1x1024xf32, #tpu.memory_space<vmem>>, %arg16: memref<1024x1024xbf16, #tpu.memory_space<vmem>>, %arg17: memref<512x1024xbf16, #tpu.memory_space<vmem>>, %arg18: memref<1x1024xf32, #tpu.memory_space<vmem>>, %arg19: memref<1024x512xbf16, #tpu.memory_space<vmem>>, %arg20: memref<1x512xf32, #tpu.memory_space<vmem>>, %arg21: memref<512x128xbf16, #tpu.memory_space<vmem>>, %arg22: memref<1x128xf32, #tpu.memory_space<vmem>>, %arg23: memref<9x!tpu.dma_semaphore, #tpu.memory_space<semaphore_mem>>) attributes {dimension_semantics = [#tpu.dimension_semantics<arbitrary>], iteration_bounds = array<i64: 1>, scalar_prefetch = 0 : i64, scratch_operands = 11 : i64, tpu.core_type = #tpu.core_type<tc>, window_params = [{transform_indices = @transform_0, window_bounds = array<i64: 2, 8, 1024>}, {pipeline_mode = #tpu.pipeline_mode<synchronous>, transform_indices = @transform_1, window_bounds = array<i64: 2, 512>}, {}, {}, {}, {}, {}, {}, {}, {}, {}, {pipeline_mode = #tpu.pipeline_mode<synchronous>, transform_indices = @transform_11, window_bounds = array<i64: 2, 128>}]} {
    %c0_i32 = arith.constant 0 : i32
    %0 = arith.cmpi eq, %arg0, %c0_i32 : i32
    %1 = arith.extui %0 : i1 to i32
    %c0_i32_0 = arith.constant 0 : i32
    %2 = arith.cmpi ne, %1, %c0_i32_0 : i32
    scf.if %2 {
      %cst_12 = arith.constant 0.000000e+00 : f32
      %22 = vector.broadcast %cst_12 : f32 to vector<2x1024xf32>
      %c0_13 = arith.constant 0 : index
      %c0_14 = arith.constant 0 : index
      %23 = vector.load %arg13[%c0_13, %c0_14] : memref<2x1024xf32, #tpu.memory_space<vmem>>, vector<2x1024xf32>
      tpu.vector_store %arg13[%c0_13, %c0_14], %22 {strides = array<i32>} : memref<2x1024xf32, #tpu.memory_space<vmem>>, vector<2x1024xf32>,
      %c0_i32_15 = arith.constant 0 : i32
      %24 = tpu.memref_slice %arg23[%c0_i32_15] : memref<9x!tpu.dma_semaphore, #tpu.memory_space<semaphore_mem>> -> memref<1x!tpu.dma_semaphore, #tpu.memory_space<semaphore_mem>>
      %25 = tpu.memref_squeeze %24 : memref<1x!tpu.dma_semaphore, #tpu.memory_space<semaphore_mem>> -> memref<!tpu.dma_semaphore, #tpu.memory_space<semaphore_mem>>
      tpu.enqueue_dma source(%arg3 : memref<1024x1024xbf16, #tpu.memory_space<any>>) target(%arg14 : memref<1024x1024xbf16, #tpu.memory_space<vmem>>) target_semaphore(%25 : memref<!tpu.dma_semaphore, #tpu.memory_space<semaphore_mem>>)
      %c1_i32_16 = arith.constant 1 : i32
      %26 = tpu.memref_slice %arg23[%c1_i32_16] : memref<9x!tpu.dma_semaphore, #tpu.memory_space<semaphore_mem>> -> memref<1x!tpu.dma_semaphore, #tpu.memory_space<semaphore_mem>>
      %27 = tpu.memref_squeeze %26 : memref<1x!tpu.dma_semaphore, #tpu.memory_space<semaphore_mem>> -> memref<!tpu.dma_semaphore, #tpu.memory_space<semaphore_mem>>
      tpu.enqueue_dma source(%arg4 : memref<1x1024xf32, #tpu.memory_space<any>>) target(%arg15 : memref<1x1024xf32, #tpu.memory_space<vmem>>) target_semaphore(%27 : memref<!tpu.dma_semaphore, #tpu.memory_space<semaphore_mem>>)
      %c2_i32 = arith.constant 2 : i32
      %28 = tpu.memref_slice %arg23[%c2_i32] : memref<9x!tpu.dma_semaphore, #tpu.memory_space<semaphore_mem>> -> memref<1x!tpu.dma_semaphore, #tpu.memory_space<semaphore_mem>>
      %29 = tpu.memref_squeeze %28 : memref<1x!tpu.dma_semaphore, #tpu.memory_space<semaphore_mem>> -> memref<!tpu.dma_semaphore, #tpu.memory_space<semaphore_mem>>
      tpu.enqueue_dma source(%arg5 : memref<1024x1024xbf16, #tpu.memory_space<any>>) target(%arg16 : memref<1024x1024xbf16, #tpu.memory_space<vmem>>) target_semaphore(%29 : memref<!tpu.dma_semaphore, #tpu.memory_space<semaphore_mem>>)
      %c3_i32 = arith.constant 3 : i32
      %30 = tpu.memref_slice %arg23[%c3_i32] : memref<9x!tpu.dma_semaphore, #tpu.memory_space<semaphore_mem>> -> memref<1x!tpu.dma_semaphore, #tpu.memory_space<semaphore_mem>>
      %31 = tpu.memref_squeeze %30 : memref<1x!tpu.dma_semaphore, #tpu.memory_space<semaphore_mem>> -> memref<!tpu.dma_semaphore, #tpu.memory_space<semaphore_mem>>
      tpu.enqueue_dma source(%arg6 : memref<512x1024xbf16, #tpu.memory_space<any>>) target(%arg17 : memref<512x1024xbf16, #tpu.memory_space<vmem>>) target_semaphore(%31 : memref<!tpu.dma_semaphore, #tpu.memory_space<semaphore_mem>>)
      %c4_i32 = arith.constant 4 : i32
      %32 = tpu.memref_slice %arg23[%c4_i32] : memref<9x!tpu.dma_semaphore, #tpu.memory_space<semaphore_mem>> -> memref<1x!tpu.dma_semaphore, #tpu.memory_space<semaphore_mem>>
      %33 = tpu.memref_squeeze %32 : memref<1x!tpu.dma_semaphore, #tpu.memory_space<semaphore_mem>> -> memref<!tpu.dma_semaphore, #tpu.memory_space<semaphore_mem>>
      tpu.enqueue_dma source(%arg7 : memref<1x1024xf32, #tpu.memory_space<any>>) target(%arg18 : memref<1x1024xf32, #tpu.memory_space<vmem>>) target_semaphore(%33 : memref<!tpu.dma_semaphore, #tpu.memory_space<semaphore_mem>>)
      %c5_i32 = arith.constant 5 : i32
      %34 = tpu.memref_slice %arg23[%c5_i32] : memref<9x!tpu.dma_semaphore, #tpu.memory_space<semaphore_mem>> -> memref<1x!tpu.dma_semaphore, #tpu.memory_space<semaphore_mem>>
      %35 = tpu.memref_squeeze %34 : memref<1x!tpu.dma_semaphore, #tpu.memory_space<semaphore_mem>> -> memref<!tpu.dma_semaphore, #tpu.memory_space<semaphore_mem>>
      tpu.enqueue_dma source(%arg8 : memref<1024x512xbf16, #tpu.memory_space<any>>) target(%arg19 : memref<1024x512xbf16, #tpu.memory_space<vmem>>) target_semaphore(%35 : memref<!tpu.dma_semaphore, #tpu.memory_space<semaphore_mem>>)
      %c6_i32 = arith.constant 6 : i32
      %36 = tpu.memref_slice %arg23[%c6_i32] : memref<9x!tpu.dma_semaphore, #tpu.memory_space<semaphore_mem>> -> memref<1x!tpu.dma_semaphore, #tpu.memory_space<semaphore_mem>>
      %37 = tpu.memref_squeeze %36 : memref<1x!tpu.dma_semaphore, #tpu.memory_space<semaphore_mem>> -> memref<!tpu.dma_semaphore, #tpu.memory_space<semaphore_mem>>
      tpu.enqueue_dma source(%arg9 : memref<1x512xf32, #tpu.memory_space<any>>) target(%arg20 : memref<1x512xf32, #tpu.memory_space<vmem>>) target_semaphore(%37 : memref<!tpu.dma_semaphore, #tpu.memory_space<semaphore_mem>>)
      %c7_i32 = arith.constant 7 : i32
      %38 = tpu.memref_slice %arg23[%c7_i32] : memref<9x!tpu.dma_semaphore, #tpu.memory_space<semaphore_mem>> -> memref<1x!tpu.dma_semaphore, #tpu.memory_space<semaphore_mem>>
      %39 = tpu.memref_squeeze %38 : memref<1x!tpu.dma_semaphore, #tpu.memory_space<semaphore_mem>> -> memref<!tpu.dma_semaphore, #tpu.memory_space<semaphore_mem>>
      tpu.enqueue_dma source(%arg10 : memref<512x128xbf16, #tpu.memory_space<any>>) target(%arg21 : memref<512x128xbf16, #tpu.memory_space<vmem>>) target_semaphore(%39 : memref<!tpu.dma_semaphore, #tpu.memory_space<semaphore_mem>>)
      %c8_i32_17 = arith.constant 8 : i32
      %40 = tpu.memref_slice %arg23[%c8_i32_17] : memref<9x!tpu.dma_semaphore, #tpu.memory_space<semaphore_mem>> -> memref<1x!tpu.dma_semaphore, #tpu.memory_space<semaphore_mem>>
      %41 = tpu.memref_squeeze %40 : memref<1x!tpu.dma_semaphore, #tpu.memory_space<semaphore_mem>> -> memref<!tpu.dma_semaphore, #tpu.memory_space<semaphore_mem>>
      tpu.enqueue_dma source(%arg11 : memref<1x128xf32, #tpu.memory_space<any>>) target(%arg22 : memref<1x128xf32, #tpu.memory_space<vmem>>) target_semaphore(%41 : memref<!tpu.dma_semaphore, #tpu.memory_space<semaphore_mem>>)
    } else {
    }
    %c0_i32_1 = arith.constant 0 : i32
    %c8_i32 = arith.constant 8 : i32
    %3 = arith.muli %c0_i32_1, %c8_i32 : i32
    %4 = tpu.assume_multiple %3, 8 : i32
    %c8_i32_2 = arith.constant 8 : i32
    %5 = arith.muli %arg0, %c8_i32_2 : i32
    %c8_i32_3 = arith.constant 8 : i32
    %6 = arith.subi %c8_i32_3, %5 : i32
    %7 = arith.subi %6, %4 : i32
    %8 = tpu.iota {dimensions = array<i32: 1>} : vector<2x8x1024xi32>
    %c0 = arith.constant 0 : index
    %9 = arith.index_cast %4 : i32 to index
    %c0_4 = arith.constant 0 : index
    %10 = vector.load %arg1[%c0, %9, %c0_4] : memref<2x8x1024xf32, #tpu.memory_space<vmem>>, vector<2x8x1024xf32>
    %11 = vector.broadcast %7 : i32 to vector<2x8x1024xi32>
    %12 = arith.cmpi slt, %8, %11 : vector<2x8x1024xi32>
    %cst = arith.constant 0.000000e+00 : f32
    %13 = vector.broadcast %cst : f32 to vector<2x8x1024xf32>
    %14 = arith.select %12, %10, %13 : vector<2x8x1024xi1>, vector<2x8x1024xf32>
    %c0_5 = arith.constant 0 : index
    %c0_6 = arith.constant 0 : index
    %15 = vector.load %arg13[%c0_5, %c0_6] : memref<2x1024xf32, #tpu.memory_space<vmem>>, vector<2x1024xf32>
    %cst_7 = arith.constant dense<0.000000e+00> : vector<2x1024xf32>
    %16 = vector.multi_reduction <add>, %14, %cst_7 [1] : vector<2x8x1024xf32> to vector<2x1024xf32>
    %17 = arith.addf %15, %16 : vector<2x1024xf32>
    %c0_8 = arith.constant 0 : index
    %c0_9 = arith.constant 0 : index
    %18 = vector.load %arg13[%c0_8, %c0_9] : memref<2x1024xf32, #tpu.memory_space<vmem>>, vector<2x1024xf32>
    tpu.vector_store %arg13[%c0_8, %c0_9], %17 {strides = array<i32>} : memref<2x1024xf32, #tpu.memory_space<vmem>>, vector<2x1024xf32>,
    %c1_i32 = arith.constant 1 : i32
    %c0_i32_10 = arith.constant 0 : i32
    %19 = arith.cmpi eq, %arg0, %c0_i32_10 : i32
    %20 = arith.extui %19 : i1 to i32
    %c0_i32_11 = arith.constant 0 : i32
    %21 = arith.cmpi ne, %20, %c0_i32_11 : i32
    scf.if %21 {
      %c0_i32_12 = arith.constant 0 : i32
      %22 = tpu.memref_slice %arg23[%c0_i32_12] : memref<9x!tpu.dma_semaphore, #tpu.memory_space<semaphore_mem>> -> memref<1x!tpu.dma_semaphore, #tpu.memory_space<semaphore_mem>>
      %23 = tpu.memref_squeeze %22 : memref<1x!tpu.dma_semaphore, #tpu.memory_space<semaphore_mem>> -> memref<!tpu.dma_semaphore, #tpu.memory_space<semaphore_mem>>
      tpu.wait_dma2 semaphore(%23 : memref<!tpu.dma_semaphore, #tpu.memory_space<semaphore_mem>>) src(%arg3 : memref<1024x1024xbf16, #tpu.memory_space<any>>) dst(%arg14 : memref<1024x1024xbf16, #tpu.memory_space<vmem>>)
      %c1_i32_13 = arith.constant 1 : i32
      %24 = tpu.memref_slice %arg23[%c1_i32_13] : memref<9x!tpu.dma_semaphore, #tpu.memory_space<semaphore_mem>> -> memref<1x!tpu.dma_semaphore, #tpu.memory_space<semaphore_mem>>
      %25 = tpu.memref_squeeze %24 : memref<1x!tpu.dma_semaphore, #tpu.memory_space<semaphore_mem>> -> memref<!tpu.dma_semaphore, #tpu.memory_space<semaphore_mem>>
      tpu.wait_dma2 semaphore(%25 : memref<!tpu.dma_semaphore, #tpu.memory_space<semaphore_mem>>) src(%arg4 : memref<1x1024xf32, #tpu.memory_space<any>>) dst(%arg15 : memref<1x1024xf32, #tpu.memory_space<vmem>>)
      %c2_i32 = arith.constant 2 : i32
      %26 = tpu.memref_slice %arg23[%c2_i32] : memref<9x!tpu.dma_semaphore, #tpu.memory_space<semaphore_mem>> -> memref<1x!tpu.dma_semaphore, #tpu.memory_space<semaphore_mem>>
      %27 = tpu.memref_squeeze %26 : memref<1x!tpu.dma_semaphore, #tpu.memory_space<semaphore_mem>> -> memref<!tpu.dma_semaphore, #tpu.memory_space<semaphore_mem>>
      tpu.wait_dma2 semaphore(%27 : memref<!tpu.dma_semaphore, #tpu.memory_space<semaphore_mem>>) src(%arg5 : memref<1024x1024xbf16, #tpu.memory_space<any>>) dst(%arg16 : memref<1024x1024xbf16, #tpu.memory_space<vmem>>)
      %c3_i32 = arith.constant 3 : i32
      %28 = tpu.memref_slice %arg23[%c3_i32] : memref<9x!tpu.dma_semaphore, #tpu.memory_space<semaphore_mem>> -> memref<1x!tpu.dma_semaphore, #tpu.memory_space<semaphore_mem>>
      %29 = tpu.memref_squeeze %28 : memref<1x!tpu.dma_semaphore, #tpu.memory_space<semaphore_mem>> -> memref<!tpu.dma_semaphore, #tpu.memory_space<semaphore_mem>>
      tpu.wait_dma2 semaphore(%29 : memref<!tpu.dma_semaphore, #tpu.memory_space<semaphore_mem>>) src(%arg6 : memref<512x1024xbf16, #tpu.memory_space<any>>) dst(%arg17 : memref<512x1024xbf16, #tpu.memory_space<vmem>>)
      %c4_i32 = arith.constant 4 : i32
      %30 = tpu.memref_slice %arg23[%c4_i32] : memref<9x!tpu.dma_semaphore, #tpu.memory_space<semaphore_mem>> -> memref<1x!tpu.dma_semaphore, #tpu.memory_space<semaphore_mem>>
      %31 = tpu.memref_squeeze %30 : memref<1x!tpu.dma_semaphore, #tpu.memory_space<semaphore_mem>> -> memref<!tpu.dma_semaphore, #tpu.memory_space<semaphore_mem>>
      tpu.wait_dma2 semaphore(%31 : memref<!tpu.dma_semaphore, #tpu.memory_space<semaphore_mem>>) src(%arg7 : memref<1x1024xf32, #tpu.memory_space<any>>) dst(%arg18 : memref<1x1024xf32, #tpu.memory_space<vmem>>)
      %c5_i32 = arith.constant 5 : i32
      %32 = tpu.memref_slice %arg23[%c5_i32] : memref<9x!tpu.dma_semaphore, #tpu.memory_space<semaphore_mem>> -> memref<1x!tpu.dma_semaphore, #tpu.memory_space<semaphore_mem>>
      %33 = tpu.memref_squeeze %32 : memref<1x!tpu.dma_semaphore, #tpu.memory_space<semaphore_mem>> -> memref<!tpu.dma_semaphore, #tpu.memory_space<semaphore_mem>>
      tpu.wait_dma2 semaphore(%33 : memref<!tpu.dma_semaphore, #tpu.memory_space<semaphore_mem>>) src(%arg8 : memref<1024x512xbf16, #tpu.memory_space<any>>) dst(%arg19 : memref<1024x512xbf16, #tpu.memory_space<vmem>>)
      %c6_i32 = arith.constant 6 : i32
      %34 = tpu.memref_slice %arg23[%c6_i32] : memref<9x!tpu.dma_semaphore, #tpu.memory_space<semaphore_mem>> -> memref<1x!tpu.dma_semaphore, #tpu.memory_space<semaphore_mem>>
      %35 = tpu.memref_squeeze %34 : memref<1x!tpu.dma_semaphore, #tpu.memory_space<semaphore_mem>> -> memref<!tpu.dma_semaphore, #tpu.memory_space<semaphore_mem>>
      tpu.wait_dma2 semaphore(%35 : memref<!tpu.dma_semaphore, #tpu.memory_space<semaphore_mem>>) src(%arg9 : memref<1x512xf32, #tpu.memory_space<any>>) dst(%arg20 : memref<1x512xf32, #tpu.memory_space<vmem>>)
      %c7_i32 = arith.constant 7 : i32
      %36 = tpu.memref_slice %arg23[%c7_i32] : memref<9x!tpu.dma_semaphore, #tpu.memory_space<semaphore_mem>> -> memref<1x!tpu.dma_semaphore, #tpu.memory_space<semaphore_mem>>
      %37 = tpu.memref_squeeze %36 : memref<1x!tpu.dma_semaphore, #tpu.memory_space<semaphore_mem>> -> memref<!tpu.dma_semaphore, #tpu.memory_space<semaphore_mem>>
      tpu.wait_dma2 semaphore(%37 : memref<!tpu.dma_semaphore, #tpu.memory_space<semaphore_mem>>) src(%arg10 : memref<512x128xbf16, #tpu.memory_space<any>>) dst(%arg21 : memref<512x128xbf16, #tpu.memory_space<vmem>>)
      %c8_i32_14 = arith.constant 8 : i32
      %38 = tpu.memref_slice %arg23[%c8_i32_14] : memref<9x!tpu.dma_semaphore, #tpu.memory_space<semaphore_mem>> -> memref<1x!tpu.dma_semaphore, #tpu.memory_space<semaphore_mem>>
      %39 = tpu.memref_squeeze %38 : memref<1x!tpu.dma_semaphore, #tpu.memory_space<semaphore_mem>> -> memref<!tpu.dma_semaphore, #tpu.memory_space<semaphore_mem>>
      tpu.wait_dma2 semaphore(%39 : memref<!tpu.dma_semaphore, #tpu.memory_space<semaphore_mem>>) src(%arg11 : memref<1x128xf32, #tpu.memory_space<any>>) dst(%arg22 : memref<1x128xf32, #tpu.memory_space<vmem>>)
      %c0_15 = arith.constant 0 : index
      %c0_16 = arith.constant 0 : index
      %40 = vector.load %arg13[%c0_15, %c0_16] : memref<2x1024xf32, #tpu.memory_space<vmem>>, vector<2x1024xf32>
      %cst_17 = arith.constant 1.250000e-01 : f32
      %41 = vector.broadcast %cst_17 : f32 to vector<2x1024xf32>
      %42 = arith.mulf %40, %41 : vector<2x1024xf32>
      %43 = arith.truncf %42 : vector<2x1024xf32> to vector<2x1024xbf16>
      %c0_18 = arith.constant 0 : index
      %c0_19 = arith.constant 0 : index
      %44 = vector.load %arg14[%c0_18, %c0_19] : memref<1024x1024xbf16, #tpu.memory_space<vmem>>, vector<1024x1024xbf16>
      %cst_20 = arith.constant dense<0.000000e+00> : vector<2x1024xf32>
      %45 = tpu.matmul %43, %44, %cst_20 {dimension_numbers = #tpu.dot_dimension_numbers<[1], [0], [0], [1], [0, 0, 1, 1], [], []>} : vector<2x1024xbf16>, vector<1024x1024xbf16>, vector<2x1024xf32> -> vector<2x1024xf32>
      %c0_21 = arith.constant 0 : index
      %c0_22 = arith.constant 0 : index
      %46 = vector.load %arg15[%c0_21, %c0_22] : memref<1x1024xf32, #tpu.memory_space<vmem>>, vector<1x1024xf32>
      %47 = vector.broadcast %46 : vector<1x1024xf32> to vector<2x1024xf32>
      %48 = arith.addf %45, %47 : vector<2x1024xf32>
      %cst_23 = arith.constant 0.000000e+00 : f32
      %49 = vector.broadcast %cst_23 : f32 to vector<2x1024xf32>
      %50 = arith.maximumf %48, %49 : vector<2x1024xf32>
      %51 = arith.truncf %50 : vector<2x1024xf32> to vector<2x1024xbf16>
      %c0_24 = arith.constant 0 : index
      %c0_25 = arith.constant 0 : index
      %52 = vector.load %arg16[%c0_24, %c0_25] : memref<1024x1024xbf16, #tpu.memory_space<vmem>>, vector<1024x1024xbf16>
      %cst_26 = arith.constant dense<0.000000e+00> : vector<2x1024xf32>
      %53 = tpu.matmul %51, %52, %cst_26 {dimension_numbers = #tpu.dot_dimension_numbers<[1], [0], [0], [1], [0, 0, 1, 1], [], []>} : vector<2x1024xbf16>, vector<1024x1024xbf16>, vector<2x1024xf32> -> vector<2x1024xf32>
      %c0_27 = arith.constant 0 : index
      %c0_28 = arith.constant 0 : index
      %54 = vector.load %arg2[%c0_27, %c0_28] : memref<2x512xf32, #tpu.memory_space<vmem>>, vector<2x512xf32>
      %55 = arith.truncf %54 : vector<2x512xf32> to vector<2x512xbf16>
      %c0_29 = arith.constant 0 : index
      %c0_30 = arith.constant 0 : index
      %56 = vector.load %arg17[%c0_29, %c0_30] : memref<512x1024xbf16, #tpu.memory_space<vmem>>, vector<512x1024xbf16>
      %cst_31 = arith.constant dense<0.000000e+00> : vector<2x1024xf32>
      %57 = tpu.matmul %55, %56, %cst_31 {dimension_numbers = #tpu.dot_dimension_numbers<[1], [0], [0], [1], [0, 0, 1, 1], [], []>} : vector<2x512xbf16>, vector<512x1024xbf16>, vector<2x1024xf32> -> vector<2x1024xf32>
      %58 = arith.addf %53, %57 : vector<2x1024xf32>
      %c0_32 = arith.constant 0 : index
      %c0_33 = arith.constant 0 : index
      %59 = vector.load %arg18[%c0_32, %c0_33] : memref<1x1024xf32, #tpu.memory_space<vmem>>, vector<1x1024xf32>
      %60 = vector.broadcast %59 : vector<1x1024xf32> to vector<2x1024xf32>
      %61 = arith.addf %58, %60 : vector<2x1024xf32>
      %cst_34 = arith.constant 0.000000e+00 : f32
      %62 = vector.broadcast %cst_34 : f32 to vector<2x1024xf32>
      %63 = arith.maximumf %61, %62 : vector<2x1024xf32>
      %64 = arith.truncf %63 : vector<2x1024xf32> to vector<2x1024xbf16>
      %c0_35 = arith.constant 0 : index
      %c0_36 = arith.constant 0 : index
      %65 = vector.load %arg19[%c0_35, %c0_36] : memref<1024x512xbf16, #tpu.memory_space<vmem>>, vector<1024x512xbf16>
      %cst_37 = arith.constant dense<0.000000e+00> : vector<2x512xf32>
      %66 = tpu.matmul %64, %65, %cst_37 {dimension_numbers = #tpu.dot_dimension_numbers<[1], [0], [0], [1], [0, 0, 1, 1], [], []>} : vector<2x1024xbf16>, vector<1024x512xbf16>, vector<2x512xf32> -> vector<2x512xf32>
      %c0_38 = arith.constant 0 : index
      %c0_39 = arith.constant 0 : index
      %67 = vector.load %arg20[%c0_38, %c0_39] : memref<1x512xf32, #tpu.memory_space<vmem>>, vector<1x512xf32>
      %68 = vector.broadcast %67 : vector<1x512xf32> to vector<2x512xf32>
      %69 = arith.addf %66, %68 : vector<2x512xf32>
      %cst_40 = arith.constant 0.000000e+00 : f32
      %70 = vector.broadcast %cst_40 : f32 to vector<2x512xf32>
      %71 = arith.maximumf %69, %70 : vector<2x512xf32>
      %72 = arith.truncf %71 : vector<2x512xf32> to vector<2x512xbf16>
      %c0_41 = arith.constant 0 : index
      %c0_42 = arith.constant 0 : index
      %73 = vector.load %arg21[%c0_41, %c0_42] : memref<512x128xbf16, #tpu.memory_space<vmem>>, vector<512x128xbf16>
      %cst_43 = arith.constant dense<0.000000e+00> : vector<2x128xf32>
      %74 = tpu.matmul %72, %73, %cst_43 {dimension_numbers = #tpu.dot_dimension_numbers<[1], [0], [0], [1], [0, 0, 1, 1], [], []>} : vector<2x512xbf16>, vector<512x128xbf16>, vector<2x128xf32> -> vector<2x128xf32>
      %c0_44 = arith.constant 0 : index
      %c0_45 = arith.constant 0 : index
      %75 = vector.load %arg22[%c0_44, %c0_45] : memref<1x128xf32, #tpu.memory_space<vmem>>, vector<1x128xf32>
      %76 = vector.broadcast %75 : vector<1x128xf32> to vector<2x128xf32>
      %77 = arith.addf %74, %76 : vector<2x128xf32>
      %c0_46 = arith.constant 0 : index
      %c0_47 = arith.constant 0 : index
      %78 = vector.load %arg12[%c0_46, %c0_47] : memref<2x128xf32, #tpu.memory_space<vmem>>, vector<2x128xf32>
      tpu.vector_store %arg12[%c0_46, %c0_47], %77 {strides = array<i32>} : memref<2x128xf32, #tpu.memory_space<vmem>>, vector<2x128xf32>,
    } else {
    }
    return
  }
  func.func @transform_0(%arg0: i32) -> (i32, i32, i32) {
    %c0_i32 = arith.constant 0 : i32
    %c0_i32_0 = arith.constant 0 : i32
    %c0_i32_1 = arith.constant 0 : i32
    return %c0_i32, %arg0, %c0_i32_0 : i32, i32, i32
  }
  func.func @transform_1(%arg0: i32) -> (i32, i32) {
    %c0_i32 = arith.constant 0 : i32
    %c0_i32_0 = arith.constant 0 : i32
    %c0_i32_1 = arith.constant 0 : i32
    return %c0_i32, %c0_i32_0 : i32, i32
  }
  func.func @transform_11(%arg0: i32) -> (i32, i32) {
    %c0_i32 = arith.constant 0 : i32
    %c0_i32_0 = arith.constant 0 : i32
    %c0_i32_1 = arith.constant 0 : i32
    return %c0_i32, %c0_i32_0 : i32, i32
  }
}

</mosaic_0001>

<bundles_post_ra>
// kernel: tpu_custom_call.1
= control target key start
LH: loop header
LB: loop body
LE: loop exit
PB: predicated region body
PF: predicated region fallthrough
CT: control target
= control target key end

     0   :  { %16 = vsyncpa [#allocation14], 0  ;;  %s5494_s0 = inlined_call_operand.hbm [shape: f32[2,8,1024], index: 0, kind: input, shape index: {}]   ;;  %s5495_s1 = inlined_call_operand.hbm [shape: f32[2,512], index: 1, kind: input, shape index: {}]   ;;  %s5496_s2 = inlined_call_operand.hbm [shape: bf16[1024,1024], index: 2, kind: input, shape index: {}]   ;;  %s5497_s3 = inlined_call_operand.hbm [shape: f32[1,1024], index: 3, kind: input, shape index: {}]   ;;  %s5498_s4 = inlined_call_operand.hbm [shape: bf16[1024,1024], index: 4, kind: input, shape index: {}]   ;;  %s5499_s5 = inlined_call_operand.hbm [shape: bf16[512,1024], index: 5, kind: input, shape index: {}]   ;;  %s5500_s6 = inlined_call_operand.hbm [shape: f32[1,1024], index: 6, kind: input, shape index: {}]   ;;  %s5501_s7 = inlined_call_operand.hbm [shape: bf16[1024,512], index: 7, kind: input, shape index: {}]   ;;  %s5502_s8 = inlined_call_operand.hbm [shape: f32[1,512], index: 8, kind: input, shape index: {}]   ;;  %s5503_s9 = inlined_call_operand.hbm [shape: bf16[512,128], index: 9, kind: input, shape index: {}]   ;;  %s5504_s10 = inlined_call_operand.hbm [shape: f32[1,128], index: 10, kind: input, shape index: {}]   ;;  %s5505_s11 = inlined_call_operand.hbm [shape: f32[2,128], index: 11, kind: output, shape index: {}]  }
   0x1   :  { %17 = vsyncpa [#allocation17], 0 }
   0x2   :  { %18 = vsyncpa [#allocation15], 0  ;;  %s4860_s17 = smov [#allocation13]   ;;  %s4660_s21 = scalar_lea.hbm %s5494_s0, 2048 }
   0x3   :  { %s24_s18 = sshll.u32 %s4860_s17, 4  ;;  %p4661_p0 = scmp.ne.s32.totalorder %s5494_s0, %s4660_s21  ;;  %s25_s18 = int_to_ptr.vmem [resolvable:$true] %s24_s18 }
   0x4   :  { %p4664_p1 = scmp.lt.u32.totalorder %s4660_s21, %s5494_s0 }
   0x6   :  { %p4666_p2 = pnand %p4664_p1, %p4661_p0 }
   0x8   :  { %4669 = shalt.err (!%p4666_p2)
}
   0x9   :  { %s4670_s26 = scalar_lea.vmem %s25_s18, 2048  ;;  %p4675_p4 = scmp.lt.s32.totalorder %s25_s18, %s25_s18 }
   0xa   :  { %p4671_p3 = scmp.ne.s32.totalorder %s25_s18, %s4670_s26  ;;  %p4676_p5 = scmp.lt.s32.totalorder %s4670_s26, %s4670_s26 }
   0xc   :  { %p4677_p6 = por %p4676_p5, %p4675_p4 }
   0xe   :  { %p4678_p7 = pnand %p4677_p6, %p4671_p3 }
  0x10   :  { %4681 = shalt.err (!%p4678_p7)
}
  0x11   :  { %s4861_s27 = smov 1024   ;;  %s4862_s28 = smov 64  }
  0x12   :  { %30 = dma.hbm_to_vmem [thread:$0]  %s5494_s0, 2048, %s25_s18, [#allocation14], %s4861_s27, %s4861_s27, %s4862_s28  }
  0x13   :  { %s4863_s12 = smov [#allocation16]   ;;  %s4682_s16 = scalar_lea.hbm %s5495_s1, 128 }
  0x14   :  { %s37_s13 = sshll.u32 %s4863_s12, 4  ;;  %p4683_p8 = scmp.ne.s32.totalorder %s5495_s1, %s4682_s16  ;;  %s38_s13 = int_to_ptr.vmem [resolvable:$true] %s37_s13 }
  0x15   :  { %p4686_p9 = scmp.lt.u32.totalorder %s4682_s16, %s5495_s1 }
  0x17   :  { %p4688_p10 = pnand %p4686_p9, %p4683_p8 }
  0x19   :  { %4691 = shalt.err (!%p4688_p10)
}
  0x1a   :  { %s4692_s22 = scalar_lea.vmem %s38_s13, 128  ;;  %p4697_p12 = scmp.lt.s32.totalorder %s38_s13, %s38_s13 }
  0x1b   :  { %p4693_p11 = scmp.ne.s32.totalorder %s38_s13, %s4692_s22  ;;  %p4698_p13 = scmp.lt.s32.totalorder %s4692_s22, %s4692_s22 }
  0x1d   :  { %p4699_p0 = por %p4698_p13, %p4697_p12 }
  0x1f   :  { %p4700_p1 = pnand %p4699_p0, %p4693_p11 }
  0x21   :  { %4703 = shalt.err (!%p4700_p1)
}
  0x22   :  { %40 = dma.hbm_to_vmem [thread:$0]  %s5495_s1, 128, %s38_s13, [#allocation17]  }
  0x23   :  { %4836 = dma.done.wait [#allocation14], 2048  }
  0x24   :  { %4837 = vsyncadd [#allocation14], 4294965248 }
  0x25   :  { %4838 = dma.done.wait [#allocation17], 128  }
  0x26   :  { %4839 = vsyncadd [#allocation17], 4294967168 }
  0x27   :  { %s58_s23 = sld [smem:[#allocation0]]   ;;  %s4864_s24 = smov [#allocation3]  }
  0x28   :  { %s66_s25 = sshll.u32 %s4864_s24, 4  ;;  %s4865_s26 = smov 1024   ;;  %s67_s25 = int_to_ptr.vmem [resolvable:$true] %s66_s25 }
  0x29   :  { %70 = sst [smem:[#allocation20]] %s4865_s26  ;;  %s4866_s27 = smov 8  }
  0x2a   :  { %72 = sst [smem:[#allocation20 + $0x1]] %s4865_s26  ;;  %s4867_s28 = smov 64  }
  0x2b   :  { %74 = sst [smem:[#allocation20 + $0x2]] %s4866_s27  ;;  %s4868_s29 = smov 128  }
  0x2c   :  { %76 = sst [smem:[#allocation20 + $0x3]] %s4867_s28  ;;  %s4869_s12 = smov 2  }
  0x2d   :  { %s4481_s1 = sshll.u32 %s58_s23, 26  ;;  %78 = sst [smem:[#allocation20 + $0x4]] %s4868_s29 }
  0x2e   :  { %s4980_s30 = sadd.s32 134217728, %s4481_s1  ;;  %80 = sst [smem:[#allocation20 + $0x5]] %s4869_s12 }
  0x2f   :  { %s4870_s13 = smov 512   ;;  %84 = sst [smem:[#allocation20 + $0x7]] %s4867_s28 }
  0x30   :  { %82 = sst [smem:[#allocation20 + $0x6]] %s4870_s13  ;;  %s4871_s14 = smov 4  }
  0x31   :  { %86 = sst [smem:[#allocation20 + $0x8]] %s4871_s14  ;;  %s4872_s15 = smov [#allocation12]  }
  0x32   :  { %s4873_s16 = smov [#allocation19]   ;;  %s4874_s20 = smov [#allocation4]  }
  0x33   :  { %88 = dma.general %s5496_s2, 65536, %s67_s25, %s4872_s15, %s4873_s16, [#allocation20], %s4980_s30, 0  }
  0x34   :  { %117 = sst [smem:[#allocation26]] %s4865_s26  ;;  %s97_s21 = sshll.u32 %s4874_s20, 4  ;;  %s98_s21 = int_to_ptr.vmem [resolvable:$true] %s97_s21 }
  0x35   :  { %119 = sst [smem:[#allocation26 + $0x1]] %s4865_s26  ;;  %s4875_s22 = smov [#allocation5]  }
  0x36   :  { %121 = sst [smem:[#allocation26 + $0x2]] %s4866_s27  ;;  %s113_s0 = sshll.u32 %s4875_s22, 4  ;;  %s114_s0 = int_to_ptr.vmem [resolvable:$true] %s113_s0 }
  0x37   :  { %123 = sst [smem:[#allocation26 + $0x3]] %s4867_s28  ;;  %s4704_s23 = scalar_lea.hbm %s5497_s3, 128 }
  0x38   :  { %125 = sst [smem:[#allocation26 + $0x4]] %s4868_s29  ;;  %p4705_p2 = scmp.ne.s32.totalorder %s5497_s3, %s4704_s23 }
  0x39   :  { %127 = sst [smem:[#allocation26 + $0x5]] %s4869_s12  ;;  %p4708_p3 = scmp.lt.u32.totalorder %s4704_s23, %s5497_s3 }
  0x3a   :  { %129 = sst [smem:[#allocation26 + $0x6]] %s4870_s13 }
  0x3b   :  { %131 = sst [smem:[#allocation26 + $0x7]] %s4867_s28  ;;  %p4710_p4 = pnand %p4708_p3, %p4705_p2 }
  0x3c   :  { %133 = sst [smem:[#allocation26 + $0x8]] %s4871_s14 }
  0x3d   :  { %4713 = shalt.err (!%p4710_p4)  }
  0x3e   :  { %s4714_s16 = scalar_lea.vmem %s98_s21, 128  ;;  %p4719_p6 = scmp.lt.s32.totalorder %s98_s21, %s98_s21 }
  0x3f   :  { %p4715_p5 = scmp.ne.s32.totalorder %s98_s21, %s4714_s16  ;;  %p4720_p7 = scmp.lt.s32.totalorder %s4714_s16, %s4714_s16 }
  0x41   :  { %p4721_p8 = por %p4720_p7, %p4719_p6 }
  0x43   :  { %p4722_p9 = pnand %p4721_p8, %p4715_p5 }
  0x45   :  { %4725 = shalt.err (!%p4722_p9)  }
  0x46   :  { %100 = dma.hbm_to_vmem [thread:$0]  %s5497_s3, 128, %s98_s21, [#allocation12 + $0x1] }
  0x47   :  { %s4876_s20 = smov [#allocation12 + $0x2]   ;;  %s4877_s22 = smov [#allocation25]  }
  0x48   :  { %135 = dma.general %s5498_s4, 65536, %s114_s0, %s4876_s20, %s4877_s22, [#allocation26], %s4980_s30, 0  }
  0x49   :  { %152 = sst [smem:[#allocation28]] %s4865_s26  ;;  %s4878_s23 = smov [#allocation6]  }
  0x4a   :  { %s148_s24 = sshll.u32 %s4878_s23, 4  ;;  %154 = sst [smem:[#allocation28 + $0x1]] %s4865_s26  ;;  %s149_s24 = int_to_ptr.vmem [resolvable:$true] %s148_s24 }
  0x4b   :  { %156 = sst [smem:[#allocation28 + $0x2]] %s4866_s27  ;;  %s4879_s3 = smov [#allocation7]  }
  0x4c   :  { %158 = sst [smem:[#allocation28 + $0x3]] %s4867_s28  ;;  %s179_s4 = sshll.u32 %s4879_s3, 4  ;;  %s5023_s4 = int_to_ptr.vmem [resolvable:$true] %s179_s4 }
  0x4d   :  { %160 = sst [smem:[#allocation28 + $0x4]] %s4868_s29  ;;  %s4880_s26 = smov [#allocation12 + $0x3]  }
  0x4e   :  { %162 = sst [smem:[#allocation28 + $0x5]] %s4869_s12  ;;  %s4881_s21 = smov [#allocation27]  }
  0x4f   :  { %164 = sst [smem:[#allocation28 + $0x6]] %s4870_s13  ;;  %s4882_s25 = smov [#allocation8]  }
  0x50   :  { %166 = sst [smem:[#allocation28 + $0x7]] %s4867_s28  ;;  %s5031_s1 = sshll.u32 %s4882_s25, 4  ;;  %s196_s1 = int_to_ptr.vmem [resolvable:$true] %s5031_s1 }
  0x51   :  { %168 = sst [smem:[#allocation28 + $0x8]] %s4871_s14  ;;  %s4883_s15 = smov [#allocation9]  }
  0x52   :  { %170 = dma.general %s5499_s5, 32768, %s149_s24, %s4880_s26, %s4881_s21, [#allocation28], %s4980_s30, 0  }
  0x53   :  { %199 = sst [smem:[#allocation32]] %s4870_s13  ;;  %s226_s16 = sshll.u32 %s4883_s15, 4  ;;  %s5039_s16 = int_to_ptr.vmem [resolvable:$true] %s226_s16 }
  0x54   :  { %201 = sst [smem:[#allocation32 + $0x1]] %s4870_s13  ;;  %s4884_s5 = smov 256  }
  0x55   :  { %203 = sst [smem:[#allocation32 + $0x2]] %s4871_s14  ;;  %s4885_s13 = smov [#allocation10]  }
  0x56   :  { %205 = sst [smem:[#allocation32 + $0x3]] %s4867_s28  ;;  %s5043_s17 = sshll.u32 %s4885_s13, 4  ;;  %s239_s17 = int_to_ptr.vmem [resolvable:$true] %s5043_s17 }
  0x57   :  { %207 = sst [smem:[#allocation32 + $0x4]] %s4868_s29  ;;  %s4726_s22 = scalar_lea.hbm %s5500_s6, 128 }
  0x58   :  { %209 = sst [smem:[#allocation32 + $0x5]] %s4869_s12  ;;  %p4727_p10 = scmp.ne.s32.totalorder %s5500_s6, %s4726_s22 }
  0x59   :  { %211 = sst [smem:[#allocation32 + $0x6]] %s4884_s5  ;;  %p4730_p11 = scmp.lt.u32.totalorder %s4726_s22, %s5500_s6 }
  0x5a   :  { %213 = sst [smem:[#allocation32 + $0x7]] %s4867_s28 }
  0x5b   :  { %215 = sst [smem:[#allocation32 + $0x8]] %s4871_s14  ;;  %p4732_p12 = pnand %p4730_p11, %p4727_p10 }
  0x5d   :  { %4735 = shalt.err (!%p4732_p12)  }
  0x5e   :  { %s4736_s28 = scalar_lea.vmem %s5023_s4, 128  ;;  %p4741_p0 = scmp.lt.s32.totalorder %s5023_s4, %s5023_s4 }
  0x5f   :  { %p4737_p13 = scmp.ne.s32.totalorder %s5023_s4, %s4736_s28  ;;  %p4742_p1 = scmp.lt.s32.totalorder %s4736_s28, %s4736_s28 }
  0x61   :  { %p4743_p2 = por %p4742_p1, %p4741_p0 }
  0x63   :  { %p4744_p3 = pnand %p4743_p2, %p4737_p13 }
  0x65   :  { %4747 = shalt.err (!%p4744_p3)  }
  0x66   :  { %182 = dma.hbm_to_vmem [thread:$0]  %s5500_s6, 128, %s5023_s4, [#allocation12 + $0x4] }
  0x67   :  { %s4886_s24 = smov [#allocation12 + $0x5]   ;;  %s4887_s3 = smov [#allocation31]  }
  0x68   :  { %217 = dma.general %s5501_s7, 32768, %s196_s1, %s4886_s24, %s4887_s3, [#allocation32], %s4980_s30, 0  }
  0x69   :  { %s4748_s25 = scalar_lea.hbm %s5502_s8, 64 }
  0x6a   :  { %p4749_p4 = scmp.ne.s32.totalorder %s5502_s8, %s4748_s25  ;;  %p4752_p5 = scmp.lt.u32.totalorder %s4748_s25, %s5502_s8 }
  0x6c   :  { %p4754_p6 = pnand %p4752_p5, %p4749_p4 }
  0x6e   :  { %4757 = shalt.err (!%p4754_p6)  }
  0x6f   :  { %s4758_s6 = scalar_lea.vmem %s5039_s16, 64  ;;  %p4763_p8 = scmp.lt.s32.totalorder %s5039_s16, %s5039_s16 }
  0x70   :  { %p4759_p7 = scmp.ne.s32.totalorder %s5039_s16, %s4758_s6  ;;  %p4764_p9 = scmp.lt.s32.totalorder %s4758_s6, %s4758_s6 }
  0x72   :  { %p4765_p10 = por %p4764_p9, %p4763_p8 }
  0x74   :  { %p4766_p11 = pnand %p4765_p10, %p4759_p7 }
  0x76   :  { %4769 = shalt.err (!%p4766_p11)  }
  0x77   :  { %229 = dma.hbm_to_vmem [thread:$0]  %s5502_s8, 64, %s5039_s16, [#allocation12 + $0x6] }
  0x78   :  { %s4770_s20 = scalar_lea.hbm %s5503_s9, 4096 }
  0x79   :  { %p4771_p12 = scmp.ne.s32.totalorder %s5503_s9, %s4770_s20  ;;  %p4774_p13 = scmp.lt.u32.totalorder %s4770_s20, %s5503_s9 }
  0x7b   :  { %p4776_p0 = pnand %p4774_p13, %p4771_p12 }
  0x7d   :  { %4779 = shalt.err (!%p4776_p0)  }
  0x7e   :  { %s4780_s18 = scalar_lea.vmem %s239_s17, 4096  ;;  %p4785_p2 = scmp.lt.s32.totalorder %s239_s17, %s239_s17 }
  0x7f   :  { %p4781_p1 = scmp.ne.s32.totalorder %s239_s17, %s4780_s18  ;;  %p4786_p3 = scmp.lt.s32.totalorder %s4780_s18, %s4780_s18 }
  0x81   :  { %p4787_p4 = por %p4786_p3, %p4785_p2 }
  0x83   :  { %p4788_p5 = pnand %p4787_p4, %p4781_p1 }
  0x85   :  { %4791 = shalt.err (!%p4788_p5)  }
  0x86   :  { %241 = dma.hbm_to_vmem [thread:$0]  %s5503_s9, 4096, %s239_s17, [#allocation12 + $0x7] }
  0x87   :  { %s4888_s28 = smov [#allocation11]   ;;  %s4792_s3 = scalar_lea.hbm %s5504_s10, 16 }
  0x88   :  { %s250_s14 = sshll.u32 %s4888_s28, 4  ;;  %p4793_p6 = scmp.ne.s32.totalorder %s5504_s10, %s4792_s3  ;;  %s251_s14 = int_to_ptr.vmem [resolvable:$true] %s250_s14 }
  0x89   :  { %p4796_p7 = scmp.lt.u32.totalorder %s4792_s3, %s5504_s10 }
  0x8b   :  { %p4798_p8 = pnand %p4796_p7, %p4793_p6 }
  0x8d   :  { %4801 = shalt.err (!%p4798_p8)  }
  0x8e   :  { %s4802_s25 = scalar_lea.vmem %s251_s14, 16  ;;  %p4807_p10 = scmp.lt.s32.totalorder %s251_s14, %s251_s14 }
  0x8f   :  { %p4803_p9 = scmp.ne.s32.totalorder %s251_s14, %s4802_s25  ;;  %p4808_p11 = scmp.lt.s32.totalorder %s4802_s25, %s4802_s25 }
  0x91   :  { %p4809_p12 = por %p4808_p11, %p4807_p10 }
  0x93   :  { %p4810_p13 = pnand %p4809_p12, %p4803_p9 }
  0x95   :  { %4813 = shalt.err (!%p4810_p13)  }
  0x96   :  { %253 = dma.hbm_to_vmem [thread:$0]  %s5504_s10, 16, %s251_s14, [#allocation12 + $0x8]  ;;  %v262_v0 = vld [vmem:[#allocation13] sm:$0xff]  ;;  %v263_v1 = vld [vmem:[#allocation13 + $0x8] sm:$0xff]  ;;  %v264_v2 = vld [vmem:[#allocation13 + $0x10] sm:$0xff]  ;;  %v415_v9 = vlaneseq  ;;  %vm483_vm0 = vcmask 1041409  }
  0x97   :  { %v265_v3 = vld [vmem:[#allocation13 + $0x18] sm:$0xff]  ;;  %v266_v4 = vld [vmem:[#allocation13 + $0x20] sm:$0xff]  ;;  %v267_v5 = vld [vmem:[#allocation13 + $0x28] sm:$0xff]  ;;  %v298_v6 = vrot.slane %v262_v0, 4  ;;  %v304_v7 = vrot.slane %v263_v1, 4  ;;  %v310_v8 = vrot.slane %v264_v2, 4 }
  0x98   :  { %v268_v10 = vld [vmem:[#allocation13 + $0x30] sm:$0xff]  ;;  %v269_v11 = vld [vmem:[#allocation13 + $0x38] sm:$0xff]  ;;  %v316_v12 = vrot.slane %v265_v3, 4  ;;  %v322_v13 = vrot.slane %v266_v4, 4  ;;  %v328_v14 = vrot.slane %v267_v5, 4  ;;  %v270_v45 = vld [vmem:[#allocation13 + $0x40] sm:$0xff] }
  0x99   :  { %v4889_v15 = vmov 1983009808   ;;  %v299_v17 = vadd.f32 %v298_v6, %v262_v0  ;;  %v305_v18 = vadd.f32 %v304_v7, %v263_v1  ;;  %v311_v19 = vadd.f32 %v310_v8, %v264_v2  ;;  %v271_v46 = vld [vmem:[#allocation13 + $0x48] sm:$0xff]  ;;  %v272_v47 = vld [vmem:[#allocation13 + $0x50] sm:$0xff]  ;;  %v273_v52 = vld [vmem:[#allocation13 + $0x58] sm:$0xff] }
  0x9a   :  { %v5110_v16 = vunpack.c.l.s4 %v4889_v15  ;;  %v334_v20 = vrot.slane %v268_v10, 4  ;;  %v317_v21 = vadd.f32 %v316_v12, %v265_v3  ;;  %v323_v22 = vadd.f32 %v322_v13, %v266_v4  ;;  %v274_v53 = vld [vmem:[#allocation13 + $0x60] sm:$0xff]  ;;  %v275_v54 = vld [vmem:[#allocation13 + $0x68] sm:$0xff]  ;;  %v276_v59 = vld [vmem:[#allocation13 + $0x70] sm:$0xff] }
  0x9b   :  { %v329_v23 = vadd.f32 %v328_v14, %v267_v5  ;;  %v340_v24 = vrot.slane %v269_v11, 4  ;;  %v300_v25 = vrot.slane %v299_v17, 2  ;;  %v306_v26 = vrot.slane %v305_v18, 2  ;;  %v277_v0 = vld [vmem:[#allocation13 + $0x78] sm:$0xff] }
  0x9c   :  { %v312_v27 = vrot.slane %v311_v19, 2  ;;  %v335_v28 = vadd.f32 %v334_v20, %v268_v10  ;;  %v318_v29 = vrot.slane %v317_v21, 2  ;;  %v324_v30 = vrot.slane %v323_v22, 2 }
  0x9d   :  { %v330_v31 = vrot.slane %v329_v23, 2  ;;  %v341_v32 = vadd.f32 %v340_v24, %v269_v11  ;;  %v301_v33 = vadd.f32 %v300_v25, %v299_v17  ;;  %v307_v34 = vadd.f32 %v306_v26, %v305_v18 }
  0x9e   :  { %v313_v35 = vadd.f32 %v312_v27, %v311_v19  ;;  %v336_v36 = vrot.slane %v335_v28, 2  ;;  %v319_v37 = vadd.f32 %v318_v29, %v317_v21  ;;  %v325_v38 = vadd.f32 %v324_v30, %v323_v22 }
  0x9f   :  { %v331_v39 = vadd.f32 %v330_v31, %v329_v23  ;;  %v342_v40 = vrot.slane %v341_v32, 2  ;;  %v302_v41 = vrot.slane %v301_v33, 1  ;;  %v308_v42 = vrot.slane %v307_v34, 1 }
  0xa0   :  { %v314_v43 = vrot.slane %v313_v35, 1  ;;  %v337_v44 = vadd.f32 %v336_v36, %v335_v28  ;;  %v320_v48 = vrot.slane %v319_v37, 1  ;;  %v326_v49 = vrot.slane %v325_v38, 1 }
  0xa1   :  { %v332_v50 = vrot.slane %v331_v39, 1  ;;  %v343_v51 = vadd.f32 %v342_v40, %v341_v32  ;;  %v5112_v55 = vadd.f32 %v302_v41, %v301_v33  ;;  %v5114_v56 = vadd.f32 %v308_v42, %v307_v34 }
  0xa2   :  { %v5116_v57 = vadd.f32 %v314_v43, %v313_v35  ;;  %v338_v58 = vrot.slane %v337_v44, 1  ;;  %v5118_v60 = vadd.f32 %v320_v48, %v319_v37  ;;  %v5120_v61 = vadd.f32 %v326_v49, %v325_v38 }
  0xa3   :  { %v5122_v62 = vadd.f32 %v332_v50, %v331_v39  ;;  %v344_v63 = vrot.slane %v343_v51, 1  ;;  %v346_v2 = vrot.slane %v270_v45, 4  ;;  %v352_v3 = vrot.slane %v271_v46, 4 }
  0xa4   :  { %v5124_v1 = vadd.f32 %v338_v58, %v337_v44  ;;  %v358_v4 = vrot.slane %v272_v47, 4  ;;  %v364_v6 = vrot.slane %v273_v52, 4  ;;  %v370_v7 = vrot.slane %v274_v53, 4 }
  0xa5   :  { %v345_v5 = vadd.f32 %v344_v63, %v343_v51  ;;  %v376_v8 = vrot.slane %v275_v54, 4  ;;  %v347_v10 = vadd.f32 %v346_v2, %v270_v45  ;;  %v353_v11 = vadd.f32 %v352_v3, %v271_v46 }
  0xa6   :  { %v359_v12 = vadd.f32 %v358_v4, %v272_v47  ;;  %v382_v13 = vrot.slane %v276_v59, 4  ;;  %v365_v14 = vadd.f32 %v364_v6, %v273_v52  ;;  %v371_v15 = vadd.f32 %v370_v7, %v274_v53 }
  0xa7   :  { %v377_v17 = vadd.f32 %v376_v8, %v275_v54  ;;  %v388_v18 = vrot.slane %v277_v0, 4  ;;  %v348_v19 = vrot.slane %v347_v10, 2  ;;  %v354_v20 = vrot.slane %v353_v11, 2 }
  0xa8   :  { %v360_v21 = vrot.slane %v359_v12, 2  ;;  %v383_v22 = vadd.f32 %v382_v13, %v276_v59  ;;  %v366_v23 = vrot.slane %v365_v14, 2  ;;  %v372_v24 = vrot.slane %v371_v15, 2 }
  0xa9   :  { %v378_v25 = vrot.slane %v377_v17, 2  ;;  %v389_v26 = vadd.f32 %v388_v18, %v277_v0  ;;  %v349_v27 = vadd.f32 %v348_v19, %v347_v10  ;;  %v355_v28 = vadd.f32 %v354_v20, %v353_v11 }
  0xaa   :  { %v361_v29 = vadd.f32 %v360_v21, %v359_v12  ;;  %v384_v30 = vrot.slane %v383_v22, 2  ;;  %v367_v31 = vadd.f32 %v366_v23, %v365_v14  ;;  %v373_v32 = vadd.f32 %v372_v24, %v371_v15 }
  0xab   :  { %v379_v33 = vadd.f32 %v378_v25, %v377_v17  ;;  %v390_v34 = vrot.slane %v389_v26, 2  ;;  %v350_v35 = vrot.slane %v349_v27, 1  ;;  %v356_v36 = vrot.slane %v355_v28, 1 }
  0xac   :  { %v362_v37 = vrot.slane %v361_v29, 1  ;;  %v385_v38 = vadd.f32 %v384_v30, %v383_v22  ;;  %v368_v39 = vrot.slane %v367_v31, 1  ;;  %v374_v40 = vrot.slane %v373_v32, 1 }
  0xad   :  { %v380_v41 = vrot.slane %v379_v33, 1  ;;  %v391_v42 = vadd.f32 %v390_v34, %v389_v26  ;;  %v351_v43 = vadd.f32 %v350_v35, %v349_v27  ;;  %v357_v44 = vadd.f32 %v356_v36, %v355_v28 }
  0xae   :  { %v363_v45 = vadd.f32 %v362_v37, %v361_v29  ;;  %v386_v46 = vrot.slane %v385_v38, 1  ;;  %v369_v47 = vadd.f32 %v368_v39, %v367_v31  ;;  %v375_v48 = vadd.f32 %v374_v40, %v373_v32 }
  0xaf   :  { %v381_v49 = vadd.f32 %v380_v41, %v379_v33  ;;  %v392_v50 = vrot.slane %v391_v42, 1  ;;  %v410_v52 = vcombine.low %v5112_v55, %v5114_v56  ;;  %v411_v53 = vcombine.low %v5116_v57, %v5118_v60 }
  0xb0   :  { %v387_v51 = vadd.f32 %v386_v46, %v385_v38  ;;  %v414_v54 = vunpack.c.0.s8 %v5110_v16  ;;  %v5132_v59 = vshrl.u32 %v415_v9, 7  ;;  %v427_v63 = vcombine.low %v5120_v61, %v5122_v62 }
  0xb1   :  { %v393_v58 = vadd.f32 %v392_v50, %v391_v42  ;;  %v428_v0 = vcombine.low %v5124_v1, %v345_v5  ;;  %v444_v2 = vcombine.low %v351_v43, %v357_v44  ;;  %v445_v3 = vcombine.low %v363_v45, %v369_v47 }
  0xb2   :  { %v461_v4 = vcombine.low %v375_v48, %v381_v49  ;;  %v5138_v6 = vsub.s32 %v414_v54, %v5132_v59  ;;  %vm485_vm1 = vcmask 1043459   ;;  %vm487_vm2 = vcmask 1045509  }
  0xb3   :  { %v462_v55 = vcombine.low %v387_v51, %v393_v58  ;;  %vm489_vm3 = vcmask 1047559  }
  0xb4   :  { %v418_v56 = vrot.slane %v410_v52, %v5138_v6  ;;  %v425_v16 = vrot.slane %v411_v53, %v5138_v6  ;;  %v435_v57 = vrot.slane %v427_v63, %v5138_v6  ;;  %v442_v9 = vrot.slane %v428_v0, %v5138_v6 }
  0xb5   :  { %v452_v60 = vrot.slane %v444_v2, %v5138_v6  ;;  %v459_v61 = vrot.slane %v445_v3, %v5138_v6  ;;  %v469_v62 = vrot.slane %v461_v4, %v5138_v6  ;;  %v476_v1 = vrot.slane %v462_v55, %v5138_v6 }
  0xb6   :  { %v426_v5 = vcombine.low %v418_v56, %v425_v16  ;;  %v443_v7 = vcombine.low %v435_v57, %v442_v9 }
  0xb7   :  { %v460_v8 = vcombine.low %v452_v60, %v459_v61  ;;  %v477_v10 = vcombine.low %v469_v62, %v476_v1 }
  0xb9   :  { %v482_v11 = vrot.slane %v460_v8, 7  ;;  %v493_v12 = vrot.slane %v477_v10, 7 }
  0xbb   :  { %v484_v13 = vsel %vm483_vm0, %v482_v11, %v426_v5  ;;  %v494_v14 = vsel %vm483_vm0, %v493_v12, %v443_v7 }
  0xbc   :  { %v486_v15 = vsel %vm485_vm1, %v482_v11, %v484_v13  ;;  %v495_v17 = vsel %vm485_vm1, %v493_v12, %v494_v14 }
  0xbd   :  { %v488_v18 = vsel %vm487_vm2, %v482_v11, %v486_v15  ;;  %v496_v19 = vsel %vm487_vm2, %v493_v12, %v495_v17 }
  0xbe   :  { %v490_v20 = vsel %vm489_vm3, %v482_v11, %v488_v18  ;;  %v5148_v21 = vsel %vm489_vm3, %v493_v12, %v496_v19 }
  0xbf   :  { %4840 = dma.done.wait [#allocation12], 65536 }
  0xc0   :  { %4841 = vsyncadd [#allocation12], 4294901760 }
  0xc1   :  { %4842 = dma.done.wait [#allocation12 + $0x1], 128 }
  0xc2   :  { %4843 = vsyncadd [#allocation12 + $0x1], 4294967168 }
  0xc3   :  { %4844 = dma.done.wait [#allocation12 + $0x2], 65536 }
  0xc4   :  { %4845 = vsyncadd [#allocation12 + $0x2], 4294901760 }
  0xc5   :  { %4846 = dma.done.wait [#allocation12 + $0x3], 32768 }
  0xc6   :  { %4847 = vsyncadd [#allocation12 + $0x3], 4294934528 }
  0xc7   :  { %4848 = dma.done.wait [#allocation12 + $0x4], 128 }
  0xc8   :  { %4849 = vsyncadd [#allocation12 + $0x4], 4294967168 }
  0xc9   :  { %4850 = dma.done.wait [#allocation12 + $0x5], 32768 }
  0xca   :  { %4851 = vsyncadd [#allocation12 + $0x5], 4294934528 }
  0xcb   :  { %4852 = dma.done.wait [#allocation12 + $0x6], 64 }
  0xcc   :  { %4853 = vsyncadd [#allocation12 + $0x6], 4294967232 }
  0xcd   :  { %4854 = dma.done.wait [#allocation12 + $0x7], 4096 }
  0xce   :  { %4855 = vsyncadd [#allocation12 + $0x7], 4294963200 }
  0xcf   :  { %4856 = dma.done.wait [#allocation12 + $0x8], 16 }
  0xd0   :  { %4857 = vsyncadd [#allocation12 + $0x8], 4294967280  ;;  %v5150_v22 = vmul.f32 0.125, %v490_v20  ;;  %v599_v25 = vld [vmem:[#allocation3 + $0x8] sm:$0xff]  ;;  %v601_v26 = vld [vmem:[#allocation3 + $0x18] sm:$0xff]  ;;  %s4890_s10 = smov [#allocation18]  }
  0xd1   :  { %v598_v27 = vld [vmem:[#allocation3] sm:$0xff]  ;;  %1152 = vmatprep.subr.bf16.mxu0 %v599_v25  ;;  %1316 = vmatprep.subr.bf16.mxu1 %v601_v26  ;;  %v600_v29 = vld [vmem:[#allocation3 + $0x10] sm:$0xff]  ;;  %v607_v30 = vld [vmem:[#allocation3 + $0x48] sm:$0xff]  ;;  %s4409_s15 = sshll.u32 %s4890_s10, 4  ;;  %s4410_s15 = int_to_ptr.vmem [resolvable:$true] %s4409_s15 }
  0xd2   :  { %v5154_v23 = vrot.slane %v5150_v22, %v5138_v6  ;;  %v609_v31 = vld [vmem:[#allocation3 + $0x58] sm:$0xff]  ;;  %1153 = vmatpush1.bf16.msra.mxu0 %v598_v27  ;;  %1317 = vmatpush1.bf16.msra.mxu1 %v600_v29  ;;  %v606_v32 = vld [vmem:[#allocation3 + $0x40] sm:$0xff]  ;;  %v608_v33 = vld [vmem:[#allocation3 + $0x50] sm:$0xff]  ;;  %v548_v25 = vcombine.high %v5150_v22, %v5150_v22  ;;  %s4814_s5 = scalar_lea.vmem %s4410_s15, 32  ;;  %p4819_p1 = scmp.lt.s32.totalorder %s4410_s15, %s4410_s15 }
  0xd3   :  { %1154 = vmatprep.subr.bf16.mxu0 %v607_v30  ;;  %1318 = vmatprep.subr.bf16.mxu1 %v609_v31  ;;  %v615_v34 = vld [vmem:[#allocation3 + $0x88] sm:$0xff]  ;;  %v617_v35 = vld [vmem:[#allocation3 + $0x98] sm:$0xff]  ;;  %v614_v36 = vld [vmem:[#allocation3 + $0x80] sm:$0xff]  ;;  %p4815_p0 = scmp.ne.s32.totalorder %s4410_s15, %s4814_s5  ;;  %p4820_p2 = scmp.lt.s32.totalorder %s4814_s5, %s4814_s5 }
  0xd4   :  { %v563_v24 = vcombine.high %v5154_v23, %v5154_v23  ;;  %v616_v37 = vld [vmem:[#allocation3 + $0x90] sm:$0xff]  ;;  %v623_v38 = vld [vmem:[#allocation3 + $0xc8] sm:$0xff]  ;;  %v625_v39 = vld [vmem:[#allocation3 + $0xd8] sm:$0xff]  ;;  %v5165_v31 = vrot.slane %v548_v25, %v5138_v6 }
  0xd5   :  { %v622_v40 = vld [vmem:[#allocation3 + $0xc0] sm:$0xff]  ;;  %v624_v41 = vld [vmem:[#allocation3 + $0xd0] sm:$0xff]  ;;  %v631_v42 = vld [vmem:[#allocation3 + $0x108] sm:$0xff]  ;;  %p4821_p3 = por %p4820_p2, %p4819_p1 }
  0xd6   :  { %v5158_v28 = vpack.c.bf16 %v563_v24, %v563_v24  ;;  %1155 = vmatpush1.bf16.msra.mxu0 %v606_v32  ;;  %1319 = vmatpush1.bf16.msra.mxu1 %v608_v33  ;;  %v633_v43 = vld [vmem:[#allocation3 + $0x118] sm:$0xff]  ;;  %v630_v44 = vld [vmem:[#allocation3 + $0x100] sm:$0xff]  ;;  %v632_v45 = vld [vmem:[#allocation3 + $0x110] sm:$0xff]  ;;  %v564_v22 = vcombine.high %v5165_v31, %v5165_v31 }
  0xd7   :  { %1156 = vmatprep.subr.bf16.mxu0 %v615_v34  ;;  %1320 = vmatprep.subr.bf16.mxu1 %v617_v35  ;;  %v639_v46 = vld [vmem:[#allocation3 + $0x148] sm:$0xff]  ;;  %v641_v47 = vld [vmem:[#allocation3 + $0x158] sm:$0xff]  ;;  %v638_v48 = vld [vmem:[#allocation3 + $0x140] sm:$0xff]  ;;  %p4822_p4 = pnand %p4821_p3, %p4815_p0 }
  0xd8   :  { %1184 = vmatprep.mubr.bf16.mxu0 %v5158_v28  ;;  %1348 = vmatprep.mubr.bf16.mxu1 %v5158_v28  ;;  %v640_v49 = vld [vmem:[#allocation3 + $0x150] sm:$0xff]  ;;  %v647_v50 = vld [vmem:[#allocation3 + $0x188] sm:$0xff]  ;;  %v649_v51 = vld [vmem:[#allocation3 + $0x198] sm:$0xff] }
  0xd9   :  { %v646_v52 = vld [vmem:[#allocation3 + $0x180] sm:$0xff]  ;;  %v648_v53 = vld [vmem:[#allocation3 + $0x190] sm:$0xff]  ;;  %v655_v54 = vld [vmem:[#allocation3 + $0x1c8] sm:$0xff] }
  0xda   :  { %1157 = vmatpush1.bf16.msra.mxu0 %v614_v36  ;;  %1321 = vmatpush1.bf16.msra.mxu1 %v616_v37  ;;  %v657_v58 = vld [vmem:[#allocation3 + $0x1d8] sm:$0xff]  ;;  %v654_v63 = vld [vmem:[#allocation3 + $0x1c0] sm:$0xff]  ;;  %v656_v0 = vld [vmem:[#allocation3 + $0x1d0] sm:$0xff]  ;;  %v5171_v36 = vpack.c.bf16 %v5154_v23, %v5154_v23 }
  0xdb   :  { %1158 = vmatprep.subr.bf16.mxu0 %v623_v38  ;;  %1322 = vmatprep.subr.bf16.mxu1 %v625_v39  ;;  %v663_v2 = vld [vmem:[#allocation3 + $0x208] sm:$0xff]  ;;  %v665_v3 = vld [vmem:[#allocation3 + $0x218] sm:$0xff]  ;;  %v662_v4 = vld [vmem:[#allocation3 + $0x200] sm:$0xff] }
  0xdc   :  { %v664_v55 = vld [vmem:[#allocation3 + $0x210] sm:$0xff]  ;;  %v671_v56 = vld [vmem:[#allocation3 + $0x248] sm:$0xff]  ;;  %v673_v16 = vld [vmem:[#allocation3 + $0x258] sm:$0xff] }
  0xdd   :  { %v670_v57 = vld [vmem:[#allocation3 + $0x240] sm:$0xff]  ;;  %v672_v9 = vld [vmem:[#allocation3 + $0x250] sm:$0xff]  ;;  %v679_v60 = vld [vmem:[#allocation3 + $0x288] sm:$0xff] }
  0xde   :  { %1159 = vmatpush1.bf16.msra.mxu0 %v622_v40  ;;  %1323 = vmatpush1.bf16.msra.mxu1 %v624_v41  ;;  %v681_v61 = vld [vmem:[#allocation3 + $0x298] sm:$0xff]  ;;  %v678_v62 = vld [vmem:[#allocation3 + $0x280] sm:$0xff]  ;;  %v680_v1 = vld [vmem:[#allocation3 + $0x290] sm:$0xff]  ;;  %v5173_v41 = vpack.c.bf16 %v564_v22, %v564_v22  ;;  %v5180_v22 = vmul.f32 0.125, %v5148_v21 }
  0xdf   :  { %1160 = vmatprep.subr.bf16.mxu0 %v631_v42  ;;  %1324 = vmatprep.subr.bf16.mxu1 %v633_v43  ;;  %v687_v5 = vld [vmem:[#allocation3 + $0x2c8] sm:$0xff]  ;;  %v689_v7 = vld [vmem:[#allocation3 + $0x2d8] sm:$0xff]  ;;  %v686_v8 = vld [vmem:[#allocation3 + $0x2c0] sm:$0xff] }
  0xe0   :  { %v688_v10 = vld [vmem:[#allocation3 + $0x2d0] sm:$0xff]  ;;  %v695_v11 = vld [vmem:[#allocation3 + $0x308] sm:$0xff]  ;;  %v697_v12 = vld [vmem:[#allocation3 + $0x318] sm:$0xff] }
  0xe1   :  { %v694_v13 = vld [vmem:[#allocation3 + $0x300] sm:$0xff]  ;;  %v696_v14 = vld [vmem:[#allocation3 + $0x310] sm:$0xff]  ;;  %v703_v15 = vld [vmem:[#allocation3 + $0x348] sm:$0xff] }
  0xe2   :  { %1161 = vmatpush1.bf16.msra.mxu0 %v630_v44  ;;  %1325 = vmatpush1.bf16.msra.mxu1 %v632_v45  ;;  %v705_v17 = vld [vmem:[#allocation3 + $0x358] sm:$0xff]  ;;  %v702_v18 = vld [vmem:[#allocation3 + $0x340] sm:$0xff]  ;;  %v704_v19 = vld [vmem:[#allocation3 + $0x350] sm:$0xff] }
  0xe3   :  { %1162 = vmatprep.subr.bf16.mxu0 %v639_v46  ;;  %1326 = vmatprep.subr.bf16.mxu1 %v641_v47  ;;  %v711_v20 = vld [vmem:[#allocation3 + $0x388] sm:$0xff]  ;;  %v713_v24 = vld [vmem:[#allocation3 + $0x398] sm:$0xff]  ;;  %v710_v26 = vld [vmem:[#allocation3 + $0x380] sm:$0xff] }
  0xe4   :  { %v712_v27 = vld [vmem:[#allocation3 + $0x390] sm:$0xff]  ;;  %v719_v29 = vld [vmem:[#allocation3 + $0x3c8] sm:$0xff]  ;;  %v721_v30 = vld [vmem:[#allocation3 + $0x3d8] sm:$0xff] }
  0xe5   :  { %v718_v32 = vld [vmem:[#allocation3 + $0x3c0] sm:$0xff]  ;;  %v720_v33 = vld [vmem:[#allocation3 + $0x3d0] sm:$0xff]  ;;  %v727_v34 = vld [vmem:[#allocation3 + $0x408] sm:$0xff] }
  0xe6   :  { %1163 = vmatpush1.bf16.msra.mxu0 %v638_v48  ;;  %1327 = vmatpush1.bf16.msra.mxu1 %v640_v49  ;;  %v729_v35 = vld [vmem:[#allocation3 + $0x418] sm:$0xff]  ;;  %v726_v37 = vld [vmem:[#allocation3 + $0x400] sm:$0xff]  ;;  %v728_v38 = vld [vmem:[#allocation3 + $0x410] sm:$0xff] }
  0xe7   :  { %1164 = vmatprep.subr.bf16.mxu0 %v647_v50  ;;  %1328 = vmatprep.subr.bf16.mxu1 %v649_v51  ;;  %v735_v39 = vld [vmem:[#allocation3 + $0x448] sm:$0xff]  ;;  %v737_v40 = vld [vmem:[#allocation3 + $0x458] sm:$0xff]  ;;  %v734_v23 = vld [vmem:[#allocation3 + $0x440] sm:$0xff] }
  0xe8   :  { %v736_v42 = vld [vmem:[#allocation3 + $0x450] sm:$0xff]  ;;  %v743_v43 = vld [vmem:[#allocation3 + $0x488] sm:$0xff]  ;;  %v745_v44 = vld [vmem:[#allocation3 + $0x498] sm:$0xff] }
  0xe9   :  { %v742_v45 = vld [vmem:[#allocation3 + $0x480] sm:$0xff]  ;;  %v744_v46 = vld [vmem:[#allocation3 + $0x490] sm:$0xff]  ;;  %v751_v47 = vld [vmem:[#allocation3 + $0x4c8] sm:$0xff] }
  0xea   :  { %1165 = vmatpush1.bf16.msra.mxu0 %v646_v52  ;;  %1329 = vmatpush1.bf16.msra.mxu1 %v648_v53  ;;  %v753_v48 = vld [vmem:[#allocation3 + $0x4d8] sm:$0xff]  ;;  %v750_v49 = vld [vmem:[#allocation3 + $0x4c0] sm:$0xff]  ;;  %v752_v50 = vld [vmem:[#allocation3 + $0x4d0] sm:$0xff] }
  0xeb   :  { %1166 = vmatprep.subr.bf16.mxu0 %v655_v54  ;;  %1330 = vmatprep.subr.bf16.mxu1 %v657_v58  ;;  %v759_v51 = vld [vmem:[#allocation3 + $0x508] sm:$0xff]  ;;  %v761_v52 = vld [vmem:[#allocation3 + $0x518] sm:$0xff]  ;;  %v758_v53 = vld [vmem:[#allocation3 + $0x500] sm:$0xff] }
  0xec   :  { %v760_v54 = vld [vmem:[#allocation3 + $0x510] sm:$0xff]  ;;  %v767_v58 = vld [vmem:[#allocation3 + $0x548] sm:$0xff]  ;;  %v825_v25 = vld [vmem:[#allocation3 + $0x718] sm:$0xff] }
  0xed   :  { %v855_v21 = vld [vmem:[#allocation3 + $0x808] sm:$0xff] }
  0xee   :  { %1167 = vmatpush1.bf16.msra.mxu0 %v654_v63  ;;  %1331 = vmatpush1.bf16.msra.mxu1 %v656_v0  ;;  %v769_v63 = vld [vmem:[#allocation3 + $0x558] sm:$0xff]  ;;  %v766_v0 = vld [vmem:[#allocation3 + $0x540] sm:$0xff] }
  0xef   :  { %1168 = vmatprep.subr.bf16.mxu0 %v663_v2  ;;  %1332 = vmatprep.subr.bf16.mxu1 %v665_v3  ;;  %v768_v2 = vld [vmem:[#allocation3 + $0x550] sm:$0xff]  ;;  %v775_v3 = vld [vmem:[#allocation3 + $0x588] sm:$0xff] }
  0xf2   :  { %1169 = vmatpush1.bf16.msra.mxu0 %v662_v4  ;;  %1333 = vmatpush1.bf16.msra.mxu1 %v664_v55  ;;  %v777_v4 = vld [vmem:[#allocation3 + $0x598] sm:$0xff]  ;;  %v774_v55 = vld [vmem:[#allocation3 + $0x580] sm:$0xff] }
  0xf3   :  { %1170 = vmatprep.subr.bf16.mxu0 %v671_v56  ;;  %1334 = vmatprep.subr.bf16.mxu1 %v673_v16  ;;  %v776_v56 = vld [vmem:[#allocation3 + $0x590] sm:$0xff]  ;;  %v783_v16 = vld [vmem:[#allocation3 + $0x5c8] sm:$0xff] }
  0xf6   :  { %1171 = vmatpush1.bf16.msra.mxu0 %v670_v57  ;;  %1335 = vmatpush1.bf16.msra.mxu1 %v672_v9  ;;  %v785_v57 = vld [vmem:[#allocation3 + $0x5d8] sm:$0xff]  ;;  %v782_v9 = vld [vmem:[#allocation3 + $0x5c0] sm:$0xff] }
  0xf7   :  { %1172 = vmatprep.subr.bf16.mxu0 %v679_v60  ;;  %1336 = vmatprep.subr.bf16.mxu1 %v681_v61  ;;  %v784_v60 = vld [vmem:[#allocation3 + $0x5d0] sm:$0xff]  ;;  %v791_v61 = vld [vmem:[#allocation3 + $0x608] sm:$0xff] }
  0xfa   :  { %1173 = vmatpush1.bf16.msra.mxu0 %v678_v62  ;;  %1337 = vmatpush1.bf16.msra.mxu1 %v680_v1  ;;  %v793_v62 = vld [vmem:[#allocation3 + $0x618] sm:$0xff]  ;;  %v790_v1 = vld [vmem:[#allocation3 + $0x600] sm:$0xff] }
  0xfb   :  { %1174 = vmatprep.subr.bf16.mxu0 %v687_v5  ;;  %1338 = vmatprep.subr.bf16.mxu1 %v689_v7  ;;  %v792_v5 = vld [vmem:[#allocation3 + $0x610] sm:$0xff]  ;;  %v799_v7 = vld [vmem:[#allocation3 + $0x648] sm:$0xff] }
  0xfe   :  { %1175 = vmatpush1.bf16.msra.mxu0 %v686_v8  ;;  %1339 = vmatpush1.bf16.msra.mxu1 %v688_v10  ;;  %v801_v8 = vld [vmem:[#allocation3 + $0x658] sm:$0xff]  ;;  %v798_v10 = vld [vmem:[#allocation3 + $0x640] sm:$0xff] }
  0xff   :  { %1176 = vmatprep.subr.bf16.mxu0 %v695_v11  ;;  %1340 = vmatprep.subr.bf16.mxu1 %v697_v12  ;;  %v800_v11 = vld [vmem:[#allocation3 + $0x650] sm:$0xff]  ;;  %v807_v12 = vld [vmem:[#allocation3 + $0x688] sm:$0xff] }
 0x102   :  { %1177 = vmatpush1.bf16.msra.mxu0 %v694_v13  ;;  %1341 = vmatpush1.bf16.msra.mxu1 %v696_v14  ;;  %v809_v13 = vld [vmem:[#allocation3 + $0x698] sm:$0xff]  ;;  %v806_v14 = vld [vmem:[#allocation3 + $0x680] sm:$0xff] }
 0x103   :  { %1178 = vmatprep.subr.bf16.mxu0 %v703_v15  ;;  %1342 = vmatprep.subr.bf16.mxu1 %v705_v17  ;;  %v808_v15 = vld [vmem:[#allocation3 + $0x690] sm:$0xff]  ;;  %v815_v17 = vld [vmem:[#allocation3 + $0x6c8] sm:$0xff] }
 0x106   :  { %1179 = vmatpush1.bf16.msra.mxu0 %v702_v18  ;;  %1343 = vmatpush1.bf16.msra.mxu1 %v704_v19  ;;  %v817_v18 = vld [vmem:[#allocation3 + $0x6d8] sm:$0xff]  ;;  %v814_v19 = vld [vmem:[#allocation3 + $0x6c0] sm:$0xff] }
 0x107   :  { %1180 = vmatprep.subr.bf16.mxu0 %v711_v20  ;;  %1344 = vmatprep.subr.bf16.mxu1 %v713_v24  ;;  %v816_v20 = vld [vmem:[#allocation3 + $0x6d0] sm:$0xff]  ;;  %v823_v24 = vld [vmem:[#allocation3 + $0x708] sm:$0xff] }
 0x10a   :  { %1181 = vmatpush1.bf16.msra.mxu0 %v710_v26  ;;  %1345 = vmatpush1.bf16.msra.mxu1 %v712_v27  ;;  %v822_v26 = vld [vmem:[#allocation3 + $0x700] sm:$0xff]  ;;  %v824_v27 = vld [vmem:[#allocation3 + $0x710] sm:$0xff] }
 0x10b   :  { %1182 = vmatprep.subr.bf16.mxu0 %v719_v29  ;;  %1346 = vmatprep.subr.bf16.mxu1 %v721_v30  ;;  %v831_v29 = vld [vmem:[#allocation3 + $0x748] sm:$0xff]  ;;  %v833_v30 = vld [vmem:[#allocation3 + $0x758] sm:$0xff] }
 0x10e   :  { %1183 = vmatpush1.bf16.msra.mxu0 %v718_v32  ;;  %1347 = vmatpush1.bf16.msra.mxu1 %v720_v33  ;;  %v830_v32 = vld [vmem:[#allocation3 + $0x740] sm:$0xff]  ;;  %v832_v33 = vld [vmem:[#allocation3 + $0x750] sm:$0xff] }
 0x10f   :  { %1193 = vmatprep.subr.bf16.mxu0 %v727_v34  ;;  %1357 = vmatprep.subr.bf16.mxu1 %v729_v35  ;;  %v839_v34 = vld [vmem:[#allocation3 + $0x788] sm:$0xff]  ;;  %v841_v35 = vld [vmem:[#allocation3 + $0x798] sm:$0xff] }
 0x111   :  { %1185 = vmatmul.mubr.bf16.vlgmr.msra.gmra.mrb[0].mxu0 %v5171_v36  ;;  %1349 = vmatmul.mubr.bf16.vlgmr.msra.gmra.mrb[0].mxu1 %v5171_v36 }
 0x112   :  { %1194 = vmatpush1.bf16.msra.mxu0 %v726_v37  ;;  %1358 = vmatpush1.bf16.msra.mxu1 %v728_v38  ;;  %v838_v37 = vld [vmem:[#allocation3 + $0x780] sm:$0xff]  ;;  %v840_v38 = vld [vmem:[#allocation3 + $0x790] sm:$0xff] }
 0x113   :  { %1195 = vmatprep.subr.bf16.mxu0 %v735_v39  ;;  %1359 = vmatprep.subr.bf16.mxu1 %v737_v40  ;;  %v847_v39 = vld [vmem:[#allocation3 + $0x7c8] sm:$0xff]  ;;  %v849_v40 = vld [vmem:[#allocation3 + $0x7d8] sm:$0xff] }
 0x114   :  { %1225 = vmatprep.mubr.bf16.mxu0 %v5173_v41  ;;  %1389 = vmatprep.mubr.bf16.mxu1 %v5173_v41 }
 0x116   :  { %1196 = vmatpush1.bf16.msra.mxu0 %v734_v23  ;;  %1360 = vmatpush1.bf16.msra.mxu1 %v736_v42  ;;  %v5184_v23 = vrot.slane %v5180_v22, %v5138_v6  ;;  %v846_v42 = vld [vmem:[#allocation3 + $0x7c0] sm:$0xff] }
 0x117   :  { %1197 = vmatprep.subr.bf16.mxu0 %v743_v43  ;;  %1361 = vmatprep.subr.bf16.mxu1 %v745_v44  ;;  %v848_v43 = vld [vmem:[#allocation3 + $0x7d0] sm:$0xff]  ;;  %v857_v44 = vld [vmem:[#allocation3 + $0x818] sm:$0xff] }
 0x11a   :  { %1198 = vmatpush1.bf16.msra.mxu0 %v742_v45  ;;  %1362 = vmatpush1.bf16.msra.mxu1 %v744_v46  ;;  %v580_v45 = vcombine.high %v5184_v23, %v5184_v23  ;;  %v5190_v46 = vpack.c.bf16 %v5165_v31, %v5165_v31  ;;  %v862_v31 = vld [vmem:[#allocation3 + $0x840] sm:$0xff] }
 0x11b   :  { %1199 = vmatprep.subr.bf16.mxu0 %v751_v47  ;;  %1363 = vmatprep.subr.bf16.mxu1 %v753_v48  ;;  %v854_v47 = vld [vmem:[#allocation3 + $0x800] sm:$0xff]  ;;  %v856_v48 = vld [vmem:[#allocation3 + $0x810] sm:$0xff] }
 0x11e   :  { %1200 = vmatpush1.bf16.msra.mxu0 %v750_v49  ;;  %1364 = vmatpush1.bf16.msra.mxu1 %v752_v50  ;;  %v863_v49 = vld [vmem:[#allocation3 + $0x848] sm:$0xff]  ;;  %v865_v50 = vld [vmem:[#allocation3 + $0x858] sm:$0xff] }
 0x11f   :  { %1201 = vmatprep.subr.bf16.mxu0 %v759_v51  ;;  %1365 = vmatprep.subr.bf16.mxu1 %v761_v52  ;;  %v5192_v51 = vpack.c.bf16 %v580_v45, %v580_v45  ;;  %v864_v52 = vld [vmem:[#allocation3 + $0x850] sm:$0xff]  ;;  %v967_v45 = vld [vmem:[#allocation3 + $0xb88] sm:$0xff] }
 0x122   :  { %1202 = vmatpush1.bf16.msra.mxu0 %v758_v53  ;;  %1366 = vmatpush1.bf16.msra.mxu1 %v760_v54  ;;  %v871_v53 = vld [vmem:[#allocation3 + $0x888] sm:$0xff]  ;;  %v873_v54 = vld [vmem:[#allocation3 + $0x898] sm:$0xff] }
 0x123   :  { %1203 = vmatprep.subr.bf16.mxu0 %v767_v58  ;;  %1367 = vmatprep.subr.bf16.mxu1 %v769_v63  ;;  %v870_v58 = vld [vmem:[#allocation3 + $0x880] sm:$0xff]  ;;  %v872_v63 = vld [vmem:[#allocation3 + $0x890] sm:$0xff] }
 0x126   :  { %1204 = vmatpush1.bf16.msra.mxu0 %v766_v0  ;;  %1368 = vmatpush1.bf16.msra.mxu1 %v768_v2  ;;  %v879_v0 = vld [vmem:[#allocation3 + $0x8c8] sm:$0xff]  ;;  %v881_v2 = vld [vmem:[#allocation3 + $0x8d8] sm:$0xff] }
 0x127   :  { %1205 = vmatprep.subr.bf16.mxu0 %v775_v3  ;;  %1369 = vmatprep.subr.bf16.mxu1 %v777_v4  ;;  %v878_v3 = vld [vmem:[#allocation3 + $0x8c0] sm:$0xff]  ;;  %v880_v4 = vld [vmem:[#allocation3 + $0x8d0] sm:$0xff] }
 0x12a   :  { %1206 = vmatpush1.bf16.msra.mxu0 %v774_v55  ;;  %1370 = vmatpush1.bf16.msra.mxu1 %v776_v56  ;;  %v887_v55 = vld [vmem:[#allocation3 + $0x908] sm:$0xff]  ;;  %v889_v56 = vld [vmem:[#allocation3 + $0x918] sm:$0xff] }
 0x12b   :  { %1207 = vmatprep.subr.bf16.mxu0 %v783_v16  ;;  %1371 = vmatprep.subr.bf16.mxu1 %v785_v57  ;;  %v886_v16 = vld [vmem:[#allocation3 + $0x900] sm:$0xff]  ;;  %v888_v57 = vld [vmem:[#allocation3 + $0x910] sm:$0xff] }
 0x12e   :  { %1208 = vmatpush1.bf16.msra.mxu0 %v782_v9  ;;  %1372 = vmatpush1.bf16.msra.mxu1 %v784_v60  ;;  %v895_v9 = vld [vmem:[#allocation3 + $0x948] sm:$0xff]  ;;  %v897_v60 = vld [vmem:[#allocation3 + $0x958] sm:$0xff] }
 0x12f   :  { %1209 = vmatprep.subr.bf16.mxu0 %v791_v61  ;;  %1373 = vmatprep.subr.bf16.mxu1 %v793_v62  ;;  %v894_v61 = vld [vmem:[#allocation3 + $0x940] sm:$0xff]  ;;  %v896_v62 = vld [vmem:[#allocation3 + $0x950] sm:$0xff] }
 0x132   :  { %1210 = vmatpush1.bf16.msra.mxu0 %v790_v1  ;;  %1374 = vmatpush1.bf16.msra.mxu1 %v792_v5  ;;  %v903_v1 = vld [vmem:[#allocation3 + $0x988] sm:$0xff]  ;;  %v905_v5 = vld [vmem:[#allocation3 + $0x998] sm:$0xff] }
 0x133   :  { %1211 = vmatprep.subr.bf16.mxu0 %v799_v7  ;;  %1375 = vmatprep.subr.bf16.mxu1 %v801_v8  ;;  %v902_v7 = vld [vmem:[#allocation3 + $0x980] sm:$0xff]  ;;  %v904_v8 = vld [vmem:[#allocation3 + $0x990] sm:$0xff] }
 0x136   :  { %1212 = vmatpush1.bf16.msra.mxu0 %v798_v10  ;;  %1376 = vmatpush1.bf16.msra.mxu1 %v800_v11  ;;  %v911_v10 = vld [vmem:[#allocation3 + $0x9c8] sm:$0xff]  ;;  %v913_v11 = vld [vmem:[#allocation3 + $0x9d8] sm:$0xff] }
 0x137   :  { %1213 = vmatprep.subr.bf16.mxu0 %v807_v12  ;;  %1377 = vmatprep.subr.bf16.mxu1 %v809_v13  ;;  %v910_v12 = vld [vmem:[#allocation3 + $0x9c0] sm:$0xff]  ;;  %v912_v13 = vld [vmem:[#allocation3 + $0x9d0] sm:$0xff] }
 0x13a   :  { %1214 = vmatpush1.bf16.msra.mxu0 %v806_v14  ;;  %1378 = vmatpush1.bf16.msra.mxu1 %v808_v15  ;;  %v919_v14 = vld [vmem:[#allocation3 + $0xa08] sm:$0xff]  ;;  %v921_v15 = vld [vmem:[#allocation3 + $0xa18] sm:$0xff] }
 0x13b   :  { %1215 = vmatprep.subr.bf16.mxu0 %v815_v17  ;;  %1379 = vmatprep.subr.bf16.mxu1 %v817_v18  ;;  %v918_v17 = vld [vmem:[#allocation3 + $0xa00] sm:$0xff]  ;;  %v920_v18 = vld [vmem:[#allocation3 + $0xa10] sm:$0xff] }
 0x13e   :  { %1216 = vmatpush1.bf16.msra.mxu0 %v814_v19  ;;  %1380 = vmatpush1.bf16.msra.mxu1 %v816_v20  ;;  %v927_v19 = vld [vmem:[#allocation3 + $0xa48] sm:$0xff]  ;;  %v929_v20 = vld [vmem:[#allocation3 + $0xa58] sm:$0xff] }
 0x13f   :  { %1217 = vmatprep.subr.bf16.mxu0 %v823_v24  ;;  %1381 = vmatprep.subr.bf16.mxu1 %v825_v25  ;;  %v926_v24 = vld [vmem:[#allocation3 + $0xa40] sm:$0xff]  ;;  %v928_v25 = vld [vmem:[#allocation3 + $0xa50] sm:$0xff] }
 0x142   :  { %1218 = vmatpush1.bf16.msra.mxu0 %v822_v26  ;;  %1382 = vmatpush1.bf16.msra.mxu1 %v824_v27  ;;  %v935_v26 = vld [vmem:[#allocation3 + $0xa88] sm:$0xff]  ;;  %v937_v27 = vld [vmem:[#allocation3 + $0xa98] sm:$0xff] }
 0x143   :  { %1219 = vmatprep.subr.bf16.mxu0 %v831_v29  ;;  %1383 = vmatprep.subr.bf16.mxu1 %v833_v30  ;;  %v934_v29 = vld [vmem:[#allocation3 + $0xa80] sm:$0xff]  ;;  %v936_v30 = vld [vmem:[#allocation3 + $0xa90] sm:$0xff] }
 0x146   :  { %1220 = vmatpush1.bf16.msra.mxu0 %v830_v32  ;;  %1384 = vmatpush1.bf16.msra.mxu1 %v832_v33  ;;  %v943_v32 = vld [vmem:[#allocation3 + $0xac8] sm:$0xff]  ;;  %v945_v33 = vld [vmem:[#allocation3 + $0xad8] sm:$0xff] }
 0x147   :  { %1221 = vmatprep.subr.bf16.mxu0 %v839_v34  ;;  %1385 = vmatprep.subr.bf16.mxu1 %v841_v35  ;;  %v942_v34 = vld [vmem:[#allocation3 + $0xac0] sm:$0xff]  ;;  %v944_v35 = vld [vmem:[#allocation3 + $0xad0] sm:$0xff] }
 0x14a   :  { %1222 = vmatpush1.bf16.msra.mxu0 %v838_v37  ;;  %1386 = vmatpush1.bf16.msra.mxu1 %v840_v38  ;;  %v951_v37 = vld [vmem:[#allocation3 + $0xb08] sm:$0xff]  ;;  %v953_v38 = vld [vmem:[#allocation3 + $0xb18] sm:$0xff] }
 0x14b   :  { %1223 = vmatprep.subr.bf16.mxu0 %v847_v39  ;;  %1387 = vmatprep.subr.bf16.mxu1 %v849_v40  ;;  %v950_v39 = vld [vmem:[#allocation3 + $0xb00] sm:$0xff]  ;;  %v952_v40 = vld [vmem:[#allocation3 + $0xb10] sm:$0xff] }
 0x14e   :  { %1224 = vmatpush1.bf16.msra.mxu0 %v846_v42  ;;  %1388 = vmatpush1.bf16.msra.mxu1 %v848_v43  ;;  %v959_v42 = vld [vmem:[#allocation3 + $0xb48] sm:$0xff]  ;;  %v961_v43 = vld [vmem:[#allocation3 + $0xb58] sm:$0xff] }
 0x14f   :  { %1234 = vmatprep.subr.bf16.mxu0 %v855_v21  ;;  %1398 = vmatprep.subr.bf16.mxu1 %v857_v44  ;;  %v958_v21 = vld [vmem:[#allocation3 + $0xb40] sm:$0xff]  ;;  %v960_v44 = vld [vmem:[#allocation3 + $0xb50] sm:$0xff] }
 0x151   :  { %1226 = vmatmul.mubr.bf16.vlgmr.msra.gmra.mrb[0].mxu0 %v5190_v46  ;;  %1390 = vmatmul.mubr.bf16.vlgmr.msra.gmra.mrb[0].mxu1 %v5190_v46 }
 0x152   :  { %1235 = vmatpush1.bf16.msra.mxu0 %v854_v47  ;;  %1399 = vmatpush1.bf16.msra.mxu1 %v856_v48  ;;  %v969_v47 = vld [vmem:[#allocation3 + $0xb98] sm:$0xff]  ;;  %v565_v48 = vcombine.high %v5180_v22, %v5180_v22 }
 0x153   :  { %1236 = vmatprep.subr.bf16.mxu0 %v863_v49  ;;  %1400 = vmatprep.subr.bf16.mxu1 %v865_v50  ;;  %v966_v49 = vld [vmem:[#allocation3 + $0xb80] sm:$0xff]  ;;  %v968_v50 = vld [vmem:[#allocation3 + $0xb90] sm:$0xff] }
 0x154   :  { %1266 = vmatprep.mubr.bf16.mxu0 %v5192_v51  ;;  %1430 = vmatprep.mubr.bf16.mxu1 %v5192_v51 }
 0x156   :  { %1237 = vmatpush1.bf16.msra.mxu0 %v862_v31  ;;  %1401 = vmatpush1.bf16.msra.mxu1 %v864_v52  ;;  %v975_v31 = vld [vmem:[#allocation3 + $0xbc8] sm:$0xff]  ;;  %v977_v52 = vld [vmem:[#allocation3 + $0xbd8] sm:$0xff] }
 0x157   :  { %1238 = vmatprep.subr.bf16.mxu0 %v871_v53  ;;  %1402 = vmatprep.subr.bf16.mxu1 %v873_v54  ;;  %v5201_v53 = vrot.slane %v565_v48, %v5138_v6  ;;  %v974_v54 = vld [vmem:[#allocation3 + $0xbc0] sm:$0xff] }
 0x158   :  { %v1070_v48 = vld [vmem:[#allocation3 + $0xec0] sm:$0xff] }
 0x159   :  { %v581_v22 = vcombine.high %v5201_v53, %v5201_v53 }
 0x15a   :  { %1239 = vmatpush1.bf16.msra.mxu0 %v870_v58  ;;  %1403 = vmatpush1.bf16.msra.mxu1 %v872_v63  ;;  %v976_v58 = vld [vmem:[#allocation3 + $0xbd0] sm:$0xff]  ;;  %v983_v63 = vld [vmem:[#allocation3 + $0xc08] sm:$0xff] }
 0x15b   :  { %1240 = vmatprep.subr.bf16.mxu0 %v879_v0  ;;  %1404 = vmatprep.subr.bf16.mxu1 %v881_v2  ;;  %v985_v0 = vld [vmem:[#allocation3 + $0xc18] sm:$0xff]  ;;  %v5207_v2 = vpack.c.bf16 %v5184_v23, %v5184_v23  ;;  %v990_v23 = vld [vmem:[#allocation3 + $0xc40] sm:$0xff] }
 0x15e   :  { %1241 = vmatpush1.bf16.msra.mxu0 %v878_v3  ;;  %1405 = vmatpush1.bf16.msra.mxu1 %v880_v4  ;;  %v982_v3 = vld [vmem:[#allocation3 + $0xc00] sm:$0xff]  ;;  %v984_v4 = vld [vmem:[#allocation3 + $0xc10] sm:$0xff] }
 0x15f   :  { %1242 = vmatprep.subr.bf16.mxu0 %v887_v55  ;;  %1406 = vmatprep.subr.bf16.mxu1 %v889_v56  ;;  %v991_v55 = vld [vmem:[#allocation3 + $0xc48] sm:$0xff]  ;;  %v993_v56 = vld [vmem:[#allocation3 + $0xc58] sm:$0xff] }
 0x162   :  { %1243 = vmatpush1.bf16.msra.mxu0 %v886_v16  ;;  %1407 = vmatpush1.bf16.msra.mxu1 %v888_v57  ;;  %v5209_v16 = vpack.c.bf16 %v581_v22, %v581_v22  ;;  %v992_v57 = vld [vmem:[#allocation3 + $0xc50] sm:$0xff] }
 0x163   :  { %1244 = vmatprep.subr.bf16.mxu0 %v895_v9  ;;  %1408 = vmatprep.subr.bf16.mxu1 %v897_v60  ;;  %v999_v9 = vld [vmem:[#allocation3 + $0xc88] sm:$0xff]  ;;  %v1001_v60 = vld [vmem:[#allocation3 + $0xc98] sm:$0xff]  ;;  %v1088_v22 = vld [vmem:[#allocation3 + $0xf50] sm:$0xff] }
 0x166   :  { %1245 = vmatpush1.bf16.msra.mxu0 %v894_v61  ;;  %1409 = vmatpush1.bf16.msra.mxu1 %v896_v62  ;;  %v998_v61 = vld [vmem:[#allocation3 + $0xc80] sm:$0xff]  ;;  %v1000_v62 = vld [vmem:[#allocation3 + $0xc90] sm:$0xff] }
 0x167   :  { %1246 = vmatprep.subr.bf16.mxu0 %v903_v1  ;;  %1410 = vmatprep.subr.bf16.mxu1 %v905_v5  ;;  %v1007_v1 = vld [vmem:[#allocation3 + $0xcc8] sm:$0xff]  ;;  %v1009_v5 = vld [vmem:[#allocation3 + $0xcd8] sm:$0xff] }
 0x16a   :  { %1247 = vmatpush1.bf16.msra.mxu0 %v902_v7  ;;  %1411 = vmatpush1.bf16.msra.mxu1 %v904_v8  ;;  %v1006_v7 = vld [vmem:[#allocation3 + $0xcc0] sm:$0xff]  ;;  %v1008_v8 = vld [vmem:[#allocation3 + $0xcd0] sm:$0xff] }
 0x16b   :  { %1248 = vmatprep.subr.bf16.mxu0 %v911_v10  ;;  %1412 = vmatprep.subr.bf16.mxu1 %v913_v11  ;;  %v1015_v10 = vld [vmem:[#allocation3 + $0xd08] sm:$0xff]  ;;  %v1017_v11 = vld [vmem:[#allocation3 + $0xd18] sm:$0xff] }
 0x16e   :  { %1249 = vmatpush1.bf16.msra.mxu0 %v910_v12  ;;  %1413 = vmatpush1.bf16.msra.mxu1 %v912_v13  ;;  %v1014_v12 = vld [vmem:[#allocation3 + $0xd00] sm:$0xff]  ;;  %v1016_v13 = vld [vmem:[#allocation3 + $0xd10] sm:$0xff] }
 0x16f   :  { %1250 = vmatprep.subr.bf16.mxu0 %v919_v14  ;;  %1414 = vmatprep.subr.bf16.mxu1 %v921_v15  ;;  %v1023_v14 = vld [vmem:[#allocation3 + $0xd48] sm:$0xff]  ;;  %v1025_v15 = vld [vmem:[#allocation3 + $0xd58] sm:$0xff] }
 0x172   :  { %1251 = vmatpush1.bf16.msra.mxu0 %v918_v17  ;;  %1415 = vmatpush1.bf16.msra.mxu1 %v920_v18  ;;  %v1022_v17 = vld [vmem:[#allocation3 + $0xd40] sm:$0xff]  ;;  %v1024_v18 = vld [vmem:[#allocation3 + $0xd50] sm:$0xff] }
 0x173   :  { %1252 = vmatprep.subr.bf16.mxu0 %v927_v19  ;;  %1416 = vmatprep.subr.bf16.mxu1 %v929_v20  ;;  %v1031_v19 = vld [vmem:[#allocation3 + $0xd88] sm:$0xff]  ;;  %v1033_v20 = vld [vmem:[#allocation3 + $0xd98] sm:$0xff] }
 0x176   :  { %1253 = vmatpush1.bf16.msra.mxu0 %v926_v24  ;;  %1417 = vmatpush1.bf16.msra.mxu1 %v928_v25  ;;  %v1030_v24 = vld [vmem:[#allocation3 + $0xd80] sm:$0xff]  ;;  %v1032_v25 = vld [vmem:[#allocation3 + $0xd90] sm:$0xff] }
 0x177   :  { %1254 = vmatprep.subr.bf16.mxu0 %v935_v26  ;;  %1418 = vmatprep.subr.bf16.mxu1 %v937_v27  ;;  %v1039_v26 = vld [vmem:[#allocation3 + $0xdc8] sm:$0xff]  ;;  %v1041_v27 = vld [vmem:[#allocation3 + $0xdd8] sm:$0xff] }
 0x17a   :  { %1255 = vmatpush1.bf16.msra.mxu0 %v934_v29  ;;  %1419 = vmatpush1.bf16.msra.mxu1 %v936_v30  ;;  %v1038_v29 = vld [vmem:[#allocation3 + $0xdc0] sm:$0xff]  ;;  %v1040_v30 = vld [vmem:[#allocation3 + $0xdd0] sm:$0xff] }
 0x17b   :  { %1256 = vmatprep.subr.bf16.mxu0 %v943_v32  ;;  %1420 = vmatprep.subr.bf16.mxu1 %v945_v33  ;;  %v1047_v32 = vld [vmem:[#allocation3 + $0xe08] sm:$0xff]  ;;  %v1049_v33 = vld [vmem:[#allocation3 + $0xe18] sm:$0xff] }
 0x17e   :  { %1257 = vmatpush1.bf16.msra.mxu0 %v942_v34  ;;  %1421 = vmatpush1.bf16.msra.mxu1 %v944_v35  ;;  %v1046_v34 = vld [vmem:[#allocation3 + $0xe00] sm:$0xff]  ;;  %v1048_v35 = vld [vmem:[#allocation3 + $0xe10] sm:$0xff] }
 0x17f   :  { %1258 = vmatprep.subr.bf16.mxu0 %v951_v37  ;;  %1422 = vmatprep.subr.bf16.mxu1 %v953_v38  ;;  %v1055_v37 = vld [vmem:[#allocation3 + $0xe48] sm:$0xff]  ;;  %v1057_v38 = vld [vmem:[#allocation3 + $0xe58] sm:$0xff] }
 0x182   :  { %1259 = vmatpush1.bf16.msra.mxu0 %v950_v39  ;;  %1423 = vmatpush1.bf16.msra.mxu1 %v952_v40  ;;  %v1054_v39 = vld [vmem:[#allocation3 + $0xe40] sm:$0xff]  ;;  %v1056_v40 = vld [vmem:[#allocation3 + $0xe50] sm:$0xff] }
 0x183   :  { %1260 = vmatprep.subr.bf16.mxu0 %v959_v42  ;;  %1424 = vmatprep.subr.bf16.mxu1 %v961_v43  ;;  %v1063_v42 = vld [vmem:[#allocation3 + $0xe88] sm:$0xff]  ;;  %v1065_v43 = vld [vmem:[#allocation3 + $0xe98] sm:$0xff] }
 0x186   :  { %1261 = vmatpush1.bf16.msra.mxu0 %v958_v21  ;;  %1425 = vmatpush1.bf16.msra.mxu1 %v960_v44  ;;  %v1062_v21 = vld [vmem:[#allocation3 + $0xe80] sm:$0xff]  ;;  %v1064_v44 = vld [vmem:[#allocation3 + $0xe90] sm:$0xff] }
 0x187   :  { %1262 = vmatprep.subr.bf16.mxu0 %v967_v45  ;;  %1426 = vmatprep.subr.bf16.mxu1 %v969_v47  ;;  %v1071_v45 = vld [vmem:[#allocation3 + $0xec8] sm:$0xff]  ;;  %v1073_v47 = vld [vmem:[#allocation3 + $0xed8] sm:$0xff] }
 0x18a   :  { %1263 = vmatpush1.bf16.msra.mxu0 %v966_v49  ;;  %1427 = vmatpush1.bf16.msra.mxu1 %v968_v50  ;;  %v1072_v49 = vld [vmem:[#allocation3 + $0xed0] sm:$0xff]  ;;  %v1079_v50 = vld [vmem:[#allocation3 + $0xf08] sm:$0xff] }
 0x18b   :  { %1264 = vmatprep.subr.bf16.mxu0 %v975_v31  ;;  %1428 = vmatprep.subr.bf16.mxu1 %v977_v52  ;;  %v1081_v31 = vld [vmem:[#allocation3 + $0xf18] sm:$0xff]  ;;  %v1078_v52 = vld [vmem:[#allocation3 + $0xf00] sm:$0xff] }
 0x18e   :  { %1265 = vmatpush1.bf16.msra.mxu0 %v974_v54  ;;  %1429 = vmatpush1.bf16.msra.mxu1 %v976_v58  ;;  %v1080_v54 = vld [vmem:[#allocation3 + $0xf10] sm:$0xff]  ;;  %v1087_v58 = vld [vmem:[#allocation3 + $0xf48] sm:$0xff] }
 0x18f   :  { %1275 = vmatprep.subr.bf16.mxu0 %v983_v63  ;;  %1439 = vmatprep.subr.bf16.mxu1 %v985_v0  ;;  %v1089_v63 = vld [vmem:[#allocation3 + $0xf58] sm:$0xff]  ;;  %v1086_v0 = vld [vmem:[#allocation3 + $0xf40] sm:$0xff] }
 0x191   :  { %1267 = vmatmul.mubr.bf16.vlgmr.msra.gmra.mrb[0].mxu0 %v5207_v2  ;;  %1431 = vmatmul.mubr.bf16.vlgmr.msra.gmra.mrb[0].mxu1 %v5207_v2 }
 0x192   :  { %1276 = vmatpush1.bf16.msra.mxu0 %v982_v3  ;;  %1440 = vmatpush1.bf16.msra.mxu1 %v984_v4  ;;  %v1095_v3 = vld [vmem:[#allocation3 + $0xf88] sm:$0xff]  ;;  %v1097_v4 = vld [vmem:[#allocation3 + $0xf98] sm:$0xff] }
 0x193   :  { %1277 = vmatprep.subr.bf16.mxu0 %v991_v55  ;;  %1441 = vmatprep.subr.bf16.mxu1 %v993_v56  ;;  %v1094_v55 = vld [vmem:[#allocation3 + $0xf80] sm:$0xff]  ;;  %v1096_v56 = vld [vmem:[#allocation3 + $0xf90] sm:$0xff] }
 0x194   :  { %1307 = vmatprep.mubr.bf16.mxu0 %v5209_v16  ;;  %1471 = vmatprep.mubr.bf16.mxu1 %v5209_v16 }
 0x196   :  { %1278 = vmatpush1.bf16.msra.mxu0 %v990_v23  ;;  %1442 = vmatpush1.bf16.msra.mxu1 %v992_v57  ;;  %v1103_v23 = vld [vmem:[#allocation3 + $0xfc8] sm:$0xff]  ;;  %v1105_v57 = vld [vmem:[#allocation3 + $0xfd8] sm:$0xff] }
 0x197   :  { %1279 = vmatprep.subr.bf16.mxu0 %v999_v9  ;;  %1443 = vmatprep.subr.bf16.mxu1 %v1001_v60  ;;  %v1102_v9 = vld [vmem:[#allocation3 + $0xfc0] sm:$0xff]  ;;  %v1104_v60 = vld [vmem:[#allocation3 + $0xfd0] sm:$0xff] }
 0x19a   :  { %1280 = vmatpush1.bf16.msra.mxu0 %v998_v61  ;;  %1444 = vmatpush1.bf16.msra.mxu1 %v1000_v62  ;;  %v603_v61 = vld [vmem:[#allocation3 + $0x28] sm:$0xff]  ;;  %v605_v62 = vld [vmem:[#allocation3 + $0x38] sm:$0xff] }
 0x19b   :  { %1281 = vmatprep.subr.bf16.mxu0 %v1007_v1  ;;  %1445 = vmatprep.subr.bf16.mxu1 %v1009_v5  ;;  %v5217_v1 = vpack.c.bf16 %v5201_v53, %v5201_v53  ;;  %v602_v5 = vld [vmem:[#allocation3 + $0x20] sm:$0xff]  ;;  %v619_v53 = vld [vmem:[#allocation3 + $0xa8] sm:$0xff] }
 0x19e   :  { %1282 = vmatpush1.bf16.msra.mxu0 %v1006_v7  ;;  %1446 = vmatpush1.bf16.msra.mxu1 %v1008_v8  ;;  %v604_v7 = vld [vmem:[#allocation3 + $0x30] sm:$0xff]  ;;  %v611_v8 = vld [vmem:[#allocation3 + $0x68] sm:$0xff] }
 0x19f   :  { %1283 = vmatprep.subr.bf16.mxu0 %v1015_v10  ;;  %1447 = vmatprep.subr.bf16.mxu1 %v1017_v11  ;;  %v613_v10 = vld [vmem:[#allocation3 + $0x78] sm:$0xff]  ;;  %v610_v11 = vld [vmem:[#allocation3 + $0x60] sm:$0xff] }
 0x1a2   :  { %1284 = vmatpush1.bf16.msra.mxu0 %v1014_v12  ;;  %1448 = vmatpush1.bf16.msra.mxu1 %v1016_v13  ;;  %v612_v12 = vld [vmem:[#allocation3 + $0x70] sm:$0xff]  ;;  %v621_v13 = vld [vmem:[#allocation3 + $0xb8] sm:$0xff] }
 0x1a3   :  { %1285 = vmatprep.subr.bf16.mxu0 %v1023_v14  ;;  %1449 = vmatprep.subr.bf16.mxu1 %v1025_v15  ;;  %v618_v14 = vld [vmem:[#allocation3 + $0xa0] sm:$0xff]  ;;  %v620_v15 = vld [vmem:[#allocation3 + $0xb0] sm:$0xff] }
 0x1a6   :  { %1286 = vmatpush1.bf16.msra.mxu0 %v1022_v17  ;;  %1450 = vmatpush1.bf16.msra.mxu1 %v1024_v18  ;;  %v627_v17 = vld [vmem:[#allocation3 + $0xe8] sm:$0xff]  ;;  %v629_v18 = vld [vmem:[#allocation3 + $0xf8] sm:$0xff] }
 0x1a7   :  { %1287 = vmatprep.subr.bf16.mxu0 %v1031_v19  ;;  %1451 = vmatprep.subr.bf16.mxu1 %v1033_v20  ;;  %v626_v19 = vld [vmem:[#allocation3 + $0xe0] sm:$0xff]  ;;  %v628_v20 = vld [vmem:[#allocation3 + $0xf0] sm:$0xff] }
 0x1aa   :  { %1288 = vmatpush1.bf16.msra.mxu0 %v1030_v24  ;;  %1452 = vmatpush1.bf16.msra.mxu1 %v1032_v25  ;;  %v635_v24 = vld [vmem:[#allocation3 + $0x128] sm:$0xff]  ;;  %v637_v25 = vld [vmem:[#allocation3 + $0x138] sm:$0xff] }
 0x1ab   :  { %1289 = vmatprep.subr.bf16.mxu0 %v1039_v26  ;;  %1453 = vmatprep.subr.bf16.mxu1 %v1041_v27  ;;  %v636_v26 = vld [vmem:[#allocation3 + $0x130] sm:$0xff]  ;;  %v643_v27 = vld [vmem:[#allocation3 + $0x168] sm:$0xff] }
 0x1ae   :  { %1290 = vmatpush1.bf16.msra.mxu0 %v1038_v29  ;;  %1454 = vmatpush1.bf16.msra.mxu1 %v1040_v30  ;;  %v645_v29 = vld [vmem:[#allocation3 + $0x178] sm:$0xff]  ;;  %v642_v30 = vld [vmem:[#allocation3 + $0x160] sm:$0xff] }
 0x1af   :  { %1291 = vmatprep.subr.bf16.mxu0 %v1047_v32  ;;  %1455 = vmatprep.subr.bf16.mxu1 %v1049_v33  ;;  %v644_v32 = vld [vmem:[#allocation3 + $0x170] sm:$0xff]  ;;  %v651_v33 = vld [vmem:[#allocation3 + $0x1a8] sm:$0xff] }
 0x1b2   :  { %1292 = vmatpush1.bf16.msra.mxu0 %v1046_v34  ;;  %1456 = vmatpush1.bf16.msra.mxu1 %v1048_v35  ;;  %v653_v34 = vld [vmem:[#allocation3 + $0x1b8] sm:$0xff]  ;;  %v650_v35 = vld [vmem:[#allocation3 + $0x1a0] sm:$0xff] }
 0x1b3   :  { %1293 = vmatprep.subr.bf16.mxu0 %v1055_v37  ;;  %1457 = vmatprep.subr.bf16.mxu1 %v1057_v38  ;;  %v652_v37 = vld [vmem:[#allocation3 + $0x1b0] sm:$0xff]  ;;  %v659_v38 = vld [vmem:[#allocation3 + $0x1e8] sm:$0xff] }
 0x1b6   :  { %1294 = vmatpush1.bf16.msra.mxu0 %v1054_v39  ;;  %1458 = vmatpush1.bf16.msra.mxu1 %v1056_v40  ;;  %v661_v39 = vld [vmem:[#allocation3 + $0x1f8] sm:$0xff]  ;;  %v658_v40 = vld [vmem:[#allocation3 + $0x1e0] sm:$0xff] }
 0x1b7   :  { %1295 = vmatprep.subr.bf16.mxu0 %v1063_v42  ;;  %1459 = vmatprep.subr.bf16.mxu1 %v1065_v43  ;;  %v660_v42 = vld [vmem:[#allocation3 + $0x1f0] sm:$0xff]  ;;  %v667_v43 = vld [vmem:[#allocation3 + $0x228] sm:$0xff] }
 0x1ba   :  { %1296 = vmatpush1.bf16.msra.mxu0 %v1062_v21  ;;  %1460 = vmatpush1.bf16.msra.mxu1 %v1064_v44  ;;  %v669_v21 = vld [vmem:[#allocation3 + $0x238] sm:$0xff]  ;;  %v666_v44 = vld [vmem:[#allocation3 + $0x220] sm:$0xff] }
 0x1bb   :  { %1297 = vmatprep.subr.bf16.mxu0 %v1071_v45  ;;  %1461 = vmatprep.subr.bf16.mxu1 %v1073_v47  ;;  %v668_v45 = vld [vmem:[#allocation3 + $0x230] sm:$0xff]  ;;  %v675_v47 = vld [vmem:[#allocation3 + $0x268] sm:$0xff] }
 0x1be   :  { %1298 = vmatpush1.bf16.msra.mxu0 %v1070_v48  ;;  %1462 = vmatpush1.bf16.msra.mxu1 %v1072_v49  ;;  %v677_v48 = vld [vmem:[#allocation3 + $0x278] sm:$0xff]  ;;  %v674_v49 = vld [vmem:[#allocation3 + $0x260] sm:$0xff] }
 0x1bf   :  { %1299 = vmatprep.subr.bf16.mxu0 %v1079_v50  ;;  %1463 = vmatprep.subr.bf16.mxu1 %v1081_v31  ;;  %v676_v50 = vld [vmem:[#allocation3 + $0x270] sm:$0xff]  ;;  %v683_v31 = vld [vmem:[#allocation3 + $0x2a8] sm:$0xff] }
 0x1c2   :  { %1300 = vmatpush1.bf16.msra.mxu0 %v1078_v52  ;;  %1464 = vmatpush1.bf16.msra.mxu1 %v1080_v54  ;;  %v685_v52 = vld [vmem:[#allocation3 + $0x2b8] sm:$0xff]  ;;  %v682_v54 = vld [vmem:[#allocation3 + $0x2a0] sm:$0xff] }
 0x1c3   :  { %1301 = vmatprep.subr.bf16.mxu0 %v1087_v58  ;;  %1465 = vmatprep.subr.bf16.mxu1 %v1089_v63  ;;  %v684_v58 = vld [vmem:[#allocation3 + $0x2b0] sm:$0xff]  ;;  %v691_v63 = vld [vmem:[#allocation3 + $0x2e8] sm:$0xff] }
 0x1c6   :  { %1302 = vmatpush1.bf16.msra.mxu0 %v1086_v0  ;;  %1466 = vmatpush1.bf16.msra.mxu1 %v1088_v22  ;;  %v693_v0 = vld [vmem:[#allocation3 + $0x2f8] sm:$0xff]  ;;  %v690_v22 = vld [vmem:[#allocation3 + $0x2e0] sm:$0xff] }
 0x1c7   :  { %1303 = vmatprep.subr.bf16.mxu0 %v1095_v3  ;;  %1467 = vmatprep.subr.bf16.mxu1 %v1097_v4  ;;  %v692_v3 = vld [vmem:[#allocation3 + $0x2f0] sm:$0xff]  ;;  %v699_v4 = vld [vmem:[#allocation3 + $0x328] sm:$0xff] }
 0x1ca   :  { %1304 = vmatpush1.bf16.msra.mxu0 %v1094_v55  ;;  %1468 = vmatpush1.bf16.msra.mxu1 %v1096_v56  ;;  %v701_v55 = vld [vmem:[#allocation3 + $0x338] sm:$0xff]  ;;  %v698_v56 = vld [vmem:[#allocation3 + $0x320] sm:$0xff] }
 0x1cb   :  { %1305 = vmatprep.subr.bf16.mxu0 %v1103_v23  ;;  %1469 = vmatprep.subr.bf16.mxu1 %v1105_v57  ;;  %v700_v23 = vld [vmem:[#allocation3 + $0x330] sm:$0xff]  ;;  %v707_v57 = vld [vmem:[#allocation3 + $0x368] sm:$0xff] }
 0x1ce   :  { %1306 = vmatpush1.bf16.msra.mxu0 %v1102_v9  ;;  %1470 = vmatpush1.bf16.msra.mxu1 %v1104_v60  ;;  %v709_v9 = vld [vmem:[#allocation3 + $0x378] sm:$0xff]  ;;  %v706_v60 = vld [vmem:[#allocation3 + $0x360] sm:$0xff] }
 0x1cf   :  { %1480 = vmatprep.subr.bf16.mxu0 %v603_v61  ;;  %1644 = vmatprep.subr.bf16.mxu1 %v605_v62  ;;  %v708_v61 = vld [vmem:[#allocation3 + $0x370] sm:$0xff]  ;;  %v715_v62 = vld [vmem:[#allocation3 + $0x3a8] sm:$0xff] }
 0x1d1   :  { %1308 = vmatmul.mubr.bf16.vlgmr.msra.gmra.mrb[0].mxu0 %v5217_v1  ;;  %1472 = vmatmul.mubr.bf16.vlgmr.msra.gmra.mrb[0].mxu1 %v5217_v1 }
 0x1d2   :  { %1481 = vmatpush1.bf16.msra.mxu0 %v602_v5  ;;  %1645 = vmatpush1.bf16.msra.mxu1 %v604_v7  ;;  %v717_v5 = vld [vmem:[#allocation3 + $0x3b8] sm:$0xff]  ;;  %v714_v7 = vld [vmem:[#allocation3 + $0x3a0] sm:$0xff] }
 0x1d3   :  { %1482 = vmatprep.subr.bf16.mxu0 %v611_v8  ;;  %1646 = vmatprep.subr.bf16.mxu1 %v613_v10  ;;  %v716_v8 = vld [vmem:[#allocation3 + $0x3b0] sm:$0xff]  ;;  %v723_v10 = vld [vmem:[#allocation3 + $0x3e8] sm:$0xff] }
 0x1d4   :  { %1512 = vmatprep.mubr.bf16.mxu0 %v5158_v28  ;;  %1676 = vmatprep.mubr.bf16.mxu1 %v5158_v28  ;;  %v634_v28 = vld [vmem:[#allocation3 + $0x120] sm:$0xff] }
 0x1d6   :  { %1483 = vmatpush1.bf16.msra.mxu0 %v610_v11  ;;  %1647 = vmatpush1.bf16.msra.mxu1 %v612_v12  ;;  %v725_v11 = vld [vmem:[#allocation3 + $0x3f8] sm:$0xff]  ;;  %v722_v12 = vld [vmem:[#allocation3 + $0x3e0] sm:$0xff] }
 0x1d7   :  { %1484 = vmatprep.subr.bf16.mxu0 %v619_v53  ;;  %1648 = vmatprep.subr.bf16.mxu1 %v621_v13  ;;  %v724_v53 = vld [vmem:[#allocation3 + $0x3f0] sm:$0xff]  ;;  %v731_v13 = vld [vmem:[#allocation3 + $0x428] sm:$0xff] }
 0x1da   :  { %1485 = vmatpush1.bf16.msra.mxu0 %v618_v14  ;;  %1649 = vmatpush1.bf16.msra.mxu1 %v620_v15  ;;  %v733_v14 = vld [vmem:[#allocation3 + $0x438] sm:$0xff]  ;;  %v730_v15 = vld [vmem:[#allocation3 + $0x420] sm:$0xff] }
 0x1db   :  { %1486 = vmatprep.subr.bf16.mxu0 %v627_v17  ;;  %1650 = vmatprep.subr.bf16.mxu1 %v629_v18  ;;  %v732_v17 = vld [vmem:[#allocation3 + $0x430] sm:$0xff]  ;;  %v739_v18 = vld [vmem:[#allocation3 + $0x468] sm:$0xff] }
 0x1de   :  { %1487 = vmatpush1.bf16.msra.mxu0 %v626_v19  ;;  %1651 = vmatpush1.bf16.msra.mxu1 %v628_v20  ;;  %v741_v19 = vld [vmem:[#allocation3 + $0x478] sm:$0xff]  ;;  %v738_v20 = vld [vmem:[#allocation3 + $0x460] sm:$0xff] }
 0x1df   :  { %1488 = vmatprep.subr.bf16.mxu0 %v635_v24  ;;  %1652 = vmatprep.subr.bf16.mxu1 %v637_v25  ;;  %v740_v24 = vld [vmem:[#allocation3 + $0x470] sm:$0xff]  ;;  %v747_v25 = vld [vmem:[#allocation3 + $0x4a8] sm:$0xff] }
 0x1e2   :  { %1489 = vmatpush1.bf16.msra.mxu0 %v634_v28  ;;  %1653 = vmatpush1.bf16.msra.mxu1 %v636_v26  ;;  %v749_v28 = vld [vmem:[#allocation3 + $0x4b8] sm:$0xff]  ;;  %v746_v26 = vld [vmem:[#allocation3 + $0x4a0] sm:$0xff] }
 0x1e3   :  { %1490 = vmatprep.subr.bf16.mxu0 %v643_v27  ;;  %1654 = vmatprep.subr.bf16.mxu1 %v645_v29  ;;  %v748_v27 = vld [vmem:[#allocation3 + $0x4b0] sm:$0xff]  ;;  %v755_v29 = vld [vmem:[#allocation3 + $0x4e8] sm:$0xff] }
 0x1e6   :  { %1491 = vmatpush1.bf16.msra.mxu0 %v642_v30  ;;  %1655 = vmatpush1.bf16.msra.mxu1 %v644_v32  ;;  %v754_v30 = vld [vmem:[#allocation3 + $0x4e0] sm:$0xff]  ;;  %v756_v32 = vld [vmem:[#allocation3 + $0x4f0] sm:$0xff] }
 0x1e7   :  { %1492 = vmatprep.subr.bf16.mxu0 %v651_v33  ;;  %1656 = vmatprep.subr.bf16.mxu1 %v653_v34  ;;  %v763_v33 = vld [vmem:[#allocation3 + $0x528] sm:$0xff]  ;;  %v765_v34 = vld [vmem:[#allocation3 + $0x538] sm:$0xff] }
 0x1ea   :  { %1493 = vmatpush1.bf16.msra.mxu0 %v650_v35  ;;  %1657 = vmatpush1.bf16.msra.mxu1 %v652_v37  ;;  %v764_v35 = vld [vmem:[#allocation3 + $0x530] sm:$0xff]  ;;  %v771_v37 = vld [vmem:[#allocation3 + $0x568] sm:$0xff] }
 0x1eb   :  { %1494 = vmatprep.subr.bf16.mxu0 %v659_v38  ;;  %1658 = vmatprep.subr.bf16.mxu1 %v661_v39  ;;  %v773_v38 = vld [vmem:[#allocation3 + $0x578] sm:$0xff]  ;;  %v770_v39 = vld [vmem:[#allocation3 + $0x560] sm:$0xff] }
 0x1ee   :  { %1495 = vmatpush1.bf16.msra.mxu0 %v658_v40  ;;  %1659 = vmatpush1.bf16.msra.mxu1 %v660_v42  ;;  %v772_v40 = vld [vmem:[#allocation3 + $0x570] sm:$0xff]  ;;  %v779_v42 = vld [vmem:[#allocation3 + $0x5a8] sm:$0xff] }
 0x1ef   :  { %1496 = vmatprep.subr.bf16.mxu0 %v667_v43  ;;  %1660 = vmatprep.subr.bf16.mxu1 %v669_v21  ;;  %v781_v43 = vld [vmem:[#allocation3 + $0x5b8] sm:$0xff]  ;;  %v778_v21 = vld [vmem:[#allocation3 + $0x5a0] sm:$0xff] }
 0x1f2   :  { %1497 = vmatpush1.bf16.msra.mxu0 %v666_v44  ;;  %1661 = vmatpush1.bf16.msra.mxu1 %v668_v45  ;;  %v780_v44 = vld [vmem:[#allocation3 + $0x5b0] sm:$0xff]  ;;  %v787_v45 = vld [vmem:[#allocation3 + $0x5e8] sm:$0xff] }
 0x1f3   :  { %1498 = vmatprep.subr.bf16.mxu0 %v675_v47  ;;  %1662 = vmatprep.subr.bf16.mxu1 %v677_v48  ;;  %v789_v47 = vld [vmem:[#allocation3 + $0x5f8] sm:$0xff]  ;;  %v786_v48 = vld [vmem:[#allocation3 + $0x5e0] sm:$0xff] }
 0x1f6   :  { %1499 = vmatpush1.bf16.msra.mxu0 %v674_v49  ;;  %1663 = vmatpush1.bf16.msra.mxu1 %v676_v50  ;;  %v788_v49 = vld [vmem:[#allocation3 + $0x5f0] sm:$0xff]  ;;  %v795_v50 = vld [vmem:[#allocation3 + $0x628] sm:$0xff] }
 0x1f7   :  { %1500 = vmatprep.subr.bf16.mxu0 %v683_v31  ;;  %1664 = vmatprep.subr.bf16.mxu1 %v685_v52  ;;  %v797_v31 = vld [vmem:[#allocation3 + $0x638] sm:$0xff]  ;;  %v794_v52 = vld [vmem:[#allocation3 + $0x620] sm:$0xff] }
 0x1fa   :  { %1501 = vmatpush1.bf16.msra.mxu0 %v682_v54  ;;  %1665 = vmatpush1.bf16.msra.mxu1 %v684_v58  ;;  %v796_v54 = vld [vmem:[#allocation3 + $0x630] sm:$0xff]  ;;  %v803_v58 = vld [vmem:[#allocation3 + $0x668] sm:$0xff] }
 0x1fb   :  { %1502 = vmatprep.subr.bf16.mxu0 %v691_v63  ;;  %1666 = vmatprep.subr.bf16.mxu1 %v693_v0  ;;  %v805_v63 = vld [vmem:[#allocation3 + $0x678] sm:$0xff]  ;;  %v802_v0 = vld [vmem:[#allocation3 + $0x660] sm:$0xff] }
 0x1fe   :  { %1503 = vmatpush1.bf16.msra.mxu0 %v690_v22  ;;  %1667 = vmatpush1.bf16.msra.mxu1 %v692_v3  ;;  %v804_v22 = vld [vmem:[#allocation3 + $0x670] sm:$0xff]  ;;  %v811_v3 = vld [vmem:[#allocation3 + $0x6a8] sm:$0xff] }
 0x1ff   :  { %1504 = vmatprep.subr.bf16.mxu0 %v699_v4  ;;  %1668 = vmatprep.subr.bf16.mxu1 %v701_v55  ;;  %v813_v4 = vld [vmem:[#allocation3 + $0x6b8] sm:$0xff]  ;;  %v810_v55 = vld [vmem:[#allocation3 + $0x6a0] sm:$0xff] }
 0x202   :  { %1505 = vmatpush1.bf16.msra.mxu0 %v698_v56  ;;  %1669 = vmatpush1.bf16.msra.mxu1 %v700_v23  ;;  %v812_v56 = vld [vmem:[#allocation3 + $0x6b0] sm:$0xff]  ;;  %v819_v23 = vld [vmem:[#allocation3 + $0x6e8] sm:$0xff] }
 0x203   :  { %1506 = vmatprep.subr.bf16.mxu0 %v707_v57  ;;  %1670 = vmatprep.subr.bf16.mxu1 %v709_v9  ;;  %v821_v57 = vld [vmem:[#allocation3 + $0x6f8] sm:$0xff]  ;;  %v818_v9 = vld [vmem:[#allocation3 + $0x6e0] sm:$0xff] }
 0x206   :  { %1507 = vmatpush1.bf16.msra.mxu0 %v706_v60  ;;  %1671 = vmatpush1.bf16.msra.mxu1 %v708_v61  ;;  %v820_v60 = vld [vmem:[#allocation3 + $0x6f0] sm:$0xff]  ;;  %v827_v61 = vld [vmem:[#allocation3 + $0x728] sm:$0xff] }
 0x207   :  { %1508 = vmatprep.subr.bf16.mxu0 %v715_v62  ;;  %1672 = vmatprep.subr.bf16.mxu1 %v717_v5  ;;  %v829_v62 = vld [vmem:[#allocation3 + $0x738] sm:$0xff]  ;;  %v826_v5 = vld [vmem:[#allocation3 + $0x720] sm:$0xff] }
 0x20a   :  { %1509 = vmatpush1.bf16.msra.mxu0 %v714_v7  ;;  %1673 = vmatpush1.bf16.msra.mxu1 %v716_v8  ;;  %v828_v7 = vld [vmem:[#allocation3 + $0x730] sm:$0xff]  ;;  %v835_v8 = vld [vmem:[#allocation3 + $0x768] sm:$0xff] }
 0x20b   :  { %1510 = vmatprep.subr.bf16.mxu0 %v723_v10  ;;  %1674 = vmatprep.subr.bf16.mxu1 %v725_v11  ;;  %v837_v10 = vld [vmem:[#allocation3 + $0x778] sm:$0xff]  ;;  %v834_v11 = vld [vmem:[#allocation3 + $0x760] sm:$0xff] }
 0x20e   :  { %1511 = vmatpush1.bf16.msra.mxu0 %v722_v12  ;;  %1675 = vmatpush1.bf16.msra.mxu1 %v724_v53  ;;  %v836_v12 = vld [vmem:[#allocation3 + $0x770] sm:$0xff]  ;;  %v843_v53 = vld [vmem:[#allocation3 + $0x7a8] sm:$0xff] }
 0x20f   :  { %1521 = vmatprep.subr.bf16.mxu0 %v731_v13  ;;  %1685 = vmatprep.subr.bf16.mxu1 %v733_v14  ;;  %v845_v13 = vld [vmem:[#allocation3 + $0x7b8] sm:$0xff]  ;;  %v842_v14 = vld [vmem:[#allocation3 + $0x7a0] sm:$0xff] }
 0x211   :  { %1513 = vmatmul.mubr.bf16.vlgmr.msra.gmra.mrb[4].mxu0 %v5171_v36  ;;  %1677 = vmatmul.mubr.bf16.vlgmr.msra.gmra.mrb[4].mxu1 %v5171_v36  ;;  %v757_v36 = vld [vmem:[#allocation3 + $0x4f8] sm:$0xff] }
 0x212   :  { %1522 = vmatpush1.bf16.msra.mxu0 %v730_v15  ;;  %1686 = vmatpush1.bf16.msra.mxu1 %v732_v17  ;;  %v844_v15 = vld [vmem:[#allocation3 + $0x7b0] sm:$0xff]  ;;  %v851_v17 = vld [vmem:[#allocation3 + $0x7e8] sm:$0xff] }
 0x213   :  { %1523 = vmatprep.subr.bf16.mxu0 %v739_v18  ;;  %1687 = vmatprep.subr.bf16.mxu1 %v741_v19  ;;  %v853_v18 = vld [vmem:[#allocation3 + $0x7f8] sm:$0xff]  ;;  %v850_v19 = vld [vmem:[#allocation3 + $0x7e0] sm:$0xff] }
 0x214   :  { %1553 = vmatprep.mubr.bf16.mxu0 %v5173_v41  ;;  %1717 = vmatprep.mubr.bf16.mxu1 %v5173_v41  ;;  %v762_v41 = vld [vmem:[#allocation3 + $0x520] sm:$0xff] }
 0x216   :  { %1524 = vmatpush1.bf16.msra.mxu0 %v738_v20  ;;  %1688 = vmatpush1.bf16.msra.mxu1 %v740_v24  ;;  %v852_v20 = vld [vmem:[#allocation3 + $0x7f0] sm:$0xff]  ;;  %v859_v24 = vld [vmem:[#allocation3 + $0x828] sm:$0xff] }
 0x217   :  { %1525 = vmatprep.subr.bf16.mxu0 %v747_v25  ;;  %1689 = vmatprep.subr.bf16.mxu1 %v749_v28  ;;  %v861_v25 = vld [vmem:[#allocation3 + $0x838] sm:$0xff]  ;;  %v858_v28 = vld [vmem:[#allocation3 + $0x820] sm:$0xff] }
 0x21a   :  { %1526 = vmatpush1.bf16.msra.mxu0 %v746_v26  ;;  %1690 = vmatpush1.bf16.msra.mxu1 %v748_v27  ;;  %v860_v26 = vld [vmem:[#allocation3 + $0x830] sm:$0xff]  ;;  %v867_v27 = vld [vmem:[#allocation3 + $0x868] sm:$0xff] }
 0x21b   :  { %1527 = vmatprep.subr.bf16.mxu0 %v755_v29  ;;  %1691 = vmatprep.subr.bf16.mxu1 %v757_v36  ;;  %v869_v29 = vld [vmem:[#allocation3 + $0x878] sm:$0xff]  ;;  %v866_v36 = vld [vmem:[#allocation3 + $0x860] sm:$0xff] }
 0x21e   :  { %1528 = vmatpush1.bf16.msra.mxu0 %v754_v30  ;;  %1692 = vmatpush1.bf16.msra.mxu1 %v756_v32  ;;  %v868_v30 = vld [vmem:[#allocation3 + $0x870] sm:$0xff]  ;;  %v875_v32 = vld [vmem:[#allocation3 + $0x8a8] sm:$0xff] }
 0x21f   :  { %1529 = vmatprep.subr.bf16.mxu0 %v763_v33  ;;  %1693 = vmatprep.subr.bf16.mxu1 %v765_v34  ;;  %v877_v33 = vld [vmem:[#allocation3 + $0x8b8] sm:$0xff]  ;;  %v874_v34 = vld [vmem:[#allocation3 + $0x8a0] sm:$0xff] }
 0x222   :  { %1530 = vmatpush1.bf16.msra.mxu0 %v762_v41  ;;  %1694 = vmatpush1.bf16.msra.mxu1 %v764_v35  ;;  %v876_v41 = vld [vmem:[#allocation3 + $0x8b0] sm:$0xff]  ;;  %v883_v35 = vld [vmem:[#allocation3 + $0x8e8] sm:$0xff] }
 0x223   :  { %1531 = vmatprep.subr.bf16.mxu0 %v771_v37  ;;  %1695 = vmatprep.subr.bf16.mxu1 %v773_v38  ;;  %v882_v37 = vld [vmem:[#allocation3 + $0x8e0] sm:$0xff]  ;;  %v884_v38 = vld [vmem:[#allocation3 + $0x8f0] sm:$0xff] }
 0x226   :  { %1532 = vmatpush1.bf16.msra.mxu0 %v770_v39  ;;  %1696 = vmatpush1.bf16.msra.mxu1 %v772_v40  ;;  %v891_v39 = vld [vmem:[#allocation3 + $0x928] sm:$0xff]  ;;  %v893_v40 = vld [vmem:[#allocation3 + $0x938] sm:$0xff] }
 0x227   :  { %1533 = vmatprep.subr.bf16.mxu0 %v779_v42  ;;  %1697 = vmatprep.subr.bf16.mxu1 %v781_v43  ;;  %v892_v42 = vld [vmem:[#allocation3 + $0x930] sm:$0xff]  ;;  %v899_v43 = vld [vmem:[#allocation3 + $0x968] sm:$0xff] }
 0x22a   :  { %1534 = vmatpush1.bf16.msra.mxu0 %v778_v21  ;;  %1698 = vmatpush1.bf16.msra.mxu1 %v780_v44  ;;  %v901_v21 = vld [vmem:[#allocation3 + $0x978] sm:$0xff]  ;;  %v898_v44 = vld [vmem:[#allocation3 + $0x960] sm:$0xff] }
 0x22b   :  { %1535 = vmatprep.subr.bf16.mxu0 %v787_v45  ;;  %1699 = vmatprep.subr.bf16.mxu1 %v789_v47  ;;  %v900_v45 = vld [vmem:[#allocation3 + $0x970] sm:$0xff]  ;;  %v907_v47 = vld [vmem:[#allocation3 + $0x9a8] sm:$0xff] }
 0x22e   :  { %1536 = vmatpush1.bf16.msra.mxu0 %v786_v48  ;;  %1700 = vmatpush1.bf16.msra.mxu1 %v788_v49  ;;  %v909_v48 = vld [vmem:[#allocation3 + $0x9b8] sm:$0xff]  ;;  %v906_v49 = vld [vmem:[#allocation3 + $0x9a0] sm:$0xff] }
 0x22f   :  { %1537 = vmatprep.subr.bf16.mxu0 %v795_v50  ;;  %1701 = vmatprep.subr.bf16.mxu1 %v797_v31  ;;  %v908_v50 = vld [vmem:[#allocation3 + $0x9b0] sm:$0xff]  ;;  %v915_v31 = vld [vmem:[#allocation3 + $0x9e8] sm:$0xff] }
 0x232   :  { %1538 = vmatpush1.bf16.msra.mxu0 %v794_v52  ;;  %1702 = vmatpush1.bf16.msra.mxu1 %v796_v54  ;;  %v917_v52 = vld [vmem:[#allocation3 + $0x9f8] sm:$0xff]  ;;  %v914_v54 = vld [vmem:[#allocation3 + $0x9e0] sm:$0xff] }
 0x233   :  { %1539 = vmatprep.subr.bf16.mxu0 %v803_v58  ;;  %1703 = vmatprep.subr.bf16.mxu1 %v805_v63  ;;  %v916_v58 = vld [vmem:[#allocation3 + $0x9f0] sm:$0xff]  ;;  %v923_v63 = vld [vmem:[#allocation3 + $0xa28] sm:$0xff] }
 0x236   :  { %1540 = vmatpush1.bf16.msra.mxu0 %v802_v0  ;;  %1704 = vmatpush1.bf16.msra.mxu1 %v804_v22  ;;  %v925_v0 = vld [vmem:[#allocation3 + $0xa38] sm:$0xff]  ;;  %v922_v22 = vld [vmem:[#allocation3 + $0xa20] sm:$0xff] }
 0x237   :  { %1541 = vmatprep.subr.bf16.mxu0 %v811_v3  ;;  %1705 = vmatprep.subr.bf16.mxu1 %v813_v4  ;;  %v924_v3 = vld [vmem:[#allocation3 + $0xa30] sm:$0xff]  ;;  %v931_v4 = vld [vmem:[#allocation3 + $0xa68] sm:$0xff] }
 0x23a   :  { %1542 = vmatpush1.bf16.msra.mxu0 %v810_v55  ;;  %1706 = vmatpush1.bf16.msra.mxu1 %v812_v56  ;;  %v933_v55 = vld [vmem:[#allocation3 + $0xa78] sm:$0xff]  ;;  %v930_v56 = vld [vmem:[#allocation3 + $0xa60] sm:$0xff] }
 0x23b   :  { %1543 = vmatprep.subr.bf16.mxu0 %v819_v23  ;;  %1707 = vmatprep.subr.bf16.mxu1 %v821_v57  ;;  %v932_v23 = vld [vmem:[#allocation3 + $0xa70] sm:$0xff]  ;;  %v939_v57 = vld [vmem:[#allocation3 + $0xaa8] sm:$0xff] }
 0x23e   :  { %1544 = vmatpush1.bf16.msra.mxu0 %v818_v9  ;;  %1708 = vmatpush1.bf16.msra.mxu1 %v820_v60  ;;  %v941_v9 = vld [vmem:[#allocation3 + $0xab8] sm:$0xff]  ;;  %v938_v60 = vld [vmem:[#allocation3 + $0xaa0] sm:$0xff] }
 0x23f   :  { %1545 = vmatprep.subr.bf16.mxu0 %v827_v61  ;;  %1709 = vmatprep.subr.bf16.mxu1 %v829_v62  ;;  %v940_v61 = vld [vmem:[#allocation3 + $0xab0] sm:$0xff]  ;;  %v947_v62 = vld [vmem:[#allocation3 + $0xae8] sm:$0xff] }
 0x242   :  { %1546 = vmatpush1.bf16.msra.mxu0 %v826_v5  ;;  %1710 = vmatpush1.bf16.msra.mxu1 %v828_v7  ;;  %v949_v5 = vld [vmem:[#allocation3 + $0xaf8] sm:$0xff]  ;;  %v946_v7 = vld [vmem:[#allocation3 + $0xae0] sm:$0xff] }
 0x243   :  { %1547 = vmatprep.subr.bf16.mxu0 %v835_v8  ;;  %1711 = vmatprep.subr.bf16.mxu1 %v837_v10  ;;  %v948_v8 = vld [vmem:[#allocation3 + $0xaf0] sm:$0xff]  ;;  %v955_v10 = vld [vmem:[#allocation3 + $0xb28] sm:$0xff] }
 0x246   :  { %1548 = vmatpush1.bf16.msra.mxu0 %v834_v11  ;;  %1712 = vmatpush1.bf16.msra.mxu1 %v836_v12  ;;  %v957_v11 = vld [vmem:[#allocation3 + $0xb38] sm:$0xff]  ;;  %v954_v12 = vld [vmem:[#allocation3 + $0xb20] sm:$0xff] }
 0x247   :  { %1549 = vmatprep.subr.bf16.mxu0 %v843_v53  ;;  %1713 = vmatprep.subr.bf16.mxu1 %v845_v13  ;;  %v956_v53 = vld [vmem:[#allocation3 + $0xb30] sm:$0xff]  ;;  %v963_v13 = vld [vmem:[#allocation3 + $0xb68] sm:$0xff] }
 0x24a   :  { %1550 = vmatpush1.bf16.msra.mxu0 %v842_v14  ;;  %1714 = vmatpush1.bf16.msra.mxu1 %v844_v15  ;;  %v965_v14 = vld [vmem:[#allocation3 + $0xb78] sm:$0xff]  ;;  %v962_v15 = vld [vmem:[#allocation3 + $0xb60] sm:$0xff] }
 0x24b   :  { %1551 = vmatprep.subr.bf16.mxu0 %v851_v17  ;;  %1715 = vmatprep.subr.bf16.mxu1 %v853_v18  ;;  %v964_v17 = vld [vmem:[#allocation3 + $0xb70] sm:$0xff]  ;;  %v971_v18 = vld [vmem:[#allocation3 + $0xba8] sm:$0xff] }
 0x24e   :  { %1552 = vmatpush1.bf16.msra.mxu0 %v850_v19  ;;  %1716 = vmatpush1.bf16.msra.mxu1 %v852_v20  ;;  %v973_v19 = vld [vmem:[#allocation3 + $0xbb8] sm:$0xff]  ;;  %v970_v20 = vld [vmem:[#allocation3 + $0xba0] sm:$0xff] }
 0x24f   :  { %1562 = vmatprep.subr.bf16.mxu0 %v859_v24  ;;  %1726 = vmatprep.subr.bf16.mxu1 %v861_v25  ;;  %v972_v24 = vld [vmem:[#allocation3 + $0xbb0] sm:$0xff]  ;;  %v979_v25 = vld [vmem:[#allocation3 + $0xbe8] sm:$0xff] }
 0x251   :  { %1554 = vmatmul.mubr.bf16.vlgmr.msra.gmra.mrb[4].mxu0 %v5190_v46  ;;  %1718 = vmatmul.mubr.bf16.vlgmr.msra.gmra.mrb[4].mxu1 %v5190_v46  ;;  %v885_v46 = vld [vmem:[#allocation3 + $0x8f8] sm:$0xff] }
 0x252   :  { %1563 = vmatpush1.bf16.msra.mxu0 %v858_v28  ;;  %1727 = vmatpush1.bf16.msra.mxu1 %v860_v26  ;;  %v981_v28 = vld [vmem:[#allocation3 + $0xbf8] sm:$0xff]  ;;  %v978_v26 = vld [vmem:[#allocation3 + $0xbe0] sm:$0xff] }
 0x253   :  { %1564 = vmatprep.subr.bf16.mxu0 %v867_v27  ;;  %1728 = vmatprep.subr.bf16.mxu1 %v869_v29  ;;  %v980_v27 = vld [vmem:[#allocation3 + $0xbf0] sm:$0xff]  ;;  %v987_v29 = vld [vmem:[#allocation3 + $0xc28] sm:$0xff] }
 0x254   :  { %1594 = vmatprep.mubr.bf16.mxu0 %v5192_v51  ;;  %1758 = vmatprep.mubr.bf16.mxu1 %v5192_v51  ;;  %v890_v51 = vld [vmem:[#allocation3 + $0x920] sm:$0xff] }
 0x256   :  { %1565 = vmatpush1.bf16.msra.mxu0 %v866_v36  ;;  %1729 = vmatpush1.bf16.msra.mxu1 %v868_v30  ;;  %v989_v36 = vld [vmem:[#allocation3 + $0xc38] sm:$0xff]  ;;  %v986_v30 = vld [vmem:[#allocation3 + $0xc20] sm:$0xff] }
 0x257   :  { %1566 = vmatprep.subr.bf16.mxu0 %v875_v32  ;;  %1730 = vmatprep.subr.bf16.mxu1 %v877_v33  ;;  %v988_v32 = vld [vmem:[#allocation3 + $0xc30] sm:$0xff]  ;;  %v995_v33 = vld [vmem:[#allocation3 + $0xc68] sm:$0xff] }
 0x25a   :  { %1567 = vmatpush1.bf16.msra.mxu0 %v874_v34  ;;  %1731 = vmatpush1.bf16.msra.mxu1 %v876_v41  ;;  %v997_v34 = vld [vmem:[#allocation3 + $0xc78] sm:$0xff]  ;;  %v994_v41 = vld [vmem:[#allocation3 + $0xc60] sm:$0xff] }
 0x25b   :  { %1568 = vmatprep.subr.bf16.mxu0 %v883_v35  ;;  %1732 = vmatprep.subr.bf16.mxu1 %v885_v46  ;;  %v996_v35 = vld [vmem:[#allocation3 + $0xc70] sm:$0xff]  ;;  %v1003_v46 = vld [vmem:[#allocation3 + $0xca8] sm:$0xff] }
 0x25e   :  { %1569 = vmatpush1.bf16.msra.mxu0 %v882_v37  ;;  %1733 = vmatpush1.bf16.msra.mxu1 %v884_v38  ;;  %v1005_v37 = vld [vmem:[#allocation3 + $0xcb8] sm:$0xff]  ;;  %v1002_v38 = vld [vmem:[#allocation3 + $0xca0] sm:$0xff] }
 0x25f   :  { %1570 = vmatprep.subr.bf16.mxu0 %v891_v39  ;;  %1734 = vmatprep.subr.bf16.mxu1 %v893_v40  ;;  %v1004_v39 = vld [vmem:[#allocation3 + $0xcb0] sm:$0xff]  ;;  %v1011_v40 = vld [vmem:[#allocation3 + $0xce8] sm:$0xff] }
 0x262   :  { %1571 = vmatpush1.bf16.msra.mxu0 %v890_v51  ;;  %1735 = vmatpush1.bf16.msra.mxu1 %v892_v42  ;;  %v1010_v51 = vld [vmem:[#allocation3 + $0xce0] sm:$0xff]  ;;  %v1012_v42 = vld [vmem:[#allocation3 + $0xcf0] sm:$0xff] }
 0x263   :  { %1572 = vmatprep.subr.bf16.mxu0 %v899_v43  ;;  %1736 = vmatprep.subr.bf16.mxu1 %v901_v21  ;;  %v1019_v43 = vld [vmem:[#allocation3 + $0xd28] sm:$0xff]  ;;  %v1021_v21 = vld [vmem:[#allocation3 + $0xd38] sm:$0xff] }
 0x266   :  { %1573 = vmatpush1.bf16.msra.mxu0 %v898_v44  ;;  %1737 = vmatpush1.bf16.msra.mxu1 %v900_v45  ;;  %v1020_v44 = vld [vmem:[#allocation3 + $0xd30] sm:$0xff]  ;;  %v1027_v45 = vld [vmem:[#allocation3 + $0xd68] sm:$0xff] }
 0x267   :  { %1574 = vmatprep.subr.bf16.mxu0 %v907_v47  ;;  %1738 = vmatprep.subr.bf16.mxu1 %v909_v48  ;;  %v1029_v47 = vld [vmem:[#allocation3 + $0xd78] sm:$0xff]  ;;  %v1026_v48 = vld [vmem:[#allocation3 + $0xd60] sm:$0xff] }
 0x26a   :  { %1575 = vmatpush1.bf16.msra.mxu0 %v906_v49  ;;  %1739 = vmatpush1.bf16.msra.mxu1 %v908_v50  ;;  %v1028_v49 = vld [vmem:[#allocation3 + $0xd70] sm:$0xff] }
 0x26b   :  { %1576 = vmatprep.subr.bf16.mxu0 %v915_v31  ;;  %1740 = vmatprep.subr.bf16.mxu1 %v917_v52  ;;  %v1035_v52 = vld [vmem:[#allocation3 + $0xda8] sm:$0xff] }
 0x26e   :  { %1577 = vmatpush1.bf16.msra.mxu0 %v914_v54  ;;  %1741 = vmatpush1.bf16.msra.mxu1 %v916_v58  ;;  %v1037_v54 = vld [vmem:[#allocation3 + $0xdb8] sm:$0xff] }
 0x26f   :  { %1578 = vmatprep.subr.bf16.mxu0 %v923_v63  ;;  %1742 = vmatprep.subr.bf16.mxu1 %v925_v0 }
 0x272   :  { %1579 = vmatpush1.bf16.msra.mxu0 %v922_v22  ;;  %1743 = vmatpush1.bf16.msra.mxu1 %v924_v3 }
 0x273   :  { %1580 = vmatprep.subr.bf16.mxu0 %v931_v4  ;;  %1744 = vmatprep.subr.bf16.mxu1 %v933_v55  ;;  %v1034_v55 = vld [vmem:[#allocation3 + $0xda0] sm:$0xff] }
 0x276   :  { %1581 = vmatpush1.bf16.msra.mxu0 %v930_v56  ;;  %1745 = vmatpush1.bf16.msra.mxu1 %v932_v23  ;;  %v1036_v56 = vld [vmem:[#allocation3 + $0xdb0] sm:$0xff]  ;;  %v1043_v23 = vld [vmem:[#allocation3 + $0xde8] sm:$0xff] }
 0x277   :  { %1582 = vmatprep.subr.bf16.mxu0 %v939_v57  ;;  %1746 = vmatprep.subr.bf16.mxu1 %v941_v9  ;;  %v1045_v57 = vld [vmem:[#allocation3 + $0xdf8] sm:$0xff]  ;;  %v1042_v9 = vld [vmem:[#allocation3 + $0xde0] sm:$0xff] }
 0x27a   :  { %1583 = vmatpush1.bf16.msra.mxu0 %v938_v60  ;;  %1747 = vmatpush1.bf16.msra.mxu1 %v940_v61  ;;  %v1044_v60 = vld [vmem:[#allocation3 + $0xdf0] sm:$0xff]  ;;  %v1051_v61 = vld [vmem:[#allocation3 + $0xe28] sm:$0xff] }
 0x27b   :  { %1584 = vmatprep.subr.bf16.mxu0 %v947_v62  ;;  %1748 = vmatprep.subr.bf16.mxu1 %v949_v5  ;;  %v1053_v62 = vld [vmem:[#allocation3 + $0xe38] sm:$0xff]  ;;  %v1050_v5 = vld [vmem:[#allocation3 + $0xe20] sm:$0xff] }
 0x27e   :  { %1585 = vmatpush1.bf16.msra.mxu0 %v946_v7  ;;  %1749 = vmatpush1.bf16.msra.mxu1 %v948_v8  ;;  %v1052_v7 = vld [vmem:[#allocation3 + $0xe30] sm:$0xff]  ;;  %v1059_v8 = vld [vmem:[#allocation3 + $0xe68] sm:$0xff] }
 0x27f   :  { %1586 = vmatprep.subr.bf16.mxu0 %v955_v10  ;;  %1750 = vmatprep.subr.bf16.mxu1 %v957_v11  ;;  %v1061_v10 = vld [vmem:[#allocation3 + $0xe78] sm:$0xff]  ;;  %v1058_v11 = vld [vmem:[#allocation3 + $0xe60] sm:$0xff] }
 0x282   :  { %1587 = vmatpush1.bf16.msra.mxu0 %v954_v12  ;;  %1751 = vmatpush1.bf16.msra.mxu1 %v956_v53  ;;  %v1060_v12 = vld [vmem:[#allocation3 + $0xe70] sm:$0xff]  ;;  %v1067_v53 = vld [vmem:[#allocation3 + $0xea8] sm:$0xff] }
 0x283   :  { %1588 = vmatprep.subr.bf16.mxu0 %v963_v13  ;;  %1752 = vmatprep.subr.bf16.mxu1 %v965_v14  ;;  %v1069_v13 = vld [vmem:[#allocation3 + $0xeb8] sm:$0xff]  ;;  %v1066_v14 = vld [vmem:[#allocation3 + $0xea0] sm:$0xff] }
 0x286   :  { %1589 = vmatpush1.bf16.msra.mxu0 %v962_v15  ;;  %1753 = vmatpush1.bf16.msra.mxu1 %v964_v17  ;;  %v1068_v15 = vld [vmem:[#allocation3 + $0xeb0] sm:$0xff]  ;;  %v1075_v17 = vld [vmem:[#allocation3 + $0xee8] sm:$0xff] }
 0x287   :  { %1590 = vmatprep.subr.bf16.mxu0 %v971_v18  ;;  %1754 = vmatprep.subr.bf16.mxu1 %v973_v19  ;;  %v1077_v18 = vld [vmem:[#allocation3 + $0xef8] sm:$0xff]  ;;  %v1074_v19 = vld [vmem:[#allocation3 + $0xee0] sm:$0xff] }
 0x28a   :  { %1591 = vmatpush1.bf16.msra.mxu0 %v970_v20  ;;  %1755 = vmatpush1.bf16.msra.mxu1 %v972_v24  ;;  %v1076_v20 = vld [vmem:[#allocation3 + $0xef0] sm:$0xff]  ;;  %v1083_v24 = vld [vmem:[#allocation3 + $0xf28] sm:$0xff] }
 0x28b   :  { %1592 = vmatprep.subr.bf16.mxu0 %v979_v25  ;;  %1756 = vmatprep.subr.bf16.mxu1 %v981_v28  ;;  %v1085_v25 = vld [vmem:[#allocation3 + $0xf38] sm:$0xff]  ;;  %v1082_v28 = vld [vmem:[#allocation3 + $0xf20] sm:$0xff] }
 0x28e   :  { %1593 = vmatpush1.bf16.msra.mxu0 %v978_v26  ;;  %1757 = vmatpush1.bf16.msra.mxu1 %v980_v27  ;;  %v1084_v26 = vld [vmem:[#allocation3 + $0xf30] sm:$0xff]  ;;  %v1091_v27 = vld [vmem:[#allocation3 + $0xf68] sm:$0xff] }
 0x28f   :  { %1603 = vmatprep.subr.bf16.mxu0 %v987_v29  ;;  %1767 = vmatprep.subr.bf16.mxu1 %v989_v36  ;;  %v1093_v29 = vld [vmem:[#allocation3 + $0xf78] sm:$0xff] }
 0x290   :  { %v2336_v36 = vld [vmem:[#allocation16] sm:$0xff] }
 0x291   :  { %1595 = vmatmul.mubr.bf16.vlgmr.msra.gmra.mrb[4].mxu0 %v5207_v2  ;;  %1759 = vmatmul.mubr.bf16.vlgmr.msra.gmra.mrb[4].mxu1 %v5207_v2  ;;  %v1013_v2 = vld [vmem:[#allocation3 + $0xcf8] sm:$0xff] }
 0x292   :  { %1604 = vmatpush1.bf16.msra.mxu0 %v986_v30  ;;  %1768 = vmatpush1.bf16.msra.mxu1 %v988_v32  ;;  %v1090_v30 = vld [vmem:[#allocation3 + $0xf60] sm:$0xff]  ;;  %v1092_v32 = vld [vmem:[#allocation3 + $0xf70] sm:$0xff] }
 0x293   :  { %1605 = vmatprep.subr.bf16.mxu0 %v995_v33  ;;  %1769 = vmatprep.subr.bf16.mxu1 %v997_v34  ;;  %v1099_v33 = vld [vmem:[#allocation3 + $0xfa8] sm:$0xff]  ;;  %v1101_v34 = vld [vmem:[#allocation3 + $0xfb8] sm:$0xff] }
 0x294   :  { %1635 = vmatprep.mubr.bf16.mxu0 %v5209_v16  ;;  %1799 = vmatprep.mubr.bf16.mxu1 %v5209_v16  ;;  %v1018_v16 = vld [vmem:[#allocation3 + $0xd20] sm:$0xff] }
 0x296   :  { %1606 = vmatpush1.bf16.msra.mxu0 %v994_v41  ;;  %1770 = vmatpush1.bf16.msra.mxu1 %v996_v35  ;;  %v2338_v41 = vcombine.high %v2336_v36, %v2336_v36  ;;  %v1098_v35 = vld [vmem:[#allocation3 + $0xfa0] sm:$0xff] }
 0x297   :  { %1607 = vmatprep.subr.bf16.mxu0 %v1003_v46  ;;  %1771 = vmatprep.subr.bf16.mxu1 %v1005_v37  ;;  %v1100_v46 = vld [vmem:[#allocation3 + $0xfb0] sm:$0xff]  ;;  %v1107_v37 = vld [vmem:[#allocation3 + $0xfe8] sm:$0xff] }
 0x29a   :  { %1608 = vmatpush1.bf16.msra.mxu0 %v1002_v38  ;;  %1772 = vmatpush1.bf16.msra.mxu1 %v1004_v39  ;;  %v1109_v38 = vld [vmem:[#allocation3 + $0xff8] sm:$0xff]  ;;  %v5244_v39 = vrot.slane %v2336_v36, %v5138_v6  ;;  %v2572_v36 = vld [vmem:[#allocation6 + $0x688] sm:$0xff] }
 0x29b   :  { %1609 = vmatprep.subr.bf16.mxu0 %v1011_v40  ;;  %1773 = vmatprep.subr.bf16.mxu1 %v1013_v2  ;;  %v5247_v40 = vrot.slane %v2338_v41, %v5138_v6  ;;  %v1106_v2 = vld [vmem:[#allocation3 + $0xfe0] sm:$0xff]  ;;  %v2363_v6 = vld [vmem:[#allocation6] sm:$0xff] }
 0x29c   :  { %v2451_v41 = vld [vmem:[#allocation6 + $0x2c0] sm:$0xff] }
 0x29e   :  { %1610 = vmatpush1.bf16.msra.mxu0 %v1010_v51  ;;  %1774 = vmatpush1.bf16.msra.mxu1 %v1012_v42  ;;  %v1108_v51 = vld [vmem:[#allocation3 + $0xff0] sm:$0xff] }
 0x29f   :  { %1611 = vmatprep.subr.bf16.mxu0 %v1019_v43  ;;  %1775 = vmatprep.subr.bf16.mxu1 %v1021_v21  ;;  %v2364_v42 = vld [vmem:[#allocation6 + $0x8] sm:$0xff]  ;;  %v2353_v21 = vcombine.high %v5244_v39, %v5244_v39 }
 0x2a0   :  { %v2492_v43 = vld [vmem:[#allocation6 + $0x408] sm:$0xff] }
 0x2a2   :  { %1612 = vmatpush1.bf16.msra.mxu0 %v1018_v16  ;;  %1776 = vmatpush1.bf16.msra.mxu1 %v1020_v44  ;;  %v2354_v16 = vcombine.high %v5247_v40, %v5247_v40  ;;  %v2491_v44 = vld [vmem:[#allocation6 + $0x400] sm:$0xff] }
 0x2a3   :  { %1613 = vmatprep.subr.bf16.mxu0 %v1027_v45  ;;  %1777 = vmatprep.subr.bf16.mxu1 %v1029_v47  ;;  %v2372_v45 = vld [vmem:[#allocation6 + $0x48] sm:$0xff] }
 0x2a4   :  { %v5235_v50 = vpop.f32.mrb[0].mxu0  ;;  %v5237_v31 = vpop.f32.mrb[0].mxu1  ;;  %v2500_v47 = vld [vmem:[#allocation6 + $0x448] sm:$0xff] }
 0x2a5   :  { %v5239_v58 = vpop.f32.mrb[1].mxu0  ;;  %v5241_v63 = vpop.f32.mrb[1].mxu1 }
 0x2a6   :  { %v1313_v0 = vpop.f32.mrb[2].mxu0  ;;  %v1477_v22 = vpop.f32.mrb[2].mxu1  ;;  %1614 = vmatpush1.bf16.msra.mxu0 %v1026_v48  ;;  %1778 = vmatpush1.bf16.msra.mxu1 %v1028_v49  ;;  %v5253_v48 = vpack.c.bf16 %v2353_v21, %v2353_v21  ;;  %v5255_v49 = vpack.c.bf16 %v2354_v16, %v2354_v16  ;;  %v2595_v21 = vld [vmem:[#allocation6 + $0x740] sm:$0xff]  ;;  %v2476_v16 = vld [vmem:[#allocation6 + $0x388] sm:$0xff] }
 0x2a7   :  { %v1314_v3 = vpop.f32.mrb[3].mxu0  ;;  %v1478_v4 = vpop.f32.mrb[3].mxu1  ;;  %1615 = vmatprep.subr.bf16.mxu0 %v1035_v52  ;;  %1779 = vmatprep.subr.bf16.mxu1 %v1037_v54  ;;  %v2371_v52 = vld [vmem:[#allocation6 + $0x40] sm:$0xff]  ;;  %v2380_v0 = vld [vmem:[#allocation6 + $0x88] sm:$0xff] }
 0x2a8   :  { %v2499_v54 = vld [vmem:[#allocation6 + $0x440] sm:$0xff]  ;;  %v2508_v22 = vld [vmem:[#allocation6 + $0x488] sm:$0xff] }
 0x2a9   :  { %v2379_v3 = vld [vmem:[#allocation6 + $0x80] sm:$0xff] }
 0x2aa   :  { %1616 = vmatpush1.bf16.msra.mxu0 %v1034_v55  ;;  %1780 = vmatpush1.bf16.msra.mxu1 %v1036_v56  ;;  %v2507_v4 = vld [vmem:[#allocation6 + $0x480] sm:$0xff]  ;;  %v2388_v55 = vld [vmem:[#allocation6 + $0xc8] sm:$0xff] }
 0x2ab   :  { %1617 = vmatprep.subr.bf16.mxu0 %v1043_v23  ;;  %1781 = vmatprep.subr.bf16.mxu1 %v1045_v57  ;;  %v2387_v56 = vld [vmem:[#allocation6 + $0xc0] sm:$0xff]  ;;  %v2396_v57 = vld [vmem:[#allocation6 + $0x108] sm:$0xff] }
 0x2ac   :  { %v2515_v23 = vld [vmem:[#allocation6 + $0x4c0] sm:$0xff] }
 0x2ae   :  { %1618 = vmatpush1.bf16.msra.mxu0 %v1042_v9  ;;  %1782 = vmatpush1.bf16.msra.mxu1 %v1044_v60  ;;  %v2524_v9 = vld [vmem:[#allocation6 + $0x508] sm:$0xff]  ;;  %v2395_v60 = vld [vmem:[#allocation6 + $0x100] sm:$0xff] }
 0x2af   :  { %1619 = vmatprep.subr.bf16.mxu0 %v1051_v61  ;;  %1783 = vmatprep.subr.bf16.mxu1 %v1053_v62  ;;  %v2523_v61 = vld [vmem:[#allocation6 + $0x500] sm:$0xff]  ;;  %v2404_v62 = vld [vmem:[#allocation6 + $0x148] sm:$0xff] }
 0x2b2   :  { %1620 = vmatpush1.bf16.msra.mxu0 %v1050_v5  ;;  %1784 = vmatpush1.bf16.msra.mxu1 %v1052_v7  ;;  %v2532_v5 = vld [vmem:[#allocation6 + $0x548] sm:$0xff]  ;;  %v2403_v7 = vld [vmem:[#allocation6 + $0x140] sm:$0xff] }
 0x2b3   :  { %1621 = vmatprep.subr.bf16.mxu0 %v1059_v8  ;;  %1785 = vmatprep.subr.bf16.mxu1 %v1061_v10  ;;  %v2531_v8 = vld [vmem:[#allocation6 + $0x540] sm:$0xff]  ;;  %v2412_v10 = vld [vmem:[#allocation6 + $0x188] sm:$0xff] }
 0x2b6   :  { %1622 = vmatpush1.bf16.msra.mxu0 %v1058_v11  ;;  %1786 = vmatpush1.bf16.msra.mxu1 %v1060_v12  ;;  %v2540_v11 = vld [vmem:[#allocation6 + $0x588] sm:$0xff]  ;;  %v2411_v12 = vld [vmem:[#allocation6 + $0x180] sm:$0xff] }
 0x2b7   :  { %1623 = vmatprep.subr.bf16.mxu0 %v1067_v53  ;;  %1787 = vmatprep.subr.bf16.mxu1 %v1069_v13  ;;  %v2539_v53 = vld [vmem:[#allocation6 + $0x580] sm:$0xff]  ;;  %v2420_v13 = vld [vmem:[#allocation6 + $0x1c8] sm:$0xff] }
 0x2ba   :  { %1624 = vmatpush1.bf16.msra.mxu0 %v1066_v14  ;;  %1788 = vmatpush1.bf16.msra.mxu1 %v1068_v15  ;;  %v2548_v14 = vld [vmem:[#allocation6 + $0x5c8] sm:$0xff]  ;;  %v2419_v15 = vld [vmem:[#allocation6 + $0x1c0] sm:$0xff] }
 0x2bb   :  { %1625 = vmatprep.subr.bf16.mxu0 %v1075_v17  ;;  %1789 = vmatprep.subr.bf16.mxu1 %v1077_v18  ;;  %v2547_v17 = vld [vmem:[#allocation6 + $0x5c0] sm:$0xff]  ;;  %v2428_v18 = vld [vmem:[#allocation6 + $0x208] sm:$0xff] }
 0x2be   :  { %1626 = vmatpush1.bf16.msra.mxu0 %v1074_v19  ;;  %1790 = vmatpush1.bf16.msra.mxu1 %v1076_v20  ;;  %v2556_v19 = vld [vmem:[#allocation6 + $0x608] sm:$0xff]  ;;  %v2427_v20 = vld [vmem:[#allocation6 + $0x200] sm:$0xff] }
 0x2bf   :  { %1627 = vmatprep.subr.bf16.mxu0 %v1083_v24  ;;  %1791 = vmatprep.subr.bf16.mxu1 %v1085_v25  ;;  %v2555_v24 = vld [vmem:[#allocation6 + $0x600] sm:$0xff]  ;;  %v2436_v25 = vld [vmem:[#allocation6 + $0x248] sm:$0xff] }
 0x2c2   :  { %1628 = vmatpush1.bf16.msra.mxu0 %v1082_v28  ;;  %1792 = vmatpush1.bf16.msra.mxu1 %v1084_v26  ;;  %v2564_v28 = vld [vmem:[#allocation6 + $0x648] sm:$0xff]  ;;  %v2435_v26 = vld [vmem:[#allocation6 + $0x240] sm:$0xff] }
 0x2c3   :  { %1629 = vmatprep.subr.bf16.mxu0 %v1091_v27  ;;  %1793 = vmatprep.subr.bf16.mxu1 %v1093_v29  ;;  %v2563_v27 = vld [vmem:[#allocation6 + $0x640] sm:$0xff]  ;;  %v2444_v29 = vld [vmem:[#allocation6 + $0x288] sm:$0xff] }
 0x2c6   :  { %1630 = vmatpush1.bf16.msra.mxu0 %v1090_v30  ;;  %1794 = vmatpush1.bf16.msra.mxu1 %v1092_v32  ;;  %v2443_v30 = vld [vmem:[#allocation6 + $0x280] sm:$0xff] }
 0x2c7   :  { %1631 = vmatprep.subr.bf16.mxu0 %v1099_v33  ;;  %1795 = vmatprep.subr.bf16.mxu1 %v1101_v34  ;;  %v2571_v32 = vld [vmem:[#allocation6 + $0x680] sm:$0xff]  ;;  %v2452_v33 = vld [vmem:[#allocation6 + $0x2c8] sm:$0xff] }
 0x2c8   :  { %v2580_v34 = vld [vmem:[#allocation6 + $0x6c8] sm:$0xff] }
 0x2ca   :  { %1632 = vmatpush1.bf16.msra.mxu0 %v1098_v35  ;;  %1796 = vmatpush1.bf16.msra.mxu1 %v1100_v46  ;;  %v2579_v35 = vld [vmem:[#allocation6 + $0x6c0] sm:$0xff]  ;;  %v2460_v46 = vld [vmem:[#allocation6 + $0x308] sm:$0xff] }
 0x2cb   :  { %1633 = vmatprep.subr.bf16.mxu0 %v1107_v37  ;;  %1797 = vmatprep.subr.bf16.mxu1 %v1109_v38  ;;  %v2588_v37 = vld [vmem:[#allocation6 + $0x708] sm:$0xff]  ;;  %v2459_v38 = vld [vmem:[#allocation6 + $0x300] sm:$0xff] }
 0x2ce   :  { %1634 = vmatpush1.bf16.msra.mxu0 %v1106_v2  ;;  %1798 = vmatpush1.bf16.msra.mxu1 %v1108_v51  ;;  %v2587_v2 = vld [vmem:[#allocation6 + $0x700] sm:$0xff]  ;;  %v2468_v51 = vld [vmem:[#allocation6 + $0x348] sm:$0xff] }
 0x2cf   :  { %2619 = vmatprep.subr.bf16.mxu0 %v2364_v42  ;;  %2660 = vmatprep.subr.bf16.mxu1 %v2492_v43  ;;  %v2596_v42 = vld [vmem:[#allocation6 + $0x748] sm:$0xff]  ;;  %v2467_v43 = vld [vmem:[#allocation6 + $0x340] sm:$0xff] }
 0x2d1   :  { %1636 = vmatmul.mubr.bf16.vlgmr.msra.gmra.mrb[4].mxu0 %v5217_v1  ;;  %1800 = vmatmul.mubr.bf16.vlgmr.msra.gmra.mrb[4].mxu1 %v5217_v1  ;;  %v2516_v1 = vld [vmem:[#allocation6 + $0x4c8] sm:$0xff] }
 0x2d2   :  { %2620 = vmatpush1.bf16.msra.mxu0 %v2363_v6  ;;  %2661 = vmatpush1.bf16.msra.mxu1 %v2491_v44  ;;  %v2604_v6 = vld [vmem:[#allocation6 + $0x788] sm:$0xff]  ;;  %v2475_v44 = vld [vmem:[#allocation6 + $0x380] sm:$0xff] }
 0x2d3   :  { %2621 = vmatprep.subr.bf16.mxu0 %v2372_v45  ;;  %2662 = vmatprep.subr.bf16.mxu1 %v2500_v47  ;;  %v2603_v45 = vld [vmem:[#allocation6 + $0x780] sm:$0xff]  ;;  %v2484_v47 = vld [vmem:[#allocation6 + $0x3c8] sm:$0xff] }
 0x2d4   :  { %2651 = vmatprep.mubr.bf16.mxu0 %v5253_v48  ;;  %2692 = vmatprep.mubr.bf16.mxu1 %v5255_v49 }
 0x2d6   :  { %2622 = vmatpush1.bf16.msra.mxu0 %v2371_v52  ;;  %2663 = vmatpush1.bf16.msra.mxu1 %v2499_v54  ;;  %v2612_v52 = vld [vmem:[#allocation6 + $0x7c8] sm:$0xff]  ;;  %v2483_v54 = vld [vmem:[#allocation6 + $0x3c0] sm:$0xff] }
 0x2d7   :  { %2623 = vmatprep.subr.bf16.mxu0 %v2380_v0  ;;  %2664 = vmatprep.subr.bf16.mxu1 %v2508_v22  ;;  %v2611_v0 = vld [vmem:[#allocation6 + $0x7c0] sm:$0xff]  ;;  %v2366_v22 = vld [vmem:[#allocation6 + $0x18] sm:$0xff] }
 0x2da   :  { %2624 = vmatpush1.bf16.msra.mxu0 %v2379_v3  ;;  %2665 = vmatpush1.bf16.msra.mxu1 %v2507_v4  ;;  %v2494_v3 = vld [vmem:[#allocation6 + $0x418] sm:$0xff]  ;;  %v5263_v4 = vpack.c.bf16 %v5244_v39, %v5244_v39  ;;  %v2373_v39 = vld [vmem:[#allocation6 + $0x50] sm:$0xff] }
 0x2db   :  { %2625 = vmatprep.subr.bf16.mxu0 %v2388_v55  ;;  %2666 = vmatprep.subr.bf16.mxu1 %v2516_v1  ;;  %v5267_v55 = vpack.c.bf16 %v5247_v40, %v5247_v40  ;;  %v2365_v1 = vld [vmem:[#allocation6 + $0x10] sm:$0xff]  ;;  %v2382_v40 = vld [vmem:[#allocation6 + $0x98] sm:$0xff] }
 0x2de   :  { %2626 = vmatpush1.bf16.msra.mxu0 %v2387_v56  ;;  %2667 = vmatpush1.bf16.msra.mxu1 %v2515_v23  ;;  %v2493_v56 = vld [vmem:[#allocation6 + $0x410] sm:$0xff]  ;;  %v2374_v23 = vld [vmem:[#allocation6 + $0x58] sm:$0xff] }
 0x2df   :  { %2627 = vmatprep.subr.bf16.mxu0 %v2396_v57  ;;  %2668 = vmatprep.subr.bf16.mxu1 %v2524_v9  ;;  %v2502_v57 = vld [vmem:[#allocation6 + $0x458] sm:$0xff]  ;;  %v2501_v9 = vld [vmem:[#allocation6 + $0x450] sm:$0xff] }
 0x2e2   :  { %2628 = vmatpush1.bf16.msra.mxu0 %v2395_v60  ;;  %2669 = vmatpush1.bf16.msra.mxu1 %v2523_v61  ;;  %v2510_v60 = vld [vmem:[#allocation6 + $0x498] sm:$0xff]  ;;  %v2381_v61 = vld [vmem:[#allocation6 + $0x90] sm:$0xff] }
 0x2e3   :  { %2629 = vmatprep.subr.bf16.mxu0 %v2404_v62  ;;  %2670 = vmatprep.subr.bf16.mxu1 %v2532_v5  ;;  %v2509_v62 = vld [vmem:[#allocation6 + $0x490] sm:$0xff]  ;;  %v2390_v5 = vld [vmem:[#allocation6 + $0xd8] sm:$0xff] }
 0x2e6   :  { %2630 = vmatpush1.bf16.msra.mxu0 %v2403_v7  ;;  %2671 = vmatpush1.bf16.msra.mxu1 %v2531_v8  ;;  %v2518_v7 = vld [vmem:[#allocation6 + $0x4d8] sm:$0xff]  ;;  %v2389_v8 = vld [vmem:[#allocation6 + $0xd0] sm:$0xff] }
 0x2e7   :  { %2631 = vmatprep.subr.bf16.mxu0 %v2412_v10  ;;  %2672 = vmatprep.subr.bf16.mxu1 %v2540_v11  ;;  %v2517_v10 = vld [vmem:[#allocation6 + $0x4d0] sm:$0xff]  ;;  %v2398_v11 = vld [vmem:[#allocation6 + $0x118] sm:$0xff] }
 0x2ea   :  { %2632 = vmatpush1.bf16.msra.mxu0 %v2411_v12  ;;  %2673 = vmatpush1.bf16.msra.mxu1 %v2539_v53  ;;  %v2526_v12 = vld [vmem:[#allocation6 + $0x518] sm:$0xff]  ;;  %v2397_v53 = vld [vmem:[#allocation6 + $0x110] sm:$0xff] }
 0x2eb   :  { %2633 = vmatprep.subr.bf16.mxu0 %v2420_v13  ;;  %2674 = vmatprep.subr.bf16.mxu1 %v2548_v14  ;;  %v2525_v13 = vld [vmem:[#allocation6 + $0x510] sm:$0xff]  ;;  %v2406_v14 = vld [vmem:[#allocation6 + $0x158] sm:$0xff] }
 0x2ee   :  { %2634 = vmatpush1.bf16.msra.mxu0 %v2419_v15  ;;  %2675 = vmatpush1.bf16.msra.mxu1 %v2547_v17  ;;  %v2534_v15 = vld [vmem:[#allocation6 + $0x558] sm:$0xff]  ;;  %v2405_v17 = vld [vmem:[#allocation6 + $0x150] sm:$0xff] }
 0x2ef   :  { %2635 = vmatprep.subr.bf16.mxu0 %v2428_v18  ;;  %2676 = vmatprep.subr.bf16.mxu1 %v2556_v19  ;;  %v2533_v18 = vld [vmem:[#allocation6 + $0x550] sm:$0xff]  ;;  %v2414_v19 = vld [vmem:[#allocation6 + $0x198] sm:$0xff] }
 0x2f2   :  { %2636 = vmatpush1.bf16.msra.mxu0 %v2427_v20  ;;  %2677 = vmatpush1.bf16.msra.mxu1 %v2555_v24  ;;  %v2542_v20 = vld [vmem:[#allocation6 + $0x598] sm:$0xff]  ;;  %v2413_v24 = vld [vmem:[#allocation6 + $0x190] sm:$0xff] }
 0x2f3   :  { %2637 = vmatprep.subr.bf16.mxu0 %v2436_v25  ;;  %2678 = vmatprep.subr.bf16.mxu1 %v2564_v28  ;;  %v2541_v25 = vld [vmem:[#allocation6 + $0x590] sm:$0xff]  ;;  %v2422_v28 = vld [vmem:[#allocation6 + $0x1d8] sm:$0xff] }
 0x2f6   :  { %2638 = vmatpush1.bf16.msra.mxu0 %v2435_v26  ;;  %2679 = vmatpush1.bf16.msra.mxu1 %v2563_v27  ;;  %v2550_v26 = vld [vmem:[#allocation6 + $0x5d8] sm:$0xff]  ;;  %v2421_v27 = vld [vmem:[#allocation6 + $0x1d0] sm:$0xff] }
 0x2f7   :  { %2639 = vmatprep.subr.bf16.mxu0 %v2444_v29  ;;  %2680 = vmatprep.subr.bf16.mxu1 %v2572_v36  ;;  %v2549_v29 = vld [vmem:[#allocation6 + $0x5d0] sm:$0xff]  ;;  %v2430_v36 = vld [vmem:[#allocation6 + $0x218] sm:$0xff] }
 0x2fa   :  { %2640 = vmatpush1.bf16.msra.mxu0 %v2443_v30  ;;  %2681 = vmatpush1.bf16.msra.mxu1 %v2571_v32  ;;  %v2558_v30 = vld [vmem:[#allocation6 + $0x618] sm:$0xff]  ;;  %v2429_v32 = vld [vmem:[#allocation6 + $0x210] sm:$0xff] }
 0x2fb   :  { %2641 = vmatprep.subr.bf16.mxu0 %v2452_v33  ;;  %2682 = vmatprep.subr.bf16.mxu1 %v2580_v34  ;;  %v2557_v33 = vld [vmem:[#allocation6 + $0x610] sm:$0xff]  ;;  %v2438_v34 = vld [vmem:[#allocation6 + $0x258] sm:$0xff] }
 0x2fe   :  { %2642 = vmatpush1.bf16.msra.mxu0 %v2451_v41  ;;  %2683 = vmatpush1.bf16.msra.mxu1 %v2579_v35  ;;  %v2566_v41 = vld [vmem:[#allocation6 + $0x658] sm:$0xff]  ;;  %v2437_v35 = vld [vmem:[#allocation6 + $0x250] sm:$0xff] }
 0x2ff   :  { %2643 = vmatprep.subr.bf16.mxu0 %v2460_v46  ;;  %2684 = vmatprep.subr.bf16.mxu1 %v2588_v37  ;;  %v2565_v46 = vld [vmem:[#allocation6 + $0x650] sm:$0xff]  ;;  %v2446_v37 = vld [vmem:[#allocation6 + $0x298] sm:$0xff] }
 0x302   :  { %2644 = vmatpush1.bf16.msra.mxu0 %v2459_v38  ;;  %2685 = vmatpush1.bf16.msra.mxu1 %v2587_v2  ;;  %v2574_v38 = vld [vmem:[#allocation6 + $0x698] sm:$0xff]  ;;  %v2445_v2 = vld [vmem:[#allocation6 + $0x290] sm:$0xff] }
 0x303   :  { %2645 = vmatprep.subr.bf16.mxu0 %v2468_v51  ;;  %2686 = vmatprep.subr.bf16.mxu1 %v2596_v42  ;;  %v2573_v51 = vld [vmem:[#allocation6 + $0x690] sm:$0xff]  ;;  %v2454_v42 = vld [vmem:[#allocation6 + $0x2d8] sm:$0xff] }
 0x306   :  { %2646 = vmatpush1.bf16.msra.mxu0 %v2467_v43  ;;  %2687 = vmatpush1.bf16.msra.mxu1 %v2595_v21  ;;  %v2582_v43 = vld [vmem:[#allocation6 + $0x6d8] sm:$0xff]  ;;  %v2453_v21 = vld [vmem:[#allocation6 + $0x2d0] sm:$0xff] }
 0x307   :  { %2647 = vmatprep.subr.bf16.mxu0 %v2476_v16  ;;  %2688 = vmatprep.subr.bf16.mxu1 %v2604_v6  ;;  %v2581_v16 = vld [vmem:[#allocation6 + $0x6d0] sm:$0xff]  ;;  %v2462_v6 = vld [vmem:[#allocation6 + $0x318] sm:$0xff] }
 0x30a   :  { %2648 = vmatpush1.bf16.msra.mxu0 %v2475_v44  ;;  %2689 = vmatpush1.bf16.msra.mxu1 %v2603_v45  ;;  %v2590_v44 = vld [vmem:[#allocation6 + $0x718] sm:$0xff]  ;;  %v2461_v45 = vld [vmem:[#allocation6 + $0x310] sm:$0xff] }
 0x30b   :  { %2649 = vmatprep.subr.bf16.mxu0 %v2484_v47  ;;  %2690 = vmatprep.subr.bf16.mxu1 %v2612_v52  ;;  %v2589_v47 = vld [vmem:[#allocation6 + $0x710] sm:$0xff]  ;;  %v2470_v52 = vld [vmem:[#allocation6 + $0x358] sm:$0xff] }
 0x30e   :  { %2650 = vmatpush1.bf16.msra.mxu0 %v2483_v54  ;;  %2691 = vmatpush1.bf16.msra.mxu1 %v2611_v0  ;;  %v2598_v54 = vld [vmem:[#allocation6 + $0x758] sm:$0xff]  ;;  %v2469_v0 = vld [vmem:[#allocation6 + $0x350] sm:$0xff] }
 0x30f   :  { %2701 = vmatprep.subr.bf16.mxu0 %v2366_v22  ;;  %2742 = vmatprep.subr.bf16.mxu1 %v2494_v3  ;;  %v2597_v22 = vld [vmem:[#allocation6 + $0x750] sm:$0xff]  ;;  %v2478_v3 = vld [vmem:[#allocation6 + $0x398] sm:$0xff] }
 0x311   :  { %2652 = vmatmul.mubr.bf16.vlgmr.msra.gmra.mrb[8].mxu0 %v5263_v4  ;;  %2693 = vmatmul.mubr.bf16.vlgmr.msra.gmra.mrb[8].mxu1 %v5267_v55 }
 0x312   :  { %2702 = vmatpush1.bf16.msra.mxu0 %v2365_v1  ;;  %2743 = vmatpush1.bf16.msra.mxu1 %v2493_v56  ;;  %v2606_v1 = vld [vmem:[#allocation6 + $0x798] sm:$0xff]  ;;  %v2477_v56 = vld [vmem:[#allocation6 + $0x390] sm:$0xff] }
 0x313   :  { %2703 = vmatprep.subr.bf16.mxu0 %v2374_v23  ;;  %2744 = vmatprep.subr.bf16.mxu1 %v2502_v57  ;;  %v2605_v23 = vld [vmem:[#allocation6 + $0x790] sm:$0xff]  ;;  %v2486_v57 = vld [vmem:[#allocation6 + $0x3d8] sm:$0xff] }
 0x314   :  { %2733 = vmatprep.mubr.bf16.mxu0 %v5253_v48  ;;  %2774 = vmatprep.mubr.bf16.mxu1 %v5255_v49 }
 0x316   :  { %2704 = vmatpush1.bf16.msra.mxu0 %v2373_v39  ;;  %2745 = vmatpush1.bf16.msra.mxu1 %v2501_v9  ;;  %v2614_v39 = vld [vmem:[#allocation6 + $0x7d8] sm:$0xff]  ;;  %v2485_v9 = vld [vmem:[#allocation6 + $0x3d0] sm:$0xff] }
 0x317   :  { %2705 = vmatprep.subr.bf16.mxu0 %v2382_v40  ;;  %2746 = vmatprep.subr.bf16.mxu1 %v2510_v60  ;;  %v2613_v40 = vld [vmem:[#allocation6 + $0x7d0] sm:$0xff]  ;;  %v2368_v60 = vld [vmem:[#allocation6 + $0x28] sm:$0xff] }
 0x31a   :  { %2706 = vmatpush1.bf16.msra.mxu0 %v2381_v61  ;;  %2747 = vmatpush1.bf16.msra.mxu1 %v2509_v62  ;;  %v2496_v61 = vld [vmem:[#allocation6 + $0x428] sm:$0xff]  ;;  %v2367_v62 = vld [vmem:[#allocation6 + $0x20] sm:$0xff] }
 0x31b   :  { %2707 = vmatprep.subr.bf16.mxu0 %v2390_v5  ;;  %2748 = vmatprep.subr.bf16.mxu1 %v2518_v7  ;;  %v2495_v5 = vld [vmem:[#allocation6 + $0x420] sm:$0xff]  ;;  %v2376_v7 = vld [vmem:[#allocation6 + $0x68] sm:$0xff] }
 0x31e   :  { %2708 = vmatpush1.bf16.msra.mxu0 %v2389_v8  ;;  %2749 = vmatpush1.bf16.msra.mxu1 %v2517_v10  ;;  %v2504_v8 = vld [vmem:[#allocation6 + $0x468] sm:$0xff]  ;;  %v2375_v10 = vld [vmem:[#allocation6 + $0x60] sm:$0xff] }
 0x31f   :  { %2709 = vmatprep.subr.bf16.mxu0 %v2398_v11  ;;  %2750 = vmatprep.subr.bf16.mxu1 %v2526_v12  ;;  %v2503_v11 = vld [vmem:[#allocation6 + $0x460] sm:$0xff]  ;;  %v2384_v12 = vld [vmem:[#allocation6 + $0xa8] sm:$0xff] }
 0x322   :  { %2710 = vmatpush1.bf16.msra.mxu0 %v2397_v53  ;;  %2751 = vmatpush1.bf16.msra.mxu1 %v2525_v13  ;;  %v2512_v53 = vld [vmem:[#allocation6 + $0x4a8] sm:$0xff]  ;;  %v2383_v13 = vld [vmem:[#allocation6 + $0xa0] sm:$0xff] }
 0x323   :  { %2711 = vmatprep.subr.bf16.mxu0 %v2406_v14  ;;  %2752 = vmatprep.subr.bf16.mxu1 %v2534_v15  ;;  %v2511_v14 = vld [vmem:[#allocation6 + $0x4a0] sm:$0xff]  ;;  %v2392_v15 = vld [vmem:[#allocation6 + $0xe8] sm:$0xff] }
 0x326   :  { %2712 = vmatpush1.bf16.msra.mxu0 %v2405_v17  ;;  %2753 = vmatpush1.bf16.msra.mxu1 %v2533_v18  ;;  %v2520_v17 = vld [vmem:[#allocation6 + $0x4e8] sm:$0xff]  ;;  %v2391_v18 = vld [vmem:[#allocation6 + $0xe0] sm:$0xff] }
 0x327   :  { %2713 = vmatprep.subr.bf16.mxu0 %v2414_v19  ;;  %2754 = vmatprep.subr.bf16.mxu1 %v2542_v20  ;;  %v2519_v19 = vld [vmem:[#allocation6 + $0x4e0] sm:$0xff]  ;;  %v2400_v20 = vld [vmem:[#allocation6 + $0x128] sm:$0xff] }
 0x32a   :  { %2714 = vmatpush1.bf16.msra.mxu0 %v2413_v24  ;;  %2755 = vmatpush1.bf16.msra.mxu1 %v2541_v25  ;;  %v2528_v24 = vld [vmem:[#allocation6 + $0x528] sm:$0xff]  ;;  %v2399_v25 = vld [vmem:[#allocation6 + $0x120] sm:$0xff] }
 0x32b   :  { %2715 = vmatprep.subr.bf16.mxu0 %v2422_v28  ;;  %2756 = vmatprep.subr.bf16.mxu1 %v2550_v26  ;;  %v2527_v28 = vld [vmem:[#allocation6 + $0x520] sm:$0xff]  ;;  %v2408_v26 = vld [vmem:[#allocation6 + $0x168] sm:$0xff] }
 0x32e   :  { %2716 = vmatpush1.bf16.msra.mxu0 %v2421_v27  ;;  %2757 = vmatpush1.bf16.msra.mxu1 %v2549_v29  ;;  %v2536_v27 = vld [vmem:[#allocation6 + $0x568] sm:$0xff]  ;;  %v2407_v29 = vld [vmem:[#allocation6 + $0x160] sm:$0xff] }
 0x32f   :  { %2717 = vmatprep.subr.bf16.mxu0 %v2430_v36  ;;  %2758 = vmatprep.subr.bf16.mxu1 %v2558_v30  ;;  %v2535_v36 = vld [vmem:[#allocation6 + $0x560] sm:$0xff]  ;;  %v2416_v30 = vld [vmem:[#allocation6 + $0x1a8] sm:$0xff] }
 0x332   :  { %2718 = vmatpush1.bf16.msra.mxu0 %v2429_v32  ;;  %2759 = vmatpush1.bf16.msra.mxu1 %v2557_v33  ;;  %v2544_v32 = vld [vmem:[#allocation6 + $0x5a8] sm:$0xff]  ;;  %v2415_v33 = vld [vmem:[#allocation6 + $0x1a0] sm:$0xff] }
 0x333   :  { %2719 = vmatprep.subr.bf16.mxu0 %v2438_v34  ;;  %2760 = vmatprep.subr.bf16.mxu1 %v2566_v41  ;;  %v2543_v34 = vld [vmem:[#allocation6 + $0x5a0] sm:$0xff]  ;;  %v2424_v41 = vld [vmem:[#allocation6 + $0x1e8] sm:$0xff] }
 0x336   :  { %2720 = vmatpush1.bf16.msra.mxu0 %v2437_v35  ;;  %2761 = vmatpush1.bf16.msra.mxu1 %v2565_v46  ;;  %v2552_v35 = vld [vmem:[#allocation6 + $0x5e8] sm:$0xff]  ;;  %v2423_v46 = vld [vmem:[#allocation6 + $0x1e0] sm:$0xff] }
 0x337   :  { %2721 = vmatprep.subr.bf16.mxu0 %v2446_v37  ;;  %2762 = vmatprep.subr.bf16.mxu1 %v2574_v38  ;;  %v2551_v37 = vld [vmem:[#allocation6 + $0x5e0] sm:$0xff]  ;;  %v2432_v38 = vld [vmem:[#allocation6 + $0x228] sm:$0xff] }
 0x33a   :  { %2722 = vmatpush1.bf16.msra.mxu0 %v2445_v2  ;;  %2763 = vmatpush1.bf16.msra.mxu1 %v2573_v51  ;;  %v2560_v2 = vld [vmem:[#allocation6 + $0x628] sm:$0xff]  ;;  %v2431_v51 = vld [vmem:[#allocation6 + $0x220] sm:$0xff] }
 0x33b   :  { %2723 = vmatprep.subr.bf16.mxu0 %v2454_v42  ;;  %2764 = vmatprep.subr.bf16.mxu1 %v2582_v43  ;;  %v2559_v42 = vld [vmem:[#allocation6 + $0x620] sm:$0xff]  ;;  %v2440_v43 = vld [vmem:[#allocation6 + $0x268] sm:$0xff] }
 0x33e   :  { %2724 = vmatpush1.bf16.msra.mxu0 %v2453_v21  ;;  %2765 = vmatpush1.bf16.msra.mxu1 %v2581_v16  ;;  %v2568_v21 = vld [vmem:[#allocation6 + $0x668] sm:$0xff]  ;;  %v2439_v16 = vld [vmem:[#allocation6 + $0x260] sm:$0xff] }
 0x33f   :  { %2725 = vmatprep.subr.bf16.mxu0 %v2462_v6  ;;  %2766 = vmatprep.subr.bf16.mxu1 %v2590_v44  ;;  %v2567_v6 = vld [vmem:[#allocation6 + $0x660] sm:$0xff]  ;;  %v2448_v44 = vld [vmem:[#allocation6 + $0x2a8] sm:$0xff] }
 0x342   :  { %2726 = vmatpush1.bf16.msra.mxu0 %v2461_v45  ;;  %2767 = vmatpush1.bf16.msra.mxu1 %v2589_v47  ;;  %v2576_v45 = vld [vmem:[#allocation6 + $0x6a8] sm:$0xff]  ;;  %v2447_v47 = vld [vmem:[#allocation6 + $0x2a0] sm:$0xff] }
 0x343   :  { %2727 = vmatprep.subr.bf16.mxu0 %v2470_v52  ;;  %2768 = vmatprep.subr.bf16.mxu1 %v2598_v54  ;;  %v2575_v52 = vld [vmem:[#allocation6 + $0x6a0] sm:$0xff]  ;;  %v2456_v54 = vld [vmem:[#allocation6 + $0x2e8] sm:$0xff] }
 0x346   :  { %2728 = vmatpush1.bf16.msra.mxu0 %v2469_v0  ;;  %2769 = vmatpush1.bf16.msra.mxu1 %v2597_v22  ;;  %v2584_v0 = vld [vmem:[#allocation6 + $0x6e8] sm:$0xff]  ;;  %v2455_v22 = vld [vmem:[#allocation6 + $0x2e0] sm:$0xff] }
 0x347   :  { %2729 = vmatprep.subr.bf16.mxu0 %v2478_v3  ;;  %2770 = vmatprep.subr.bf16.mxu1 %v2606_v1  ;;  %v2583_v3 = vld [vmem:[#allocation6 + $0x6e0] sm:$0xff]  ;;  %v2464_v1 = vld [vmem:[#allocation6 + $0x328] sm:$0xff] }
 0x34a   :  { %2730 = vmatpush1.bf16.msra.mxu0 %v2477_v56  ;;  %2771 = vmatpush1.bf16.msra.mxu1 %v2605_v23  ;;  %v2592_v56 = vld [vmem:[#allocation6 + $0x728] sm:$0xff]  ;;  %v2463_v23 = vld [vmem:[#allocation6 + $0x320] sm:$0xff] }
 0x34b   :  { %2731 = vmatprep.subr.bf16.mxu0 %v2486_v57  ;;  %2772 = vmatprep.subr.bf16.mxu1 %v2614_v39  ;;  %v2591_v57 = vld [vmem:[#allocation6 + $0x720] sm:$0xff]  ;;  %v2472_v39 = vld [vmem:[#allocation6 + $0x368] sm:$0xff] }
 0x34e   :  { %2732 = vmatpush1.bf16.msra.mxu0 %v2485_v9  ;;  %2773 = vmatpush1.bf16.msra.mxu1 %v2613_v40  ;;  %v2600_v9 = vld [vmem:[#allocation6 + $0x768] sm:$0xff]  ;;  %v2471_v40 = vld [vmem:[#allocation6 + $0x360] sm:$0xff] }
 0x34f   :  { %2783 = vmatprep.subr.bf16.mxu0 %v2368_v60  ;;  %2824 = vmatprep.subr.bf16.mxu1 %v2496_v61  ;;  %v2599_v60 = vld [vmem:[#allocation6 + $0x760] sm:$0xff]  ;;  %v2480_v61 = vld [vmem:[#allocation6 + $0x3a8] sm:$0xff] }
 0x351   :  { %2734 = vmatmul.mubr.bf16.vlgmr.msra.gmra.mrb[12].mxu0 %v5263_v4  ;;  %2775 = vmatmul.mubr.bf16.vlgmr.msra.gmra.mrb[12].mxu1 %v5267_v55 }
 0x352   :  { %2784 = vmatpush1.bf16.msra.mxu0 %v2367_v62  ;;  %2825 = vmatpush1.bf16.msra.mxu1 %v2495_v5  ;;  %v2608_v62 = vld [vmem:[#allocation6 + $0x7a8] sm:$0xff]  ;;  %v2479_v5 = vld [vmem:[#allocation6 + $0x3a0] sm:$0xff] }
 0x353   :  { %2785 = vmatprep.subr.bf16.mxu0 %v2376_v7  ;;  %2826 = vmatprep.subr.bf16.mxu1 %v2504_v8  ;;  %v2607_v7 = vld [vmem:[#allocation6 + $0x7a0] sm:$0xff]  ;;  %v2488_v8 = vld [vmem:[#allocation6 + $0x3e8] sm:$0xff] }
 0x354   :  { %2815 = vmatprep.mubr.bf16.mxu0 %v5253_v48  ;;  %2856 = vmatprep.mubr.bf16.mxu1 %v5255_v49 }
 0x356   :  { %2786 = vmatpush1.bf16.msra.mxu0 %v2375_v10  ;;  %2827 = vmatpush1.bf16.msra.mxu1 %v2503_v11  ;;  %v2616_v10 = vld [vmem:[#allocation6 + $0x7e8] sm:$0xff]  ;;  %v2487_v11 = vld [vmem:[#allocation6 + $0x3e0] sm:$0xff] }
 0x357   :  { %2787 = vmatprep.subr.bf16.mxu0 %v2384_v12  ;;  %2828 = vmatprep.subr.bf16.mxu1 %v2512_v53  ;;  %v2615_v12 = vld [vmem:[#allocation6 + $0x7e0] sm:$0xff]  ;;  %v2370_v53 = vld [vmem:[#allocation6 + $0x38] sm:$0xff] }
 0x35a   :  { %2788 = vmatpush1.bf16.msra.mxu0 %v2383_v13  ;;  %2829 = vmatpush1.bf16.msra.mxu1 %v2511_v14  ;;  %v2498_v13 = vld [vmem:[#allocation6 + $0x438] sm:$0xff]  ;;  %v2369_v14 = vld [vmem:[#allocation6 + $0x30] sm:$0xff] }
 0x35b   :  { %2789 = vmatprep.subr.bf16.mxu0 %v2392_v15  ;;  %2830 = vmatprep.subr.bf16.mxu1 %v2520_v17  ;;  %v2497_v15 = vld [vmem:[#allocation6 + $0x430] sm:$0xff]  ;;  %v2378_v17 = vld [vmem:[#allocation6 + $0x78] sm:$0xff] }
 0x35e   :  { %2790 = vmatpush1.bf16.msra.mxu0 %v2391_v18  ;;  %2831 = vmatpush1.bf16.msra.mxu1 %v2519_v19  ;;  %v2506_v18 = vld [vmem:[#allocation6 + $0x478] sm:$0xff]  ;;  %v2377_v19 = vld [vmem:[#allocation6 + $0x70] sm:$0xff] }
 0x35f   :  { %2791 = vmatprep.subr.bf16.mxu0 %v2400_v20  ;;  %2832 = vmatprep.subr.bf16.mxu1 %v2528_v24  ;;  %v2505_v20 = vld [vmem:[#allocation6 + $0x470] sm:$0xff]  ;;  %v2386_v24 = vld [vmem:[#allocation6 + $0xb8] sm:$0xff] }
 0x362   :  { %2792 = vmatpush1.bf16.msra.mxu0 %v2399_v25  ;;  %2833 = vmatpush1.bf16.msra.mxu1 %v2527_v28  ;;  %v2514_v25 = vld [vmem:[#allocation6 + $0x4b8] sm:$0xff]  ;;  %v2385_v28 = vld [vmem:[#allocation6 + $0xb0] sm:$0xff] }
 0x363   :  { %2793 = vmatprep.subr.bf16.mxu0 %v2408_v26  ;;  %2834 = vmatprep.subr.bf16.mxu1 %v2536_v27  ;;  %v2513_v26 = vld [vmem:[#allocation6 + $0x4b0] sm:$0xff]  ;;  %v2394_v27 = vld [vmem:[#allocation6 + $0xf8] sm:$0xff] }
 0x366   :  { %2794 = vmatpush1.bf16.msra.mxu0 %v2407_v29  ;;  %2835 = vmatpush1.bf16.msra.mxu1 %v2535_v36  ;;  %v2522_v29 = vld [vmem:[#allocation6 + $0x4f8] sm:$0xff]  ;;  %v2393_v36 = vld [vmem:[#allocation6 + $0xf0] sm:$0xff] }
 0x367   :  { %2795 = vmatprep.subr.bf16.mxu0 %v2416_v30  ;;  %2836 = vmatprep.subr.bf16.mxu1 %v2544_v32  ;;  %v2521_v30 = vld [vmem:[#allocation6 + $0x4f0] sm:$0xff]  ;;  %v2402_v32 = vld [vmem:[#allocation6 + $0x138] sm:$0xff] }
 0x36a   :  { %2796 = vmatpush1.bf16.msra.mxu0 %v2415_v33  ;;  %2837 = vmatpush1.bf16.msra.mxu1 %v2543_v34  ;;  %v2530_v33 = vld [vmem:[#allocation6 + $0x538] sm:$0xff] }
 0x36b   :  { %2797 = vmatprep.subr.bf16.mxu0 %v2424_v41  ;;  %2838 = vmatprep.subr.bf16.mxu1 %v2552_v35  ;;  %v2410_v34 = vld [vmem:[#allocation6 + $0x178] sm:$0xff]  ;;  %v2409_v35 = vld [vmem:[#allocation6 + $0x170] sm:$0xff] }
 0x36c   :  { %v2538_v41 = vld [vmem:[#allocation6 + $0x578] sm:$0xff] }
 0x36e   :  { %2798 = vmatpush1.bf16.msra.mxu0 %v2423_v46  ;;  %2839 = vmatpush1.bf16.msra.mxu1 %v2551_v37  ;;  %v2537_v46 = vld [vmem:[#allocation6 + $0x570] sm:$0xff] }
 0x36f   :  { %2799 = vmatprep.subr.bf16.mxu0 %v2432_v38  ;;  %2840 = vmatprep.subr.bf16.mxu1 %v2560_v2  ;;  %v2418_v2 = vld [vmem:[#allocation6 + $0x1b8] sm:$0xff] }
 0x372   :  { %2800 = vmatpush1.bf16.msra.mxu0 %v2431_v51  ;;  %2841 = vmatpush1.bf16.msra.mxu1 %v2559_v42  ;;  %v2546_v51 = vld [vmem:[#allocation6 + $0x5b8] sm:$0xff] }
 0x373   :  { %2801 = vmatprep.subr.bf16.mxu0 %v2440_v43  ;;  %2842 = vmatprep.subr.bf16.mxu1 %v2568_v21 }
 0x376   :  { %2802 = vmatpush1.bf16.msra.mxu0 %v2439_v16  ;;  %2843 = vmatpush1.bf16.msra.mxu1 %v2567_v6 }
 0x377   :  { %2803 = vmatprep.subr.bf16.mxu0 %v2448_v44  ;;  %2844 = vmatprep.subr.bf16.mxu1 %v2576_v45  ;;  %v2417_v45 = vld [vmem:[#allocation6 + $0x1b0] sm:$0xff] }
 0x37a   :  { %2804 = vmatpush1.bf16.msra.mxu0 %v2447_v47  ;;  %2845 = vmatpush1.bf16.msra.mxu1 %v2575_v52  ;;  %v2545_v47 = vld [vmem:[#allocation6 + $0x5b0] sm:$0xff]  ;;  %v2426_v52 = vld [vmem:[#allocation6 + $0x1f8] sm:$0xff] }
 0x37b   :  { %2805 = vmatprep.subr.bf16.mxu0 %v2456_v54  ;;  %2846 = vmatprep.subr.bf16.mxu1 %v2584_v0  ;;  %v2554_v54 = vld [vmem:[#allocation6 + $0x5f8] sm:$0xff]  ;;  %v2425_v0 = vld [vmem:[#allocation6 + $0x1f0] sm:$0xff] }
 0x37e   :  { %2806 = vmatpush1.bf16.msra.mxu0 %v2455_v22  ;;  %2847 = vmatpush1.bf16.msra.mxu1 %v2583_v3  ;;  %v2553_v22 = vld [vmem:[#allocation6 + $0x5f0] sm:$0xff]  ;;  %v2434_v3 = vld [vmem:[#allocation6 + $0x238] sm:$0xff] }
 0x37f   :  { %2807 = vmatprep.subr.bf16.mxu0 %v2464_v1  ;;  %2848 = vmatprep.subr.bf16.mxu1 %v2592_v56  ;;  %v2562_v1 = vld [vmem:[#allocation6 + $0x638] sm:$0xff]  ;;  %v2433_v56 = vld [vmem:[#allocation6 + $0x230] sm:$0xff] }
 0x382   :  { %2808 = vmatpush1.bf16.msra.mxu0 %v2463_v23  ;;  %2849 = vmatpush1.bf16.msra.mxu1 %v2591_v57  ;;  %v2561_v23 = vld [vmem:[#allocation6 + $0x630] sm:$0xff]  ;;  %v2442_v57 = vld [vmem:[#allocation6 + $0x278] sm:$0xff] }
 0x383   :  { %2809 = vmatprep.subr.bf16.mxu0 %v2472_v39  ;;  %2850 = vmatprep.subr.bf16.mxu1 %v2600_v9  ;;  %v2570_v39 = vld [vmem:[#allocation6 + $0x678] sm:$0xff]  ;;  %v2441_v9 = vld [vmem:[#allocation6 + $0x270] sm:$0xff] }
 0x386   :  { %2810 = vmatpush1.bf16.msra.mxu0 %v2471_v40  ;;  %2851 = vmatpush1.bf16.msra.mxu1 %v2599_v60  ;;  %v2569_v40 = vld [vmem:[#allocation6 + $0x670] sm:$0xff]  ;;  %v2450_v60 = vld [vmem:[#allocation6 + $0x2b8] sm:$0xff] }
 0x387   :  { %2811 = vmatprep.subr.bf16.mxu0 %v2480_v61  ;;  %2852 = vmatprep.subr.bf16.mxu1 %v2608_v62  ;;  %v2578_v61 = vld [vmem:[#allocation6 + $0x6b8] sm:$0xff]  ;;  %v2449_v62 = vld [vmem:[#allocation6 + $0x2b0] sm:$0xff] }
 0x38a   :  { %2812 = vmatpush1.bf16.msra.mxu0 %v2479_v5  ;;  %2853 = vmatpush1.bf16.msra.mxu1 %v2607_v7  ;;  %v2577_v5 = vld [vmem:[#allocation6 + $0x6b0] sm:$0xff]  ;;  %v2458_v7 = vld [vmem:[#allocation6 + $0x2f8] sm:$0xff] }
 0x38b   :  { %2813 = vmatprep.subr.bf16.mxu0 %v2488_v8  ;;  %2854 = vmatprep.subr.bf16.mxu1 %v2616_v10  ;;  %v2586_v8 = vld [vmem:[#allocation6 + $0x6f8] sm:$0xff]  ;;  %v2457_v10 = vld [vmem:[#allocation6 + $0x2f0] sm:$0xff] }
 0x38e   :  { %2814 = vmatpush1.bf16.msra.mxu0 %v2487_v11  ;;  %2855 = vmatpush1.bf16.msra.mxu1 %v2615_v12  ;;  %v2585_v11 = vld [vmem:[#allocation6 + $0x6f0] sm:$0xff]  ;;  %v2466_v12 = vld [vmem:[#allocation6 + $0x338] sm:$0xff] }
 0x38f   :  { %2865 = vmatprep.subr.bf16.mxu0 %v2370_v53  ;;  %2906 = vmatprep.subr.bf16.mxu1 %v2498_v13  ;;  %v2594_v53 = vld [vmem:[#allocation6 + $0x738] sm:$0xff]  ;;  %v2465_v13 = vld [vmem:[#allocation6 + $0x330] sm:$0xff] }
 0x391   :  { %2816 = vmatmul.mubr.bf16.vlgmr.msra.gmra.mrb[16].mxu0 %v5263_v4  ;;  %2857 = vmatmul.mubr.bf16.vlgmr.msra.gmra.mrb[16].mxu1 %v5267_v55 }
 0x392   :  { %2866 = vmatpush1.bf16.msra.mxu0 %v2369_v14  ;;  %2907 = vmatpush1.bf16.msra.mxu1 %v2497_v15  ;;  %v2593_v14 = vld [vmem:[#allocation6 + $0x730] sm:$0xff]  ;;  %v5290_v15 = vsub.s32 1, %v5132_v59 }
 0x393   :  { %2867 = vmatprep.subr.bf16.mxu0 %v2378_v17  ;;  %2908 = vmatprep.subr.bf16.mxu1 %v2506_v18  ;;  %v2474_v17 = vld [vmem:[#allocation6 + $0x378] sm:$0xff] }
 0x394   :  { %2897 = vmatprep.mubr.bf16.mxu0 %v5253_v48  ;;  %2938 = vmatprep.mubr.bf16.mxu1 %v5255_v49  ;;  %v2401_v48 = vld [vmem:[#allocation6 + $0x130] sm:$0xff]  ;;  %v2602_v18 = vld [vmem:[#allocation6 + $0x778] sm:$0xff] }
 0x395   :  { %v2529_v49 = vld [vmem:[#allocation6 + $0x530] sm:$0xff] }
 0x396   :  { %2868 = vmatpush1.bf16.msra.mxu0 %v2377_v19  ;;  %2909 = vmatpush1.bf16.msra.mxu1 %v2505_v20  ;;  %v5292_v19 = vld [vmem:[#allocation4] sm:$0xff]  ;;  %v5295_v20 = vsub.s32 3, %v5132_v59 }
 0x397   :  { %2869 = vmatprep.subr.bf16.mxu0 %v2386_v24  ;;  %2910 = vmatprep.subr.bf16.mxu1 %v2514_v25  ;;  %v2473_v24 = vld [vmem:[#allocation6 + $0x370] sm:$0xff] }
 0x398   :  { %v2601_v25 = vld [vmem:[#allocation6 + $0x770] sm:$0xff] }
 0x39a   :  { %2870 = vmatpush1.bf16.msra.mxu0 %v2385_v28  ;;  %2911 = vmatpush1.bf16.msra.mxu1 %v2513_v26  ;;  %v1119_v28 = vrot.slane %v5292_v19, %v5290_v15  ;;  %v2482_v26 = vld [vmem:[#allocation6 + $0x3b8] sm:$0xff] }
 0x39b   :  { %2871 = vmatprep.subr.bf16.mxu0 %v2394_v27  ;;  %2912 = vmatprep.subr.bf16.mxu1 %v2522_v29  ;;  %v2610_v27 = vld [vmem:[#allocation6 + $0x7b8] sm:$0xff]  ;;  %v1127_v29 = vrot.slane %v5292_v19, %v5295_v20 }
 0x39e   :  { %2872 = vmatpush1.bf16.msra.mxu0 %v2393_v36  ;;  %2913 = vmatpush1.bf16.msra.mxu1 %v2521_v30  ;;  %v2481_v36 = vld [vmem:[#allocation6 + $0x3b0] sm:$0xff] }
 0x39f   :  { %2873 = vmatprep.subr.bf16.mxu0 %v2402_v32  ;;  %2914 = vmatprep.subr.bf16.mxu1 %v2530_v33  ;;  %v2609_v30 = vld [vmem:[#allocation6 + $0x7b0] sm:$0xff]  ;;  %v4544_v32 = vadd.f32 %v5239_v58, %v1119_v28  ;;  %v2490_v33 = vld [vmem:[#allocation6 + $0x3f8] sm:$0xff]  ;;  %v1881_v28 = vld [vmem:[#allocation5 + $0x1c8] sm:$0xff] }
 0x3a2   :  { %2874 = vmatpush1.bf16.msra.mxu0 %v2401_v48  ;;  %2915 = vmatpush1.bf16.msra.mxu1 %v2529_v49  ;;  %v2618_v48 = vld [vmem:[#allocation6 + $0x7f8] sm:$0xff]  ;;  %v4546_v49 = vadd.f32 %v5241_v63, %v1127_v29  ;;  %v1833_v63 = vld [vmem:[#allocation5 + $0x48] sm:$0xff]  ;;  %v2008_v29 = vld [vmem:[#allocation5 + $0x5c0] sm:$0xff] }
 0x3a3   :  { %2875 = vmatprep.subr.bf16.mxu0 %v2410_v34  ;;  %2916 = vmatprep.subr.bf16.mxu1 %v2538_v41  ;;  %v2489_v34 = vld [vmem:[#allocation6 + $0x3f0] sm:$0xff] }
 0x3a4   :  { %v5281_v37 = vpop.f32.mrb[4].mxu0  ;;  %v5283_v38 = vpop.f32.mrb[4].mxu1  ;;  %v2617_v41 = vld [vmem:[#allocation6 + $0x7f0] sm:$0xff] }
 0x3a5   :  { %v5285_v42 = vpop.f32.mrb[5].mxu0  ;;  %v5287_v43 = vpop.f32.mrb[5].mxu1 }
 0x3a6   :  { %v1641_v21 = vpop.f32.mrb[6].mxu0  ;;  %v1805_v16 = vpop.f32.mrb[6].mxu1  ;;  %2876 = vmatpush1.bf16.msra.mxu0 %v2409_v35  ;;  %2917 = vmatpush1.bf16.msra.mxu1 %v2537_v46  ;;  %v1809_v35 = vmax.f32 %v4544_v32, 0.0  ;;  %v1825_v46 = vld [vmem:[#allocation5 + $0x8] sm:$0xff]  ;;  %v1888_v32 = vld [vmem:[#allocation5 + $0x200] sm:$0xff] }
 0x3a7   :  { %v1642_v6 = vpop.f32.mrb[7].mxu0  ;;  %v1806_v44 = vpop.f32.mrb[7].mxu1  ;;  %2877 = vmatprep.subr.bf16.mxu0 %v2418_v2  ;;  %2918 = vmatprep.subr.bf16.mxu1 %v2546_v51  ;;  %v1953_v2 = vld [vmem:[#allocation5 + $0x408] sm:$0xff]  ;;  %v1811_v51 = vmax.f32 %v4546_v49, 0.0  ;;  %v1824_v21 = vld [vmem:[#allocation5] sm:$0xff] }
 0x3a8   :  { %v5303_v58 = vpack.c.bf16 %v1809_v35, %v1809_v35  ;;  %v1952_v16 = vld [vmem:[#allocation5 + $0x400] sm:$0xff]  ;;  %v1961_v44 = vld [vmem:[#allocation5 + $0x448] sm:$0xff] }
 0x3a9   :  { %v5305_v6 = vpack.c.bf16 %v1811_v51, %v1811_v51  ;;  %v2025_v49 = vld [vmem:[#allocation5 + $0x648] sm:$0xff]  ;;  %v2032_v51 = vld [vmem:[#allocation5 + $0x680] sm:$0xff] }
 0x3aa   :  { %2878 = vmatpush1.bf16.msra.mxu0 %v2417_v45  ;;  %2919 = vmatpush1.bf16.msra.mxu1 %v2545_v47  ;;  %v1832_v45 = vld [vmem:[#allocation5 + $0x40] sm:$0xff]  ;;  %v1905_v35 = vld [vmem:[#allocation5 + $0x288] sm:$0xff] }
 0x3ab   :  { %2879 = vmatprep.subr.bf16.mxu0 %v2426_v52  ;;  %2920 = vmatprep.subr.bf16.mxu1 %v2554_v54  ;;  %v1960_v47 = vld [vmem:[#allocation5 + $0x440] sm:$0xff]  ;;  %v1841_v52 = vld [vmem:[#allocation5 + $0x88] sm:$0xff] }
 0x3ac   :  { %v1969_v54 = vld [vmem:[#allocation5 + $0x488] sm:$0xff] }
 0x3ae   :  { %2880 = vmatpush1.bf16.msra.mxu0 %v2425_v0  ;;  %2921 = vmatpush1.bf16.msra.mxu1 %v2553_v22  ;;  %v1849_v0 = vld [vmem:[#allocation5 + $0xc8] sm:$0xff] }
 0x3af   :  { %2881 = vmatprep.subr.bf16.mxu0 %v2434_v3  ;;  %2922 = vmatprep.subr.bf16.mxu1 %v2562_v1  ;;  %v1977_v22 = vld [vmem:[#allocation5 + $0x4c8] sm:$0xff]  ;;  %v1848_v3 = vld [vmem:[#allocation5 + $0xc0] sm:$0xff] }
 0x3b0   :  { %v1976_v1 = vld [vmem:[#allocation5 + $0x4c0] sm:$0xff] }
 0x3b2   :  { %2882 = vmatpush1.bf16.msra.mxu0 %v2433_v56  ;;  %2923 = vmatpush1.bf16.msra.mxu1 %v2561_v23  ;;  %v1857_v56 = vld [vmem:[#allocation5 + $0x108] sm:$0xff] }
 0x3b3   :  { %2883 = vmatprep.subr.bf16.mxu0 %v2442_v57  ;;  %2924 = vmatprep.subr.bf16.mxu1 %v2570_v39  ;;  %v1985_v23 = vld [vmem:[#allocation5 + $0x508] sm:$0xff]  ;;  %v1856_v57 = vld [vmem:[#allocation5 + $0x100] sm:$0xff] }
 0x3b4   :  { %v1984_v39 = vld [vmem:[#allocation5 + $0x500] sm:$0xff] }
 0x3b6   :  { %2884 = vmatpush1.bf16.msra.mxu0 %v2441_v9  ;;  %2925 = vmatpush1.bf16.msra.mxu1 %v2569_v40  ;;  %v1865_v9 = vld [vmem:[#allocation5 + $0x148] sm:$0xff] }
 0x3b7   :  { %2885 = vmatprep.subr.bf16.mxu0 %v2450_v60  ;;  %2926 = vmatprep.subr.bf16.mxu1 %v2578_v61  ;;  %v1993_v40 = vld [vmem:[#allocation5 + $0x548] sm:$0xff]  ;;  %v1864_v60 = vld [vmem:[#allocation5 + $0x140] sm:$0xff] }
 0x3ba   :  { %2886 = vmatpush1.bf16.msra.mxu0 %v2449_v62  ;;  %2927 = vmatpush1.bf16.msra.mxu1 %v2577_v5  ;;  %v1992_v5 = vld [vmem:[#allocation5 + $0x540] sm:$0xff] }
 0x3bb   :  { %2887 = vmatprep.subr.bf16.mxu0 %v2458_v7  ;;  %2928 = vmatprep.subr.bf16.mxu1 %v2586_v8  ;;  %v1873_v7 = vld [vmem:[#allocation5 + $0x188] sm:$0xff] }
 0x3be   :  { %2888 = vmatpush1.bf16.msra.mxu0 %v2457_v10  ;;  %2929 = vmatpush1.bf16.msra.mxu1 %v2585_v11 }
 0x3bf   :  { %2889 = vmatprep.subr.bf16.mxu0 %v2466_v12  ;;  %2930 = vmatprep.subr.bf16.mxu1 %v2594_v53  ;;  %v2001_v12 = vld [vmem:[#allocation5 + $0x588] sm:$0xff] }
 0x3c2   :  { %2890 = vmatpush1.bf16.msra.mxu0 %v2465_v13  ;;  %2931 = vmatpush1.bf16.msra.mxu1 %v2593_v14 }
 0x3c3   :  { %2891 = vmatprep.subr.bf16.mxu0 %v2474_v17  ;;  %2932 = vmatprep.subr.bf16.mxu1 %v2602_v18 }
 0x3c6   :  { %2892 = vmatpush1.bf16.msra.mxu0 %v2473_v24  ;;  %2933 = vmatpush1.bf16.msra.mxu1 %v2601_v25  ;;  %v1872_v24 = vld [vmem:[#allocation5 + $0x180] sm:$0xff] }
 0x3c7   :  { %2893 = vmatprep.subr.bf16.mxu0 %v2482_v26  ;;  %2934 = vmatprep.subr.bf16.mxu1 %v2610_v27  ;;  %v2000_v25 = vld [vmem:[#allocation5 + $0x580] sm:$0xff]  ;;  %v2009_v26 = vld [vmem:[#allocation5 + $0x5c8] sm:$0xff] }
 0x3c8   :  { %v1880_v27 = vld [vmem:[#allocation5 + $0x1c0] sm:$0xff] }
 0x3ca   :  { %2894 = vmatpush1.bf16.msra.mxu0 %v2481_v36  ;;  %2935 = vmatpush1.bf16.msra.mxu1 %v2609_v30  ;;  %v1889_v36 = vld [vmem:[#allocation5 + $0x208] sm:$0xff] }
 0x3cb   :  { %2895 = vmatprep.subr.bf16.mxu0 %v2490_v33  ;;  %2936 = vmatprep.subr.bf16.mxu1 %v2618_v48  ;;  %v2017_v30 = vld [vmem:[#allocation5 + $0x608] sm:$0xff]  ;;  %v2016_v33 = vld [vmem:[#allocation5 + $0x600] sm:$0xff] }
 0x3cc   :  { %v1897_v48 = vld [vmem:[#allocation5 + $0x248] sm:$0xff] }
 0x3ce   :  { %2896 = vmatpush1.bf16.msra.mxu0 %v2489_v34  ;;  %2937 = vmatpush1.bf16.msra.mxu1 %v2617_v41  ;;  %v1896_v34 = vld [vmem:[#allocation5 + $0x240] sm:$0xff] }
 0x3cf   :  { %2947 = vmatprep.subr.bf16.mxu0 %v1825_v46  ;;  %2988 = vmatprep.subr.bf16.mxu1 %v1953_v2  ;;  %v2024_v41 = vld [vmem:[#allocation5 + $0x640] sm:$0xff]  ;;  %v2033_v46 = vld [vmem:[#allocation5 + $0x688] sm:$0xff] }
 0x3d0   :  { %v1904_v2 = vld [vmem:[#allocation5 + $0x280] sm:$0xff] }
 0x3d1   :  { %2898 = vmatmul.mubr.bf16.vlgmr.msra.gmra.mrb[20].mxu0 %v5263_v4  ;;  %2939 = vmatmul.mubr.bf16.vlgmr.msra.gmra.mrb[20].mxu1 %v5267_v55  ;;  %v1840_v4 = vld [vmem:[#allocation5 + $0x80] sm:$0xff] }
 0x3d2   :  { %2948 = vmatpush1.bf16.msra.mxu0 %v1824_v21  ;;  %2979 = vmatprep.mubr.bf16.mxu0 %v5303_v58  ;;  %v1968_v55 = vld [vmem:[#allocation5 + $0x480] sm:$0xff]  ;;  %v1913_v21 = vld [vmem:[#allocation5 + $0x2c8] sm:$0xff] }
 0x3d3   :  { %2989 = vmatpush1.bf16.msra.mxu1 %v1952_v16  ;;  %3020 = vmatprep.mubr.bf16.mxu1 %v5305_v6  ;;  %v2041_v16 = vld [vmem:[#allocation5 + $0x6c8] sm:$0xff] }
 0x3d4   :  { %2949 = vmatprep.subr.bf16.mxu0 %v1833_v63  ;;  %2990 = vmatprep.subr.bf16.mxu1 %v1961_v44  ;;  %v1912_v63 = vld [vmem:[#allocation5 + $0x2c0] sm:$0xff] }
 0x3d5   :  { %v2040_v44 = vld [vmem:[#allocation5 + $0x6c0] sm:$0xff] }
 0x3d6   :  { %2950 = vmatpush1.bf16.msra.mxu0 %v1832_v45  ;;  %v1921_v45 = vld [vmem:[#allocation5 + $0x308] sm:$0xff] }
 0x3d7   :  { %2991 = vmatpush1.bf16.msra.mxu1 %v1960_v47  ;;  %2951 = vmatprep.subr.bf16.mxu0 %v1841_v52  ;;  %v2049_v47 = vld [vmem:[#allocation5 + $0x708] sm:$0xff]  ;;  %v5316_v52 = vsub.s32 0, %v5132_v59 }
 0x3d8   :  { %2992 = vmatprep.subr.bf16.mxu1 %v1969_v54  ;;  %v1920_v54 = vld [vmem:[#allocation5 + $0x300] sm:$0xff] }
 0x3da   :  { %2952 = vmatpush1.bf16.msra.mxu0 %v1840_v4  ;;  %v5319_v4 = vsub.s32 2, %v5132_v59 }
 0x3db   :  { %2993 = vmatpush1.bf16.msra.mxu1 %v1968_v55  ;;  %2953 = vmatprep.subr.bf16.mxu0 %v1849_v0  ;;  %v2048_v55 = vld [vmem:[#allocation5 + $0x700] sm:$0xff]  ;;  %v1929_v0 = vld [vmem:[#allocation5 + $0x348] sm:$0xff] }
 0x3dc   :  { %2994 = vmatprep.subr.bf16.mxu1 %v1977_v22  ;;  %v1134_v22 = vsub.s32 5, %v5132_v59 }
 0x3de   :  { %2954 = vmatpush1.bf16.msra.mxu0 %v1848_v3  ;;  %v2057_v3 = vld [vmem:[#allocation5 + $0x748] sm:$0xff] }
 0x3df   :  { %2995 = vmatpush1.bf16.msra.mxu1 %v1976_v1  ;;  %2955 = vmatprep.subr.bf16.mxu0 %v1857_v56  ;;  %v1142_v1 = vsub.s32 7, %v5132_v59  ;;  %v1115_v56 = vrot.slane %v5292_v19, %v5316_v52 }
 0x3e0   :  { %2996 = vmatprep.subr.bf16.mxu1 %v1985_v23  ;;  %v1928_v23 = vld [vmem:[#allocation5 + $0x340] sm:$0xff] }
 0x3e2   :  { %2956 = vmatpush1.bf16.msra.mxu0 %v1856_v57  ;;  %v1123_v57 = vrot.slane %v5292_v19, %v5319_v4 }
 0x3e3   :  { %2997 = vmatpush1.bf16.msra.mxu1 %v1984_v39  ;;  %2957 = vmatprep.subr.bf16.mxu0 %v1865_v9  ;;  %v2056_v39 = vld [vmem:[#allocation5 + $0x740] sm:$0xff]  ;;  %v1937_v9 = vld [vmem:[#allocation5 + $0x388] sm:$0xff] }
 0x3e4   :  { %v2653_v61 = vpop.f32.mrb[8].mxu0  ;;  %v2694_v62 = vpop.f32.mrb[8].mxu1  ;;  %2998 = vmatprep.subr.bf16.mxu1 %v1993_v40  ;;  %v1135_v40 = vrot.slane %v5292_v19, %v1134_v22 }
 0x3e5   :  { %v5311_v8 = vadd.f32 %v2694_v62, %v2653_v61  ;;  %v2655_v10 = vpop.f32.mrb[9].mxu0  ;;  %v2696_v11 = vpop.f32.mrb[9].mxu1  ;;  %v1143_v61 = vrot.slane %v5292_v19, %v1142_v1  ;;  %v4543_v62 = vadd.f32 %v5235_v50, %v1115_v56  ;;  %v2072_v50 = vld [vmem:[#allocation5 + $0x7c0] sm:$0xff] }
 0x3e6   :  { %v5313_v53 = vadd.f32 %v2696_v11, %v2655_v10  ;;  %v2657_v13 = vpop.f32.mrb[10].mxu0  ;;  %v2698_v14 = vpop.f32.mrb[10].mxu1  ;;  %2958 = vmatpush1.bf16.msra.mxu0 %v1864_v60  ;;  %v2065_v60 = vld [vmem:[#allocation5 + $0x788] sm:$0xff]  ;;  %v2064_v10 = vld [vmem:[#allocation5 + $0x780] sm:$0xff] }
 0x3e7   :  { %2999 = vmatpush1.bf16.msra.mxu1 %v1992_v5  ;;  %v2658_v17 = vpop.f32.mrb[11].mxu0  ;;  %v2699_v18 = vpop.f32.mrb[11].mxu1  ;;  %2959 = vmatprep.subr.bf16.mxu0 %v1873_v7  ;;  %v1936_v5 = vld [vmem:[#allocation5 + $0x380] sm:$0xff]  ;;  %v4545_v7 = vadd.f32 %v5237_v31, %v1123_v57  ;;  %v1945_v11 = vld [vmem:[#allocation5 + $0x3c8] sm:$0xff]  ;;  %v4550_v14 = vadd.f32 %v5287_v43, %v1143_v61 }
 0x3e8   :  { %3000 = vmatprep.subr.bf16.mxu1 %v2001_v12  ;;  %v4548_v12 = vadd.f32 %v5285_v42, %v1135_v40  ;;  %v2073_v13 = vld [vmem:[#allocation5 + $0x7c8] sm:$0xff]  ;;  %v1808_v17 = vmax.f32 %v4543_v62, 0.0  ;;  %v1944_v18 = vld [vmem:[#allocation5 + $0x3c0] sm:$0xff] }
 0x3e9   :  { %v1815_v31 = vmax.f32 %v4550_v14, 0.0  ;;  %v2080_v42 = vld [vmem:[#allocation5 + $0x800] sm:$0xff]  ;;  %v2129_v57 = vld [vmem:[#allocation5 + $0x988] sm:$0xff] }
 0x3ea   :  { %2960 = vmatpush1.bf16.msra.mxu0 %v1872_v24  ;;  %v1810_v24 = vmax.f32 %v4545_v7, 0.0  ;;  %v2208_v43 = vld [vmem:[#allocation5 + $0xc00] sm:$0xff]  ;;  %v2265_v14 = vld [vmem:[#allocation5 + $0xdc8] sm:$0xff] }
 0x3eb   :  { %3001 = vmatpush1.bf16.msra.mxu1 %v2000_v25  ;;  %2961 = vmatprep.subr.bf16.mxu0 %v1881_v28  ;;  %v2081_v25 = vld [vmem:[#allocation5 + $0x808] sm:$0xff]  ;;  %v1813_v28 = vmax.f32 %v4548_v12, 0.0  ;;  %v2256_v12 = vld [vmem:[#allocation5 + $0xd80] sm:$0xff] }
 0x3ec   :  { %3002 = vmatprep.subr.bf16.mxu1 %v2009_v26  ;;  %v2209_v26 = vld [vmem:[#allocation5 + $0xc08] sm:$0xff] }
 0x3ee   :  { %2962 = vmatpush1.bf16.msra.mxu0 %v1880_v27  ;;  %v5337_v27 = vpack.c.bf16 %v1808_v17, %v1808_v17  ;;  %v2136_v17 = vld [vmem:[#allocation5 + $0x9c0] sm:$0xff] }
 0x3ef   :  { %3003 = vmatpush1.bf16.msra.mxu1 %v2008_v29  ;;  %2963 = vmatprep.subr.bf16.mxu0 %v1889_v36  ;;  %v5339_v29 = vpack.c.bf16 %v1810_v24, %v1810_v24  ;;  %v5341_v36 = vpack.c.bf16 %v1813_v28, %v1813_v28  ;;  %v2145_v24 = vld [vmem:[#allocation5 + $0xa08] sm:$0xff]  ;;  %v2272_v28 = vld [vmem:[#allocation5 + $0xe00] sm:$0xff] }
 0x3f0   :  { %3004 = vmatprep.subr.bf16.mxu1 %v2017_v30  ;;  %v2089_v30 = vld [vmem:[#allocation5 + $0x848] sm:$0xff] }
 0x3f2   :  { %2964 = vmatpush1.bf16.msra.mxu0 %v1888_v32  ;;  %v5344_v32 = vpack.c.bf16 %v1815_v31, %v1815_v31  ;;  %v2281_v31 = vld [vmem:[#allocation5 + $0xe48] sm:$0xff] }
 0x3f3   :  { %3005 = vmatpush1.bf16.msra.mxu1 %v2016_v33  ;;  %2965 = vmatprep.subr.bf16.mxu0 %v1897_v48  ;;  %v2217_v33 = vld [vmem:[#allocation5 + $0xc48] sm:$0xff]  ;;  %v2088_v48 = vld [vmem:[#allocation5 + $0x840] sm:$0xff] }
 0x3f4   :  { %3006 = vmatprep.subr.bf16.mxu1 %v2025_v49  ;;  %v2216_v49 = vld [vmem:[#allocation5 + $0xc40] sm:$0xff] }
 0x3f6   :  { %2966 = vmatpush1.bf16.msra.mxu0 %v1896_v34  ;;  %v2097_v34 = vld [vmem:[#allocation5 + $0x888] sm:$0xff] }
 0x3f7   :  { %3007 = vmatpush1.bf16.msra.mxu1 %v2024_v41  ;;  %2967 = vmatprep.subr.bf16.mxu0 %v1905_v35  ;;  %v2225_v41 = vld [vmem:[#allocation5 + $0xc88] sm:$0xff]  ;;  %v2096_v35 = vld [vmem:[#allocation5 + $0x880] sm:$0xff] }
 0x3f8   :  { %3008 = vmatprep.subr.bf16.mxu1 %v2033_v46  ;;  %v2224_v46 = vld [vmem:[#allocation5 + $0xc80] sm:$0xff] }
 0x3fa   :  { %2968 = vmatpush1.bf16.msra.mxu0 %v1904_v2  ;;  %v2105_v2 = vld [vmem:[#allocation5 + $0x8c8] sm:$0xff] }
 0x3fb   :  { %3009 = vmatpush1.bf16.msra.mxu1 %v2032_v51  ;;  %2969 = vmatprep.subr.bf16.mxu0 %v1913_v21  ;;  %v2233_v51 = vld [vmem:[#allocation5 + $0xcc8] sm:$0xff]  ;;  %v2104_v21 = vld [vmem:[#allocation5 + $0x8c0] sm:$0xff] }
 0x3fc   :  { %3010 = vmatprep.subr.bf16.mxu1 %v2041_v16  ;;  %v2232_v16 = vld [vmem:[#allocation5 + $0xcc0] sm:$0xff] }
 0x3fe   :  { %2970 = vmatpush1.bf16.msra.mxu0 %v1912_v63  ;;  %v2113_v63 = vld [vmem:[#allocation5 + $0x908] sm:$0xff] }
 0x3ff   :  { %3011 = vmatpush1.bf16.msra.mxu1 %v2040_v44  ;;  %2971 = vmatprep.subr.bf16.mxu0 %v1921_v45  ;;  %v2241_v44 = vld [vmem:[#allocation5 + $0xd08] sm:$0xff]  ;;  %v2112_v45 = vld [vmem:[#allocation5 + $0x900] sm:$0xff] }
 0x400   :  { %3012 = vmatprep.subr.bf16.mxu1 %v2049_v47  ;;  %v2240_v47 = vld [vmem:[#allocation5 + $0xd00] sm:$0xff] }
 0x402   :  { %2972 = vmatpush1.bf16.msra.mxu0 %v1920_v54  ;;  %v2121_v54 = vld [vmem:[#allocation5 + $0x948] sm:$0xff] }
 0x403   :  { %3013 = vmatpush1.bf16.msra.mxu1 %v2048_v55  ;;  %2973 = vmatprep.subr.bf16.mxu0 %v1929_v0  ;;  %v2249_v55 = vld [vmem:[#allocation5 + $0xd48] sm:$0xff]  ;;  %v2120_v0 = vld [vmem:[#allocation5 + $0x940] sm:$0xff] }
 0x404   :  { %3014 = vmatprep.subr.bf16.mxu1 %v2057_v3 }
 0x406   :  { %2974 = vmatpush1.bf16.msra.mxu0 %v1928_v23  ;;  %v2248_v23 = vld [vmem:[#allocation5 + $0xd40] sm:$0xff] }
 0x407   :  { %3015 = vmatpush1.bf16.msra.mxu1 %v2056_v39  ;;  %2975 = vmatprep.subr.bf16.mxu0 %v1937_v9 }
 0x408   :  { %3016 = vmatprep.subr.bf16.mxu1 %v2065_v60  ;;  %v2257_v60 = vld [vmem:[#allocation5 + $0xd88] sm:$0xff] }
 0x40a   :  { %2976 = vmatpush1.bf16.msra.mxu0 %v1936_v5 }
 0x40b   :  { %3017 = vmatpush1.bf16.msra.mxu1 %v2064_v10  ;;  %2977 = vmatprep.subr.bf16.mxu0 %v1945_v11  ;;  %v2128_v11 = vld [vmem:[#allocation5 + $0x980] sm:$0xff] }
 0x40c   :  { %3018 = vmatprep.subr.bf16.mxu1 %v2073_v13  ;;  %v2137_v13 = vld [vmem:[#allocation5 + $0x9c8] sm:$0xff] }
 0x40e   :  { %2978 = vmatpush1.bf16.msra.mxu0 %v1944_v18  ;;  %v2264_v18 = vld [vmem:[#allocation5 + $0xdc0] sm:$0xff] }
 0x40f   :  { %3019 = vmatpush1.bf16.msra.mxu1 %v2072_v50  ;;  %3029 = vmatprep.subr.bf16.mxu0 %v2081_v25  ;;  %v2273_v50 = vld [vmem:[#allocation5 + $0xe08] sm:$0xff]  ;;  %v2144_v25 = vld [vmem:[#allocation5 + $0xa00] sm:$0xff] }
 0x410   :  { %3070 = vmatprep.subr.bf16.mxu1 %v2209_v26  ;;  %v2153_v26 = vld [vmem:[#allocation5 + $0xa48] sm:$0xff] }
 0x411   :  { %2980 = vmatmul.mubr.bf16.vlgmr.msra.gmra.mrb[24].mxu0 %v5337_v27 }
 0x412   :  { %3021 = vmatmul.mubr.bf16.vlgmr.msra.gmra.mrb[24].mxu1 %v5339_v29  ;;  %3030 = vmatpush1.bf16.msra.mxu0 %v2080_v42  ;;  %v2152_v42 = vld [vmem:[#allocation5 + $0xa40] sm:$0xff] }
 0x413   :  { %3061 = vmatprep.mubr.bf16.mxu0 %v5341_v36  ;;  %3071 = vmatpush1.bf16.msra.mxu1 %v2208_v43  ;;  %v2280_v43 = vld [vmem:[#allocation5 + $0xe40] sm:$0xff] }
 0x414   :  { %3102 = vmatprep.mubr.bf16.mxu1 %v5344_v32  ;;  %3031 = vmatprep.subr.bf16.mxu0 %v2089_v30  ;;  %v2161_v30 = vld [vmem:[#allocation5 + $0xa88] sm:$0xff] }
 0x415   :  { %3072 = vmatprep.subr.bf16.mxu1 %v2217_v33  ;;  %v2289_v33 = vld [vmem:[#allocation5 + $0xe88] sm:$0xff] }
 0x416   :  { %3032 = vmatpush1.bf16.msra.mxu0 %v2088_v48  ;;  %v2160_v48 = vld [vmem:[#allocation5 + $0xa80] sm:$0xff] }
 0x417   :  { %3073 = vmatpush1.bf16.msra.mxu1 %v2216_v49  ;;  %3033 = vmatprep.subr.bf16.mxu0 %v2097_v34  ;;  %v2288_v49 = vld [vmem:[#allocation5 + $0xe80] sm:$0xff]  ;;  %v2169_v34 = vld [vmem:[#allocation5 + $0xac8] sm:$0xff] }
 0x418   :  { %3074 = vmatprep.subr.bf16.mxu1 %v2225_v41  ;;  %v2297_v41 = vld [vmem:[#allocation5 + $0xec8] sm:$0xff] }
 0x41a   :  { %3034 = vmatpush1.bf16.msra.mxu0 %v2096_v35  ;;  %v2168_v35 = vld [vmem:[#allocation5 + $0xac0] sm:$0xff] }
 0x41b   :  { %3075 = vmatpush1.bf16.msra.mxu1 %v2224_v46  ;;  %3035 = vmatprep.subr.bf16.mxu0 %v2105_v2  ;;  %v2296_v46 = vld [vmem:[#allocation5 + $0xec0] sm:$0xff]  ;;  %v2177_v2 = vld [vmem:[#allocation5 + $0xb08] sm:$0xff] }
 0x41c   :  { %3076 = vmatprep.subr.bf16.mxu1 %v2233_v51  ;;  %v2305_v51 = vld [vmem:[#allocation5 + $0xf08] sm:$0xff] }
 0x41e   :  { %3036 = vmatpush1.bf16.msra.mxu0 %v2104_v21  ;;  %v1130_v21 = vsub.s32 4, %v5132_v59 }
 0x41f   :  { %3077 = vmatpush1.bf16.msra.mxu1 %v2232_v16  ;;  %3037 = vmatprep.subr.bf16.mxu0 %v2113_v63  ;;  %v2176_v16 = vld [vmem:[#allocation5 + $0xb00] sm:$0xff]  ;;  %v1138_v63 = vsub.s32 6, %v5132_v59 }
 0x420   :  { %3078 = vmatprep.subr.bf16.mxu1 %v2241_v44  ;;  %v2304_v44 = vld [vmem:[#allocation5 + $0xf00] sm:$0xff] }
 0x422   :  { %3038 = vmatpush1.bf16.msra.mxu0 %v2112_v45  ;;  %v2185_v45 = vld [vmem:[#allocation5 + $0xb48] sm:$0xff] }
 0x423   :  { %3079 = vmatpush1.bf16.msra.mxu1 %v2240_v47  ;;  %3039 = vmatprep.subr.bf16.mxu0 %v2121_v54  ;;  %v2313_v47 = vld [vmem:[#allocation5 + $0xf48] sm:$0xff]  ;;  %v1131_v54 = vrot.slane %v5292_v19, %v1130_v21 }
 0x424   :  { %v2735_v3 = vpop.f32.mrb[12].mxu0  ;;  %v2776_v56 = vpop.f32.mrb[12].mxu1  ;;  %3080 = vmatprep.subr.bf16.mxu1 %v2249_v55  ;;  %v2184_v55 = vld [vmem:[#allocation5 + $0xb40] sm:$0xff] }
 0x425   :  { %v5349_v39 = vadd.f32 %v2776_v56, %v2735_v3  ;;  %v2737_v9 = vpop.f32.mrb[13].mxu0  ;;  %v2778_v40 = vpop.f32.mrb[13].mxu1  ;;  %v2312_v3 = vld [vmem:[#allocation5 + $0xf40] sm:$0xff]  ;;  %v2193_v56 = vld [vmem:[#allocation5 + $0xb88] sm:$0xff] }
 0x426   :  { %v5351_v61 = vadd.f32 %v2778_v40, %v2737_v9  ;;  %v2739_v62 = vpop.f32.mrb[14].mxu0  ;;  %v2780_v5 = vpop.f32.mrb[14].mxu1  ;;  %3040 = vmatpush1.bf16.msra.mxu0 %v2120_v0  ;;  %v1139_v0 = vrot.slane %v5292_v19, %v1138_v63  ;;  %v2192_v9 = vld [vmem:[#allocation5 + $0xb80] sm:$0xff] }
 0x427   :  { %3081 = vmatpush1.bf16.msra.mxu1 %v2248_v23  ;;  %v2740_v7 = vpop.f32.mrb[15].mxu0  ;;  %v2781_v10 = vpop.f32.mrb[15].mxu1  ;;  %3041 = vmatprep.subr.bf16.mxu0 %v2129_v57  ;;  %v2321_v23 = vld [vmem:[#allocation5 + $0xf88] sm:$0xff]  ;;  %v4547_v57 = vadd.f32 %v5281_v37, %v1131_v54  ;;  %v2200_v19 = vld [vmem:[#allocation5 + $0xbc0] sm:$0xff] }
 0x428   :  { %3082 = vmatprep.subr.bf16.mxu1 %v2257_v60  ;;  %v4549_v40 = vadd.f32 %v5283_v38, %v1139_v0  ;;  %v2320_v60 = vld [vmem:[#allocation5 + $0xf80] sm:$0xff]  ;;  %v2201_v62 = vld [vmem:[#allocation5 + $0xbc8] sm:$0xff]  ;;  %v1826_v38 = vld [vmem:[#allocation5 + $0x10] sm:$0xff] }
 0x429   :  { %v2329_v5 = vld [vmem:[#allocation5 + $0xfc8] sm:$0xff]  ;;  %v1812_v7 = vmax.f32 %v4547_v57, 0.0 }
 0x42a   :  { %3042 = vmatpush1.bf16.msra.mxu0 %v2128_v11  ;;  %v1814_v10 = vmax.f32 %v4549_v40, 0.0  ;;  %v2328_v11 = vld [vmem:[#allocation5 + $0xfc0] sm:$0xff] }
 0x42b   :  { %3083 = vmatpush1.bf16.msra.mxu1 %v2256_v12  ;;  %3043 = vmatprep.subr.bf16.mxu0 %v2137_v13  ;;  %v1827_v12 = vld [vmem:[#allocation5 + $0x18] sm:$0xff]  ;;  %v5363_v37 = vpack.c.bf16 %v1812_v7, %v1812_v7 }
 0x42c   :  { %3084 = vmatprep.subr.bf16.mxu1 %v2265_v14  ;;  %v1955_v13 = vld [vmem:[#allocation5 + $0x418] sm:$0xff]  ;;  %v5365_v14 = vpack.c.bf16 %v1814_v10, %v1814_v10  ;;  %v2010_v10 = vld [vmem:[#allocation5 + $0x5d0] sm:$0xff] }
 0x42d   :  { %v2011_v7 = vld [vmem:[#allocation5 + $0x5d8] sm:$0xff] }
 0x42e   :  { %3044 = vmatpush1.bf16.msra.mxu0 %v2136_v17  ;;  %v1954_v17 = vld [vmem:[#allocation5 + $0x410] sm:$0xff] }
 0x42f   :  { %3085 = vmatpush1.bf16.msra.mxu1 %v2264_v18  ;;  %3045 = vmatprep.subr.bf16.mxu0 %v2145_v24  ;;  %v1835_v18 = vld [vmem:[#allocation5 + $0x58] sm:$0xff] }
 0x430   :  { %3086 = vmatprep.subr.bf16.mxu1 %v2273_v50  ;;  %v1963_v24 = vld [vmem:[#allocation5 + $0x458] sm:$0xff]  ;;  %v1834_v50 = vld [vmem:[#allocation5 + $0x50] sm:$0xff] }
 0x432   :  { %3046 = vmatpush1.bf16.msra.mxu0 %v2144_v25  ;;  %v1962_v25 = vld [vmem:[#allocation5 + $0x450] sm:$0xff] }
 0x433   :  { %3087 = vmatpush1.bf16.msra.mxu1 %v2272_v28  ;;  %3047 = vmatprep.subr.bf16.mxu0 %v2153_v26  ;;  %v1843_v28 = vld [vmem:[#allocation5 + $0x98] sm:$0xff] }
 0x434   :  { %3088 = vmatprep.subr.bf16.mxu1 %v2281_v31  ;;  %v1971_v26 = vld [vmem:[#allocation5 + $0x498] sm:$0xff]  ;;  %v1842_v31 = vld [vmem:[#allocation5 + $0x90] sm:$0xff] }
 0x436   :  { %3048 = vmatpush1.bf16.msra.mxu0 %v2152_v42  ;;  %v1970_v42 = vld [vmem:[#allocation5 + $0x490] sm:$0xff] }
 0x437   :  { %3089 = vmatpush1.bf16.msra.mxu1 %v2280_v43  ;;  %3049 = vmatprep.subr.bf16.mxu0 %v2161_v30  ;;  %v1851_v43 = vld [vmem:[#allocation5 + $0xd8] sm:$0xff] }
 0x438   :  { %3090 = vmatprep.subr.bf16.mxu1 %v2289_v33  ;;  %v1979_v30 = vld [vmem:[#allocation5 + $0x4d8] sm:$0xff]  ;;  %v1850_v33 = vld [vmem:[#allocation5 + $0xd0] sm:$0xff] }
 0x43a   :  { %3050 = vmatpush1.bf16.msra.mxu0 %v2160_v48  ;;  %v1978_v48 = vld [vmem:[#allocation5 + $0x4d0] sm:$0xff] }
 0x43b   :  { %3091 = vmatpush1.bf16.msra.mxu1 %v2288_v49  ;;  %3051 = vmatprep.subr.bf16.mxu0 %v2169_v34  ;;  %v1859_v49 = vld [vmem:[#allocation5 + $0x118] sm:$0xff] }
 0x43c   :  { %3092 = vmatprep.subr.bf16.mxu1 %v2297_v41  ;;  %v1987_v34 = vld [vmem:[#allocation5 + $0x518] sm:$0xff]  ;;  %v1858_v41 = vld [vmem:[#allocation5 + $0x110] sm:$0xff] }
 0x43e   :  { %3052 = vmatpush1.bf16.msra.mxu0 %v2168_v35  ;;  %v1986_v35 = vld [vmem:[#allocation5 + $0x510] sm:$0xff] }
 0x43f   :  { %3093 = vmatpush1.bf16.msra.mxu1 %v2296_v46  ;;  %3053 = vmatprep.subr.bf16.mxu0 %v2177_v2  ;;  %v1867_v46 = vld [vmem:[#allocation5 + $0x158] sm:$0xff] }
 0x440   :  { %3094 = vmatprep.subr.bf16.mxu1 %v2305_v51  ;;  %v1995_v2 = vld [vmem:[#allocation5 + $0x558] sm:$0xff]  ;;  %v1866_v51 = vld [vmem:[#allocation5 + $0x150] sm:$0xff] }
 0x442   :  { %3054 = vmatpush1.bf16.msra.mxu0 %v2176_v16 }
 0x443   :  { %3095 = vmatpush1.bf16.msra.mxu1 %v2304_v44  ;;  %3055 = vmatprep.subr.bf16.mxu0 %v2185_v45  ;;  %v1994_v45 = vld [vmem:[#allocation5 + $0x550] sm:$0xff] }
 0x444   :  { %3096 = vmatprep.subr.bf16.mxu1 %v2313_v47  ;;  %v1875_v47 = vld [vmem:[#allocation5 + $0x198] sm:$0xff] }
 0x446   :  { %3056 = vmatpush1.bf16.msra.mxu0 %v2184_v55 }
 0x447   :  { %3097 = vmatpush1.bf16.msra.mxu1 %v2312_v3  ;;  %3057 = vmatprep.subr.bf16.mxu0 %v2193_v56  ;;  %v2003_v3 = vld [vmem:[#allocation5 + $0x598] sm:$0xff] }
 0x448   :  { %3098 = vmatprep.subr.bf16.mxu1 %v2321_v23 }
 0x44a   :  { %3058 = vmatpush1.bf16.msra.mxu0 %v2192_v9 }
 0x44b   :  { %3099 = vmatpush1.bf16.msra.mxu1 %v2320_v60  ;;  %3059 = vmatprep.subr.bf16.mxu0 %v2201_v62  ;;  %v1874_v60 = vld [vmem:[#allocation5 + $0x190] sm:$0xff] }
 0x44c   :  { %3100 = vmatprep.subr.bf16.mxu1 %v2329_v5  ;;  %v2002_v62 = vld [vmem:[#allocation5 + $0x590] sm:$0xff]  ;;  %v1883_v5 = vld [vmem:[#allocation5 + $0x1d8] sm:$0xff] }
 0x44e   :  { %3060 = vmatpush1.bf16.msra.mxu0 %v2200_v19  ;;  %v1882_v19 = vld [vmem:[#allocation5 + $0x1d0] sm:$0xff] }
 0x44f   :  { %3101 = vmatpush1.bf16.msra.mxu1 %v2328_v11  ;;  %3111 = vmatprep.subr.bf16.mxu0 %v1827_v12  ;;  %v1891_v11 = vld [vmem:[#allocation5 + $0x218] sm:$0xff] }
 0x450   :  { %3152 = vmatprep.subr.bf16.mxu1 %v1955_v13  ;;  %v2019_v12 = vld [vmem:[#allocation5 + $0x618] sm:$0xff]  ;;  %v1890_v13 = vld [vmem:[#allocation5 + $0x210] sm:$0xff] }
 0x451   :  { %3062 = vmatmul.mubr.bf16.vlgmr.msra.gmra.mrb[28].mxu0 %v5363_v37 }
 0x452   :  { %3103 = vmatmul.mubr.bf16.vlgmr.msra.gmra.mrb[28].mxu1 %v5365_v14  ;;  %3112 = vmatpush1.bf16.msra.mxu0 %v1826_v38  ;;  %v2018_v38 = vld [vmem:[#allocation5 + $0x610] sm:$0xff] }
 0x453   :  { %3143 = vmatprep.mubr.bf16.mxu0 %v5303_v58  ;;  %3153 = vmatpush1.bf16.msra.mxu1 %v1954_v17  ;;  %v1899_v17 = vld [vmem:[#allocation5 + $0x258] sm:$0xff] }
 0x454   :  { %3184 = vmatprep.mubr.bf16.mxu1 %v5305_v6  ;;  %3113 = vmatprep.subr.bf16.mxu0 %v1835_v18  ;;  %v2027_v18 = vld [vmem:[#allocation5 + $0x658] sm:$0xff] }
 0x455   :  { %3154 = vmatprep.subr.bf16.mxu1 %v1963_v24  ;;  %v1898_v24 = vld [vmem:[#allocation5 + $0x250] sm:$0xff] }
 0x456   :  { %3114 = vmatpush1.bf16.msra.mxu0 %v1834_v50  ;;  %v2026_v50 = vld [vmem:[#allocation5 + $0x650] sm:$0xff] }
 0x457   :  { %3155 = vmatpush1.bf16.msra.mxu1 %v1962_v25  ;;  %3115 = vmatprep.subr.bf16.mxu0 %v1843_v28  ;;  %v1907_v25 = vld [vmem:[#allocation5 + $0x298] sm:$0xff] }
 0x458   :  { %3156 = vmatprep.subr.bf16.mxu1 %v1971_v26  ;;  %v2035_v28 = vld [vmem:[#allocation5 + $0x698] sm:$0xff]  ;;  %v1906_v26 = vld [vmem:[#allocation5 + $0x290] sm:$0xff] }
 0x45a   :  { %3116 = vmatpush1.bf16.msra.mxu0 %v1842_v31  ;;  %v2034_v31 = vld [vmem:[#allocation5 + $0x690] sm:$0xff] }
 0x45b   :  { %3157 = vmatpush1.bf16.msra.mxu1 %v1970_v42  ;;  %3117 = vmatprep.subr.bf16.mxu0 %v1851_v43  ;;  %v1915_v42 = vld [vmem:[#allocation5 + $0x2d8] sm:$0xff] }
 0x45c   :  { %3158 = vmatprep.subr.bf16.mxu1 %v1979_v30  ;;  %v2043_v43 = vld [vmem:[#allocation5 + $0x6d8] sm:$0xff]  ;;  %v1914_v30 = vld [vmem:[#allocation5 + $0x2d0] sm:$0xff] }
 0x45e   :  { %3118 = vmatpush1.bf16.msra.mxu0 %v1850_v33  ;;  %v2042_v33 = vld [vmem:[#allocation5 + $0x6d0] sm:$0xff] }
 0x45f   :  { %3159 = vmatpush1.bf16.msra.mxu1 %v1978_v48  ;;  %3119 = vmatprep.subr.bf16.mxu0 %v1859_v49  ;;  %v1923_v48 = vld [vmem:[#allocation5 + $0x318] sm:$0xff] }
 0x460   :  { %3160 = vmatprep.subr.bf16.mxu1 %v1987_v34  ;;  %v2051_v49 = vld [vmem:[#allocation5 + $0x718] sm:$0xff]  ;;  %v1922_v34 = vld [vmem:[#allocation5 + $0x310] sm:$0xff] }
 0x462   :  { %3120 = vmatpush1.bf16.msra.mxu0 %v1858_v41  ;;  %v2050_v41 = vld [vmem:[#allocation5 + $0x710] sm:$0xff] }
 0x463   :  { %3161 = vmatpush1.bf16.msra.mxu1 %v1986_v35  ;;  %3121 = vmatprep.subr.bf16.mxu0 %v1867_v46  ;;  %v1931_v35 = vld [vmem:[#allocation5 + $0x358] sm:$0xff] }
 0x464   :  { %v2817_v16 = vpop.f32.mrb[16].mxu0  ;;  %v2858_v44 = vpop.f32.mrb[16].mxu1  ;;  %3162 = vmatprep.subr.bf16.mxu1 %v1995_v2  ;;  %v2059_v46 = vld [vmem:[#allocation5 + $0x758] sm:$0xff]  ;;  %v1930_v2 = vld [vmem:[#allocation5 + $0x350] sm:$0xff] }
 0x465   :  { %v5371_v54 = vadd.f32 %v2858_v44, %v2817_v16  ;;  %v2819_v55 = vpop.f32.mrb[17].mxu0  ;;  %v2860_v0 = vpop.f32.mrb[17].mxu1  ;;  %v1939_v16 = vld [vmem:[#allocation5 + $0x398] sm:$0xff] }
 0x466   :  { %v5373_v56 = vadd.f32 %v2860_v0, %v2819_v55  ;;  %v2821_v23 = vpop.f32.mrb[18].mxu0  ;;  %v2862_v57 = vpop.f32.mrb[18].mxu1  ;;  %3122 = vmatpush1.bf16.msra.mxu0 %v1866_v51  ;;  %v2058_v51 = vld [vmem:[#allocation5 + $0x750] sm:$0xff]  ;;  %v2067_v44 = vld [vmem:[#allocation5 + $0x798] sm:$0xff] }
 0x467   :  { %3163 = vmatpush1.bf16.msra.mxu1 %v1994_v45  ;;  %v2822_v9 = vpop.f32.mrb[19].mxu0  ;;  %v2863_v40 = vpop.f32.mrb[19].mxu1  ;;  %3123 = vmatprep.subr.bf16.mxu0 %v1875_v47  ;;  %v1938_v45 = vld [vmem:[#allocation5 + $0x390] sm:$0xff]  ;;  %v1947_v55 = vld [vmem:[#allocation5 + $0x3d8] sm:$0xff] }
 0x468   :  { %3164 = vmatprep.subr.bf16.mxu1 %v2003_v3  ;;  %v2066_v47 = vld [vmem:[#allocation5 + $0x790] sm:$0xff]  ;;  %v2075_v0 = vld [vmem:[#allocation5 + $0x7d8] sm:$0xff] }
 0x469   :  { %v1946_v3 = vld [vmem:[#allocation5 + $0x3d0] sm:$0xff]  ;;  %v2083_v57 = vld [vmem:[#allocation5 + $0x818] sm:$0xff] }
 0x46a   :  { %3124 = vmatpush1.bf16.msra.mxu0 %v1874_v60  ;;  %v2074_v23 = vld [vmem:[#allocation5 + $0x7d0] sm:$0xff]  ;;  %v2211_v9 = vld [vmem:[#allocation5 + $0xc18] sm:$0xff] }
 0x46b   :  { %3165 = vmatpush1.bf16.msra.mxu1 %v2002_v62  ;;  %3125 = vmatprep.subr.bf16.mxu0 %v1883_v5  ;;  %v2082_v40 = vld [vmem:[#allocation5 + $0x810] sm:$0xff]  ;;  %v2091_v62 = vld [vmem:[#allocation5 + $0x858] sm:$0xff] }
 0x46c   :  { %3166 = vmatprep.subr.bf16.mxu1 %v2011_v7  ;;  %v2210_v60 = vld [vmem:[#allocation5 + $0xc10] sm:$0xff]  ;;  %v2219_v5 = vld [vmem:[#allocation5 + $0xc58] sm:$0xff] }
 0x46d   :  { %v2090_v7 = vld [vmem:[#allocation5 + $0x850] sm:$0xff] }
 0x46e   :  { %3126 = vmatpush1.bf16.msra.mxu0 %v1882_v19  ;;  %v2218_v19 = vld [vmem:[#allocation5 + $0xc50] sm:$0xff] }
 0x46f   :  { %3167 = vmatpush1.bf16.msra.mxu1 %v2010_v10  ;;  %3127 = vmatprep.subr.bf16.mxu0 %v1891_v11  ;;  %v2099_v10 = vld [vmem:[#allocation5 + $0x898] sm:$0xff] }
 0x470   :  { %3168 = vmatprep.subr.bf16.mxu1 %v2019_v12  ;;  %v2227_v11 = vld [vmem:[#allocation5 + $0xc98] sm:$0xff]  ;;  %v2098_v12 = vld [vmem:[#allocation5 + $0x890] sm:$0xff] }
 0x472   :  { %3128 = vmatpush1.bf16.msra.mxu0 %v1890_v13  ;;  %v2226_v13 = vld [vmem:[#allocation5 + $0xc90] sm:$0xff] }
 0x473   :  { %3169 = vmatpush1.bf16.msra.mxu1 %v2018_v38  ;;  %3129 = vmatprep.subr.bf16.mxu0 %v1899_v17  ;;  %v2107_v38 = vld [vmem:[#allocation5 + $0x8d8] sm:$0xff] }
 0x474   :  { %3170 = vmatprep.subr.bf16.mxu1 %v2027_v18  ;;  %v2235_v17 = vld [vmem:[#allocation5 + $0xcd8] sm:$0xff]  ;;  %v2106_v18 = vld [vmem:[#allocation5 + $0x8d0] sm:$0xff] }
 0x476   :  { %3130 = vmatpush1.bf16.msra.mxu0 %v1898_v24  ;;  %v2234_v24 = vld [vmem:[#allocation5 + $0xcd0] sm:$0xff] }
 0x477   :  { %3171 = vmatpush1.bf16.msra.mxu1 %v2026_v50  ;;  %3131 = vmatprep.subr.bf16.mxu0 %v1907_v25  ;;  %v2115_v50 = vld [vmem:[#allocation5 + $0x918] sm:$0xff] }
 0x478   :  { %3172 = vmatprep.subr.bf16.mxu1 %v2035_v28  ;;  %v2243_v25 = vld [vmem:[#allocation5 + $0xd18] sm:$0xff]  ;;  %v2114_v28 = vld [vmem:[#allocation5 + $0x910] sm:$0xff] }
 0x47a   :  { %3132 = vmatpush1.bf16.msra.mxu0 %v1906_v26  ;;  %v2242_v26 = vld [vmem:[#allocation5 + $0xd10] sm:$0xff] }
 0x47b   :  { %3173 = vmatpush1.bf16.msra.mxu1 %v2034_v31  ;;  %3133 = vmatprep.subr.bf16.mxu0 %v1915_v42  ;;  %v2123_v31 = vld [vmem:[#allocation5 + $0x958] sm:$0xff] }
 0x47c   :  { %3174 = vmatprep.subr.bf16.mxu1 %v2043_v43  ;;  %v2251_v42 = vld [vmem:[#allocation5 + $0xd58] sm:$0xff]  ;;  %v2122_v43 = vld [vmem:[#allocation5 + $0x950] sm:$0xff] }
 0x47e   :  { %3134 = vmatpush1.bf16.msra.mxu0 %v1914_v30 }
 0x47f   :  { %3175 = vmatpush1.bf16.msra.mxu1 %v2042_v33  ;;  %3135 = vmatprep.subr.bf16.mxu0 %v1923_v48  ;;  %v2250_v48 = vld [vmem:[#allocation5 + $0xd50] sm:$0xff] }
 0x480   :  { %3176 = vmatprep.subr.bf16.mxu1 %v2051_v49  ;;  %v2131_v49 = vld [vmem:[#allocation5 + $0x998] sm:$0xff] }
 0x482   :  { %3136 = vmatpush1.bf16.msra.mxu0 %v1922_v34 }
 0x483   :  { %3177 = vmatpush1.bf16.msra.mxu1 %v2050_v41  ;;  %3137 = vmatprep.subr.bf16.mxu0 %v1931_v35 }
 0x484   :  { %3178 = vmatprep.subr.bf16.mxu1 %v2059_v46  ;;  %v2259_v46 = vld [vmem:[#allocation5 + $0xd98] sm:$0xff] }
 0x486   :  { %3138 = vmatpush1.bf16.msra.mxu0 %v1930_v2 }
 0x487   :  { %3179 = vmatpush1.bf16.msra.mxu1 %v2058_v51  ;;  %3139 = vmatprep.subr.bf16.mxu0 %v1939_v16 }
 0x488   :  { %3180 = vmatprep.subr.bf16.mxu1 %v2067_v44 }
 0x48a   :  { %3140 = vmatpush1.bf16.msra.mxu0 %v1938_v45 }
 0x48b   :  { %3181 = vmatpush1.bf16.msra.mxu1 %v2066_v47  ;;  %3141 = vmatprep.subr.bf16.mxu0 %v1947_v55  ;;  %v2130_v47 = vld [vmem:[#allocation5 + $0x990] sm:$0xff] }
 0x48c   :  { %3182 = vmatprep.subr.bf16.mxu1 %v2075_v0  ;;  %v2258_v55 = vld [vmem:[#allocation5 + $0xd90] sm:$0xff]  ;;  %v2139_v0 = vld [vmem:[#allocation5 + $0x9d8] sm:$0xff] }
 0x48e   :  { %3142 = vmatpush1.bf16.msra.mxu0 %v1946_v3  ;;  %v2267_v3 = vld [vmem:[#allocation5 + $0xdd8] sm:$0xff] }
 0x48f   :  { %3183 = vmatpush1.bf16.msra.mxu1 %v2074_v23  ;;  %3193 = vmatprep.subr.bf16.mxu0 %v2083_v57  ;;  %v2138_v23 = vld [vmem:[#allocation5 + $0x9d0] sm:$0xff] }
 0x490   :  { %3234 = vmatprep.subr.bf16.mxu1 %v2211_v9  ;;  %v2266_v57 = vld [vmem:[#allocation5 + $0xdd0] sm:$0xff]  ;;  %v2147_v9 = vld [vmem:[#allocation5 + $0xa18] sm:$0xff] }
 0x491   :  { %3144 = vmatmul.mubr.bf16.vlgmr.msra.gmra.mrb[32].mxu0 %v5337_v27 }
 0x492   :  { %3185 = vmatmul.mubr.bf16.vlgmr.msra.gmra.mrb[32].mxu1 %v5339_v29  ;;  %3194 = vmatpush1.bf16.msra.mxu0 %v2082_v40  ;;  %v2275_v40 = vld [vmem:[#allocation5 + $0xe18] sm:$0xff] }
 0x493   :  { %3225 = vmatprep.mubr.bf16.mxu0 %v5341_v36  ;;  %3235 = vmatpush1.bf16.msra.mxu1 %v2210_v60  ;;  %v2146_v60 = vld [vmem:[#allocation5 + $0xa10] sm:$0xff] }
 0x494   :  { %3266 = vmatprep.mubr.bf16.mxu1 %v5344_v32  ;;  %3195 = vmatprep.subr.bf16.mxu0 %v2091_v62  ;;  %v2274_v62 = vld [vmem:[#allocation5 + $0xe10] sm:$0xff] }
 0x495   :  { %3236 = vmatprep.subr.bf16.mxu1 %v2219_v5  ;;  %v2155_v5 = vld [vmem:[#allocation5 + $0xa58] sm:$0xff] }
 0x496   :  { %3196 = vmatpush1.bf16.msra.mxu0 %v2090_v7  ;;  %v2283_v7 = vld [vmem:[#allocation5 + $0xe58] sm:$0xff] }
 0x497   :  { %3237 = vmatpush1.bf16.msra.mxu1 %v2218_v19  ;;  %3197 = vmatprep.subr.bf16.mxu0 %v2099_v10  ;;  %v2154_v19 = vld [vmem:[#allocation5 + $0xa50] sm:$0xff] }
 0x498   :  { %3238 = vmatprep.subr.bf16.mxu1 %v2227_v11  ;;  %v2282_v10 = vld [vmem:[#allocation5 + $0xe50] sm:$0xff]  ;;  %v2163_v11 = vld [vmem:[#allocation5 + $0xa98] sm:$0xff] }
 0x49a   :  { %3198 = vmatpush1.bf16.msra.mxu0 %v2098_v12  ;;  %v2291_v12 = vld [vmem:[#allocation5 + $0xe98] sm:$0xff] }
 0x49b   :  { %3239 = vmatpush1.bf16.msra.mxu1 %v2226_v13  ;;  %3199 = vmatprep.subr.bf16.mxu0 %v2107_v38  ;;  %v2162_v13 = vld [vmem:[#allocation5 + $0xa90] sm:$0xff] }
 0x49c   :  { %3240 = vmatprep.subr.bf16.mxu1 %v2235_v17  ;;  %v2290_v38 = vld [vmem:[#allocation5 + $0xe90] sm:$0xff]  ;;  %v2171_v17 = vld [vmem:[#allocation5 + $0xad8] sm:$0xff] }
 0x49e   :  { %3200 = vmatpush1.bf16.msra.mxu0 %v2106_v18  ;;  %v2299_v18 = vld [vmem:[#allocation5 + $0xed8] sm:$0xff] }
 0x49f   :  { %3241 = vmatpush1.bf16.msra.mxu1 %v2234_v24  ;;  %3201 = vmatprep.subr.bf16.mxu0 %v2115_v50  ;;  %v2170_v24 = vld [vmem:[#allocation5 + $0xad0] sm:$0xff] }
 0x4a0   :  { %3242 = vmatprep.subr.bf16.mxu1 %v2243_v25  ;;  %v2298_v50 = vld [vmem:[#allocation5 + $0xed0] sm:$0xff]  ;;  %v2179_v25 = vld [vmem:[#allocation5 + $0xb18] sm:$0xff] }
 0x4a2   :  { %3202 = vmatpush1.bf16.msra.mxu0 %v2114_v28  ;;  %v2307_v28 = vld [vmem:[#allocation5 + $0xf18] sm:$0xff] }
 0x4a3   :  { %3243 = vmatpush1.bf16.msra.mxu1 %v2242_v26  ;;  %3203 = vmatprep.subr.bf16.mxu0 %v2123_v31  ;;  %v2178_v26 = vld [vmem:[#allocation5 + $0xb10] sm:$0xff] }
 0x4a4   :  { %v2899_v30 = vpop.f32.mrb[20].mxu0  ;;  %v2940_v33 = vpop.f32.mrb[20].mxu1  ;;  %3244 = vmatprep.subr.bf16.mxu1 %v2251_v42  ;;  %v2306_v31 = vld [vmem:[#allocation5 + $0xf10] sm:$0xff]  ;;  %v2187_v42 = vld [vmem:[#allocation5 + $0xb58] sm:$0xff] }
 0x4a5   :  { %v5379_v34 = vadd.f32 %v2940_v33, %v2899_v30  ;;  %v2901_v41 = vpop.f32.mrb[21].mxu0  ;;  %v2942_v35 = vpop.f32.mrb[21].mxu1  ;;  %v2186_v30 = vld [vmem:[#allocation5 + $0xb50] sm:$0xff] }
 0x4a6   :  { %v5381_v2 = vadd.f32 %v2942_v35, %v2901_v41  ;;  %v2903_v51 = vpop.f32.mrb[22].mxu0  ;;  %v2944_v16 = vpop.f32.mrb[22].mxu1  ;;  %3204 = vmatpush1.bf16.msra.mxu0 %v2122_v43  ;;  %v2315_v43 = vld [vmem:[#allocation5 + $0xf58] sm:$0xff]  ;;  %v2314_v33 = vld [vmem:[#allocation5 + $0xf50] sm:$0xff] }
 0x4a7   :  { %3245 = vmatpush1.bf16.msra.mxu1 %v2250_v48  ;;  %v2904_v44 = vpop.f32.mrb[23].mxu0  ;;  %v2945_v45 = vpop.f32.mrb[23].mxu1  ;;  %3205 = vmatprep.subr.bf16.mxu0 %v2131_v49  ;;  %v2195_v48 = vld [vmem:[#allocation5 + $0xb98] sm:$0xff]  ;;  %v2194_v41 = vld [vmem:[#allocation5 + $0xb90] sm:$0xff] }
 0x4a8   :  { %3246 = vmatprep.subr.bf16.mxu1 %v2259_v46  ;;  %v2323_v49 = vld [vmem:[#allocation5 + $0xf98] sm:$0xff]  ;;  %v2322_v35 = vld [vmem:[#allocation5 + $0xf90] sm:$0xff]  ;;  %v1829_v45 = vld [vmem:[#allocation5 + $0x28] sm:$0xff] }
 0x4a9   :  { %v2203_v46 = vld [vmem:[#allocation5 + $0xbd8] sm:$0xff]  ;;  %v2202_v16 = vld [vmem:[#allocation5 + $0xbd0] sm:$0xff] }
 0x4aa   :  { %3206 = vmatpush1.bf16.msra.mxu0 %v2130_v47  ;;  %v2331_v51 = vld [vmem:[#allocation5 + $0xfd8] sm:$0xff]  ;;  %v2330_v44 = vld [vmem:[#allocation5 + $0xfd0] sm:$0xff]  ;;  %v1957_v47 = vld [vmem:[#allocation5 + $0x428] sm:$0xff] }
 0x4ab   :  { %3247 = vmatpush1.bf16.msra.mxu1 %v2258_v55  ;;  %3207 = vmatprep.subr.bf16.mxu0 %v2139_v0  ;;  %v1828_v55 = vld [vmem:[#allocation5 + $0x20] sm:$0xff] }
 0x4ac   :  { %3248 = vmatprep.subr.bf16.mxu1 %v2267_v3  ;;  %v1956_v0 = vld [vmem:[#allocation5 + $0x420] sm:$0xff]  ;;  %v1837_v3 = vld [vmem:[#allocation5 + $0x68] sm:$0xff] }
 0x4ae   :  { %3208 = vmatpush1.bf16.msra.mxu0 %v2138_v23  ;;  %v1965_v23 = vld [vmem:[#allocation5 + $0x468] sm:$0xff] }
 0x4af   :  { %3249 = vmatpush1.bf16.msra.mxu1 %v2266_v57  ;;  %3209 = vmatprep.subr.bf16.mxu0 %v2147_v9  ;;  %v1836_v57 = vld [vmem:[#allocation5 + $0x60] sm:$0xff] }
 0x4b0   :  { %3250 = vmatprep.subr.bf16.mxu1 %v2275_v40  ;;  %v1964_v9 = vld [vmem:[#allocation5 + $0x460] sm:$0xff]  ;;  %v1845_v40 = vld [vmem:[#allocation5 + $0xa8] sm:$0xff] }
 0x4b2   :  { %3210 = vmatpush1.bf16.msra.mxu0 %v2146_v60  ;;  %v1973_v60 = vld [vmem:[#allocation5 + $0x4a8] sm:$0xff] }
 0x4b3   :  { %3251 = vmatpush1.bf16.msra.mxu1 %v2274_v62  ;;  %3211 = vmatprep.subr.bf16.mxu0 %v2155_v5  ;;  %v1844_v62 = vld [vmem:[#allocation5 + $0xa0] sm:$0xff] }
 0x4b4   :  { %3252 = vmatprep.subr.bf16.mxu1 %v2283_v7  ;;  %v1972_v5 = vld [vmem:[#allocation5 + $0x4a0] sm:$0xff]  ;;  %v1853_v7 = vld [vmem:[#allocation5 + $0xe8] sm:$0xff] }
 0x4b6   :  { %3212 = vmatpush1.bf16.msra.mxu0 %v2154_v19  ;;  %v1981_v19 = vld [vmem:[#allocation5 + $0x4e8] sm:$0xff] }
 0x4b7   :  { %3253 = vmatpush1.bf16.msra.mxu1 %v2282_v10  ;;  %3213 = vmatprep.subr.bf16.mxu0 %v2163_v11  ;;  %v1852_v10 = vld [vmem:[#allocation5 + $0xe0] sm:$0xff] }
 0x4b8   :  { %3254 = vmatprep.subr.bf16.mxu1 %v2291_v12  ;;  %v1980_v11 = vld [vmem:[#allocation5 + $0x4e0] sm:$0xff]  ;;  %v1861_v12 = vld [vmem:[#allocation5 + $0x128] sm:$0xff] }
 0x4ba   :  { %3214 = vmatpush1.bf16.msra.mxu0 %v2162_v13  ;;  %v1989_v13 = vld [vmem:[#allocation5 + $0x528] sm:$0xff] }
 0x4bb   :  { %3255 = vmatpush1.bf16.msra.mxu1 %v2290_v38  ;;  %3215 = vmatprep.subr.bf16.mxu0 %v2171_v17  ;;  %v1860_v38 = vld [vmem:[#allocation5 + $0x120] sm:$0xff] }
 0x4bc   :  { %3256 = vmatprep.subr.bf16.mxu1 %v2299_v18  ;;  %v1988_v17 = vld [vmem:[#allocation5 + $0x520] sm:$0xff]  ;;  %v1869_v18 = vld [vmem:[#allocation5 + $0x168] sm:$0xff] }
 0x4be   :  { %3216 = vmatpush1.bf16.msra.mxu0 %v2170_v24  ;;  %v1997_v24 = vld [vmem:[#allocation5 + $0x568] sm:$0xff] }
 0x4bf   :  { %3257 = vmatpush1.bf16.msra.mxu1 %v2298_v50  ;;  %3217 = vmatprep.subr.bf16.mxu0 %v2179_v25  ;;  %v1868_v50 = vld [vmem:[#allocation5 + $0x160] sm:$0xff] }
 0x4c0   :  { %3258 = vmatprep.subr.bf16.mxu1 %v2307_v28  ;;  %v1996_v28 = vld [vmem:[#allocation5 + $0x560] sm:$0xff] }
 0x4c2   :  { %3218 = vmatpush1.bf16.msra.mxu0 %v2178_v26  ;;  %v1877_v26 = vld [vmem:[#allocation5 + $0x1a8] sm:$0xff] }
 0x4c3   :  { %3259 = vmatpush1.bf16.msra.mxu1 %v2306_v31  ;;  %3219 = vmatprep.subr.bf16.mxu0 %v2187_v42 }
 0x4c4   :  { %3260 = vmatprep.subr.bf16.mxu1 %v2315_v43 }
 0x4c6   :  { %3220 = vmatpush1.bf16.msra.mxu0 %v2186_v30  ;;  %v2005_v30 = vld [vmem:[#allocation5 + $0x5a8] sm:$0xff] }
 0x4c7   :  { %3261 = vmatpush1.bf16.msra.mxu1 %v2314_v33  ;;  %3221 = vmatprep.subr.bf16.mxu0 %v2195_v48 }
 0x4c8   :  { %3262 = vmatprep.subr.bf16.mxu1 %v2323_v49 }
 0x4ca   :  { %3222 = vmatpush1.bf16.msra.mxu0 %v2194_v41 }
 0x4cb   :  { %3263 = vmatpush1.bf16.msra.mxu1 %v2322_v35  ;;  %3223 = vmatprep.subr.bf16.mxu0 %v2203_v46 }
 0x4cc   :  { %3264 = vmatprep.subr.bf16.mxu1 %v2331_v51  ;;  %v1876_v51 = vld [vmem:[#allocation5 + $0x1a0] sm:$0xff] }
 0x4ce   :  { %3224 = vmatpush1.bf16.msra.mxu0 %v2202_v16 }
 0x4cf   :  { %3265 = vmatpush1.bf16.msra.mxu1 %v2330_v44  ;;  %3275 = vmatprep.subr.bf16.mxu0 %v1829_v45  ;;  %v1885_v45 = vld [vmem:[#allocation5 + $0x1e8] sm:$0xff] }
 0x4d0   :  { %3316 = vmatprep.subr.bf16.mxu1 %v1957_v47  ;;  %v2013_v47 = vld [vmem:[#allocation5 + $0x5e8] sm:$0xff] }
 0x4d1   :  { %3226 = vmatmul.mubr.bf16.vlgmr.msra.gmra.mrb[36].mxu0 %v5363_v37 }
 0x4d2   :  { %3267 = vmatmul.mubr.bf16.vlgmr.msra.gmra.mrb[36].mxu1 %v5365_v14  ;;  %3276 = vmatpush1.bf16.msra.mxu0 %v1828_v55  ;;  %v2012_v55 = vld [vmem:[#allocation5 + $0x5e0] sm:$0xff] }
 0x4d3   :  { %3307 = vmatprep.mubr.bf16.mxu0 %v5303_v58  ;;  %3317 = vmatpush1.bf16.msra.mxu1 %v1956_v0  ;;  %v1893_v0 = vld [vmem:[#allocation5 + $0x228] sm:$0xff] }
 0x4d4   :  { %3348 = vmatprep.mubr.bf16.mxu1 %v5305_v6  ;;  %3277 = vmatprep.subr.bf16.mxu0 %v1837_v3  ;;  %v2021_v3 = vld [vmem:[#allocation5 + $0x628] sm:$0xff] }
 0x4d5   :  { %3318 = vmatprep.subr.bf16.mxu1 %v1965_v23  ;;  %v1892_v23 = vld [vmem:[#allocation5 + $0x220] sm:$0xff] }
 0x4d6   :  { %3278 = vmatpush1.bf16.msra.mxu0 %v1836_v57  ;;  %v2020_v57 = vld [vmem:[#allocation5 + $0x620] sm:$0xff] }
 0x4d7   :  { %3319 = vmatpush1.bf16.msra.mxu1 %v1964_v9  ;;  %3279 = vmatprep.subr.bf16.mxu0 %v1845_v40  ;;  %v1901_v9 = vld [vmem:[#allocation5 + $0x268] sm:$0xff] }
 0x4d8   :  { %3320 = vmatprep.subr.bf16.mxu1 %v1973_v60  ;;  %v2029_v40 = vld [vmem:[#allocation5 + $0x668] sm:$0xff]  ;;  %v1900_v60 = vld [vmem:[#allocation5 + $0x260] sm:$0xff] }
 0x4da   :  { %3280 = vmatpush1.bf16.msra.mxu0 %v1844_v62  ;;  %v2028_v62 = vld [vmem:[#allocation5 + $0x660] sm:$0xff] }
 0x4db   :  { %3321 = vmatpush1.bf16.msra.mxu1 %v1972_v5  ;;  %3281 = vmatprep.subr.bf16.mxu0 %v1853_v7  ;;  %v1909_v5 = vld [vmem:[#allocation5 + $0x2a8] sm:$0xff] }
 0x4dc   :  { %3322 = vmatprep.subr.bf16.mxu1 %v1981_v19  ;;  %v2037_v7 = vld [vmem:[#allocation5 + $0x6a8] sm:$0xff]  ;;  %v1908_v19 = vld [vmem:[#allocation5 + $0x2a0] sm:$0xff] }
 0x4de   :  { %3282 = vmatpush1.bf16.msra.mxu0 %v1852_v10  ;;  %v2036_v10 = vld [vmem:[#allocation5 + $0x6a0] sm:$0xff] }
 0x4df   :  { %3323 = vmatpush1.bf16.msra.mxu1 %v1980_v11  ;;  %3283 = vmatprep.subr.bf16.mxu0 %v1861_v12  ;;  %v1917_v11 = vld [vmem:[#allocation5 + $0x2e8] sm:$0xff] }
 0x4e0   :  { %3324 = vmatprep.subr.bf16.mxu1 %v1989_v13  ;;  %v2045_v12 = vld [vmem:[#allocation5 + $0x6e8] sm:$0xff]  ;;  %v1916_v13 = vld [vmem:[#allocation5 + $0x2e0] sm:$0xff] }
 0x4e2   :  { %3284 = vmatpush1.bf16.msra.mxu0 %v1860_v38  ;;  %v2044_v38 = vld [vmem:[#allocation5 + $0x6e0] sm:$0xff] }
 0x4e3   :  { %3325 = vmatpush1.bf16.msra.mxu1 %v1988_v17  ;;  %3285 = vmatprep.subr.bf16.mxu0 %v1869_v18  ;;  %v1925_v17 = vld [vmem:[#allocation5 + $0x328] sm:$0xff] }
 0x4e4   :  { %v2981_v25 = vpop.f32.mrb[24].mxu0  ;;  %3326 = vmatprep.subr.bf16.mxu1 %v1997_v24  ;;  %v2053_v18 = vld [vmem:[#allocation5 + $0x728] sm:$0xff]  ;;  %v1924_v24 = vld [vmem:[#allocation5 + $0x320] sm:$0xff] }
 0x4e5   :  { %v2982_v31 = vadd.f32 %v2981_v25, %v5311_v8  ;;  %v3022_v42 = vpop.f32.mrb[24].mxu1  ;;  %v2983_v43 = vpop.f32.mrb[25].mxu0  ;;  %v2004_v8 = vld [vmem:[#allocation5 + $0x5a0] sm:$0xff]  ;;  %v1933_v25 = vld [vmem:[#allocation5 + $0x368] sm:$0xff] }
 0x4e6   :  { %v2984_v33 = vadd.f32 %v2983_v43, %v5313_v53  ;;  %v3024_v48 = vpop.f32.mrb[25].mxu1  ;;  %v2985_v49 = vpop.f32.mrb[26].mxu0  ;;  %3286 = vmatpush1.bf16.msra.mxu0 %v1868_v50  ;;  %v1884_v53 = vld [vmem:[#allocation5 + $0x1e0] sm:$0xff]  ;;  %v2069_v43 = vld [vmem:[#allocation5 + $0x7a8] sm:$0xff] }
 0x4e7   :  { %v5389_v41 = vadd.f32 %v3022_v42, %v2982_v31  ;;  %v3026_v35 = vpop.f32.mrb[26].mxu1  ;;  %3327 = vmatpush1.bf16.msra.mxu1 %v1996_v28  ;;  %v2986_v46 = vpop.f32.mrb[27].mxu0  ;;  %3287 = vmatprep.subr.bf16.mxu0 %v1877_v26  ;;  %v2052_v50 = vld [vmem:[#allocation5 + $0x720] sm:$0xff]  ;;  %v2061_v28 = vld [vmem:[#allocation5 + $0x768] sm:$0xff] }
 0x4e8   :  { %v5391_v16 = vadd.f32 %v3024_v48, %v2984_v33  ;;  %v3027_v44 = vpop.f32.mrb[27].mxu1  ;;  %3328 = vmatprep.subr.bf16.mxu1 %v2005_v30  ;;  %v1932_v26 = vld [vmem:[#allocation5 + $0x360] sm:$0xff]  ;;  %v1941_v42 = vld [vmem:[#allocation5 + $0x3a8] sm:$0xff] }
 0x4e9   :  { %v2060_v31 = vld [vmem:[#allocation5 + $0x760] sm:$0xff]  ;;  %v1949_v48 = vld [vmem:[#allocation5 + $0x3e8] sm:$0xff] }
 0x4ea   :  { %3288 = vmatpush1.bf16.msra.mxu0 %v1876_v51  ;;  %v1940_v30 = vld [vmem:[#allocation5 + $0x3a0] sm:$0xff]  ;;  %v2077_v49 = vld [vmem:[#allocation5 + $0x7e8] sm:$0xff] }
 0x4eb   :  { %3329 = vmatpush1.bf16.msra.mxu1 %v2004_v8  ;;  %3289 = vmatprep.subr.bf16.mxu0 %v1885_v45  ;;  %v2068_v33 = vld [vmem:[#allocation5 + $0x7a0] sm:$0xff]  ;;  %v2085_v51 = vld [vmem:[#allocation5 + $0x828] sm:$0xff] }
 0x4ec   :  { %3330 = vmatprep.subr.bf16.mxu1 %v2013_v47  ;;  %v1948_v35 = vld [vmem:[#allocation5 + $0x3e0] sm:$0xff]  ;;  %v2213_v44 = vld [vmem:[#allocation5 + $0xc28] sm:$0xff] }
 0x4ed   :  { %v2076_v46 = vld [vmem:[#allocation5 + $0x7e0] sm:$0xff]  ;;  %v2093_v47 = vld [vmem:[#allocation5 + $0x868] sm:$0xff] }
 0x4ee   :  { %3290 = vmatpush1.bf16.msra.mxu0 %v1884_v53  ;;  %v2084_v8 = vld [vmem:[#allocation5 + $0x820] sm:$0xff]  ;;  %v2221_v53 = vld [vmem:[#allocation5 + $0xc68] sm:$0xff] }
 0x4ef   :  { %3331 = vmatpush1.bf16.msra.mxu1 %v2012_v55  ;;  %3291 = vmatprep.subr.bf16.mxu0 %v1893_v0  ;;  %v2212_v45 = vld [vmem:[#allocation5 + $0xc20] sm:$0xff] }
 0x4f0   :  { %3332 = vmatprep.subr.bf16.mxu1 %v2021_v3  ;;  %v2092_v55 = vld [vmem:[#allocation5 + $0x860] sm:$0xff]  ;;  %v2101_v3 = vld [vmem:[#allocation5 + $0x8a8] sm:$0xff] }
 0x4f1   :  { %v2220_v0 = vld [vmem:[#allocation5 + $0xc60] sm:$0xff] }
 0x4f2   :  { %3292 = vmatpush1.bf16.msra.mxu0 %v1892_v23  ;;  %v2229_v23 = vld [vmem:[#allocation5 + $0xca8] sm:$0xff] }
 0x4f3   :  { %3333 = vmatpush1.bf16.msra.mxu1 %v2020_v57  ;;  %3293 = vmatprep.subr.bf16.mxu0 %v1901_v9  ;;  %v2100_v57 = vld [vmem:[#allocation5 + $0x8a0] sm:$0xff] }
 0x4f4   :  { %3334 = vmatprep.subr.bf16.mxu1 %v2029_v40  ;;  %v2228_v9 = vld [vmem:[#allocation5 + $0xca0] sm:$0xff]  ;;  %v2109_v40 = vld [vmem:[#allocation5 + $0x8e8] sm:$0xff] }
 0x4f6   :  { %3294 = vmatpush1.bf16.msra.mxu0 %v1900_v60  ;;  %v2237_v60 = vld [vmem:[#allocation5 + $0xce8] sm:$0xff] }
 0x4f7   :  { %3335 = vmatpush1.bf16.msra.mxu1 %v2028_v62  ;;  %3295 = vmatprep.subr.bf16.mxu0 %v1909_v5  ;;  %v2108_v62 = vld [vmem:[#allocation5 + $0x8e0] sm:$0xff] }
 0x4f8   :  { %3336 = vmatprep.subr.bf16.mxu1 %v2037_v7  ;;  %v2236_v5 = vld [vmem:[#allocation5 + $0xce0] sm:$0xff]  ;;  %v2117_v7 = vld [vmem:[#allocation5 + $0x928] sm:$0xff] }
 0x4fa   :  { %3296 = vmatpush1.bf16.msra.mxu0 %v1908_v19  ;;  %v2245_v19 = vld [vmem:[#allocation5 + $0xd28] sm:$0xff] }
 0x4fb   :  { %3337 = vmatpush1.bf16.msra.mxu1 %v2036_v10  ;;  %3297 = vmatprep.subr.bf16.mxu0 %v1917_v11  ;;  %v2116_v10 = vld [vmem:[#allocation5 + $0x920] sm:$0xff] }
 0x4fc   :  { %3338 = vmatprep.subr.bf16.mxu1 %v2045_v12  ;;  %v2244_v11 = vld [vmem:[#allocation5 + $0xd20] sm:$0xff]  ;;  %v2125_v12 = vld [vmem:[#allocation5 + $0x968] sm:$0xff] }
 0x4fe   :  { %3298 = vmatpush1.bf16.msra.mxu0 %v1916_v13  ;;  %v2253_v13 = vld [vmem:[#allocation5 + $0xd68] sm:$0xff] }
 0x4ff   :  { %3339 = vmatpush1.bf16.msra.mxu1 %v2044_v38  ;;  %3299 = vmatprep.subr.bf16.mxu0 %v1925_v17  ;;  %v2124_v38 = vld [vmem:[#allocation5 + $0x960] sm:$0xff] }
 0x500   :  { %3340 = vmatprep.subr.bf16.mxu1 %v2053_v18  ;;  %v2252_v18 = vld [vmem:[#allocation5 + $0xd60] sm:$0xff] }
 0x502   :  { %3300 = vmatpush1.bf16.msra.mxu0 %v1924_v24  ;;  %v2133_v24 = vld [vmem:[#allocation5 + $0x9a8] sm:$0xff] }
 0x503   :  { %3341 = vmatpush1.bf16.msra.mxu1 %v2052_v50  ;;  %3301 = vmatprep.subr.bf16.mxu0 %v1933_v25 }
 0x504   :  { %3342 = vmatprep.subr.bf16.mxu1 %v2061_v28 }
 0x506   :  { %3302 = vmatpush1.bf16.msra.mxu0 %v1932_v26  ;;  %v2261_v26 = vld [vmem:[#allocation5 + $0xda8] sm:$0xff] }
 0x507   :  { %3343 = vmatpush1.bf16.msra.mxu1 %v2060_v31  ;;  %3303 = vmatprep.subr.bf16.mxu0 %v1941_v42 }
 0x508   :  { %3344 = vmatprep.subr.bf16.mxu1 %v2069_v43 }
 0x50a   :  { %3304 = vmatpush1.bf16.msra.mxu0 %v1940_v30 }
 0x50b   :  { %3345 = vmatpush1.bf16.msra.mxu1 %v2068_v33  ;;  %3305 = vmatprep.subr.bf16.mxu0 %v1949_v48 }
 0x50c   :  { %3346 = vmatprep.subr.bf16.mxu1 %v2077_v49  ;;  %v2132_v49 = vld [vmem:[#allocation5 + $0x9a0] sm:$0xff] }
 0x50e   :  { %3306 = vmatpush1.bf16.msra.mxu0 %v1948_v35 }
 0x50f   :  { %3347 = vmatpush1.bf16.msra.mxu1 %v2076_v46  ;;  %3357 = vmatprep.subr.bf16.mxu0 %v2085_v51  ;;  %v2141_v51 = vld [vmem:[#allocation5 + $0x9e8] sm:$0xff] }
 0x510   :  { %3398 = vmatprep.subr.bf16.mxu1 %v2213_v44  ;;  %v2269_v44 = vld [vmem:[#allocation5 + $0xde8] sm:$0xff] }
 0x511   :  { %3308 = vmatmul.mubr.bf16.vlgmr.msra.gmra.mrb[40].mxu0 %v5337_v27 }
 0x512   :  { %3349 = vmatmul.mubr.bf16.vlgmr.msra.gmra.mrb[40].mxu1 %v5339_v29  ;;  %3358 = vmatpush1.bf16.msra.mxu0 %v2084_v8  ;;  %v2268_v8 = vld [vmem:[#allocation5 + $0xde0] sm:$0xff] }
 0x513   :  { %3389 = vmatprep.mubr.bf16.mxu0 %v5341_v36  ;;  %3399 = vmatpush1.bf16.msra.mxu1 %v2212_v45  ;;  %v2149_v45 = vld [vmem:[#allocation5 + $0xa28] sm:$0xff] }
 0x514   :  { %3430 = vmatprep.mubr.bf16.mxu1 %v5344_v32  ;;  %3359 = vmatprep.subr.bf16.mxu0 %v2093_v47  ;;  %v2277_v47 = vld [vmem:[#allocation5 + $0xe28] sm:$0xff] }
 0x515   :  { %3400 = vmatprep.subr.bf16.mxu1 %v2221_v53  ;;  %v2148_v53 = vld [vmem:[#allocation5 + $0xa20] sm:$0xff] }
 0x516   :  { %3360 = vmatpush1.bf16.msra.mxu0 %v2092_v55  ;;  %v2276_v55 = vld [vmem:[#allocation5 + $0xe20] sm:$0xff] }
 0x517   :  { %3401 = vmatpush1.bf16.msra.mxu1 %v2220_v0  ;;  %3361 = vmatprep.subr.bf16.mxu0 %v2101_v3  ;;  %v2157_v0 = vld [vmem:[#allocation5 + $0xa68] sm:$0xff] }
 0x518   :  { %3402 = vmatprep.subr.bf16.mxu1 %v2229_v23  ;;  %v2285_v3 = vld [vmem:[#allocation5 + $0xe68] sm:$0xff]  ;;  %v2156_v23 = vld [vmem:[#allocation5 + $0xa60] sm:$0xff] }
 0x51a   :  { %3362 = vmatpush1.bf16.msra.mxu0 %v2100_v57  ;;  %v2284_v57 = vld [vmem:[#allocation5 + $0xe60] sm:$0xff] }
 0x51b   :  { %3403 = vmatpush1.bf16.msra.mxu1 %v2228_v9  ;;  %3363 = vmatprep.subr.bf16.mxu0 %v2109_v40  ;;  %v2165_v9 = vld [vmem:[#allocation5 + $0xaa8] sm:$0xff] }
 0x51c   :  { %3404 = vmatprep.subr.bf16.mxu1 %v2237_v60  ;;  %v2293_v40 = vld [vmem:[#allocation5 + $0xea8] sm:$0xff]  ;;  %v2164_v60 = vld [vmem:[#allocation5 + $0xaa0] sm:$0xff] }
 0x51e   :  { %3364 = vmatpush1.bf16.msra.mxu0 %v2108_v62  ;;  %v2292_v62 = vld [vmem:[#allocation5 + $0xea0] sm:$0xff] }
 0x51f   :  { %3405 = vmatpush1.bf16.msra.mxu1 %v2236_v5  ;;  %3365 = vmatprep.subr.bf16.mxu0 %v2117_v7  ;;  %v2173_v5 = vld [vmem:[#allocation5 + $0xae8] sm:$0xff] }
 0x520   :  { %3406 = vmatprep.subr.bf16.mxu1 %v2245_v19  ;;  %v2301_v7 = vld [vmem:[#allocation5 + $0xee8] sm:$0xff]  ;;  %v2172_v19 = vld [vmem:[#allocation5 + $0xae0] sm:$0xff] }
 0x522   :  { %3366 = vmatpush1.bf16.msra.mxu0 %v2116_v10  ;;  %v2300_v10 = vld [vmem:[#allocation5 + $0xee0] sm:$0xff] }
 0x523   :  { %3407 = vmatpush1.bf16.msra.mxu1 %v2244_v11  ;;  %3367 = vmatprep.subr.bf16.mxu0 %v2125_v12  ;;  %v2181_v11 = vld [vmem:[#allocation5 + $0xb28] sm:$0xff] }
 0x524   :  { %v3063_v17 = vpop.f32.mrb[28].mxu0  ;;  %3408 = vmatprep.subr.bf16.mxu1 %v2253_v13  ;;  %v2309_v12 = vld [vmem:[#allocation5 + $0xf28] sm:$0xff]  ;;  %v2180_v13 = vld [vmem:[#allocation5 + $0xb20] sm:$0xff] }
 0x525   :  { %v3064_v50 = vadd.f32 %v3063_v17, %v5389_v41  ;;  %v3104_v25 = vpop.f32.mrb[28].mxu1  ;;  %v3065_v28 = vpop.f32.mrb[29].mxu0  ;;  %v2260_v41 = vld [vmem:[#allocation5 + $0xda0] sm:$0xff]  ;;  %v2189_v17 = vld [vmem:[#allocation5 + $0xb68] sm:$0xff] }
 0x526   :  { %v3066_v31 = vadd.f32 %v3065_v28, %v5391_v16  ;;  %v3106_v42 = vpop.f32.mrb[29].mxu1  ;;  %v3067_v43 = vpop.f32.mrb[30].mxu0  ;;  %3368 = vmatpush1.bf16.msra.mxu0 %v2124_v38  ;;  %v2140_v16 = vld [vmem:[#allocation5 + $0x9e0] sm:$0xff]  ;;  %v2325_v28 = vld [vmem:[#allocation5 + $0xfa8] sm:$0xff] }
 0x527   :  { %v5399_v30 = vadd.f32 %v3104_v25, %v3064_v50  ;;  %v3108_v33 = vpop.f32.mrb[30].mxu1  ;;  %3409 = vmatpush1.bf16.msra.mxu1 %v2252_v18  ;;  %v3068_v48 = vpop.f32.mrb[31].mxu0  ;;  %3369 = vmatprep.subr.bf16.mxu0 %v2133_v24  ;;  %v2308_v38 = vld [vmem:[#allocation5 + $0xf20] sm:$0xff]  ;;  %v2317_v18 = vld [vmem:[#allocation5 + $0xf68] sm:$0xff] }
 0x528   :  { %v5401_v35 = vadd.f32 %v3106_v42, %v3066_v31  ;;  %v3109_v46 = vpop.f32.mrb[31].mxu1  ;;  %3410 = vmatprep.subr.bf16.mxu1 %v2261_v26  ;;  %v2188_v24 = vld [vmem:[#allocation5 + $0xb60] sm:$0xff]  ;;  %v2197_v25 = vld [vmem:[#allocation5 + $0xba8] sm:$0xff] }
 0x529   :  { %v2316_v50 = vld [vmem:[#allocation5 + $0xf60] sm:$0xff]  ;;  %v2205_v42 = vld [vmem:[#allocation5 + $0xbe8] sm:$0xff]  ;;  %v1959_v46 = vld [vmem:[#allocation5 + $0x438] sm:$0xff] }
 0x52a   :  { %3370 = vmatpush1.bf16.msra.mxu0 %v2132_v49  ;;  %v2196_v26 = vld [vmem:[#allocation5 + $0xba0] sm:$0xff]  ;;  %v2333_v43 = vld [vmem:[#allocation5 + $0xfe8] sm:$0xff]  ;;  %v1831_v49 = vld [vmem:[#allocation5 + $0x38] sm:$0xff] }
 0x52b   :  { %3411 = vmatpush1.bf16.msra.mxu1 %v2260_v41  ;;  %3371 = vmatprep.subr.bf16.mxu0 %v2141_v51  ;;  %v2324_v31 = vld [vmem:[#allocation5 + $0xfa0] sm:$0xff]  ;;  %v1830_v41 = vld [vmem:[#allocation5 + $0x30] sm:$0xff] }
 0x52c   :  { %3412 = vmatprep.subr.bf16.mxu1 %v2269_v44  ;;  %v2204_v33 = vld [vmem:[#allocation5 + $0xbe0] sm:$0xff]  ;;  %v1958_v51 = vld [vmem:[#allocation5 + $0x430] sm:$0xff]  ;;  %v1839_v44 = vld [vmem:[#allocation5 + $0x78] sm:$0xff] }
 0x52d   :  { %v2332_v48 = vld [vmem:[#allocation5 + $0xfe0] sm:$0xff] }
 0x52e   :  { %3372 = vmatpush1.bf16.msra.mxu0 %v2140_v16  ;;  %v1967_v16 = vld [vmem:[#allocation5 + $0x478] sm:$0xff] }
 0x52f   :  { %3413 = vmatpush1.bf16.msra.mxu1 %v2268_v8  ;;  %3373 = vmatprep.subr.bf16.mxu0 %v2149_v45  ;;  %v1838_v8 = vld [vmem:[#allocation5 + $0x70] sm:$0xff] }
 0x530   :  { %3414 = vmatprep.subr.bf16.mxu1 %v2277_v47  ;;  %v1966_v45 = vld [vmem:[#allocation5 + $0x470] sm:$0xff]  ;;  %v1847_v47 = vld [vmem:[#allocation5 + $0xb8] sm:$0xff] }
 0x532   :  { %3374 = vmatpush1.bf16.msra.mxu0 %v2148_v53  ;;  %v1975_v53 = vld [vmem:[#allocation5 + $0x4b8] sm:$0xff] }
 0x533   :  { %3415 = vmatpush1.bf16.msra.mxu1 %v2276_v55  ;;  %3375 = vmatprep.subr.bf16.mxu0 %v2157_v0  ;;  %v1846_v55 = vld [vmem:[#allocation5 + $0xb0] sm:$0xff] }
 0x534   :  { %3416 = vmatprep.subr.bf16.mxu1 %v2285_v3  ;;  %v1974_v0 = vld [vmem:[#allocation5 + $0x4b0] sm:$0xff]  ;;  %v1855_v3 = vld [vmem:[#allocation5 + $0xf8] sm:$0xff] }
 0x536   :  { %3376 = vmatpush1.bf16.msra.mxu0 %v2156_v23  ;;  %v1983_v23 = vld [vmem:[#allocation5 + $0x4f8] sm:$0xff] }
 0x537   :  { %3417 = vmatpush1.bf16.msra.mxu1 %v2284_v57  ;;  %3377 = vmatprep.subr.bf16.mxu0 %v2165_v9  ;;  %v1982_v57 = vld [vmem:[#allocation5 + $0x4f0] sm:$0xff]  ;;  %v1991_v9 = vld [vmem:[#allocation5 + $0x538] sm:$0xff] }
 0x538   :  { %3418 = vmatprep.subr.bf16.mxu1 %v2293_v40  ;;  %v1862_v40 = vld [vmem:[#allocation5 + $0x130] sm:$0xff] }
 0x53a   :  { %3378 = vmatpush1.bf16.msra.mxu0 %v2164_v60  ;;  %v1990_v60 = vld [vmem:[#allocation5 + $0x530] sm:$0xff] }
 0x53b   :  { %3419 = vmatpush1.bf16.msra.mxu1 %v2292_v62  ;;  %3379 = vmatprep.subr.bf16.mxu0 %v2173_v5  ;;  %v1871_v62 = vld [vmem:[#allocation5 + $0x178] sm:$0xff] }
 0x53c   :  { %3420 = vmatprep.subr.bf16.mxu1 %v2301_v7  ;;  %v1999_v5 = vld [vmem:[#allocation5 + $0x578] sm:$0xff]  ;;  %v1870_v7 = vld [vmem:[#allocation5 + $0x170] sm:$0xff] }
 0x53e   :  { %3380 = vmatpush1.bf16.msra.mxu0 %v2172_v19 }
 0x53f   :  { %3421 = vmatpush1.bf16.msra.mxu1 %v2300_v10  ;;  %3381 = vmatprep.subr.bf16.mxu0 %v2181_v11  ;;  %v1998_v10 = vld [vmem:[#allocation5 + $0x570] sm:$0xff]  ;;  %v1879_v11 = vld [vmem:[#allocation5 + $0x1b8] sm:$0xff] }
 0x540   :  { %3422 = vmatprep.subr.bf16.mxu1 %v2309_v12 }
 0x542   :  { %3382 = vmatpush1.bf16.msra.mxu0 %v2180_v13 }
 0x543   :  { %3423 = vmatpush1.bf16.msra.mxu1 %v2308_v38  ;;  %3383 = vmatprep.subr.bf16.mxu0 %v2189_v17  ;;  %v2007_v17 = vld [vmem:[#allocation5 + $0x5b8] sm:$0xff] }
 0x544   :  { %3424 = vmatprep.subr.bf16.mxu1 %v2317_v18 }
 0x546   :  { %3384 = vmatpush1.bf16.msra.mxu0 %v2188_v24 }
 0x547   :  { %3425 = vmatpush1.bf16.msra.mxu1 %v2316_v50  ;;  %3385 = vmatprep.subr.bf16.mxu0 %v2197_v25 }
 0x548   :  { %3426 = vmatprep.subr.bf16.mxu1 %v2325_v28 }
 0x54a   :  { %3386 = vmatpush1.bf16.msra.mxu0 %v2196_v26 }
 0x54b   :  { %3427 = vmatpush1.bf16.msra.mxu1 %v2324_v31  ;;  %3387 = vmatprep.subr.bf16.mxu0 %v2205_v42  ;;  %v1878_v31 = vld [vmem:[#allocation5 + $0x1b0] sm:$0xff] }
 0x54c   :  { %3428 = vmatprep.subr.bf16.mxu1 %v2333_v43 }
 0x54e   :  { %3388 = vmatpush1.bf16.msra.mxu0 %v2204_v33  ;;  %v1887_v33 = vld [vmem:[#allocation5 + $0x1f8] sm:$0xff] }
 0x54f   :  { %3429 = vmatpush1.bf16.msra.mxu1 %v2332_v48  ;;  %3439 = vmatprep.subr.bf16.mxu0 %v1831_v49  ;;  %v2015_v48 = vld [vmem:[#allocation5 + $0x5f8] sm:$0xff]  ;;  %v2014_v49 = vld [vmem:[#allocation5 + $0x5f0] sm:$0xff] }
 0x550   :  { %3480 = vmatprep.subr.bf16.mxu1 %v1959_v46  ;;  %v1895_v46 = vld [vmem:[#allocation5 + $0x238] sm:$0xff] }
 0x551   :  { %3390 = vmatmul.mubr.bf16.vlgmr.msra.gmra.mrb[44].mxu0 %v5363_v37 }
 0x552   :  { %3431 = vmatmul.mubr.bf16.vlgmr.msra.gmra.mrb[44].mxu1 %v5365_v14  ;;  %3440 = vmatpush1.bf16.msra.mxu0 %v1830_v41  ;;  %v2023_v41 = vld [vmem:[#allocation5 + $0x638] sm:$0xff] }
 0x553   :  { %3471 = vmatprep.mubr.bf16.mxu0 %v5303_v58  ;;  %3481 = vmatpush1.bf16.msra.mxu1 %v1958_v51  ;;  %v1854_v58 = vld [vmem:[#allocation5 + $0xf0] sm:$0xff] }
 0x554   :  { %3512 = vmatprep.mubr.bf16.mxu1 %v5305_v6  ;;  %3441 = vmatprep.subr.bf16.mxu0 %v1839_v44  ;;  %v1863_v6 = vld [vmem:[#allocation5 + $0x138] sm:$0xff]  ;;  %v1894_v51 = vld [vmem:[#allocation5 + $0x230] sm:$0xff] }
 0x555   :  { %3482 = vmatprep.subr.bf16.mxu1 %v1967_v16  ;;  %v2022_v44 = vld [vmem:[#allocation5 + $0x630] sm:$0xff]  ;;  %v1903_v16 = vld [vmem:[#allocation5 + $0x278] sm:$0xff] }
 0x556   :  { %3442 = vmatpush1.bf16.msra.mxu0 %v1838_v8  ;;  %v2031_v8 = vld [vmem:[#allocation5 + $0x678] sm:$0xff] }
 0x557   :  { %3483 = vmatpush1.bf16.msra.mxu1 %v1966_v45  ;;  %3443 = vmatprep.subr.bf16.mxu0 %v1847_v47  ;;  %v1902_v45 = vld [vmem:[#allocation5 + $0x270] sm:$0xff] }
 0x558   :  { %3484 = vmatprep.subr.bf16.mxu1 %v1975_v53  ;;  %v2030_v47 = vld [vmem:[#allocation5 + $0x670] sm:$0xff]  ;;  %v1911_v53 = vld [vmem:[#allocation5 + $0x2b8] sm:$0xff] }
 0x55a   :  { %3444 = vmatpush1.bf16.msra.mxu0 %v1846_v55  ;;  %v2039_v55 = vld [vmem:[#allocation5 + $0x6b8] sm:$0xff] }
 0x55b   :  { %3485 = vmatpush1.bf16.msra.mxu1 %v1974_v0  ;;  %3445 = vmatprep.subr.bf16.mxu0 %v1855_v3  ;;  %v1910_v0 = vld [vmem:[#allocation5 + $0x2b0] sm:$0xff] }
 0x55c   :  { %3486 = vmatprep.subr.bf16.mxu1 %v1983_v23  ;;  %v2038_v3 = vld [vmem:[#allocation5 + $0x6b0] sm:$0xff]  ;;  %v1919_v23 = vld [vmem:[#allocation5 + $0x2f8] sm:$0xff] }
 0x55e   :  { %3446 = vmatpush1.bf16.msra.mxu0 %v1854_v58  ;;  %v2047_v58 = vld [vmem:[#allocation5 + $0x6f8] sm:$0xff] }
 0x55f   :  { %3487 = vmatpush1.bf16.msra.mxu1 %v1982_v57  ;;  %3447 = vmatprep.subr.bf16.mxu0 %v1863_v6  ;;  %v1918_v57 = vld [vmem:[#allocation5 + $0x2f0] sm:$0xff] }
 0x560   :  { %3488 = vmatprep.subr.bf16.mxu1 %v1991_v9  ;;  %v2046_v6 = vld [vmem:[#allocation5 + $0x6f0] sm:$0xff]  ;;  %v1927_v9 = vld [vmem:[#allocation5 + $0x338] sm:$0xff] }
 0x562   :  { %3448 = vmatpush1.bf16.msra.mxu0 %v1862_v40  ;;  %v2055_v40 = vld [vmem:[#allocation5 + $0x738] sm:$0xff] }
 0x563   :  { %3489 = vmatpush1.bf16.msra.mxu1 %v1990_v60  ;;  %3449 = vmatprep.subr.bf16.mxu0 %v1871_v62  ;;  %v1926_v60 = vld [vmem:[#allocation5 + $0x330] sm:$0xff] }
 0x564   :  { %v3145_v19 = vpop.f32.mrb[32].mxu0  ;;  %3490 = vmatprep.subr.bf16.mxu1 %v1999_v5  ;;  %v2054_v62 = vld [vmem:[#allocation5 + $0x730] sm:$0xff]  ;;  %v1935_v5 = vld [vmem:[#allocation5 + $0x378] sm:$0xff] }
 0x565   :  { %v3146_v12 = vadd.f32 %v3145_v19, %v5349_v39  ;;  %v3186_v13 = vpop.f32.mrb[32].mxu1  ;;  %v3147_v38 = vpop.f32.mrb[33].mxu0  ;;  %v2006_v39 = vld [vmem:[#allocation5 + $0x5b0] sm:$0xff] }
 0x566   :  { %v3148_v18 = vadd.f32 %v3147_v38, %v5351_v61  ;;  %v3188_v24 = vpop.f32.mrb[33].mxu1  ;;  %v3149_v50 = vpop.f32.mrb[34].mxu0  ;;  %3450 = vmatpush1.bf16.msra.mxu0 %v1870_v7  ;;  %v1886_v61 = vld [vmem:[#allocation5 + $0x1f0] sm:$0xff]  ;;  %v2063_v7 = vld [vmem:[#allocation5 + $0x778] sm:$0xff] }
 0x567   :  { %v5409_v25 = vadd.f32 %v3186_v13, %v3146_v12  ;;  %v3190_v28 = vpop.f32.mrb[34].mxu1  ;;  %3491 = vmatpush1.bf16.msra.mxu1 %v1998_v10  ;;  %v3150_v26 = vpop.f32.mrb[35].mxu0  ;;  %3451 = vmatprep.subr.bf16.mxu0 %v1879_v11  ;;  %v1934_v19 = vld [vmem:[#allocation5 + $0x370] sm:$0xff]  ;;  %v1943_v11 = vld [vmem:[#allocation5 + $0x3b8] sm:$0xff] }
 0x568   :  { %v5411_v42 = vadd.f32 %v3188_v24, %v3148_v18  ;;  %v3191_v43 = vpop.f32.mrb[35].mxu1  ;;  %3492 = vmatprep.subr.bf16.mxu1 %v2007_v17  ;;  %v2062_v10 = vld [vmem:[#allocation5 + $0x770] sm:$0xff]  ;;  %v2071_v12 = vld [vmem:[#allocation5 + $0x7b8] sm:$0xff] }
 0x569   :  { %v1942_v13 = vld [vmem:[#allocation5 + $0x3b0] sm:$0xff]  ;;  %v1951_v17 = vld [vmem:[#allocation5 + $0x3f8] sm:$0xff] }
 0x56a   :  { %3452 = vmatpush1.bf16.msra.mxu0 %v1878_v31  ;;  %v2070_v38 = vld [vmem:[#allocation5 + $0x7b0] sm:$0xff]  ;;  %v2079_v18 = vld [vmem:[#allocation5 + $0x7f8] sm:$0xff] }
 0x56b   :  { %3493 = vmatpush1.bf16.msra.mxu1 %v2006_v39  ;;  %3453 = vmatprep.subr.bf16.mxu0 %v1887_v33  ;;  %v1950_v24 = vld [vmem:[#allocation5 + $0x3f0] sm:$0xff]  ;;  %v2087_v28 = vld [vmem:[#allocation5 + $0x838] sm:$0xff] }
 0x56c   :  { %3494 = vmatprep.subr.bf16.mxu1 %v2015_v48  ;;  %v2078_v50 = vld [vmem:[#allocation5 + $0x7f0] sm:$0xff]  ;;  %v2215_v26 = vld [vmem:[#allocation5 + $0xc38] sm:$0xff] }
 0x56d   :  { %v2086_v31 = vld [vmem:[#allocation5 + $0x830] sm:$0xff]  ;;  %v2095_v39 = vld [vmem:[#allocation5 + $0x878] sm:$0xff] }
 0x56e   :  { %3454 = vmatpush1.bf16.msra.mxu0 %v1886_v61  ;;  %v2214_v43 = vld [vmem:[#allocation5 + $0xc30] sm:$0xff]  ;;  %v2223_v33 = vld [vmem:[#allocation5 + $0xc78] sm:$0xff] }
 0x56f   :  { %3495 = vmatpush1.bf16.msra.mxu1 %v2014_v49  ;;  %3455 = vmatprep.subr.bf16.mxu0 %v1895_v46  ;;  %v2094_v48 = vld [vmem:[#allocation5 + $0x870] sm:$0xff]  ;;  %v2103_v49 = vld [vmem:[#allocation5 + $0x8b8] sm:$0xff] }
 0x570   :  { %3496 = vmatprep.subr.bf16.mxu1 %v2023_v41  ;;  %v2222_v61 = vld [vmem:[#allocation5 + $0xc70] sm:$0xff]  ;;  %v2231_v46 = vld [vmem:[#allocation5 + $0xcb8] sm:$0xff] }
 0x571   :  { %v2230_v41 = vld [vmem:[#allocation5 + $0xcb0] sm:$0xff] }
 0x572   :  { %3456 = vmatpush1.bf16.msra.mxu0 %v1894_v51  ;;  %v2239_v51 = vld [vmem:[#allocation5 + $0xcf8] sm:$0xff] }
 0x573   :  { %3497 = vmatpush1.bf16.msra.mxu1 %v2022_v44  ;;  %3457 = vmatprep.subr.bf16.mxu0 %v1903_v16  ;;  %v2238_v44 = vld [vmem:[#allocation5 + $0xcf0] sm:$0xff]  ;;  %v2247_v16 = vld [vmem:[#allocation5 + $0xd38] sm:$0xff] }
 0x574   :  { %3498 = vmatprep.subr.bf16.mxu1 %v2031_v8  ;;  %v2118_v8 = vld [vmem:[#allocation5 + $0x930] sm:$0xff] }
 0x576   :  { %3458 = vmatpush1.bf16.msra.mxu0 %v1902_v45  ;;  %v2246_v45 = vld [vmem:[#allocation5 + $0xd30] sm:$0xff] }
 0x577   :  { %3499 = vmatpush1.bf16.msra.mxu1 %v2030_v47  ;;  %3459 = vmatprep.subr.bf16.mxu0 %v1911_v53  ;;  %v2127_v47 = vld [vmem:[#allocation5 + $0x978] sm:$0xff] }
 0x578   :  { %3500 = vmatprep.subr.bf16.mxu1 %v2039_v55  ;;  %v2255_v53 = vld [vmem:[#allocation5 + $0xd78] sm:$0xff]  ;;  %v2126_v55 = vld [vmem:[#allocation5 + $0x970] sm:$0xff] }
 0x57a   :  { %3460 = vmatpush1.bf16.msra.mxu0 %v1910_v0 }
 0x57b   :  { %3501 = vmatpush1.bf16.msra.mxu1 %v2038_v3  ;;  %3461 = vmatprep.subr.bf16.mxu0 %v1919_v23  ;;  %v2254_v3 = vld [vmem:[#allocation5 + $0xd70] sm:$0xff]  ;;  %v2135_v23 = vld [vmem:[#allocation5 + $0x9b8] sm:$0xff] }
 0x57c   :  { %3502 = vmatprep.subr.bf16.mxu1 %v2047_v58 }
 0x57e   :  { %3462 = vmatpush1.bf16.msra.mxu0 %v1918_v57 }
 0x57f   :  { %3503 = vmatpush1.bf16.msra.mxu1 %v2046_v6  ;;  %3463 = vmatprep.subr.bf16.mxu0 %v1927_v9  ;;  %v2263_v9 = vld [vmem:[#allocation5 + $0xdb8] sm:$0xff] }
 0x580   :  { %3504 = vmatprep.subr.bf16.mxu1 %v2055_v40 }
 0x582   :  { %3464 = vmatpush1.bf16.msra.mxu0 %v1926_v60 }
 0x583   :  { %3505 = vmatpush1.bf16.msra.mxu1 %v2054_v62  ;;  %3465 = vmatprep.subr.bf16.mxu0 %v1935_v5 }
 0x584   :  { %3506 = vmatprep.subr.bf16.mxu1 %v2063_v7 }
 0x586   :  { %3466 = vmatpush1.bf16.msra.mxu0 %v1934_v19 }
 0x587   :  { %3507 = vmatpush1.bf16.msra.mxu1 %v2062_v10  ;;  %3467 = vmatprep.subr.bf16.mxu0 %v1943_v11  ;;  %v2134_v10 = vld [vmem:[#allocation5 + $0x9b0] sm:$0xff] }
 0x588   :  { %3508 = vmatprep.subr.bf16.mxu1 %v2071_v12 }
 0x58a   :  { %3468 = vmatpush1.bf16.msra.mxu0 %v1942_v13  ;;  %v2143_v13 = vld [vmem:[#allocation5 + $0x9f8] sm:$0xff] }
 0x58b   :  { %3509 = vmatpush1.bf16.msra.mxu1 %v2070_v38  ;;  %3469 = vmatprep.subr.bf16.mxu0 %v1951_v17  ;;  %v2271_v38 = vld [vmem:[#allocation5 + $0xdf8] sm:$0xff]  ;;  %v2270_v17 = vld [vmem:[#allocation5 + $0xdf0] sm:$0xff] }
 0x58c   :  { %3510 = vmatprep.subr.bf16.mxu1 %v2079_v18  ;;  %v2151_v18 = vld [vmem:[#allocation5 + $0xa38] sm:$0xff] }
 0x58e   :  { %3470 = vmatpush1.bf16.msra.mxu0 %v1950_v24  ;;  %v2279_v24 = vld [vmem:[#allocation5 + $0xe38] sm:$0xff] }
 0x58f   :  { %3511 = vmatpush1.bf16.msra.mxu1 %v2078_v50  ;;  %3521 = vmatprep.subr.bf16.mxu0 %v2087_v28  ;;  %v2150_v50 = vld [vmem:[#allocation5 + $0xa30] sm:$0xff] }
 0x590   :  { %3562 = vmatprep.subr.bf16.mxu1 %v2215_v26  ;;  %v2278_v28 = vld [vmem:[#allocation5 + $0xe30] sm:$0xff]  ;;  %v2159_v26 = vld [vmem:[#allocation5 + $0xa78] sm:$0xff] }
 0x591   :  { %3472 = vmatmul.mubr.bf16.vlgmr.msra.gmra.mrb[48].mxu0 %v5337_v27  ;;  %v2102_v27 = vld [vmem:[#allocation5 + $0x8b0] sm:$0xff] }
 0x592   :  { %3513 = vmatmul.mubr.bf16.vlgmr.msra.gmra.mrb[48].mxu1 %v5339_v29  ;;  %3522 = vmatpush1.bf16.msra.mxu0 %v2086_v31  ;;  %v2111_v29 = vld [vmem:[#allocation5 + $0x8f8] sm:$0xff] }
 0x593   :  { %3553 = vmatprep.mubr.bf16.mxu0 %v5341_v36  ;;  %3563 = vmatpush1.bf16.msra.mxu1 %v2214_v43  ;;  %v2110_v36 = vld [vmem:[#allocation5 + $0x8f0] sm:$0xff]  ;;  %v2287_v31 = vld [vmem:[#allocation5 + $0xe78] sm:$0xff] }
 0x594   :  { %3594 = vmatprep.mubr.bf16.mxu1 %v5344_v32  ;;  %3523 = vmatprep.subr.bf16.mxu0 %v2095_v39  ;;  %v2119_v32 = vld [vmem:[#allocation5 + $0x938] sm:$0xff]  ;;  %v2158_v43 = vld [vmem:[#allocation5 + $0xa70] sm:$0xff] }
 0x595   :  { %3564 = vmatprep.subr.bf16.mxu1 %v2223_v33  ;;  %v2286_v39 = vld [vmem:[#allocation5 + $0xe70] sm:$0xff]  ;;  %v2167_v33 = vld [vmem:[#allocation5 + $0xab8] sm:$0xff] }
 0x596   :  { %3524 = vmatpush1.bf16.msra.mxu0 %v2094_v48  ;;  %v2295_v48 = vld [vmem:[#allocation5 + $0xeb8] sm:$0xff] }
 0x597   :  { %3565 = vmatpush1.bf16.msra.mxu1 %v2222_v61  ;;  %3525 = vmatprep.subr.bf16.mxu0 %v2103_v49  ;;  %v2166_v61 = vld [vmem:[#allocation5 + $0xab0] sm:$0xff] }
 0x598   :  { %3566 = vmatprep.subr.bf16.mxu1 %v2231_v46  ;;  %v2294_v49 = vld [vmem:[#allocation5 + $0xeb0] sm:$0xff]  ;;  %v2175_v46 = vld [vmem:[#allocation5 + $0xaf8] sm:$0xff] }
 0x59a   :  { %3526 = vmatpush1.bf16.msra.mxu0 %v2102_v27  ;;  %v2303_v27 = vld [vmem:[#allocation5 + $0xef8] sm:$0xff] }
 0x59b   :  { %3567 = vmatpush1.bf16.msra.mxu1 %v2230_v41  ;;  %3527 = vmatprep.subr.bf16.mxu0 %v2111_v29  ;;  %v2174_v41 = vld [vmem:[#allocation5 + $0xaf0] sm:$0xff] }
 0x59c   :  { %3568 = vmatprep.subr.bf16.mxu1 %v2239_v51  ;;  %v2302_v29 = vld [vmem:[#allocation5 + $0xef0] sm:$0xff]  ;;  %v2183_v51 = vld [vmem:[#allocation5 + $0xb38] sm:$0xff] }
 0x59e   :  { %3528 = vmatpush1.bf16.msra.mxu0 %v2110_v36  ;;  %v2311_v36 = vld [vmem:[#allocation5 + $0xf38] sm:$0xff] }
 0x59f   :  { %3569 = vmatpush1.bf16.msra.mxu1 %v2238_v44  ;;  %3529 = vmatprep.subr.bf16.mxu0 %v2119_v32  ;;  %v2182_v44 = vld [vmem:[#allocation5 + $0xb30] sm:$0xff] }
 0x5a0   :  { %3570 = vmatprep.subr.bf16.mxu1 %v2247_v16  ;;  %v2310_v32 = vld [vmem:[#allocation5 + $0xf30] sm:$0xff]  ;;  %v2191_v16 = vld [vmem:[#allocation5 + $0xb78] sm:$0xff] }
 0x5a2   :  { %3530 = vmatpush1.bf16.msra.mxu0 %v2118_v8  ;;  %v2319_v8 = vld [vmem:[#allocation5 + $0xf78] sm:$0xff] }
 0x5a3   :  { %3571 = vmatpush1.bf16.msra.mxu1 %v2246_v45  ;;  %3531 = vmatprep.subr.bf16.mxu0 %v2127_v47  ;;  %v5423_v45 = vld [vmem:[#allocation7] sm:$0xff]  ;;  %v2190_v47 = vld [vmem:[#allocation5 + $0xb70] sm:$0xff] }
 0x5a4   :  { %v3227_v0 = vpop.f32.mrb[36].mxu0  ;;  %3572 = vmatprep.subr.bf16.mxu1 %v2255_v53  ;;  %v2318_v53 = vld [vmem:[#allocation5 + $0xf70] sm:$0xff] }
 0x5a5   :  { %v3228_v58 = vadd.f32 %v3227_v0, %v5409_v25  ;;  %v3268_v57 = vpop.f32.mrb[36].mxu1  ;;  %v3229_v6 = vpop.f32.mrb[37].mxu0  ;;  %v2262_v25 = vld [vmem:[#allocation5 + $0xdb0] sm:$0xff]  ;;  %v3612_v0 = vrot.slane %v5423_v45, %v5290_v15 }
 0x5a6   :  { %v3230_v40 = vadd.f32 %v3229_v6, %v5411_v42  ;;  %v3270_v60 = vpop.f32.mrb[37].mxu1  ;;  %v3231_v62 = vpop.f32.mrb[38].mxu0  ;;  %3532 = vmatpush1.bf16.msra.mxu0 %v2126_v55  ;;  %v2142_v42 = vld [vmem:[#allocation5 + $0x9f0] sm:$0xff]  ;;  %v2199_v55 = vld [vmem:[#allocation5 + $0xbb8] sm:$0xff] }
 0x5a7   :  { %v5419_v5 = vadd.f32 %v3268_v57, %v3228_v58  ;;  %v3272_v7 = vpop.f32.mrb[38].mxu1  ;;  %3573 = vmatpush1.bf16.msra.mxu1 %v2254_v3  ;;  %v3232_v19 = vpop.f32.mrb[39].mxu0  ;;  %3533 = vmatprep.subr.bf16.mxu0 %v2135_v23  ;;  %v2327_v3 = vld [vmem:[#allocation5 + $0xfb8] sm:$0xff]  ;;  %v2198_v23 = vld [vmem:[#allocation5 + $0xbb0] sm:$0xff]  ;;  %v3646_v6 = vadd.f32 %v3612_v0, %v5401_v35  ;;  %v3693_v0 = vld [vmem:[#allocation8 + $0xc0] sm:$0xff] }
 0x5a8   :  { %v5421_v11 = vadd.f32 %v3270_v60, %v3230_v40  ;;  %v3273_v12 = vpop.f32.mrb[39].mxu1  ;;  %3574 = vmatprep.subr.bf16.mxu1 %v2263_v9  ;;  %v2326_v58 = vld [vmem:[#allocation5 + $0xfb0] sm:$0xff]  ;;  %v2207_v57 = vld [vmem:[#allocation5 + $0xbf8] sm:$0xff]  ;;  %v3672_v19 = vld [vmem:[#allocation8 + $0x18] sm:$0xff] }
 0x5a9   :  { %v2335_v9 = vld [vmem:[#allocation5 + $0xff8] sm:$0xff]  ;;  %v2206_v40 = vld [vmem:[#allocation5 + $0xbf0] sm:$0xff]  ;;  %v3654_v7 = vmax.f32 %v3646_v6, 0.0 }
 0x5aa   :  { %3534 = vmatpush1.bf16.msra.mxu0 %v2134_v10  ;;  %v2334_v60 = vld [vmem:[#allocation5 + $0xff0] sm:$0xff]  ;;  %v3669_v10 = vld [vmem:[#allocation8] sm:$0xff]  ;;  %v3671_v12 = vld [vmem:[#allocation8 + $0x10] sm:$0xff] }
 0x5ab   :  { %3575 = vmatpush1.bf16.msra.mxu1 %v2262_v25  ;;  %3535 = vmatprep.subr.bf16.mxu0 %v2143_v13  ;;  %v3670_v62 = vld [vmem:[#allocation8 + $0x8] sm:$0xff]  ;;  %v3662_v25 = vpack.c.bf16 %v3654_v7, %v3654_v7  ;;  %v3676_v13 = vld [vmem:[#allocation8 + $0x38] sm:$0xff]  ;;  %v3699_v6 = vld [vmem:[#allocation8 + $0xf0] sm:$0xff] }
 0x5ac   :  { %3576 = vmatprep.subr.bf16.mxu1 %v2271_v38  ;;  %v3674_v35 = vld [vmem:[#allocation8 + $0x28] sm:$0xff]  ;;  %v3673_v38 = vld [vmem:[#allocation8 + $0x20] sm:$0xff] }
 0x5ad   :  { %v3706_v7 = vld [vmem:[#allocation8 + $0x128] sm:$0xff] }
 0x5ae   :  { %3536 = vmatpush1.bf16.msra.mxu0 %v2142_v42  ;;  %v3675_v42 = vld [vmem:[#allocation8 + $0x30] sm:$0xff] }
 0x5af   :  { %3577 = vmatpush1.bf16.msra.mxu1 %v2270_v17  ;;  %3537 = vmatprep.subr.bf16.mxu0 %v2151_v18  ;;  %v3678_v17 = vld [vmem:[#allocation8 + $0x48] sm:$0xff]  ;;  %v3680_v18 = vld [vmem:[#allocation8 + $0x58] sm:$0xff] }
 0x5b0   :  { %3578 = vmatprep.subr.bf16.mxu1 %v2279_v24  ;;  %v3677_v24 = vld [vmem:[#allocation8 + $0x40] sm:$0xff] }
 0x5b2   :  { %3538 = vmatpush1.bf16.msra.mxu0 %v2150_v50  ;;  %v3682_v50 = vld [vmem:[#allocation8 + $0x68] sm:$0xff] }
 0x5b3   :  { %3579 = vmatpush1.bf16.msra.mxu1 %v2278_v28  ;;  %3539 = vmatprep.subr.bf16.mxu0 %v2159_v26  ;;  %v3684_v28 = vld [vmem:[#allocation8 + $0x78] sm:$0xff]  ;;  %v3683_v26 = vld [vmem:[#allocation8 + $0x70] sm:$0xff] }
 0x5b4   :  { %3580 = vmatprep.subr.bf16.mxu1 %v2287_v31  ;;  %v3686_v31 = vld [vmem:[#allocation8 + $0x88] sm:$0xff] }
 0x5b6   :  { %3540 = vmatpush1.bf16.msra.mxu0 %v2158_v43  ;;  %v3688_v43 = vld [vmem:[#allocation8 + $0x98] sm:$0xff] }
 0x5b7   :  { %3581 = vmatpush1.bf16.msra.mxu1 %v2286_v39  ;;  %3541 = vmatprep.subr.bf16.mxu0 %v2167_v33  ;;  %v3685_v39 = vld [vmem:[#allocation8 + $0x80] sm:$0xff]  ;;  %v3687_v33 = vld [vmem:[#allocation8 + $0x90] sm:$0xff] }
 0x5b8   :  { %3582 = vmatprep.subr.bf16.mxu1 %v2295_v48  ;;  %v3690_v48 = vld [vmem:[#allocation8 + $0xa8] sm:$0xff] }
 0x5ba   :  { %3542 = vmatpush1.bf16.msra.mxu0 %v2166_v61  ;;  %v3692_v61 = vld [vmem:[#allocation8 + $0xb8] sm:$0xff] }
 0x5bb   :  { %3583 = vmatpush1.bf16.msra.mxu1 %v2294_v49  ;;  %3543 = vmatprep.subr.bf16.mxu0 %v2175_v46  ;;  %v3689_v49 = vld [vmem:[#allocation8 + $0xa0] sm:$0xff] }
 0x5bc   :  { %3584 = vmatprep.subr.bf16.mxu1 %v2303_v27  ;;  %v3691_v27 = vld [vmem:[#allocation8 + $0xb0] sm:$0xff] }
 0x5be   :  { %3544 = vmatpush1.bf16.msra.mxu0 %v2174_v41  ;;  %v3694_v41 = vld [vmem:[#allocation8 + $0xc8] sm:$0xff] }
 0x5bf   :  { %3585 = vmatpush1.bf16.msra.mxu1 %v2302_v29  ;;  %3545 = vmatprep.subr.bf16.mxu0 %v2183_v51 }
 0x5c0   :  { %3586 = vmatprep.subr.bf16.mxu1 %v2311_v36 }
 0x5c2   :  { %3546 = vmatpush1.bf16.msra.mxu0 %v2182_v44  ;;  %v3696_v44 = vld [vmem:[#allocation8 + $0xd8] sm:$0xff] }
 0x5c3   :  { %3587 = vmatpush1.bf16.msra.mxu1 %v2310_v32  ;;  %3547 = vmatprep.subr.bf16.mxu0 %v2191_v16 }
 0x5c4   :  { %3588 = vmatprep.subr.bf16.mxu1 %v2319_v8 }
 0x5c6   :  { %3548 = vmatpush1.bf16.msra.mxu0 %v2190_v47 }
 0x5c7   :  { %3589 = vmatpush1.bf16.msra.mxu1 %v2318_v53  ;;  %3549 = vmatprep.subr.bf16.mxu0 %v2199_v55 }
 0x5c8   :  { %3590 = vmatprep.subr.bf16.mxu1 %v2327_v3 }
 0x5ca   :  { %3550 = vmatpush1.bf16.msra.mxu0 %v2198_v23 }
 0x5cb   :  { %3591 = vmatpush1.bf16.msra.mxu1 %v2326_v58  ;;  %3551 = vmatprep.subr.bf16.mxu0 %v2207_v57  ;;  %v3698_v58 = vld [vmem:[#allocation8 + $0xe8] sm:$0xff]  ;;  %v3700_v57 = vld [vmem:[#allocation8 + $0xf8] sm:$0xff] }
 0x5cc   :  { %3592 = vmatprep.subr.bf16.mxu1 %v2335_v9  ;;  %v3702_v9 = vld [vmem:[#allocation8 + $0x108] sm:$0xff] }
 0x5ce   :  { %3552 = vmatpush1.bf16.msra.mxu0 %v2206_v40  ;;  %v3704_v40 = vld [vmem:[#allocation8 + $0x118] sm:$0xff] }
 0x5cf   :  { %3593 = vmatpush1.bf16.msra.mxu1 %v2334_v60  ;;  %3947 = vmatprep.subr.bf16.mxu0 %v3670_v62  ;;  %v3701_v60 = vld [vmem:[#allocation8 + $0x100] sm:$0xff]  ;;  %v3703_v62 = vld [vmem:[#allocation8 + $0x110] sm:$0xff] }
 0x5d0   :  { %4111 = vmatprep.subr.bf16.mxu1 %v3672_v19  ;;  %v3708_v19 = vld [vmem:[#allocation8 + $0x138] sm:$0xff] }
 0x5d1   :  { %3554 = vmatmul.mubr.bf16.vlgmr.msra.gmra.mrb[52].mxu0 %v5363_v37  ;;  %v3679_v37 = vld [vmem:[#allocation8 + $0x50] sm:$0xff] }
 0x5d2   :  { %3595 = vmatmul.mubr.bf16.vlgmr.msra.gmra.mrb[52].mxu1 %v5365_v14  ;;  %3948 = vmatpush1.bf16.msra.mxu0 %v3669_v10  ;;  %v3681_v14 = vld [vmem:[#allocation8 + $0x60] sm:$0xff] }
 0x5d3   :  { %3979 = vmatprep.mubr.bf16.mxu0 %v3662_v25  ;;  %4112 = vmatpush1.bf16.msra.mxu1 %v3671_v12  ;;  %v3705_v10 = vld [vmem:[#allocation8 + $0x120] sm:$0xff]  ;;  %v3707_v12 = vld [vmem:[#allocation8 + $0x130] sm:$0xff] }
 0x5d4   :  { %4143 = vmatprep.mubr.bf16.mxu1 %v3662_v25  ;;  %3949 = vmatprep.subr.bf16.mxu0 %v3674_v35  ;;  %v3710_v25 = vld [vmem:[#allocation8 + $0x148] sm:$0xff]  ;;  %v3712_v35 = vld [vmem:[#allocation8 + $0x158] sm:$0xff] }
 0x5d5   :  { %4113 = vmatprep.subr.bf16.mxu1 %v3676_v13  ;;  %v3709_v13 = vld [vmem:[#allocation8 + $0x140] sm:$0xff] }
 0x5d6   :  { %3950 = vmatpush1.bf16.msra.mxu0 %v3673_v38  ;;  %v3711_v38 = vld [vmem:[#allocation8 + $0x150] sm:$0xff] }
 0x5d7   :  { %4114 = vmatpush1.bf16.msra.mxu1 %v3675_v42  ;;  %3951 = vmatprep.subr.bf16.mxu0 %v3678_v17  ;;  %v3714_v42 = vld [vmem:[#allocation8 + $0x168] sm:$0xff]  ;;  %v3716_v17 = vld [vmem:[#allocation8 + $0x178] sm:$0xff] }
 0x5d8   :  { %4115 = vmatprep.subr.bf16.mxu1 %v3680_v18  ;;  %v3713_v18 = vld [vmem:[#allocation8 + $0x160] sm:$0xff] }
 0x5da   :  { %3952 = vmatpush1.bf16.msra.mxu0 %v3677_v24  ;;  %v3715_v24 = vld [vmem:[#allocation8 + $0x170] sm:$0xff] }
 0x5db   :  { %4116 = vmatpush1.bf16.msra.mxu1 %v3679_v37  ;;  %3953 = vmatprep.subr.bf16.mxu0 %v3682_v50  ;;  %v3718_v37 = vld [vmem:[#allocation8 + $0x188] sm:$0xff]  ;;  %v3720_v50 = vld [vmem:[#allocation8 + $0x198] sm:$0xff] }
 0x5dc   :  { %4117 = vmatprep.subr.bf16.mxu1 %v3684_v28  ;;  %v3717_v28 = vld [vmem:[#allocation8 + $0x180] sm:$0xff] }
 0x5de   :  { %3954 = vmatpush1.bf16.msra.mxu0 %v3681_v14  ;;  %v3719_v14 = vld [vmem:[#allocation8 + $0x190] sm:$0xff] }
 0x5df   :  { %4118 = vmatpush1.bf16.msra.mxu1 %v3683_v26  ;;  %3955 = vmatprep.subr.bf16.mxu0 %v3686_v31  ;;  %v3722_v26 = vld [vmem:[#allocation8 + $0x1a8] sm:$0xff]  ;;  %v3724_v31 = vld [vmem:[#allocation8 + $0x1b8] sm:$0xff] }
 0x5e0   :  { %4119 = vmatprep.subr.bf16.mxu1 %v3688_v43  ;;  %v3608_v43 = vrot.slane %v5423_v45, %v5316_v52 }
 0x5e2   :  { %3956 = vmatpush1.bf16.msra.mxu0 %v3685_v39  ;;  %v3721_v39 = vld [vmem:[#allocation8 + $0x1a0] sm:$0xff] }
 0x5e3   :  { %4120 = vmatpush1.bf16.msra.mxu1 %v3687_v33  ;;  %3957 = vmatprep.subr.bf16.mxu0 %v3690_v48  ;;  %v3723_v33 = vld [vmem:[#allocation8 + $0x1b0] sm:$0xff]  ;;  %v3726_v48 = vld [vmem:[#allocation8 + $0x1c8] sm:$0xff] }
 0x5e4   :  { %v3309_v46 = vpop.f32.mrb[40].mxu0  ;;  %4121 = vmatprep.subr.bf16.mxu1 %v3692_v61  ;;  %v3620_v61 = vrot.slane %v5423_v45, %v5295_v20 }
 0x5e5   :  { %v3310_v29 = vadd.f32 %v3309_v46, %v5371_v54  ;;  %v3350_v51 = vpop.f32.mrb[40].mxu1  ;;  %v3311_v36 = vpop.f32.mrb[41].mxu0  ;;  %v3695_v54 = vld [vmem:[#allocation8 + $0xd0] sm:$0xff]  ;;  %v3645_v46 = vadd.f32 %v3608_v43, %v5399_v30 }
 0x5e6   :  { %v3312_v32 = vadd.f32 %v3311_v36, %v5373_v56  ;;  %v3352_v16 = vpop.f32.mrb[41].mxu1  ;;  %v3313_v8 = vpop.f32.mrb[42].mxu0  ;;  %3958 = vmatpush1.bf16.msra.mxu0 %v3689_v49  ;;  %v3697_v56 = vld [vmem:[#allocation8 + $0xe0] sm:$0xff]  ;;  %v3728_v49 = vld [vmem:[#allocation8 + $0x1d8] sm:$0xff] }
 0x5e7   :  { %v5432_v47 = vadd.f32 %v3350_v51, %v3310_v29  ;;  %v3354_v53 = vpop.f32.mrb[42].mxu1  ;;  %4122 = vmatpush1.bf16.msra.mxu1 %v3691_v27  ;;  %v3314_v55 = vpop.f32.mrb[43].mxu0  ;;  %3959 = vmatprep.subr.bf16.mxu0 %v3694_v41  ;;  %v3725_v27 = vld [vmem:[#allocation8 + $0x1c0] sm:$0xff]  ;;  %v3727_v41 = vld [vmem:[#allocation8 + $0x1d0] sm:$0xff]  ;;  %v3730_v29 = vld [vmem:[#allocation8 + $0x1e8] sm:$0xff]  ;;  %v3648_v51 = vadd.f32 %v3620_v61, %v5421_v11 }
 0x5e8   :  { %v5434_v3 = vadd.f32 %v3352_v16, %v3312_v32  ;;  %v3355_v23 = vpop.f32.mrb[43].mxu1  ;;  %4123 = vmatprep.subr.bf16.mxu1 %v3696_v44  ;;  %v3732_v36 = vld [vmem:[#allocation8 + $0x1f8] sm:$0xff]  ;;  %v3653_v44 = vmax.f32 %v3645_v46, 0.0  ;;  %v3729_v32 = vld [vmem:[#allocation8 + $0x1e0] sm:$0xff]  ;;  %v3731_v16 = vld [vmem:[#allocation8 + $0x1f0] sm:$0xff] }
 0x5e9   :  { %v3734_v8 = vld [vmem:[#allocation8 + $0x208] sm:$0xff]  ;;  %v3656_v53 = vmax.f32 %v3648_v51, 0.0  ;;  %v3736_v55 = vld [vmem:[#allocation8 + $0x218] sm:$0xff]  ;;  %v3735_v23 = vld [vmem:[#allocation8 + $0x210] sm:$0xff] }
 0x5ea   :  { %3960 = vmatpush1.bf16.msra.mxu0 %v3693_v0  ;;  %v3661_v30 = vpack.c.bf16 %v3653_v44, %v3653_v44  ;;  %v3733_v0 = vld [vmem:[#allocation8 + $0x200] sm:$0xff]  ;;  %v3738_v11 = vld [vmem:[#allocation8 + $0x228] sm:$0xff]  ;;  %v3763_v51 = vld [vmem:[#allocation8 + $0x2f0] sm:$0xff] }
 0x5eb   :  { %4124 = vmatpush1.bf16.msra.mxu1 %v3695_v54  ;;  %3961 = vmatprep.subr.bf16.mxu0 %v3698_v58  ;;  %v3664_v54 = vpack.c.bf16 %v3656_v53, %v3656_v53  ;;  %v3740_v58 = vld [vmem:[#allocation8 + $0x238] sm:$0xff] }
 0x5ec   :  { %4125 = vmatprep.subr.bf16.mxu1 %v3700_v57  ;;  %v3737_v57 = vld [vmem:[#allocation8 + $0x220] sm:$0xff]  ;;  %v3768_v44 = vld [vmem:[#allocation8 + $0x318] sm:$0xff] }
 0x5ed   :  { %v3772_v53 = vld [vmem:[#allocation8 + $0x338] sm:$0xff] }
 0x5ee   :  { %3962 = vmatpush1.bf16.msra.mxu0 %v3697_v56  ;;  %v3739_v56 = vld [vmem:[#allocation8 + $0x230] sm:$0xff] }
 0x5ef   :  { %4126 = vmatpush1.bf16.msra.mxu1 %v3699_v6  ;;  %3963 = vmatprep.subr.bf16.mxu0 %v3702_v9  ;;  %v3742_v6 = vld [vmem:[#allocation8 + $0x248] sm:$0xff]  ;;  %v3744_v9 = vld [vmem:[#allocation8 + $0x258] sm:$0xff] }
 0x5f0   :  { %4127 = vmatprep.subr.bf16.mxu1 %v3704_v40  ;;  %v3741_v40 = vld [vmem:[#allocation8 + $0x240] sm:$0xff] }
 0x5f2   :  { %3964 = vmatpush1.bf16.msra.mxu0 %v3701_v60  ;;  %v3743_v60 = vld [vmem:[#allocation8 + $0x250] sm:$0xff] }
 0x5f3   :  { %4128 = vmatpush1.bf16.msra.mxu1 %v3703_v62  ;;  %3965 = vmatprep.subr.bf16.mxu0 %v3706_v7  ;;  %v3746_v62 = vld [vmem:[#allocation8 + $0x268] sm:$0xff]  ;;  %v3748_v7 = vld [vmem:[#allocation8 + $0x278] sm:$0xff] }
 0x5f4   :  { %4129 = vmatprep.subr.bf16.mxu1 %v3708_v19  ;;  %v3745_v19 = vld [vmem:[#allocation8 + $0x260] sm:$0xff] }
 0x5f6   :  { %3966 = vmatpush1.bf16.msra.mxu0 %v3705_v10  ;;  %v3747_v10 = vld [vmem:[#allocation8 + $0x270] sm:$0xff] }
 0x5f7   :  { %4130 = vmatpush1.bf16.msra.mxu1 %v3707_v12  ;;  %3967 = vmatprep.subr.bf16.mxu0 %v3710_v25  ;;  %v3750_v12 = vld [vmem:[#allocation8 + $0x288] sm:$0xff]  ;;  %v3752_v25 = vld [vmem:[#allocation8 + $0x298] sm:$0xff] }
 0x5f8   :  { %4131 = vmatprep.subr.bf16.mxu1 %v3712_v35  ;;  %v3749_v35 = vld [vmem:[#allocation8 + $0x280] sm:$0xff] }
 0x5fa   :  { %3968 = vmatpush1.bf16.msra.mxu0 %v3709_v13  ;;  %v3751_v13 = vld [vmem:[#allocation8 + $0x290] sm:$0xff] }
 0x5fb   :  { %4132 = vmatpush1.bf16.msra.mxu1 %v3711_v38  ;;  %3969 = vmatprep.subr.bf16.mxu0 %v3714_v42  ;;  %v3754_v38 = vld [vmem:[#allocation8 + $0x2a8] sm:$0xff]  ;;  %v3756_v42 = vld [vmem:[#allocation8 + $0x2b8] sm:$0xff] }
 0x5fc   :  { %4133 = vmatprep.subr.bf16.mxu1 %v3716_v17  ;;  %v3753_v17 = vld [vmem:[#allocation8 + $0x2a0] sm:$0xff] }
 0x5fe   :  { %3970 = vmatpush1.bf16.msra.mxu0 %v3713_v18 }
 0x5ff   :  { %4134 = vmatpush1.bf16.msra.mxu1 %v3715_v24  ;;  %3971 = vmatprep.subr.bf16.mxu0 %v3718_v37  ;;  %v3755_v24 = vld [vmem:[#allocation8 + $0x2b0] sm:$0xff]  ;;  %v3758_v37 = vld [vmem:[#allocation8 + $0x2c8] sm:$0xff] }
 0x600   :  { %4135 = vmatprep.subr.bf16.mxu1 %v3720_v50 }
 0x602   :  { %3972 = vmatpush1.bf16.msra.mxu0 %v3717_v28 }
 0x603   :  { %4136 = vmatpush1.bf16.msra.mxu1 %v3719_v14  ;;  %3973 = vmatprep.subr.bf16.mxu0 %v3722_v26  ;;  %v3760_v26 = vld [vmem:[#allocation8 + $0x2d8] sm:$0xff] }
 0x604   :  { %4137 = vmatprep.subr.bf16.mxu1 %v3724_v31 }
 0x606   :  { %3974 = vmatpush1.bf16.msra.mxu0 %v3721_v39 }
 0x607   :  { %4138 = vmatpush1.bf16.msra.mxu1 %v3723_v33  ;;  %3975 = vmatprep.subr.bf16.mxu0 %v3726_v48 }
 0x608   :  { %4139 = vmatprep.subr.bf16.mxu1 %v3728_v49  ;;  %v3757_v49 = vld [vmem:[#allocation8 + $0x2c0] sm:$0xff] }
 0x60a   :  { %3976 = vmatpush1.bf16.msra.mxu0 %v3725_v27 }
 0x60b   :  { %4140 = vmatpush1.bf16.msra.mxu1 %v3727_v41  ;;  %3977 = vmatprep.subr.bf16.mxu0 %v3730_v29  ;;  %v3762_v41 = vld [vmem:[#allocation8 + $0x2e8] sm:$0xff]  ;;  %v3764_v29 = vld [vmem:[#allocation8 + $0x2f8] sm:$0xff] }
 0x60c   :  { %4141 = vmatprep.subr.bf16.mxu1 %v3732_v36  ;;  %v3766_v36 = vld [vmem:[#allocation8 + $0x308] sm:$0xff] }
 0x60e   :  { %3978 = vmatpush1.bf16.msra.mxu0 %v3729_v32  ;;  %v3765_v32 = vld [vmem:[#allocation8 + $0x300] sm:$0xff] }
 0x60f   :  { %4142 = vmatpush1.bf16.msra.mxu1 %v3731_v16  ;;  %3988 = vmatprep.subr.bf16.mxu0 %v3734_v8  ;;  %v3767_v16 = vld [vmem:[#allocation8 + $0x310] sm:$0xff]  ;;  %v3770_v8 = vld [vmem:[#allocation8 + $0x328] sm:$0xff] }
 0x610   :  { %4152 = vmatprep.subr.bf16.mxu1 %v3736_v55  ;;  %v3769_v55 = vld [vmem:[#allocation8 + $0x320] sm:$0xff] }
 0x611   :  { %3980 = vmatmul.mubr.bf16.vlgmr.msra.gmra.mrb[56].mxu0 %v3661_v30 }
 0x612   :  { %4144 = vmatmul.mubr.bf16.vlgmr.msra.gmra.mrb[56].mxu1 %v3661_v30  ;;  %3989 = vmatpush1.bf16.msra.mxu0 %v3733_v0  ;;  %v3771_v30 = vld [vmem:[#allocation8 + $0x330] sm:$0xff]  ;;  %v3774_v0 = vld [vmem:[#allocation8 + $0x348] sm:$0xff] }
 0x613   :  { %4020 = vmatprep.mubr.bf16.mxu0 %v3664_v54  ;;  %4153 = vmatpush1.bf16.msra.mxu1 %v3735_v23  ;;  %v3776_v23 = vld [vmem:[#allocation8 + $0x358] sm:$0xff] }
 0x614   :  { %4184 = vmatprep.mubr.bf16.mxu1 %v3664_v54  ;;  %3990 = vmatprep.subr.bf16.mxu0 %v3738_v11  ;;  %v3773_v54 = vld [vmem:[#allocation8 + $0x340] sm:$0xff]  ;;  %v3775_v11 = vld [vmem:[#allocation8 + $0x350] sm:$0xff] }
 0x615   :  { %4154 = vmatprep.subr.bf16.mxu1 %v3740_v58  ;;  %v3778_v58 = vld [vmem:[#allocation8 + $0x368] sm:$0xff] }
 0x616   :  { %3991 = vmatpush1.bf16.msra.mxu0 %v3737_v57  ;;  %v3780_v57 = vld [vmem:[#allocation8 + $0x378] sm:$0xff] }
 0x617   :  { %4155 = vmatpush1.bf16.msra.mxu1 %v3739_v56  ;;  %3992 = vmatprep.subr.bf16.mxu0 %v3742_v6  ;;  %v3777_v56 = vld [vmem:[#allocation8 + $0x360] sm:$0xff]  ;;  %v3779_v6 = vld [vmem:[#allocation8 + $0x370] sm:$0xff] }
 0x618   :  { %4156 = vmatprep.subr.bf16.mxu1 %v3744_v9  ;;  %v3782_v9 = vld [vmem:[#allocation8 + $0x388] sm:$0xff] }
 0x61a   :  { %3993 = vmatpush1.bf16.msra.mxu0 %v3741_v40  ;;  %v3784_v40 = vld [vmem:[#allocation8 + $0x398] sm:$0xff] }
 0x61b   :  { %4157 = vmatpush1.bf16.msra.mxu1 %v3743_v60  ;;  %3994 = vmatprep.subr.bf16.mxu0 %v3746_v62  ;;  %v3781_v60 = vld [vmem:[#allocation8 + $0x380] sm:$0xff]  ;;  %v3783_v62 = vld [vmem:[#allocation8 + $0x390] sm:$0xff] }
 0x61c   :  { %4158 = vmatprep.subr.bf16.mxu1 %v3748_v7  ;;  %v3786_v7 = vld [vmem:[#allocation8 + $0x3a8] sm:$0xff] }
 0x61e   :  { %3995 = vmatpush1.bf16.msra.mxu0 %v3745_v19  ;;  %v3788_v19 = vld [vmem:[#allocation8 + $0x3b8] sm:$0xff] }
 0x61f   :  { %4159 = vmatpush1.bf16.msra.mxu1 %v3747_v10  ;;  %3996 = vmatprep.subr.bf16.mxu0 %v3750_v12  ;;  %v3616_v10 = vrot.slane %v5423_v45, %v5319_v4  ;;  %v3785_v12 = vld [vmem:[#allocation8 + $0x3a0] sm:$0xff] }
 0x620   :  { %4160 = vmatprep.subr.bf16.mxu1 %v3752_v25  ;;  %v3787_v25 = vld [vmem:[#allocation8 + $0x3b0] sm:$0xff] }
 0x622   :  { %3997 = vmatpush1.bf16.msra.mxu0 %v3749_v35  ;;  %v3790_v35 = vld [vmem:[#allocation8 + $0x3c8] sm:$0xff] }
 0x623   :  { %4161 = vmatpush1.bf16.msra.mxu1 %v3751_v13  ;;  %3998 = vmatprep.subr.bf16.mxu0 %v3754_v38  ;;  %v3628_v13 = vrot.slane %v5423_v45, %v1134_v22  ;;  %v3792_v38 = vld [vmem:[#allocation8 + $0x3d8] sm:$0xff]  ;;  %v3795_v22 = vld [vmem:[#allocation8 + $0x3f0] sm:$0xff] }
 0x624   :  { %v3391_v18 = vpop.f32.mrb[44].mxu0  ;;  %4162 = vmatprep.subr.bf16.mxu1 %v3756_v42  ;;  %v3647_v42 = vadd.f32 %v3616_v10, %v5419_v5 }
 0x625   :  { %v3392_v50 = vadd.f32 %v3391_v18, %v5432_v47  ;;  %v3432_v28 = vpop.f32.mrb[44].mxu1  ;;  %v3393_v14 = vpop.f32.mrb[45].mxu0  ;;  %v3759_v47 = vld [vmem:[#allocation8 + $0x2d0] sm:$0xff] }
 0x626   :  { %v3394_v31 = vadd.f32 %v3393_v14, %v5434_v3  ;;  %v3434_v43 = vpop.f32.mrb[45].mxu1  ;;  %v3395_v39 = vpop.f32.mrb[46].mxu0  ;;  %3999 = vmatpush1.bf16.msra.mxu0 %v3753_v17  ;;  %v3761_v3 = vld [vmem:[#allocation8 + $0x2e0] sm:$0xff]  ;;  %v3791_v18 = vld [vmem:[#allocation8 + $0x3d0] sm:$0xff] }
 0x627   :  { %v5444_v33 = vadd.f32 %v3432_v28, %v3392_v50  ;;  %v3436_v48 = vpop.f32.mrb[46].mxu1  ;;  %4163 = vmatpush1.bf16.msra.mxu1 %v3755_v24  ;;  %v3396_v61 = vpop.f32.mrb[47].mxu0  ;;  %4000 = vmatprep.subr.bf16.mxu0 %v3758_v37  ;;  %v3789_v17 = vld [vmem:[#allocation8 + $0x3c0] sm:$0xff]  ;;  %v3794_v24 = vld [vmem:[#allocation8 + $0x3e8] sm:$0xff]  ;;  %v3796_v50 = vld [vmem:[#allocation8 + $0x3f8] sm:$0xff]  ;;  %v3655_v28 = vmax.f32 %v3647_v42, 0.0 }
 0x628   :  { %v5446_v46 = vadd.f32 %v3434_v43, %v3394_v31  ;;  %v3437_v27 = vpop.f32.mrb[47].mxu1  ;;  %4164 = vmatprep.subr.bf16.mxu1 %v3760_v26  ;;  %v3793_v14 = vld [vmem:[#allocation8 + $0x3e0] sm:$0xff]  ;;  %v3798_v26 = vld [vmem:[#allocation8 + $0x408] sm:$0xff]  ;;  %v3800_v43 = vld [vmem:[#allocation8 + $0x418] sm:$0xff] }
 0x629   :  { %v3663_v5 = vpack.c.bf16 %v3655_v28, %v3655_v28  ;;  %v3797_v39 = vld [vmem:[#allocation8 + $0x400] sm:$0xff]  ;;  %v3799_v48 = vld [vmem:[#allocation8 + $0x410] sm:$0xff]  ;;  %v3828_v42 = vld [vmem:[#allocation8 + $0x4f8] sm:$0xff] }
 0x62a   :  { %4001 = vmatpush1.bf16.msra.mxu0 %v3757_v49  ;;  %v3650_v37 = vadd.f32 %v3628_v13, %v5446_v46  ;;  %v3802_v49 = vld [vmem:[#allocation8 + $0x428] sm:$0xff]  ;;  %v3804_v46 = vld [vmem:[#allocation8 + $0x438] sm:$0xff]  ;;  %v3801_v27 = vld [vmem:[#allocation8 + $0x420] sm:$0xff] }
 0x62b   :  { %4165 = vmatpush1.bf16.msra.mxu1 %v3759_v47  ;;  %4002 = vmatprep.subr.bf16.mxu0 %v3762_v41  ;;  %v3803_v47 = vld [vmem:[#allocation8 + $0x430] sm:$0xff]  ;;  %v3806_v41 = vld [vmem:[#allocation8 + $0x448] sm:$0xff] }
 0x62c   :  { %4166 = vmatprep.subr.bf16.mxu1 %v3764_v29  ;;  %v3658_v31 = vmax.f32 %v3650_v37, 0.0  ;;  %v3808_v29 = vld [vmem:[#allocation8 + $0x458] sm:$0xff]  ;;  %v3829_v37 = vld [vmem:[#allocation8 + $0x500] sm:$0xff]  ;;  %v3834_v28 = vld [vmem:[#allocation8 + $0x528] sm:$0xff] }
 0x62e   :  { %4003 = vmatpush1.bf16.msra.mxu0 %v3761_v3  ;;  %v3666_v61 = vpack.c.bf16 %v3658_v31, %v3658_v31  ;;  %v3805_v3 = vld [vmem:[#allocation8 + $0x440] sm:$0xff]  ;;  %v3838_v31 = vld [vmem:[#allocation8 + $0x548] sm:$0xff] }
 0x62f   :  { %4167 = vmatpush1.bf16.msra.mxu1 %v3763_v51  ;;  %4004 = vmatprep.subr.bf16.mxu0 %v3766_v36  ;;  %v3807_v51 = vld [vmem:[#allocation8 + $0x450] sm:$0xff]  ;;  %v3810_v36 = vld [vmem:[#allocation8 + $0x468] sm:$0xff] }
 0x630   :  { %4168 = vmatprep.subr.bf16.mxu1 %v3768_v44  ;;  %v3812_v44 = vld [vmem:[#allocation8 + $0x478] sm:$0xff] }
 0x632   :  { %4005 = vmatpush1.bf16.msra.mxu0 %v3765_v32  ;;  %v3809_v32 = vld [vmem:[#allocation8 + $0x460] sm:$0xff] }
 0x633   :  { %4169 = vmatpush1.bf16.msra.mxu1 %v3767_v16  ;;  %4006 = vmatprep.subr.bf16.mxu0 %v3770_v8  ;;  %v3811_v16 = vld [vmem:[#allocation8 + $0x470] sm:$0xff]  ;;  %v3814_v8 = vld [vmem:[#allocation8 + $0x488] sm:$0xff] }
 0x634   :  { %4170 = vmatprep.subr.bf16.mxu1 %v3772_v53  ;;  %v3816_v53 = vld [vmem:[#allocation8 + $0x498] sm:$0xff] }
 0x636   :  { %4007 = vmatpush1.bf16.msra.mxu0 %v3769_v55  ;;  %v3813_v55 = vld [vmem:[#allocation8 + $0x480] sm:$0xff] }
 0x637   :  { %4171 = vmatpush1.bf16.msra.mxu1 %v3771_v30  ;;  %4008 = vmatprep.subr.bf16.mxu0 %v3774_v0  ;;  %v3815_v30 = vld [vmem:[#allocation8 + $0x490] sm:$0xff]  ;;  %v3818_v0 = vld [vmem:[#allocation8 + $0x4a8] sm:$0xff] }
 0x638   :  { %4172 = vmatprep.subr.bf16.mxu1 %v3776_v23  ;;  %v3820_v23 = vld [vmem:[#allocation8 + $0x4b8] sm:$0xff] }
 0x63a   :  { %4009 = vmatpush1.bf16.msra.mxu0 %v3773_v54  ;;  %v3817_v54 = vld [vmem:[#allocation8 + $0x4a0] sm:$0xff] }
 0x63b   :  { %4173 = vmatpush1.bf16.msra.mxu1 %v3775_v11  ;;  %4010 = vmatprep.subr.bf16.mxu0 %v3778_v58  ;;  %v3819_v58 = vld [vmem:[#allocation8 + $0x4b0] sm:$0xff] }
 0x63c   :  { %4174 = vmatprep.subr.bf16.mxu1 %v3780_v57  ;;  %v3822_v57 = vld [vmem:[#allocation8 + $0x4c8] sm:$0xff] }
 0x63e   :  { %4011 = vmatpush1.bf16.msra.mxu0 %v3777_v56 }
 0x63f   :  { %4175 = vmatpush1.bf16.msra.mxu1 %v3779_v6  ;;  %4012 = vmatprep.subr.bf16.mxu0 %v3782_v9 }
 0x640   :  { %4176 = vmatprep.subr.bf16.mxu1 %v3784_v40  ;;  %v3824_v40 = vld [vmem:[#allocation8 + $0x4d8] sm:$0xff] }
 0x642   :  { %4013 = vmatpush1.bf16.msra.mxu0 %v3781_v60 }
 0x643   :  { %4177 = vmatpush1.bf16.msra.mxu1 %v3783_v62  ;;  %4014 = vmatprep.subr.bf16.mxu0 %v3786_v7 }
 0x644   :  { %4178 = vmatprep.subr.bf16.mxu1 %v3788_v19 }
 0x646   :  { %4015 = vmatpush1.bf16.msra.mxu0 %v3785_v12 }
 0x647   :  { %4179 = vmatpush1.bf16.msra.mxu1 %v3787_v25  ;;  %4016 = vmatprep.subr.bf16.mxu0 %v3790_v35  ;;  %v3821_v25 = vld [vmem:[#allocation8 + $0x4c0] sm:$0xff] }
 0x648   :  { %4180 = vmatprep.subr.bf16.mxu1 %v3792_v38  ;;  %v3826_v38 = vld [vmem:[#allocation8 + $0x4e8] sm:$0xff] }
 0x64a   :  { %4017 = vmatpush1.bf16.msra.mxu0 %v3789_v17  ;;  %v3827_v17 = vld [vmem:[#allocation8 + $0x4f0] sm:$0xff] }
 0x64b   :  { %4181 = vmatpush1.bf16.msra.mxu1 %v3791_v18  ;;  %4018 = vmatprep.subr.bf16.mxu0 %v3794_v24  ;;  %v3830_v18 = vld [vmem:[#allocation8 + $0x508] sm:$0xff]  ;;  %v3832_v24 = vld [vmem:[#allocation8 + $0x518] sm:$0xff] }
 0x64c   :  { %4182 = vmatprep.subr.bf16.mxu1 %v3796_v50  ;;  %v3831_v50 = vld [vmem:[#allocation8 + $0x510] sm:$0xff] }
 0x64e   :  { %4019 = vmatpush1.bf16.msra.mxu0 %v3793_v14  ;;  %v3836_v14 = vld [vmem:[#allocation8 + $0x538] sm:$0xff] }
 0x64f   :  { %4183 = vmatpush1.bf16.msra.mxu1 %v3795_v22  ;;  %4029 = vmatprep.subr.bf16.mxu0 %v3798_v26  ;;  %v3833_v22 = vld [vmem:[#allocation8 + $0x520] sm:$0xff]  ;;  %v3835_v26 = vld [vmem:[#allocation8 + $0x530] sm:$0xff] }
 0x650   :  { %4193 = vmatprep.subr.bf16.mxu1 %v3800_v43  ;;  %v3840_v43 = vld [vmem:[#allocation8 + $0x558] sm:$0xff] }
 0x651   :  { %4021 = vmatmul.mubr.bf16.vlgmr.msra.gmra.mrb[56].mxu0 %v3663_v5 }
 0x652   :  { %4185 = vmatmul.mubr.bf16.vlgmr.msra.gmra.mrb[56].mxu1 %v3663_v5  ;;  %4030 = vmatpush1.bf16.msra.mxu0 %v3797_v39  ;;  %v3837_v5 = vld [vmem:[#allocation8 + $0x540] sm:$0xff]  ;;  %v3839_v39 = vld [vmem:[#allocation8 + $0x550] sm:$0xff] }
 0x653   :  { %4061 = vmatprep.mubr.bf16.mxu0 %v3666_v61  ;;  %4194 = vmatpush1.bf16.msra.mxu1 %v3799_v48  ;;  %v3842_v48 = vld [vmem:[#allocation8 + $0x568] sm:$0xff] }
 0x654   :  { %4225 = vmatprep.mubr.bf16.mxu1 %v3666_v61  ;;  %4031 = vmatprep.subr.bf16.mxu0 %v3802_v49  ;;  %v3844_v61 = vld [vmem:[#allocation8 + $0x578] sm:$0xff]  ;;  %v3841_v49 = vld [vmem:[#allocation8 + $0x560] sm:$0xff] }
 0x655   :  { %4195 = vmatprep.subr.bf16.mxu1 %v3804_v46  ;;  %v3843_v46 = vld [vmem:[#allocation8 + $0x570] sm:$0xff] }
 0x656   :  { %4032 = vmatpush1.bf16.msra.mxu0 %v3801_v27  ;;  %v3846_v27 = vld [vmem:[#allocation8 + $0x588] sm:$0xff] }
 0x657   :  { %4196 = vmatpush1.bf16.msra.mxu1 %v3803_v47  ;;  %4033 = vmatprep.subr.bf16.mxu0 %v3806_v41  ;;  %v3848_v47 = vld [vmem:[#allocation8 + $0x598] sm:$0xff]  ;;  %v3845_v41 = vld [vmem:[#allocation8 + $0x580] sm:$0xff] }
 0x658   :  { %4197 = vmatprep.subr.bf16.mxu1 %v3808_v29  ;;  %v3847_v29 = vld [vmem:[#allocation8 + $0x590] sm:$0xff] }
 0x65a   :  { %4034 = vmatpush1.bf16.msra.mxu0 %v3805_v3  ;;  %v3850_v3 = vld [vmem:[#allocation8 + $0x5a8] sm:$0xff] }
 0x65b   :  { %4198 = vmatpush1.bf16.msra.mxu1 %v3807_v51  ;;  %4035 = vmatprep.subr.bf16.mxu0 %v3810_v36  ;;  %v3852_v51 = vld [vmem:[#allocation8 + $0x5b8] sm:$0xff]  ;;  %v3624_v36 = vrot.slane %v5423_v45, %v1130_v21  ;;  %v3857_v21 = vld [vmem:[#allocation8 + $0x5e0] sm:$0xff]  ;;  %v3859_v45 = vld [vmem:[#allocation8 + $0x5f0] sm:$0xff] }
 0x65c   :  { %4199 = vmatprep.subr.bf16.mxu1 %v3812_v44  ;;  %v3849_v44 = vld [vmem:[#allocation8 + $0x5a0] sm:$0xff] }
 0x65e   :  { %4036 = vmatpush1.bf16.msra.mxu0 %v3809_v32  ;;  %v3851_v32 = vld [vmem:[#allocation8 + $0x5b0] sm:$0xff] }
 0x65f   :  { %4200 = vmatpush1.bf16.msra.mxu1 %v3811_v16  ;;  %4037 = vmatprep.subr.bf16.mxu0 %v3814_v8  ;;  %v3854_v16 = vld [vmem:[#allocation8 + $0x5c8] sm:$0xff]  ;;  %v3856_v8 = vld [vmem:[#allocation8 + $0x5d8] sm:$0xff] }
 0x660   :  { %4201 = vmatprep.subr.bf16.mxu1 %v3816_v53  ;;  %v3649_v53 = vadd.f32 %v3624_v36, %v5444_v33  ;;  %v3861_v33 = vld [vmem:[#allocation8 + $0x600] sm:$0xff]  ;;  %v3892_v36 = vld [vmem:[#allocation8 + $0x6f8] sm:$0xff] }
 0x662   :  { %4038 = vmatpush1.bf16.msra.mxu0 %v3813_v55  ;;  %v3853_v55 = vld [vmem:[#allocation8 + $0x5c0] sm:$0xff] }
 0x663   :  { %4202 = vmatpush1.bf16.msra.mxu1 %v3815_v30  ;;  %4039 = vmatprep.subr.bf16.mxu0 %v3818_v0  ;;  %v3855_v30 = vld [vmem:[#allocation8 + $0x5d0] sm:$0xff]  ;;  %v3858_v0 = vld [vmem:[#allocation8 + $0x5e8] sm:$0xff] }
 0x664   :  { %v3473_v11 = vpop.f32.mrb[48].mxu0  ;;  %4203 = vmatprep.subr.bf16.mxu1 %v3820_v23  ;;  %v3860_v23 = vld [vmem:[#allocation8 + $0x5f8] sm:$0xff] }
 0x665   :  { %v3474_v56 = vadd.f32 %v3473_v11, %v5379_v34  ;;  %v3514_v6 = vpop.f32.mrb[48].mxu1  ;;  %v3475_v9 = vpop.f32.mrb[49].mxu0  ;;  %v3823_v34 = vld [vmem:[#allocation8 + $0x4d0] sm:$0xff]  ;;  %v3862_v11 = vld [vmem:[#allocation8 + $0x608] sm:$0xff] }
 0x666   :  { %v3476_v60 = vadd.f32 %v3475_v9, %v5381_v2  ;;  %v3516_v62 = vpop.f32.mrb[49].mxu1  ;;  %v3477_v7 = vpop.f32.mrb[50].mxu0  ;;  %4040 = vmatpush1.bf16.msra.mxu0 %v3817_v54  ;;  %v3825_v2 = vld [vmem:[#allocation8 + $0x4e0] sm:$0xff]  ;;  %v3657_v54 = vmax.f32 %v3649_v53, 0.0  ;;  %v3868_v9 = vld [vmem:[#allocation8 + $0x638] sm:$0xff] }
 0x667   :  { %v5457_v19 = vadd.f32 %v3514_v6, %v3474_v56  ;;  %v3518_v10 = vpop.f32.mrb[50].mxu1  ;;  %4204 = vmatpush1.bf16.msra.mxu1 %v3819_v58  ;;  %v3478_v12 = vpop.f32.mrb[51].mxu0  ;;  %4041 = vmatprep.subr.bf16.mxu0 %v3822_v57  ;;  %v3864_v58 = vld [vmem:[#allocation8 + $0x618] sm:$0xff]  ;;  %v3863_v56 = vld [vmem:[#allocation8 + $0x610] sm:$0xff]  ;;  %v3866_v6 = vld [vmem:[#allocation8 + $0x628] sm:$0xff] }
 0x668   :  { %v5459_v35 = vadd.f32 %v3516_v62, %v3476_v60  ;;  %v3519_v13 = vpop.f32.mrb[51].mxu1  ;;  %4205 = vmatprep.subr.bf16.mxu1 %v3824_v40  ;;  %v3665_v57 = vpack.c.bf16 %v3657_v54, %v3657_v54  ;;  %v3865_v40 = vld [vmem:[#allocation8 + $0x620] sm:$0xff]  ;;  %v3867_v60 = vld [vmem:[#allocation8 + $0x630] sm:$0xff]  ;;  %v3870_v62 = vld [vmem:[#allocation8 + $0x648] sm:$0xff] }
 0x669   :  { %v3872_v7 = vld [vmem:[#allocation8 + $0x658] sm:$0xff]  ;;  %v3869_v10 = vld [vmem:[#allocation8 + $0x640] sm:$0xff]  ;;  %v3871_v12 = vld [vmem:[#allocation8 + $0x650] sm:$0xff] }
 0x66a   :  { %4042 = vmatpush1.bf16.msra.mxu0 %v3821_v25  ;;  %v3874_v25 = vld [vmem:[#allocation8 + $0x668] sm:$0xff]  ;;  %v3876_v13 = vld [vmem:[#allocation8 + $0x678] sm:$0xff] }
 0x66b   :  { %4206 = vmatpush1.bf16.msra.mxu1 %v3823_v34  ;;  %4043 = vmatprep.subr.bf16.mxu0 %v3826_v38  ;;  %v3873_v34 = vld [vmem:[#allocation8 + $0x660] sm:$0xff]  ;;  %v3875_v38 = vld [vmem:[#allocation8 + $0x670] sm:$0xff]  ;;  %v3900_v54 = vld [vmem:[#allocation8 + $0x738] sm:$0xff] }
 0x66c   :  { %4207 = vmatprep.subr.bf16.mxu1 %v3828_v42  ;;  %v3878_v42 = vld [vmem:[#allocation8 + $0x688] sm:$0xff] }
 0x66e   :  { %4044 = vmatpush1.bf16.msra.mxu0 %v3825_v2  ;;  %v3880_v2 = vld [vmem:[#allocation8 + $0x698] sm:$0xff] }
 0x66f   :  { %4208 = vmatpush1.bf16.msra.mxu1 %v3827_v17  ;;  %4045 = vmatprep.subr.bf16.mxu0 %v3830_v18  ;;  %v3877_v17 = vld [vmem:[#allocation8 + $0x680] sm:$0xff]  ;;  %v3879_v18 = vld [vmem:[#allocation8 + $0x690] sm:$0xff] }
 0x670   :  { %4209 = vmatprep.subr.bf16.mxu1 %v3832_v24  ;;  %v3882_v24 = vld [vmem:[#allocation8 + $0x6a8] sm:$0xff] }
 0x672   :  { %4046 = vmatpush1.bf16.msra.mxu0 %v3829_v37  ;;  %v3884_v37 = vld [vmem:[#allocation8 + $0x6b8] sm:$0xff] }
 0x673   :  { %4210 = vmatpush1.bf16.msra.mxu1 %v3831_v50  ;;  %4047 = vmatprep.subr.bf16.mxu0 %v3834_v28  ;;  %v3881_v50 = vld [vmem:[#allocation8 + $0x6a0] sm:$0xff] }
 0x674   :  { %4211 = vmatprep.subr.bf16.mxu1 %v3836_v14  ;;  %v3883_v14 = vld [vmem:[#allocation8 + $0x6b0] sm:$0xff] }
 0x676   :  { %4048 = vmatpush1.bf16.msra.mxu0 %v3833_v22  ;;  %v3886_v22 = vld [vmem:[#allocation8 + $0x6c8] sm:$0xff] }
 0x677   :  { %4212 = vmatpush1.bf16.msra.mxu1 %v3835_v26  ;;  %4049 = vmatprep.subr.bf16.mxu0 %v3838_v31 }
 0x678   :  { %4213 = vmatprep.subr.bf16.mxu1 %v3840_v43 }
 0x67a   :  { %4050 = vmatpush1.bf16.msra.mxu0 %v3837_v5  ;;  %v3888_v5 = vld [vmem:[#allocation8 + $0x6d8] sm:$0xff] }
 0x67b   :  { %4214 = vmatpush1.bf16.msra.mxu1 %v3839_v39  ;;  %4051 = vmatprep.subr.bf16.mxu0 %v3842_v48 }
 0x67c   :  { %4215 = vmatprep.subr.bf16.mxu1 %v3844_v61  ;;  %v5467_v61 = vld [vmem:[#allocation7] sm:$0xff] }
 0x67e   :  { %4052 = vmatpush1.bf16.msra.mxu0 %v3841_v49  ;;  %v3636_v49 = vrot.slane %v5467_v61, %v1142_v1  ;;  %v3889_v1 = vld [vmem:[#allocation8 + $0x6e0] sm:$0xff] }
 0x67f   :  { %4216 = vmatpush1.bf16.msra.mxu1 %v3843_v46  ;;  %4053 = vmatprep.subr.bf16.mxu0 %v3846_v27 }
 0x680   :  { %4217 = vmatprep.subr.bf16.mxu1 %v3848_v47 }
 0x682   :  { %4054 = vmatpush1.bf16.msra.mxu0 %v3845_v41 }
 0x683   :  { %4218 = vmatpush1.bf16.msra.mxu1 %v3847_v29  ;;  %4055 = vmatprep.subr.bf16.mxu0 %v3850_v3 }
 0x684   :  { %4219 = vmatprep.subr.bf16.mxu1 %v3852_v51  ;;  %v3890_v51 = vld [vmem:[#allocation8 + $0x6e8] sm:$0xff] }
 0x686   :  { %4056 = vmatpush1.bf16.msra.mxu0 %v3849_v44 }
 0x687   :  { %4220 = vmatpush1.bf16.msra.mxu1 %v3851_v32  ;;  %4057 = vmatprep.subr.bf16.mxu0 %v3854_v16  ;;  %v3891_v16 = vld [vmem:[#allocation8 + $0x6f0] sm:$0xff] }
 0x688   :  { %4221 = vmatprep.subr.bf16.mxu1 %v3856_v8  ;;  %v3894_v8 = vld [vmem:[#allocation8 + $0x708] sm:$0xff] }
 0x68a   :  { %4058 = vmatpush1.bf16.msra.mxu0 %v3853_v55  ;;  %v3896_v55 = vld [vmem:[#allocation8 + $0x718] sm:$0xff] }
 0x68b   :  { %4222 = vmatpush1.bf16.msra.mxu1 %v3855_v30  ;;  %4059 = vmatprep.subr.bf16.mxu0 %v3858_v0  ;;  %v3893_v30 = vld [vmem:[#allocation8 + $0x700] sm:$0xff]  ;;  %v3895_v0 = vld [vmem:[#allocation8 + $0x710] sm:$0xff] }
 0x68c   :  { %4223 = vmatprep.subr.bf16.mxu1 %v3860_v23  ;;  %v3898_v23 = vld [vmem:[#allocation8 + $0x728] sm:$0xff] }
 0x68e   :  { %4060 = vmatpush1.bf16.msra.mxu0 %v3857_v21  ;;  %v3897_v21 = vld [vmem:[#allocation8 + $0x720] sm:$0xff] }
 0x68f   :  { %4224 = vmatpush1.bf16.msra.mxu1 %v3859_v45  ;;  %4070 = vmatprep.subr.bf16.mxu0 %v3862_v11  ;;  %v3899_v45 = vld [vmem:[#allocation8 + $0x730] sm:$0xff]  ;;  %v3902_v11 = vld [vmem:[#allocation8 + $0x748] sm:$0xff] }
 0x690   :  { %4234 = vmatprep.subr.bf16.mxu1 %v3864_v58  ;;  %v3904_v58 = vld [vmem:[#allocation8 + $0x758] sm:$0xff] }
 0x691   :  { %4062 = vmatmul.mubr.bf16.vlgmr.msra.gmra.mrb[56].mxu0 %v3665_v57 }
 0x692   :  { %4226 = vmatmul.mubr.bf16.vlgmr.msra.gmra.mrb[56].mxu1 %v3665_v57  ;;  %4071 = vmatpush1.bf16.msra.mxu0 %v3861_v33  ;;  %v3901_v57 = vld [vmem:[#allocation8 + $0x740] sm:$0xff]  ;;  %v3903_v33 = vld [vmem:[#allocation8 + $0x750] sm:$0xff] }
 0x693   :  { %4235 = vmatpush1.bf16.msra.mxu1 %v3863_v56  ;;  %4072 = vmatprep.subr.bf16.mxu0 %v3866_v6  ;;  %v3906_v56 = vld [vmem:[#allocation8 + $0x768] sm:$0xff]  ;;  %v3908_v6 = vld [vmem:[#allocation8 + $0x778] sm:$0xff] }
 0x694   :  { %4236 = vmatprep.subr.bf16.mxu1 %v3868_v9  ;;  %v3905_v9 = vld [vmem:[#allocation8 + $0x760] sm:$0xff] }
 0x696   :  { %4073 = vmatpush1.bf16.msra.mxu0 %v3865_v40  ;;  %v3907_v40 = vld [vmem:[#allocation8 + $0x770] sm:$0xff] }
 0x697   :  { %4237 = vmatpush1.bf16.msra.mxu1 %v3867_v60  ;;  %4074 = vmatprep.subr.bf16.mxu0 %v3870_v62  ;;  %v3910_v60 = vld [vmem:[#allocation8 + $0x788] sm:$0xff]  ;;  %v3912_v62 = vld [vmem:[#allocation8 + $0x798] sm:$0xff] }
 0x698   :  { %4238 = vmatprep.subr.bf16.mxu1 %v3872_v7  ;;  %v3909_v7 = vld [vmem:[#allocation8 + $0x780] sm:$0xff] }
 0x69a   :  { %4075 = vmatpush1.bf16.msra.mxu0 %v3869_v10  ;;  %v3911_v10 = vld [vmem:[#allocation8 + $0x790] sm:$0xff] }
 0x69b   :  { %4239 = vmatpush1.bf16.msra.mxu1 %v3871_v12  ;;  %4076 = vmatprep.subr.bf16.mxu0 %v3874_v25  ;;  %v3914_v12 = vld [vmem:[#allocation8 + $0x7a8] sm:$0xff]  ;;  %v3916_v25 = vld [vmem:[#allocation8 + $0x7b8] sm:$0xff] }
 0x69c   :  { %4240 = vmatprep.subr.bf16.mxu1 %v3876_v13  ;;  %v3632_v13 = vrot.slane %v5467_v61, %v1138_v63  ;;  %v3921_v63 = vld [vmem:[#allocation8 + $0x7e0] sm:$0xff]  ;;  %v4300_v61 = vld [vmem:[#allocation10 + $0x88] sm:$0xff] }
 0x69e   :  { %4077 = vmatpush1.bf16.msra.mxu0 %v3873_v34  ;;  %v3913_v34 = vld [vmem:[#allocation8 + $0x7a0] sm:$0xff] }
 0x69f   :  { %4241 = vmatpush1.bf16.msra.mxu1 %v3875_v38  ;;  %4078 = vmatprep.subr.bf16.mxu0 %v3878_v42  ;;  %v3915_v38 = vld [vmem:[#allocation8 + $0x7b0] sm:$0xff]  ;;  %v3918_v42 = vld [vmem:[#allocation8 + $0x7c8] sm:$0xff] }
 0x6a0   :  { %4242 = vmatprep.subr.bf16.mxu1 %v3880_v2  ;;  %v3920_v2 = vld [vmem:[#allocation8 + $0x7d8] sm:$0xff] }
 0x6a2   :  { %4079 = vmatpush1.bf16.msra.mxu0 %v3877_v17 }
 0x6a3   :  { %4243 = vmatpush1.bf16.msra.mxu1 %v3879_v18  ;;  %4080 = vmatprep.subr.bf16.mxu0 %v3882_v24  ;;  %v3917_v18 = vld [vmem:[#allocation8 + $0x7c0] sm:$0xff]  ;;  %v3919_v24 = vld [vmem:[#allocation8 + $0x7d0] sm:$0xff] }
 0x6a4   :  { %v3555_v28 = vpop.f32.mrb[52].mxu0  ;;  %4244 = vmatprep.subr.bf16.mxu1 %v3884_v37  ;;  %v3922_v37 = vld [vmem:[#allocation8 + $0x7e8] sm:$0xff] }
 0x6a5   :  { %v3556_v26 = vadd.f32 %v3555_v28, %v5457_v19  ;;  %v3596_v31 = vpop.f32.mrb[52].mxu1  ;;  %v3557_v43 = vpop.f32.mrb[53].mxu0  ;;  %v3885_v19 = vld [vmem:[#allocation8 + $0x6c0] sm:$0xff]  ;;  %v3923_v28 = vld [vmem:[#allocation8 + $0x7f0] sm:$0xff] }
 0x6a6   :  { %v3558_v39 = vadd.f32 %v3557_v43, %v5459_v35  ;;  %v3598_v48 = vpop.f32.mrb[53].mxu1  ;;  %v3559_v46 = vpop.f32.mrb[54].mxu0  ;;  %4081 = vmatpush1.bf16.msra.mxu0 %v3881_v50  ;;  %v3887_v35 = vld [vmem:[#allocation8 + $0x6d0] sm:$0xff]  ;;  %v3924_v50 = vld [vmem:[#allocation8 + $0x7f8] sm:$0xff]  ;;  %v4299_v43 = vld [vmem:[#allocation10 + $0x80] sm:$0xff] }
 0x6a7   :  { %v5472_v27 = vadd.f32 %v3596_v31, %v3556_v26  ;;  %v3600_v47 = vpop.f32.mrb[54].mxu1  ;;  %4245 = vmatpush1.bf16.msra.mxu1 %v3883_v14  ;;  %v3560_v41 = vpop.f32.mrb[55].mxu0  ;;  %4082 = vmatprep.subr.bf16.mxu0 %v3886_v22  ;;  %v4291_v14 = vld [vmem:[#allocation10 + $0x40] sm:$0xff]  ;;  %v4309_v46 = vld [vmem:[#allocation10 + $0xd0] sm:$0xff] }
 0x6a8   :  { %v3599_v29 = vadd.f32 %v3598_v48, %v3558_v39  ;;  %v3601_v3 = vpop.f32.mrb[55].mxu1  ;;  %4246 = vmatprep.subr.bf16.mxu1 %v3888_v5  ;;  %v4307_v22 = vld [vmem:[#allocation10 + $0xc0] sm:$0xff]  ;;  %v4292_v5 = vld [vmem:[#allocation10 + $0x48] sm:$0xff]  ;;  %v4301_v47 = vld [vmem:[#allocation10 + $0x90] sm:$0xff] }
 0x6a9   :  { %v3651_v17 = vadd.f32 %v3632_v13, %v5472_v27  ;;  %v4283_v31 = vld [vmem:[#allocation10] sm:$0xff]  ;;  %v4308_v39 = vld [vmem:[#allocation10 + $0xc8] sm:$0xff]  ;;  %v4285_v27 = vld [vmem:[#allocation10 + $0x10] sm:$0xff] }
 0x6aa   :  { %v3652_v44 = vadd.f32 %v3636_v49, %v3599_v29  ;;  %4083 = vmatpush1.bf16.msra.mxu0 %v3885_v19  ;;  %v4284_v48 = vld [vmem:[#allocation10 + $0x8] sm:$0xff]  ;;  %v4293_v49 = vld [vmem:[#allocation10 + $0x50] sm:$0xff]  ;;  %v4294_v41 = vld [vmem:[#allocation10 + $0x58] sm:$0xff] }
 0x6ab   :  { %4247 = vmatpush1.bf16.msra.mxu1 %v3887_v35  ;;  %4084 = vmatprep.subr.bf16.mxu0 %v3890_v51  ;;  %v3659_v59 = vmax.f32 %v3651_v17, 0.0  ;;  %v4310_v19 = vld [vmem:[#allocation10 + $0xd8] sm:$0xff]  ;;  %v4295_v35 = vld [vmem:[#allocation10 + $0x60] sm:$0xff] }
 0x6ac   :  { %v3660_v32 = vmax.f32 %v3652_v44, 0.0  ;;  %4248 = vmatprep.subr.bf16.mxu1 %v3892_v36  ;;  %v4286_v29 = vld [vmem:[#allocation10 + $0x18] sm:$0xff]  ;;  %v4311_v51 = vld [vmem:[#allocation10 + $0xe0] sm:$0xff] }
 0x6ad   :  { %v3667_v26 = vpack.c.bf16 %v3659_v59, %v3659_v59  ;;  %v4302_v3 = vld [vmem:[#allocation10 + $0x98] sm:$0xff]  ;;  %v4287_v36 = vld [vmem:[#allocation10 + $0x20] sm:$0xff] }
 0x6ae   :  { %v3668_v53 = vpack.c.bf16 %v3660_v32, %v3660_v32  ;;  %4085 = vmatpush1.bf16.msra.mxu0 %v3889_v1  ;;  %v4303_v44 = vld [vmem:[#allocation10 + $0xa0] sm:$0xff]  ;;  %v4296_v1 = vld [vmem:[#allocation10 + $0x68] sm:$0xff] }
 0x6af   :  { %4249 = vmatpush1.bf16.msra.mxu1 %v3891_v16  ;;  %4086 = vmatprep.subr.bf16.mxu0 %v3894_v8  ;;  %v4312_v32 = vld [vmem:[#allocation10 + $0xe8] sm:$0xff] }
 0x6b0   :  { %4102 = vmatprep.mubr.bf16.mxu0 %v3668_v53  ;;  %4266 = vmatprep.mubr.bf16.mxu1 %v3668_v53  ;;  %v4288_v16 = vld [vmem:[#allocation10 + $0x28] sm:$0xff]  ;;  %v4297_v53 = vld [vmem:[#allocation10 + $0x70] sm:$0xff] }
 0x6b1   :  { %4250 = vmatprep.subr.bf16.mxu1 %v3896_v55  ;;  %v4304_v8 = vld [vmem:[#allocation10 + $0xa8] sm:$0xff]  ;;  %v4313_v55 = vld [vmem:[#allocation10 + $0xf0] sm:$0xff] }
 0x6b2   :  { %4087 = vmatpush1.bf16.msra.mxu0 %v3893_v30  ;;  %v4289_v30 = vld [vmem:[#allocation10 + $0x30] sm:$0xff] }
 0x6b3   :  { %4251 = vmatpush1.bf16.msra.mxu1 %v3895_v0  ;;  %4088 = vmatprep.subr.bf16.mxu0 %v3898_v23  ;;  %v4305_v0 = vld [vmem:[#allocation10 + $0xb0] sm:$0xff]  ;;  %v4298_v23 = vld [vmem:[#allocation10 + $0x78] sm:$0xff] }
 0x6b4   :  { %4252 = vmatprep.subr.bf16.mxu1 %v3900_v54  ;;  %v4314_v54 = vld [vmem:[#allocation10 + $0xf8] sm:$0xff] }
 0x6b6   :  { %4089 = vmatpush1.bf16.msra.mxu0 %v3897_v21  ;;  %v4290_v21 = vld [vmem:[#allocation10 + $0x38] sm:$0xff] }
 0x6b7   :  { %4253 = vmatpush1.bf16.msra.mxu1 %v3899_v45  ;;  %4090 = vmatprep.subr.bf16.mxu0 %v3902_v11  ;;  %v4306_v45 = vld [vmem:[#allocation10 + $0xb8] sm:$0xff] }
 0x6b8   :  { %4254 = vmatprep.subr.bf16.mxu1 %v3904_v58  ;;  %v3925_v11 = vld [vmem:[#allocation9] sm:$0xf] }
 0x6b9   :  { %v3930_v58 = vrot.slane %v3925_v11, %v5316_v52 }
 0x6ba   :  { %4091 = vmatpush1.bf16.msra.mxu0 %v3901_v57  ;;  %v3938_v57 = vrot.slane %v3925_v11, %v5319_v4 }
 0x6bb   :  { %4255 = vmatpush1.bf16.msra.mxu1 %v3903_v33  ;;  %4092 = vmatprep.subr.bf16.mxu0 %v3906_v56  ;;  %v3934_v33 = vrot.slane %v3925_v11, %v5290_v15  ;;  %v3942_v56 = vrot.slane %v3925_v11, %v5295_v20 }
 0x6bc   :  { %4256 = vmatprep.subr.bf16.mxu1 %v3908_v6 }
 0x6be   :  { %4093 = vmatpush1.bf16.msra.mxu0 %v3905_v9 }
 0x6bf   :  { %4257 = vmatpush1.bf16.msra.mxu1 %v3907_v40  ;;  %4094 = vmatprep.subr.bf16.mxu0 %v3910_v60 }
 0x6c0   :  { %4258 = vmatprep.subr.bf16.mxu1 %v3912_v62 }
 0x6c2   :  { %4095 = vmatpush1.bf16.msra.mxu0 %v3909_v7 }
 0x6c3   :  { %4259 = vmatpush1.bf16.msra.mxu1 %v3911_v10  ;;  %4096 = vmatprep.subr.bf16.mxu0 %v3914_v12 }
 0x6c4   :  { %4260 = vmatprep.subr.bf16.mxu1 %v3916_v25 }
 0x6c6   :  { %4097 = vmatpush1.bf16.msra.mxu0 %v3913_v34 }
 0x6c7   :  { %4261 = vmatpush1.bf16.msra.mxu1 %v3915_v38  ;;  %4098 = vmatprep.subr.bf16.mxu0 %v3918_v42 }
 0x6c8   :  { %4262 = vmatprep.subr.bf16.mxu1 %v3920_v2 }
 0x6ca   :  { %4099 = vmatpush1.bf16.msra.mxu0 %v3917_v18 }
 0x6cb   :  { %4263 = vmatpush1.bf16.msra.mxu1 %v3919_v24  ;;  %4100 = vmatprep.subr.bf16.mxu0 %v3922_v37 }
 0x6cc   :  { %4264 = vmatprep.subr.bf16.mxu1 %v3924_v50  ;;  %v4489_v50 = vld [vmem:[#allocation11] ss:$0 sm:$0xff] }
 0x6ce   :  { %4101 = vmatpush1.bf16.msra.mxu0 %v3921_v63 }
 0x6cf   :  { %4265 = vmatpush1.bf16.msra.mxu1 %v3923_v28  ;;  %4499 = vmatprep.subr.bf16.mxu0 %v4291_v14 }
 0x6d0   :  { %4521 = vmatprep.subr.bf16.mxu1 %v4307_v22 }
 0x6d1   :  { %4103 = vmatmul.mubr.bf16.vlgmr.msra.gmra.mrb[56].mxu0 %v3667_v26 }
 0x6d2   :  { %4267 = vmatmul.mubr.bf16.vlgmr.msra.gmra.mrb[56].mxu1 %v3667_v26  ;;  %4500 = vmatpush3.bf16.msra.mxu0 %v4283_v31 }
 0x6d3   :  { %4522 = vmatpush3.bf16.msra.mxu1 %v4299_v43  ;;  %4501 = vmatprep.subr.bf16.mxu0 %v4292_v5 }
 0x6d4   :  { %4523 = vmatprep.subr.bf16.mxu1 %v4308_v39 }
 0x6d6   :  { %4502 = vmatpush3.bf16.msra.mxu0 %v4284_v48 }
 0x6d7   :  { %4524 = vmatpush3.bf16.msra.mxu1 %v4300_v61  ;;  %4503 = vmatprep.subr.bf16.mxu0 %v4293_v49 }
 0x6d8   :  { %4525 = vmatprep.subr.bf16.mxu1 %v4309_v46 }
 0x6da   :  { %4504 = vmatpush3.bf16.msra.mxu0 %v4285_v27 }
 0x6db   :  { %4526 = vmatpush3.bf16.msra.mxu1 %v4301_v47  ;;  %4505 = vmatprep.subr.bf16.mxu0 %v4294_v41 }
 0x6dc   :  { %4527 = vmatprep.subr.bf16.mxu1 %v4310_v19 }
 0x6de   :  { %4506 = vmatpush3.bf16.msra.mxu0 %v4286_v29 }
 0x6df   :  { %4528 = vmatpush3.bf16.msra.mxu1 %v4302_v3  ;;  %4507 = vmatprep.subr.bf16.mxu0 %v4295_v35 }
 0x6e0   :  { %4529 = vmatprep.subr.bf16.mxu1 %v4311_v51 }
 0x6e2   :  { %4508 = vmatpush3.bf16.msra.mxu0 %v4287_v36 }
 0x6e3   :  { %4530 = vmatpush3.bf16.msra.mxu1 %v4303_v44  ;;  %4509 = vmatprep.subr.bf16.mxu0 %v4296_v1 }
 0x6e4   :  { %4531 = vmatprep.subr.bf16.mxu1 %v4312_v32 }
 0x6e6   :  { %4510 = vmatpush3.bf16.msra.mxu0 %v4288_v16 }
 0x6e7   :  { %4532 = vmatpush3.bf16.msra.mxu1 %v4304_v8  ;;  %4511 = vmatprep.subr.bf16.mxu0 %v4297_v53 }
 0x6e8   :  { %4533 = vmatprep.subr.bf16.mxu1 %v4313_v55 }
 0x6ea   :  { %4512 = vmatpush3.bf16.msra.mxu0 %v4289_v30 }
 0x6eb   :  { %4534 = vmatpush3.bf16.msra.mxu1 %v4305_v0  ;;  %4513 = vmatprep.subr.bf16.mxu0 %v4298_v23 }
 0x6ec   :  { %4535 = vmatprep.subr.bf16.mxu1 %v4314_v54 }
 0x6ee   :  { %4514 = vmatpush3.bf16.msra.mxu0 %v4290_v21 }
 0x6ef   :  { %4536 = vmatpush3.bf16.msra.mxu1 %v4306_v45 }
 0x7a4   :  { %v4104_v6 = vpop.f32.mrb[56].mxu0 }
 0x7a5   :  { %v4551_v9 = vadd.f32 %v4104_v6, %v3930_v58  ;;  %v4268_v40 = vpop.f32.mrb[56].mxu1  ;;  %v4106_v60 = vpop.f32.mrb[57].mxu0 }
 0x7a6   :  { %v4553_v62 = vadd.f32 %v4268_v40, %v3938_v57  ;;  %v4552_v7 = vadd.f32 %v4106_v60, %v3934_v33  ;;  %v4270_v10 = vpop.f32.mrb[57].mxu1  ;;  %v4108_v12 = vpop.f32.mrb[58].mxu0 }
 0x7a7   :  { %v4275_v25 = vmax.f32 %v4551_v9, 0.0  ;;  %v4554_v13 = vadd.f32 %v4270_v10, %v3942_v56  ;;  %v4272_v34 = vpop.f32.mrb[58].mxu1  ;;  %v4109_v38 = vpop.f32.mrb[59].mxu0 }
 0x7a8   :  { %v4277_v42 = vmax.f32 %v4553_v62, 0.0  ;;  %v4276_v52 = vmax.f32 %v4552_v7, 0.0  ;;  %v4273_v2 = vpop.f32.mrb[59].mxu1 }
 0x7a9   :  { %v4278_v4 = vmax.f32 %v4554_v13, 0.0  ;;  %v4279_v15 = vpack.c.bf16 %v4275_v25, %v4275_v25 }
 0x7aa   :  { %v4280_v17 = vpack.c.bf16 %v4276_v52, %v4276_v52  ;;  %v4281_v20 = vpack.c.bf16 %v4277_v42, %v4277_v42 }
 0x7ab   :  { %v4282_v18 = vpack.c.bf16 %v4278_v4, %v4278_v4 }
 0x7ac   :  { %4354 = vmatprep.mubr.bf16.mxu0 %v4280_v17 }
 0x7ad   :  { %4394 = vmatprep.mubr.bf16.mxu1 %v4282_v18  ;;  %4355 = vmatmul.mubr.bf16.vlgmr.msra.gmra.mrb[60].mxu0 %v4279_v15 }
 0x7ae   :  { %4395 = vmatmul.mubr.bf16.vlgmr.msra.gmra.mrb[60].mxu1 %v4281_v20 }
 0x880   :  { %v4515_v24 = vpop.f32.mrb[60].mxu0 }
 0x881   :  { %v4537_v37 = vpop.f32.mrb[60].mxu1  ;;  %v4516_v59 = vpop.f32.mrb[61].mxu0 }
 0x882   :  { %v4517_v63 = vadd.f32 %v4516_v59, %v4515_v24  ;;  %v4538_v28 = vpop.f32.mrb[61].mxu1  ;;  %v4518_v14 = vpop.f32.mrb[62].mxu0 }
 0x883   :  { %v4539_v22 = vadd.f32 %v4538_v28, %v4537_v37  ;;  %v4540_v26 = vpop.f32.mrb[62].mxu1  ;;  %v4519_v31 = vpop.f32.mrb[63].mxu0 }
 0x884   :  { %v4357_v43 = vadd.f32 %v4517_v63, %v4489_v50  ;;  %v4541_v5 = vpop.f32.mrb[63].mxu1 }
 0x886   :  { %v4397_v39 = vadd.f32 %v4539_v22, %v4357_v43 }
 0x888   :  { %4402 = vst [vmem:[#allocation18] sm:$0x3] %v4397_v39 }
 0x889   :  { %4825 = shalt.err (!%p4822_p4)
}
 0x88a   :  { %s4826_s6 = scalar_lea.hbm %s5505_s11, 32 }
 0x88b   :  { %p4827_p5 = scmp.ne.s32.totalorder %s5505_s11, %s4826_s6  ;;  %p4830_p6 = scmp.lt.u32.totalorder %s4826_s6, %s5505_s11 }
 0x88d   :  { %p4832_p7 = pnand %p4830_p6, %p4827_p5 }
 0x88f   :  { %4835 = shalt.err (!%p4832_p7)
}
 0x890   :  { %4412 = dma.vmem_to_hbm [thread:$0]  %s4410_s15, 32, %s5505_s11, [#allocation15]  }
 0x891   :  { %4858 = dma.done.wait [#allocation15], 32  }
 0x892   :  { %4859 = vsyncadd [#allocation15], 4294967264 }
 0x893   :  { %4416 = vsyncpa [#allocation14], 1 }
 0x894   :  { %4417 = vsyncpa [#allocation17], 1 }
 0x895   :  { %4418 = vsyncpa [#allocation15], 1 }
 0x896   :  { %4419 = vsyncmov [#allocation12] }
 0x899   :  { %s4420_s29 = vpop.sfrf %4419 }
 0x89a   :  { %p4490_p8 = scmp.ne.s32.totalorder %s4420_s29, 0 }
 0x89c   :  { %4424 = shalt.err (%p4490_p8)  }
 0x89d   :  { %4426 = vsyncmov [#allocation12 + $0x1] }
 0x8a0   :  { %s4427_s2 = vpop.sfrf %4426 }
 0x8a1   :  { %p4491_p9 = scmp.ne.s32.totalorder %s4427_s2, 0 }
 0x8a3   :  { %4431 = shalt.err (%p4491_p9)  }
 0x8a4   :  { %4433 = vsyncmov [#allocation12 + $0x2] }
 0x8a7   :  { %s4434_s12 = vpop.sfrf %4433 }
 0x8a8   :  { %p4492_p10 = scmp.ne.s32.totalorder %s4434_s12, 0 }
 0x8aa   :  { %4438 = shalt.err (%p4492_p10)  }
 0x8ab   :  { %4440 = vsyncmov [#allocation12 + $0x3] }
 0x8ae   :  { %s4441_s18 = vpop.sfrf %4440 }
 0x8af   :  { %p4493_p11 = scmp.ne.s32.totalorder %s4441_s18, 0 }
 0x8b1   :  { %4445 = shalt.err (%p4493_p11)  }
 0x8b2   :  { %4447 = vsyncmov [#allocation12 + $0x4] }
 0x8b5   :  { %s4448_s11 = vpop.sfrf %4447 }
 0x8b6   :  { %p4494_p12 = scmp.ne.s32.totalorder %s4448_s11, 0 }
 0x8b8   :  { %4452 = shalt.err (%p4494_p12)  }
 0x8b9   :  { %4454 = vsyncmov [#allocation12 + $0x5] }
 0x8bc   :  { %s4455_s8 = vpop.sfrf %4454 }
 0x8bd   :  { %p4495_p13 = scmp.ne.s32.totalorder %s4455_s8, 0 }
 0x8bf   :  { %4459 = shalt.err (%p4495_p13)  }
 0x8c0   :  { %4461 = vsyncmov [#allocation12 + $0x6] }
 0x8c3   :  { %s4462_s16 = vpop.sfrf %4461 }
 0x8c4   :  { %p4496_p0 = scmp.ne.s32.totalorder %s4462_s16, 0 }
 0x8c6   :  { %4466 = shalt.err (%p4496_p0)  }
 0x8c7   :  { %4468 = vsyncmov [#allocation12 + $0x7] }
 0x8ca   :  { %s4469_s28 = vpop.sfrf %4468 }
 0x8cb   :  { %p4497_p1 = scmp.ne.s32.totalorder %s4469_s28, 0 }
 0x8cd   :  { %4473 = shalt.err (%p4497_p1)  }
 0x8ce   :  { %4475 = vsyncmov [#allocation12 + $0x8] }
 0x8d1   :  { %s4476_s14 = vpop.sfrf %4475 }
 0x8d2   :  { %p4498_p2 = scmp.ne.s32.totalorder %s4476_s14, 0 }
 0x8d4   :  { %4480 = shalt.err (%p4498_p2)  }

</bundles_post_ra>
